<compile_context>
chip_gen: v7x
topology: tpu7x:2x2x1
jax: 0.10.0
libtpu: 0.0.40
codegen_flags: <defaults>
</compile_context>

<pallas_src>
import jax
import jax.numpy as jnp
from jax.experimental import pallas as pl
from jax.experimental.pallas import tpu as pltpu

EPS = 1e-5   # PyTorch BatchNorm1d default eps

# Padded feature dims.
D_IN = 768   # bert hidden size
D1 = 4096    # fc1 out: 4000 -> 4096
D2 = 1024    # fc2 out: 1000 -> 1024
D3 = 128     # fc3 out:    6 -> 128

# Reduction-chunk size along the fc1-output / fc2-input axis.
# W1 chunk 768x2048 bf16 (3 MiB) + W2 chunk 2048x1024 bf16 (4 MiB),
# double-buffered + small side inputs ~= 14.6 MiB VMEM.
TK = 2048


# ----------------------------- fused kernel ---------------------------------

def _fused_mlp_kernel(x_ref, w1_ref, ss1_ref, w2_ref, ss2_ref, w3_ref, b3_ref,
                      o_ref, acc_ref):
    """pooled -> fc1+bn1+relu -> fc2+bn2+relu -> fc3(+bias), fully fused.

    grid = (J,): J = D1 // TK chunks of fc1's output (the layer-2 reduction,
    'arbitrary').  Each step computes one TK-wide slab of layer 1 and folds it
    into the (B, D2) f32 accumulator; the last step applies bn2 + relu + fc3
    and writes the lane-padded logits.  Weights are bf16 MXU operands,
    accumulation and all elementwise math are f32.
    """
    j = pl.program_id(0)

    @pl.when(j == 0)
    def _init():
        acc_ref[...] = jnp.zeros_like(acc_ref)

    # ---- layer 1 chunk: x1 = relu(bn1(pooled @ W1[:, j*TK:(j+1)*TK])) ------
    y1 = jnp.dot(x_ref[...], w1_ref[...], preferred_element_type=jnp.float32)
    y1 = y1 * ss1_ref[0:1, :] + ss1_ref[1:2, :]        # fc1 bias folded into bn1
    x1 = jnp.maximum(y1, 0.0)                          # dropout = id (eval)

    # ---- layer 2 partial: acc += x1 @ W2[j-chunk, :] ------------------------
    acc_ref[...] = acc_ref[...] + jnp.dot(
        x1.astype(jnp.bfloat16), w2_ref[...], preferred_element_type=jnp.float32)

    # ---- last reduction step: bn2 + relu + fc3 + bias -----------------------
    @pl.when(j == pl.num_programs(0) - 1)
    def _finalize():
        y2 = acc_ref[...] * ss2_ref[0:1, :] + ss2_ref[1:2, :]   # fc2 bias folded
        x2 = jnp.maximum(y2, 0.0)                               # dropout = id
        o_ref[...] = jnp.dot(x2.astype(jnp.bfloat16), w3_ref[...],
                             preferred_element_type=jnp.float32) + b3_ref[...]


def fused_mlp(pooled_bf16, w1, ss1, w2, ss2, w3, b3):
    B, K = pooled_bf16.shape
    N1 = w1.shape[1]            # 4096
    N2 = w2.shape[1]            # 1024
    N3 = w3.shape[1]            # 128
    J = N1 // TK

    flops = 2 * B * (K * N1 + N1 * N2 + N2 * N3)
    bytes_accessed = (
        2 * (K * N1 + N1 * N2 + N2 * N3)       # bf16 weights
        + 4 * (2 * N1 + 2 * N2 + N3)           # f32 scale/shift/bias
        + 2 * B * K + 4 * B * N3)              # bf16 pooled in, f32 logits out

    return pl.pallas_call(
        _fused_mlp_kernel,
        out_shape=jax.ShapeDtypeStruct((B, N3), jnp.float32),
        grid=(J,),
        in_specs=[
            pl.BlockSpec((B, K), lambda j: (0, 0)),      # pooled bf16 (tiny)
            pl.BlockSpec((K, TK), lambda j: (0, j)),     # W1 chunk (bf16)
            pl.BlockSpec((2, TK), lambda j: (0, j)),     # bn1 scale/shift chunk
            pl.BlockSpec((TK, N2), lambda j: (j, 0)),    # W2 chunk (bf16)
            pl.BlockSpec((2, N2), lambda j: (0, 0)),     # bn2 scale/shift
            pl.BlockSpec((N2, N3), lambda j: (0, 0)),    # W3 (bf16)
            pl.BlockSpec((1, N3), lambda j: (0, 0)),     # fc3 bias
        ],
        out_specs=pl.BlockSpec((B, N3), lambda j: (0, 0)),   # resident logits
        scratch_shapes=[
            pltpu.VMEM((B, N2), jnp.float32),            # layer-2 accumulator
        ],
        compiler_params=pltpu.CompilerParams(
            dimension_semantics=("arbitrary",),
            vmem_limit_bytes=32 * 1024 * 1024),          # TK=2048 tile on v5e too
        cost_estimate=pl.CostEstimate(
            flops=flops, transcendentals=0, bytes_accessed=bytes_accessed),
    )(pooled_bf16, w1, ss1, w2, ss2, w3, b3)


# ----------------------------- params / glue --------------------------------

def _pad2(a, rows, cols):
    return jnp.zeros((rows, cols), a.dtype).at[: a.shape[0], : a.shape[1]].set(a)


def _pad1(a, n):
    return jnp.zeros((n,), a.dtype).at[: a.shape[0]].set(a)


def prepare_params(p):
    """Fold BatchNorm(eval) + linear bias into per-feature scale/shift, pad
    feature dims to multiples of 128, and quantize weights to bf16."""
    s1 = p["g1"] / jnp.sqrt(p["v1"] + EPS)
    t1 = p["be1"] - p["m1"] * s1 + p["b1"] * s1     # bn1 shift + fc1 bias
    s2 = p["g2"] / jnp.sqrt(p["v2"] + EPS)
    t2 = p["be2"] - p["m2"] * s2 + p["b2"] * s2     # bn2 shift + fc2 bias

    W1 = _pad2(p["w1"], D_IN, D1).astype(jnp.bfloat16)
    W2 = _pad2(p["w2"], D1, D2).astype(jnp.bfloat16)
    W3 = _pad2(p["w3"], D2, D3).astype(jnp.bfloat16)
    ss1 = jnp.stack([_pad1(s1, D1), _pad1(t1, D1)])   # (2, 4096) f32
    ss2 = jnp.stack([_pad1(s2, D2), _pad1(t2, D2)])   # (2, 1024) f32
    b3 = _pad1(p["b3"], D3).reshape(1, D3)            # (1, 128) f32
    return W1, ss1, W2, ss2, W3, b3


def text_ann_forward(hidden, p):
    """Pallas implementation of Text_ANN.forward (eval mode).

    hidden: synthesized BERT last_hidden_state, (B, S, 768) float32.
    """
    W1, ss1, W2, ss2, W3, b3 = prepare_params(p)
    # Sequence mean hoisted out of the kernel; attention_mask intentionally
    # ignored, matching the original `.mean(dim=1)`.  Cast once to bf16 — the
    # MXU operand dtype used inside the kernel.
    pooled = jnp.mean(hidden, axis=1).astype(jnp.bfloat16)   # (B, 768)
    logits = fused_mlp(pooled, W1, ss1, W2, ss2, W3, b3)     # (B, 128)
    return logits[:, :6]                                     # num_classes = 6


def reference_forward(hidden, p):
    x = jnp.mean(hidden, axis=1)
    x = x @ p["w1"] + p["b1"]
    x = (x - p["m1"]) / jnp.sqrt(p["v1"] + EPS) * p["g1"] + p["be1"]
    x = jnp.maximum(x, 0.0)
    x = x @ p["w2"] + p["b2"]
    x = (x - p["m2"]) / jnp.sqrt(p["v2"] + EPS) * p["g2"] + p["be2"]
    x = jnp.maximum(x, 0.0)
    return x @ p["w3"] + p["b3"]


def make_params(key):
    ks = jax.random.split(key, 12)
    f32 = jnp.float32

    def lin(kw, kb, k_in, n_out):
        w = jax.random.normal(kw, (k_in, n_out), f32) * (1.0 / jnp.sqrt(k_in))
        b = jax.random.normal(kb, (n_out,), f32) * 0.01
        return w, b

    w1, b1 = lin(ks[0], ks[1], 768, 4000)
    w2, b2 = lin(ks[2], ks[3], 4000, 1000)
    w3, b3 = lin(ks[4], ks[5], 1000, 6)
    # BatchNorm1d (eval / running stats), deterministic non-trivial values.
    g1 = 1.0 + 0.05 * jax.random.normal(ks[6], (4000,), f32)
    be1 = 0.05 * jax.random.normal(ks[7], (4000,), f32)
    m1 = 0.05 * jax.random.normal(ks[8], (4000,), f32)
    v1 = 0.5 + jax.random.uniform(ks[9], (4000,), f32)
    g2 = 1.0 + 0.05 * jax.random.normal(ks[10], (1000,), f32)
    be2 = 0.05 * jax.random.normal(ks[11], (1000,), f32)
    m2 = jnp.zeros((1000,), f32) + 0.01
    v2 = jnp.ones((1000,), f32) * 0.9
    return dict(w1=w1, b1=b1, w2=w2, b2=b2, w3=w3, b3=b3,
                g1=g1, be1=be1, m1=m1, v1=v1,
                g2=g2, be2=be2, m2=m2, v2=v2)


if __name__ == "__main__":
    key = jax.random.PRNGKey(0)
    k_ids, k_emb, k_par = jax.random.split(key, 3)

    B, S, H, VOCAB = 8, 8, 768, 128
    input_ids = jax.random.randint(k_ids, (B, S), 0, VOCAB, dtype=jnp.int32)
    attention_mask = jnp.ones((B, S), dtype=jnp.int32)  # unused by .mean(dim=1)

    # Deterministic stand-in for the frozen BERT encoder output.
    emb_table = 0.02 * jax.random.normal(k_emb, (VOCAB, H), jnp.float32)
    last_hidden_state = jnp.take(emb_table, input_ids, axis=0)  # (B, S, 768)

    params = make_params(k_par)

    logits = text_ann_forward(last_hidden_state, params)
    logits = jax.block_until_ready(logits)

    ref = reference_forward(last_hidden_state, params)
    assert logits.shape == (B, 6), logits.shape
    # bf16 weight/activation-operand quantization -> slightly loosened tol
    # vs the pure-f32 reference.
    assert jnp.allclose(logits, ref, rtol=2e-2, atol=1e-2), (
        float(jnp.max(jnp.abs(logits - ref))))

    print("KERNEL_OK")
</pallas_src>

<mosaic_0001>
module attributes {stable_mosaic.version = 11 : i64} {
  func.func @_fused_mlp_kernel(%arg0: i32, %arg1: memref<8x768xbf16, #tpu.memory_space<vmem>>, %arg2: memref<768x2048xbf16, #tpu.memory_space<vmem>>, %arg3: memref<2x2048xf32, #tpu.memory_space<vmem>>, %arg4: memref<2048x1024xbf16, #tpu.memory_space<vmem>>, %arg5: memref<2x1024xf32, #tpu.memory_space<vmem>>, %arg6: memref<1024x128xbf16, #tpu.memory_space<vmem>>, %arg7: memref<1x128xf32, #tpu.memory_space<vmem>>, %arg8: memref<8x128xf32, #tpu.memory_space<vmem>>, %arg9: memref<8x1024xf32, #tpu.memory_space<vmem>>) attributes {dimension_semantics = [#tpu.dimension_semantics<arbitrary>], iteration_bounds = array<i64: 2>, scalar_prefetch = 0 : i64, scratch_operands = 1 : i64, tpu.core_type = #tpu.core_type<tc>, window_params = [{pipeline_mode = #tpu.pipeline_mode<synchronous>, transform_indices = @transform_0, window_bounds = array<i64: 8, 768>}, {transform_indices = @transform_1, window_bounds = array<i64: 768, 2048>}, {transform_indices = @transform_2, window_bounds = array<i64: 2, 2048>}, {transform_indices = @transform_3, window_bounds = array<i64: 2048, 1024>}, {pipeline_mode = #tpu.pipeline_mode<synchronous>, transform_indices = @transform_4, window_bounds = array<i64: 2, 1024>}, {pipeline_mode = #tpu.pipeline_mode<synchronous>, transform_indices = @transform_5, window_bounds = array<i64: 1024, 128>}, {pipeline_mode = #tpu.pipeline_mode<synchronous>, transform_indices = @transform_6, window_bounds = array<i64: 1, 128>}, {pipeline_mode = #tpu.pipeline_mode<synchronous>, transform_indices = @transform_7, window_bounds = array<i64: 8, 128>}]} {
    %c0_i32 = arith.constant 0 : i32
    %0 = arith.cmpi eq, %arg0, %c0_i32 : i32
    %1 = arith.extui %0 : i1 to i32
    %c0_i32_0 = arith.constant 0 : i32
    %2 = arith.cmpi ne, %1, %c0_i32_0 : i32
    scf.if %2 {
      %cst_16 = arith.constant 0.000000e+00 : f32
      %23 = vector.broadcast %cst_16 : f32 to vector<8x1024xf32>
      %c0_17 = arith.constant 0 : index
      %c0_18 = arith.constant 0 : index
      %24 = vector.load %arg9[%c0_17, %c0_18] : memref<8x1024xf32, #tpu.memory_space<vmem>>, vector<8x1024xf32>
      tpu.vector_store %arg9[%c0_17, %c0_18], %23 {strides = array<i32>} : memref<8x1024xf32, #tpu.memory_space<vmem>>, vector<8x1024xf32>,
    } else {
    }
    %c0 = arith.constant 0 : index
    %c0_1 = arith.constant 0 : index
    %3 = vector.load %arg1[%c0, %c0_1] : memref<8x768xbf16, #tpu.memory_space<vmem>>, vector<8x768xbf16>
    %c0_2 = arith.constant 0 : index
    %c0_3 = arith.constant 0 : index
    %4 = vector.load %arg2[%c0_2, %c0_3] : memref<768x2048xbf16, #tpu.memory_space<vmem>>, vector<768x2048xbf16>
    %cst = arith.constant dense<0.000000e+00> : vector<8x2048xf32>
    %5 = tpu.matmul %3, %4, %cst {dimension_numbers = #tpu.dot_dimension_numbers<[1], [0], [0], [1], [0, 0, 1, 1], [], []>} : vector<8x768xbf16>, vector<768x2048xbf16>, vector<8x2048xf32> -> vector<8x2048xf32>
    %c0_4 = arith.constant 0 : index
    %c0_5 = arith.constant 0 : index
    %6 = vector.load %arg3[%c0_4, %c0_5] : memref<2x2048xf32, #tpu.memory_space<vmem>>, vector<1x2048xf32>
    %7 = vector.broadcast %6 : vector<1x2048xf32> to vector<8x2048xf32>
    %8 = arith.mulf %5, %7 : vector<8x2048xf32>
    %c1 = arith.constant 1 : index
    %c0_6 = arith.constant 0 : index
    %9 = vector.load %arg3[%c1, %c0_6] : memref<2x2048xf32, #tpu.memory_space<vmem>>, vector<1x2048xf32>
    %10 = vector.broadcast %9 : vector<1x2048xf32> to vector<8x2048xf32>
    %11 = arith.addf %8, %10 : vector<8x2048xf32>
    %cst_7 = arith.constant 0.000000e+00 : f32
    %12 = vector.broadcast %cst_7 : f32 to vector<8x2048xf32>
    %13 = arith.maximumf %11, %12 : vector<8x2048xf32>
    %c0_8 = arith.constant 0 : index
    %c0_9 = arith.constant 0 : index
    %14 = vector.load %arg9[%c0_8, %c0_9] : memref<8x1024xf32, #tpu.memory_space<vmem>>, vector<8x1024xf32>
    %15 = arith.truncf %13 : vector<8x2048xf32> to vector<8x2048xbf16>
    %c0_10 = arith.constant 0 : index
    %c0_11 = arith.constant 0 : index
    %16 = vector.load %arg4[%c0_10, %c0_11] : memref<2048x1024xbf16, #tpu.memory_space<vmem>>, vector<2048x1024xbf16>
    %cst_12 = arith.constant dense<0.000000e+00> : vector<8x1024xf32>
    %17 = tpu.matmul %15, %16, %cst_12 {dimension_numbers = #tpu.dot_dimension_numbers<[1], [0], [0], [1], [0, 0, 1, 1], [], []>} : vector<8x2048xbf16>, vector<2048x1024xbf16>, vector<8x1024xf32> -> vector<8x1024xf32>
    %18 = arith.addf %14, %17 : vector<8x1024xf32>
    %c0_13 = arith.constant 0 : index
    %c0_14 = arith.constant 0 : index
    %19 = vector.load %arg9[%c0_13, %c0_14] : memref<8x1024xf32, #tpu.memory_space<vmem>>, vector<8x1024xf32>
    tpu.vector_store %arg9[%c0_13, %c0_14], %18 {strides = array<i32>} : memref<8x1024xf32, #tpu.memory_space<vmem>>, vector<8x1024xf32>,
    %c1_i32 = arith.constant 1 : i32
    %20 = arith.cmpi eq, %arg0, %c1_i32 : i32
    %21 = arith.extui %20 : i1 to i32
    %c0_i32_15 = arith.constant 0 : i32
    %22 = arith.cmpi ne, %21, %c0_i32_15 : i32
    scf.if %22 {
      %c0_16 = arith.constant 0 : index
      %c0_17 = arith.constant 0 : index
      %23 = vector.load %arg9[%c0_16, %c0_17] : memref<8x1024xf32, #tpu.memory_space<vmem>>, vector<8x1024xf32>
      %c0_18 = arith.constant 0 : index
      %c0_19 = arith.constant 0 : index
      %24 = vector.load %arg5[%c0_18, %c0_19] : memref<2x1024xf32, #tpu.memory_space<vmem>>, vector<1x1024xf32>
      %25 = vector.broadcast %24 : vector<1x1024xf32> to vector<8x1024xf32>
      %26 = arith.mulf %23, %25 : vector<8x1024xf32>
      %c1_20 = arith.constant 1 : index
      %c0_21 = arith.constant 0 : index
      %27 = vector.load %arg5[%c1_20, %c0_21] : memref<2x1024xf32, #tpu.memory_space<vmem>>, vector<1x1024xf32>
      %28 = vector.broadcast %27 : vector<1x1024xf32> to vector<8x1024xf32>
      %29 = arith.addf %26, %28 : vector<8x1024xf32>
      %cst_22 = arith.constant 0.000000e+00 : f32
      %30 = vector.broadcast %cst_22 : f32 to vector<8x1024xf32>
      %31 = arith.maximumf %29, %30 : vector<8x1024xf32>
      %32 = arith.truncf %31 : vector<8x1024xf32> to vector<8x1024xbf16>
      %c0_23 = arith.constant 0 : index
      %c0_24 = arith.constant 0 : index
      %33 = vector.load %arg6[%c0_23, %c0_24] : memref<1024x128xbf16, #tpu.memory_space<vmem>>, vector<1024x128xbf16>
      %cst_25 = arith.constant dense<0.000000e+00> : vector<8x128xf32>
      %34 = tpu.matmul %32, %33, %cst_25 {dimension_numbers = #tpu.dot_dimension_numbers<[1], [0], [0], [1], [0, 0, 1, 1], [], []>} : vector<8x1024xbf16>, vector<1024x128xbf16>, vector<8x128xf32> -> vector<8x128xf32>
      %c0_26 = arith.constant 0 : index
      %c0_27 = arith.constant 0 : index
      %35 = vector.load %arg7[%c0_26, %c0_27] : memref<1x128xf32, #tpu.memory_space<vmem>>, vector<1x128xf32>
      %36 = vector.broadcast %35 : vector<1x128xf32> to vector<8x128xf32>
      %37 = arith.addf %34, %36 : vector<8x128xf32>
      %c0_28 = arith.constant 0 : index
      %c0_29 = arith.constant 0 : index
      %38 = vector.load %arg8[%c0_28, %c0_29] : memref<8x128xf32, #tpu.memory_space<vmem>>, vector<8x128xf32>
      tpu.vector_store %arg8[%c0_28, %c0_29], %37 {strides = array<i32>} : memref<8x128xf32, #tpu.memory_space<vmem>>, vector<8x128xf32>,
    } else {
    }
    return
  }
  func.func @transform_0(%arg0: i32) -> (i32, i32) {
    %c0_i32 = arith.constant 0 : i32
    %c0_i32_0 = arith.constant 0 : i32
    %c0_i32_1 = arith.constant 0 : i32
    return %c0_i32, %c0_i32_0 : i32, i32
  }
  func.func @transform_1(%arg0: i32) -> (i32, i32) {
    %c0_i32 = arith.constant 0 : i32
    %c0_i32_0 = arith.constant 0 : i32
    return %c0_i32, %arg0 : i32, i32
  }
  func.func @transform_2(%arg0: i32) -> (i32, i32) {
    %c0_i32 = arith.constant 0 : i32
    %c0_i32_0 = arith.constant 0 : i32
    return %c0_i32, %arg0 : i32, i32
  }
  func.func @transform_3(%arg0: i32) -> (i32, i32) {
    %c0_i32 = arith.constant 0 : i32
    %c0_i32_0 = arith.constant 0 : i32
    return %arg0, %c0_i32 : i32, i32
  }
  func.func @transform_4(%arg0: i32) -> (i32, i32) {
    %c0_i32 = arith.constant 0 : i32
    %c0_i32_0 = arith.constant 0 : i32
    %c0_i32_1 = arith.constant 0 : i32
    return %c0_i32, %c0_i32_0 : i32, i32
  }
  func.func @transform_5(%arg0: i32) -> (i32, i32) {
    %c0_i32 = arith.constant 0 : i32
    %c0_i32_0 = arith.constant 0 : i32
    %c0_i32_1 = arith.constant 0 : i32
    return %c0_i32, %c0_i32_0 : i32, i32
  }
  func.func @transform_6(%arg0: i32) -> (i32, i32) {
    %c0_i32 = arith.constant 0 : i32
    %c0_i32_0 = arith.constant 0 : i32
    %c0_i32_1 = arith.constant 0 : i32
    return %c0_i32, %c0_i32_0 : i32, i32
  }
  func.func @transform_7(%arg0: i32) -> (i32, i32) {
    %c0_i32 = arith.constant 0 : i32
    %c0_i32_0 = arith.constant 0 : i32
    %c0_i32_1 = arith.constant 0 : i32
    return %c0_i32, %c0_i32_0 : i32, i32
  }
}

</mosaic_0001>

<bundles_post_ra>
// kernel: tpu_custom_call.1
= control target key start
LH: loop header
LB: loop body
LE: loop exit
PB: predicated region body
PF: predicated region fallthrough
CT: control target
= control target key end

     0   :  { %s19798_s0 = inlined_call_operand.hbm [shape: bf16[8,768], index: 0, kind: input, shape index: {}]   ;;  %s19799_s1 = inlined_call_operand.hbm [shape: bf16[768,4096], index: 1, kind: input, shape index: {}]   ;;  %s19800_s2 = inlined_call_operand.hbm [shape: f32[2,4096], index: 2, kind: input, shape index: {}]   ;;  %s19801_s3 = inlined_call_operand.hbm [shape: bf16[4096,1024], index: 3, kind: input, shape index: {}]   ;;  %s19802_s4 = inlined_call_operand.hbm [shape: f32[2,1024], index: 4, kind: input, shape index: {}]   ;;  %s19803_s5 = inlined_call_operand.hbm [shape: bf16[1024,128], index: 5, kind: input, shape index: {}]   ;;  %s19804_s6 = inlined_call_operand.hbm [shape: f32[1,128], index: 6, kind: input, shape index: {}]   ;;  %s19805_s7 = inlined_call_operand.hbm [shape: f32[8,128], index: 7, kind: output, shape index: {}]  }
   0x1   :  { %19823 = sst [smem:[#allocation25_spill]] %s19799_s1 }
   0x2   :  { %19824 = sst [smem:[#allocation26_spill]] %s19802_s4 }
   0x3   :  { %19825 = sst [smem:[#allocation27_spill]] %s19803_s5 }
   0x4   :  { %19826 = sst [smem:[#allocation28_spill]] %s19805_s7 }
   0x5   :  { %12 = vsyncpa [#allocation4], 0 }
   0x6   :  { %13 = vsyncpa [#allocation7], 0 }
   0x7   :  { %15 = vsyncpa [#allocation7 + $0x1], 0 }
   0x8   :  { %16 = vsyncpa [#allocation10], 0 }
   0x9   :  { %18 = vsyncpa [#allocation10 + $0x1], 0 }
   0xa   :  { %19 = vsyncpa [#allocation13], 0 }
   0xb   :  { %20 = vsyncpa [#allocation5], 0  ;;  %s17275_s24 = smov 0   ;;  %s17277_s25 = smov 0  }
   0xc   :  { %s17279_s26 = smov 0   ;;  %s17281_s27 = smov 0  }
   0xd LB: > { %19827 = sst [smem:[#allocation22_spill]] %s17214_s26  ;;  %s17294_s28 = sadd.s32 4294967295, %s17218_s27   ;;  %s17218_s27 = sphi %s17281_s27, %s19855_s27   ;;  %s17214_s26 = sphi %s17279_s26, %s19857_s26   ;;  %s17210_s25 = sphi %s17277_s25, %s19859_s25   ;;  %s17206_s24 = sphi %s17275_s24, %s19858_s24  }
   0xe   : > { %p67_p0 = scmp.ne.s32.totalorder %s17210_s25, %s17206_s24  ;;  %p19806_p1 = scmp.eq.s32.totalorder %s17294_s28, 0 }
   0xf   : > { %p14710_p2 = scmp.ge.s32.totalorder %s17218_s27, 1  ;;  %p214_p3 = scmp.lt.s32.totalorder %s17218_s27, 3 }
  0x10   : > { %p17303_p5 = por %p19806_p1, %p67_p0  ;;  %s17220_s8 = smov [#allocation11]  }
  0x11   : > { %p17307_p6 = pnand %p14710_p2, %p214_p3  ;;  %s238_s9 = sshll.u32 %s17220_s8, 4  ;;  %s239_s9 = int_to_ptr.vmem [resolvable:$true] %s238_s9 }
  0x12   : > { %s19828_s29 = scalar_select %p17303_p5, 1, 0 }
  0x13   : > { %s19829_s30 = scalar_select %p17307_p6, 1, 0 }
  0x14   : > { %p16788_p7 = pneg %p17307_p6  ;;  %s17221_s10 = smov [#allocation12]  }
  0x15   : > { %s248_s11 = sshll.u32 %s17221_s10, 4  ;;  %s19831_s4 = sld [smem:[#allocation26_spill]]  ;;  %s17319_s11 = int_to_ptr.vmem [resolvable:$true] %s248_s11 }
  0x16   : > { %p17315_p8 = pnand %p16788_p7, %p19806_p1 }
  0x18   : > { %s19830_s12 = scalar_select %p17315_p8, 1, 0 }
  0x19   : > { %p17329_p10 = pneg %p17315_p8 }
  0x1b   : > { %s16936_s15 = scalar_lea.hbm %s19831_s4, 256 }
  0x1c   : > { %p16937_p9 = scmp.ne.s32.totalorder %s19831_s4, %s16936_s15  ;;  %p16943_p13 = scmp.lt.u32.totalorder %s16936_s15, %s19831_s4 }
  0x1d   : > { %s19832_s18 = scalar_select %p17329_p10, 1, 0 }
  0x1e   : > { %p16939_p11 = pnand %p17329_p10, %p16937_p9 }
  0x20   : > { %p16940_p12 = pneg %p16939_p11 }
  0x22   : > { %p16945_p0 = pnand %p16943_p13, %p16940_p12 }
  0x24   : > { %16948 = shalt.err (!%p16945_p0)
}
  0x25   : > { %s16949_s21 = scalar_lea.vmem %s239_s9, 256  ;;  %p16957_p4 = scmp.lt.s32.totalorder %s239_s9, %s239_s9 }
  0x26   : > { %p16950_p2 = scmp.ne.s32.totalorder %s239_s9, %s16949_s21  ;;  %p16958_p1 = scmp.lt.s32.totalorder %s16949_s21, %s16949_s21 }
  0x28   : > { %p16952_p3 = pnand %p16950_p2, %p17329_p10  ;;  %p16959_p5 = por %p16958_p1, %p16957_p4 }
  0x2a   : > { %p16953_p7 = pneg %p16952_p3 }
  0x2c   : > { %p16960_p6 = pnand %p16959_p5, %p16953_p7 }
  0x2e   : > { %16963 = shalt.err (!%p16960_p6)
}
  0x2f   : > { %16794 = dma.hbm_to_vmem [thread:$0]  (!%p17315_p8), %s19831_s4, 256, %s239_s9, [#allocation10]  }
  0x30   : > { %s19833_s5 = sld [smem:[#allocation27_spill]] }
  0x36   : > { %s16964_s10 = scalar_lea.hbm %s19833_s5, 8192 }
  0x37   : > { %p16965_p9 = scmp.ne.s32.totalorder %s19833_s5, %s16964_s10  ;;  %p16971_p4 = scmp.lt.u32.totalorder %s16964_s10, %s19833_s5 }
  0x39   : > { %p16967_p11 = pnand %p16965_p9, %p17329_p10 }
  0x3b   : > { %p16968_p1 = pneg %p16967_p11 }
  0x3d   : > { %p16973_p5 = pnand %p16971_p4, %p16968_p1 }
  0x3f   : > { %16976 = shalt.err (!%p16973_p5)
}
  0x40   : > { %s16977_s9 = scalar_lea.vmem %s17319_s11, 8192  ;;  %p16985_p0 = scmp.lt.s32.totalorder %s17319_s11, %s17319_s11 }
  0x41   : > { %p16978_p6 = scmp.ne.s32.totalorder %s17319_s11, %s16977_s9  ;;  %p16986_p2 = scmp.lt.s32.totalorder %s16977_s9, %s16977_s9 }
  0x43   : > { %p16980_p12 = pnand %p16978_p6, %p17329_p10  ;;  %p16987_p3 = por %p16986_p2, %p16985_p0 }
  0x45   : > { %p16981_p13 = pneg %p16980_p12 }
  0x47   : > { %p16988_p7 = pnand %p16987_p3, %p16981_p13 }
  0x49   : > { %16991 = shalt.err (!%p16988_p7)
}
  0x4a   : > { %s19809_s17 = smov 64   ;;  %s17223_s19 = smov 4  }
  0x4b   : > { %16797 = dma.hbm_to_vmem [thread:$0]  (!%p17315_p8), %s19833_s5, 8192, %s17319_s11, [#allocation13], %s19809_s17, %s19809_s17, %s17223_s19  }
  0x4c   : > { %s17371_s22 = sadd.s32 1, %s17218_s27   ;;  %s54_s23 = sadd.s32 1, %s17214_s26 }
  0x4d   : > { %19834 = sst [smem:[#allocation23_spill]] %s17371_s22  ;;  %s51_s24 = ssub.s32 %s17218_s27, %s17371_s22 }
  0x4e   : > { %p61_p9 = scmp.ne.s32.totalorder %s17214_s26, %s17210_s25  ;;  %p52_p11 = scmp.eq.s32.totalorder %s51_s24, 0 }
  0x4f   : > { %p62_p1 = scmp.eq.s32.totalorder %s17218_s27, 0  ;;  %p16815_p4 = scmp.lt.s32.totalorder %s17218_s27, 2 }
  0x50   : > { %s19810_s8 = sand.u32 1, %s17218_s27   ;;  %s17385_s13 = sand.u32 1, %s17214_s26  }
  0x51   : > { %s17382_s10 = scalar_select %p52_p11, %s17214_s26, %s54_s23  }
  0x52   : > { %p63_p5 = por %p62_p1, %p61_p9  ;;  %s16604_s14 = sshll.u32 %s17218_s27, 10 }
  0x53   : > { %19835 = sst [smem:[#allocation24_spill]] %s17382_s10  ;;  %s16760_s15 = smul.u32 6144, %s17385_s13 }
  0x54   : > { %s19836_s1 = sld [smem:[#allocation25_spill]]  ;;  %p17394_p6 = pnand %p16815_p4, %p63_p5 }
  0x55   : > { %s277_s20 = scalar_lea.vmem [#allocation6], %s16760_s15  ;;  %s17402_s23 = scalar_lea.sflag [#allocation7], %s19810_s8 }
  0x56   : > { %s19837_s19 = scalar_select %p17394_p6, 1, 0 }
  0x57   : > { %s284_s21 = sshll.u32 %s277_s20, 4  ;;  %p17408_p13 = pneg %p17394_p6  ;;  %s17398_s21 = int_to_ptr.vmem [resolvable:$true] %s284_s21 }
  0x5a   : > { %s17392_s9 = scalar_lea.hbm %s19836_s1, %s16604_s14  ;;  %s16997_s15 = scalar_lea.hbm %s19836_s1, 196608 }
  0x5b   : > { %s16992_s24 = scalar_lea.hbm %s17392_s9, 98304  ;;  %p16998_p3 = scmp.lt.u32.totalorder %s17392_s9, %s19836_s1 }
  0x5c   : > { %p16993_p12 = scmp.ne.s32.totalorder %s17392_s9, %s16992_s24  ;;  %p16999_p7 = scmp.lt.u32.totalorder %s16997_s15, %s16992_s24 }
  0x5d   : > { %s19838_s14 = scalar_select %p17408_p13, 1, 0 }
  0x5e   : > { %p16995_p0 = pnand %p17408_p13, %p16993_p12  ;;  %p17000_p9 = por %p16999_p7, %p16998_p3 }
  0x5f   : > { %p17001_p11 = scmp.lt.u32.totalorder %s16992_s24, %s17392_s9 }
  0x60   : > { %p16996_p2 = pneg %p16995_p0 }
  0x61   : > { %p17002_p1 = por %p17001_p11, %p17000_p9 }
  0x63   : > { %p17003_p4 = pnand %p17002_p1, %p16996_p2 }
  0x65   : > { %17006 = shalt.err (!%p17003_p4)
}
  0x66   : > { %s17007_s8 = scalar_lea.vmem %s17398_s21, 98304  ;;  %s17224_s11 = smov [#allocation6]  }
  0x67   : > { %p17008_p5 = scmp.ne.s32.totalorder %s17398_s21, %s17007_s8  ;;  %s17012_s16 = sshll.u32 %s17224_s11, 4  ;;  %s17013_s16 = int_to_ptr.vmem [resolvable:$false] %s17012_s16 }
  0x68   : > { %s17014_s17 = scalar_lea.vmem %s17013_s16, 196608  ;;  %p17015_p8 = scmp.lt.s32.totalorder %s17398_s21, %s17013_s16 }
  0x69   : > { %p17010_p12 = pnand %p17008_p5, %p17408_p13  ;;  %p17016_p10 = scmp.lt.s32.totalorder %s17014_s17, %s17007_s8 }
  0x6b   : > { %p17011_p0 = pneg %p17010_p12  ;;  %p17017_p3 = por %p17016_p10, %p17015_p8 }
  0x6d   : > { %p17018_p7 = pnand %p17017_p3, %p17011_p0 }
  0x6f   : > { %17021 = shalt.err (!%p17018_p7)
}
  0x70   : > { %s17225_s24 = smov 2048   ;;  %s17226_s15 = smov 1024  }
  0x71   : > { %s19839_s20 = smov 64   ;;  %s17227_s1 = smov [#allocation3]  }
  0x72   : > { %16804 = dma.hbm_to_vmem [thread:$0]  (!%p17394_p6), %s17392_s9, 98304, %s17398_s21, %s17402_s23, %s17225_s24, %s17226_s15, %s19839_s20  }
  0x73   : > { %s227_s4 = sshll.u32 %s17227_s1, 4  ;;  %s17228_s11 = smov [#allocation14]   ;;  %s228_s4 = int_to_ptr.vmem [resolvable:$true] %s227_s4 }
  0x74   : > { %s262_s5 = sshll.u32 %s17228_s11, 4  ;;  %s17022_s17 = scalar_lea.hbm %s19798_s0, 384  ;;  %s263_s5 = int_to_ptr.vmem [resolvable:$true] %s262_s5 }
  0x75   : > { %p17023_p8 = scmp.ne.s32.totalorder %s19798_s0, %s17022_s17  ;;  %p19840_p10 = scmp.ne.s32.totalorder %s19832_s18, 0 }
  0x76   : > { %p17029_p11 = scmp.lt.u32.totalorder %s17022_s17, %s19798_s0 }
  0x77   : > { %p17025_p2 = pnand %p17023_p8, %p19840_p10 }
  0x79   : > { %p17026_p9 = pneg %p17025_p2 }
  0x7b   : > { %p17031_p1 = pnand %p17029_p11, %p17026_p9 }
  0x7d   : > { %17034 = shalt.err (!%p17031_p1)
}
  0x7e   : > { %s17035_s1 = scalar_lea.vmem %s228_s4, 384  ;;  %p17043_p0 = scmp.lt.s32.totalorder %s228_s4, %s228_s4 }
  0x7f   : > { %p17036_p4 = scmp.ne.s32.totalorder %s228_s4, %s17035_s1  ;;  %p17044_p3 = scmp.lt.s32.totalorder %s17035_s1, %s17035_s1 }
  0x81   : > { %p17038_p5 = pnand %p17036_p4, %p19840_p10  ;;  %p17045_p7 = por %p17044_p3, %p17043_p0 }
  0x83   : > { %p17039_p12 = pneg %p17038_p5 }
  0x85   : > { %p17046_p6 = pnand %p17045_p7, %p17039_p12 }
  0x87   : > { %17049 = shalt.err (!%p17046_p6)
}
  0x88   : > { %p19841_p8 = scmp.ne.s32.totalorder %s19830_s12, 0  ;;  %s14718_s7 = sshll.u32 %s17385_s13, 5 }
  0x89   : > { %s17050_s21 = scalar_lea.hbm %s19804_s6, 16 }
  0x8a   : > { %16791 = dma.hbm_to_vmem [thread:$0]  (!%p19841_p8), %s19798_s0, 384, %s228_s4, [#allocation4]  }
  0x8b   : > { %p17051_p2 = scmp.ne.s32.totalorder %s19804_s6, %s17050_s21  ;;  %p17057_p11 = scmp.lt.u32.totalorder %s17050_s21, %s19804_s6 }
  0x8d   : > { %p17053_p6 = pnand %p17051_p2, %p19840_p10 }
  0x8f   : > { %p17054_p9 = pneg %p17053_p6 }
  0x91   : > { %p17059_p1 = pnand %p17057_p11, %p17054_p9 }
  0x93   : > { %17062 = shalt.err (!%p17059_p1)
}
  0x94   : > { %s17063_s4 = scalar_lea.vmem %s263_s5, 16  ;;  %s17070_s16 = scalar_lea.vmem %s263_s5, 32 }
  0x95   : > { %p17064_p4 = scmp.ne.s32.totalorder %s263_s5, %s17063_s4  ;;  %p17071_p0 = scmp.lt.s32.totalorder %s263_s5, %s263_s5 }
  0x96   : > { %p17072_p3 = scmp.lt.s32.totalorder %s17070_s16, %s17063_s4 }
  0x97   : > { %p17066_p5 = pnand %p17064_p4, %p19840_p10 }
  0x98   : > { %p17073_p7 = por %p17072_p3, %p17071_p0 }
  0x99   : > { %p17067_p12 = pneg %p17066_p5 }
  0x9b   : > { %p17074_p13 = pnand %p17073_p7, %p17067_p12 }
  0x9d   : > { %17077 = shalt.err (!%p17074_p13)
}
  0x9e   : > { %16800 = dma.hbm_to_vmem [thread:$0]  (!%p19841_p8), %s19804_s6, 16, %s263_s5, [#allocation13]  }
  0x9f   : > { %s16605_s1 = sshll.u32 %s17218_s27, 9  ;;  %s298_s22 = scalar_lea.vmem [#allocation8], %s14718_s7 }
  0xa0   : > { %s17474_s18 = scalar_lea.hbm %s19800_s2, %s16605_s1  ;;  %s306_s9 = sshll.u32 %s298_s22, 4  ;;  %s307_s9 = int_to_ptr.vmem [resolvable:$true] %s306_s9 }
  0xa1   : > { %s17078_s12 = scalar_lea.hbm %s17474_s18, 512  ;;  %p19842_p10 = scmp.ne.s32.totalorder %s19838_s14, 0 }
  0xa2   : > { %p17079_p13 = scmp.ne.s32.totalorder %s17474_s18, %s17078_s12  ;;  %s17083_s24 = scalar_lea.hbm %s19800_s2, 1024 }
  0xa3   : > { %p17084_p8 = scmp.lt.u32.totalorder %s17474_s18, %s19800_s2  ;;  %p17085_p9 = scmp.lt.u32.totalorder %s17083_s24, %s17078_s12 }
  0xa4   : > { %p17081_p2 = pnand %p17079_p13, %p19842_p10  ;;  %p17087_p1 = scmp.lt.u32.totalorder %s17078_s12, %s17474_s18 }
  0xa5   : > { %p17086_p11 = por %p17085_p9, %p17084_p8 }
  0xa6   : > { %p17082_p6 = pneg %p17081_p2 }
  0xa7   : > { %p17088_p4 = por %p17087_p1, %p17086_p11 }
  0xa9   : > { %p17089_p5 = pnand %p17088_p4, %p17082_p6 }
  0xab   : > { %17092 = shalt.err (!%p17089_p5)
}
  0xac   : > { %s17093_s7 = scalar_lea.vmem %s307_s9, 512  ;;  %s17229_s11 = smov [#allocation8]  }
  0xad   : > { %p17094_p12 = scmp.ne.s32.totalorder %s307_s9, %s17093_s7  ;;  %s17098_s4 = sshll.u32 %s17229_s11, 4  ;;  %s17099_s4 = int_to_ptr.vmem [resolvable:$false] %s17098_s4 }
  0xae   : > { %s17100_s16 = scalar_lea.vmem %s17099_s4, 1024  ;;  %p17101_p7 = scmp.lt.s32.totalorder %s307_s9, %s17099_s4 }
  0xaf   : > { %p17096_p0 = pnand %p17094_p12, %p19842_p10  ;;  %p17102_p13 = scmp.lt.s32.totalorder %s17100_s16, %s17093_s7 }
  0xb1   : > { %p17097_p3 = pneg %p17096_p0  ;;  %p17103_p2 = por %p17102_p13, %p17101_p7 }
  0xb3   : > { %p17104_p8 = pnand %p17103_p2, %p17097_p3 }
  0xb5   : > { %17107 = shalt.err (!%p17104_p8)
}
  0xb6   : > { %p19843_p9 = scmp.ne.s32.totalorder %s19837_s19, 0  ;;  %s14721_s8 = sshll.u32 %s17385_s13, 13 }
  0xb7   : > { %s16607_s17 = sshll.u32 %s17218_s27, 17  ;;  %s317_s22 = scalar_lea.vmem [#allocation9], %s14721_s8 }
  0xb8   : > { %16807 = dma.hbm_to_vmem [thread:$0]  (!%p19843_p9), %s17474_s18, 512, %s307_s9, %s17402_s23  }
  0xb9   : > { %s17499_s10 = scalar_lea.hbm %s19801_s3, %s16607_s17  ;;  %s325_s12 = sshll.u32 %s317_s22, 4  ;;  %s17501_s12 = int_to_ptr.vmem [resolvable:$true] %s325_s12 }
  0xba   : > { %s19844_s21 = sand.u32 1, %s17218_s27   ;;  %s17108_s24 = scalar_lea.hbm %s17499_s10, 131072 }
  0xbb   : > { %s17505_s5 = scalar_lea.sflag [#allocation10], %s19844_s21  ;;  %p17109_p6 = scmp.ne.s32.totalorder %s17499_s10, %s17108_s24 }
  0xbc   : > { %s17113_s18 = scalar_lea.hbm %s19801_s3, 262144  ;;  %p17114_p4 = scmp.lt.u32.totalorder %s17499_s10, %s19801_s3 }
  0xbd   : > { %p17111_p11 = pnand %p17109_p6, %p19842_p10  ;;  %p17115_p5 = scmp.lt.u32.totalorder %s17113_s18, %s17108_s24 }
  0xbe   : > { %p17117_p0 = scmp.lt.u32.totalorder %s17108_s24, %s17499_s10 }
  0xbf   : > { %p17112_p1 = pneg %p17111_p11  ;;  %p17116_p12 = por %p17115_p5, %p17114_p4 }
  0xc1   : > { %p17118_p3 = por %p17117_p0, %p17116_p12 }
  0xc3   : > { %p17119_p7 = pnand %p17118_p3, %p17112_p1 }
  0xc5   : > { %17122 = shalt.err (!%p17119_p7)
}
  0xc6   : > { %s17123_s27 = scalar_lea.vmem %s17501_s12, 131072  ;;  %s17230_s20 = smov [#allocation9]  }
  0xc7   : > { %p17124_p13 = scmp.ne.s32.totalorder %s17501_s12, %s17123_s27  ;;  %s17128_s7 = sshll.u32 %s17230_s20, 4  ;;  %s17129_s7 = int_to_ptr.vmem [resolvable:$false] %s17128_s7 }
  0xc8   : > { %s17130_s11 = scalar_lea.vmem %s17129_s7, 262144  ;;  %p17131_p6 = scmp.lt.s32.totalorder %s17501_s12, %s17129_s7 }
  0xc9   : > { %p17126_p2 = pnand %p17124_p13, %p19842_p10  ;;  %p17132_p11 = scmp.lt.s32.totalorder %s17130_s11, %s17123_s27 }
  0xcb   : > { %p17127_p8 = pneg %p17126_p2  ;;  %p17133_p4 = por %p17132_p11, %p17131_p6 }
  0xcd   : > { %p17134_p5 = pnand %p17133_p4, %p17127_p8 }
  0xcf   : > { %17137 = shalt.err (!%p17134_p5)
}
  0xd0   : > { %s17231_s4 = smov 512   ;;  %s17232_s16 = smov 32  }
  0xd1   : > { %16810 = dma.hbm_to_vmem [thread:$0]  (!%p19843_p9), %s17499_s10, 131072, %s17501_s12, %s17505_s5, %s17231_s4, %s17231_s4, %s17232_s16  }
  0xd2   : > { %p19845_p10 = scmp.ne.s32.totalorder %s19829_s30, 0 }
  0xd3   : > { %p19846_p1 = scmp.eq.s32.totalorder (!%p19845_p10), %s17294_s28, 0 }
  0xd4   : > { %337 = sbr.rel (%p19845_p10) target bundleno = 2548 (0x9f4), region = 48 }
  0xdb   : > { %17181 = dma.done.wait (%p19846_p1), [#allocation4], 384   ;;  %p19847_p12 = pmov %p19846_p1 }
  0xdc   : > { %s343_s14 = sand.u32 1, %s17294_s28   ;;  %s345_s8 = sand.u32 1, %s17210_s25  }
  0xdd   : > { %17183 = vsyncadd (%p19847_p12), [#allocation4], 4294966912  ;;  %s16761_s17 = smul.u32 6144, %s345_s8  ;;  %s344_s1 = scalar_lea.sflag [#allocation7], %s343_s14 }
  0xde   : > { %p19848_p0 = scmp.ne.s32.totalorder %s19828_s29, 0 }
  0xdf   : > { %s17537_s26 = scalar_lea.vmem [#allocation6], %s16761_s17 }
  0xe0   : > { %17185 = dma.done.wait (%p19848_p0), %s344_s1, 98816  }
  0xe1   : > { %17187 = vsyncadd (%p19848_p0), %s344_s1, 4294868480  ;;  %s14727_s30 = sshll.u32 %s345_s8, 5  ;;  %s14728_s19 = sshll.u32 %s345_s8, 13 }
  0xe2   : > { %s17543_s10 = scalar_lea.vmem [#allocation8], %s14727_s30  ;;  %s362_s22 = scalar_lea.sflag [#allocation10], %s343_s14 }
  0xe3   : > { %s17545_s12 = scalar_lea.vmem [#allocation9], %s14728_s19 }
  0xe4   : > { %17189 = dma.done.wait (%p19848_p0), %s362_s22, 131072  }
  0xe5   : > { %17191 = vsyncadd (%p19848_p0), %s362_s22, 4294836224  ;;  %p19849_p9 = pmov %p19846_p1 }
  0xe6   : > { %p19850_p3 = pmov %p19846_p1 }
  0xe7   : > { %17193 = dma.done.wait (%p19849_p9), [#allocation10], 256  }
  0xe8   : > { %17195 = vsyncadd (%p19850_p3), [#allocation10], 4294967040  ;;  %p19851_p7 = pmov %p19846_p1 }
  0xe9   : > { %p19852_p13 = pmov %p19846_p1 }
  0xea   : > { %17197 = dma.done.wait (%p19851_p7), [#allocation13], 8208  }
  0xeb   : > { %17199 = vsyncadd (%p19852_p13), [#allocation13], 4294959088  ;;  %p19853_p2 = scmp.ne.s32.totalorder %s17294_s28, 0 }
  0xec   : > { %v17233_v0 = vmov (!%p19853_p2), 0.0  }
  0xed   : > { %420 = sbr.rel (%p19853_p2) target bundleno = 244 (0xf4), region = 80  ;;  %421 = vst [vmem:[#allocation2] sm:$0xff] (!%p19853_p2), %v17233_v0  ;;  %422 = vst [vmem:[#allocation2 + $0x8] sm:$0xff] (!%p19853_p2), %v17233_v0 }
  0xee   : > { %423 = vst [vmem:[#allocation2 + $0x10] sm:$0xff] (!%p19853_p2), %v17233_v0  ;;  %424 = vst [vmem:[#allocation2 + $0x18] sm:$0xff] (!%p19853_p2), %v17233_v0 }
  0xef   : > { %425 = vst [vmem:[#allocation2 + $0x20] sm:$0xff] (!%p19853_p2), %v17233_v0  ;;  %426 = vst [vmem:[#allocation2 + $0x28] sm:$0xff] (!%p19853_p2), %v17233_v0 }
  0xf0   : > { %427 = vst [vmem:[#allocation2 + $0x30] sm:$0xff] (!%p19853_p2), %v17233_v0  ;;  %428 = vst [vmem:[#allocation2 + $0x38] sm:$0xff] (!%p19853_p2), %v17233_v0 }
  0xf4 PF: > { %v432_v1 = vld [vmem:[%s17537_s26] sm:$0xff]  ;;  %v433_v3 = vld [vmem:[%s17537_s26 + $0x8] sm:$0xff]  ;;  %p16534_p8 = scmp.ne.s32.totalorder %s17294_s28, 1 }
  0xf5   : > { %v440_v2 = vld [vmem:[%s17537_s26 + $0x40] sm:$0xff]  ;;  %v441_v5 = vld [vmem:[%s17537_s26 + $0x48] sm:$0xff] }
  0xf6   : > { %v14740_v4 = vcombine.high %v432_v1, %v440_v2  ;;  %v14739_v6 = vcombine.low %v432_v1, %v440_v2  ;;  %v448_v7 = vld [vmem:[%s17537_s26 + $0x80] sm:$0xff]  ;;  %v14742_v9 = vcombine.high %v433_v3, %v441_v5  ;;  %v14741_v10 = vcombine.low %v433_v3, %v441_v5  ;;  %v449_v12 = vld [vmem:[%s17537_s26 + $0x88] sm:$0xff] }
  0xf7   : > { %v456_v8 = vld [vmem:[%s17537_s26 + $0xc0] sm:$0xff]  ;;  %v457_v13 = vld [vmem:[%s17537_s26 + $0xc8] sm:$0xff] }
  0xf8   : > { %v14756_v11 = vcombine.high %v448_v7, %v456_v8  ;;  %v464_v14 = vld [vmem:[%s17537_s26 + $0x100] sm:$0xff]  ;;  %5061 = vmatprep.subr.bf16.mxu0 %v14740_v4  ;;  %v14758_v15 = vcombine.high %v449_v12, %v457_v13  ;;  %v465_v17 = vld [vmem:[%s17537_s26 + $0x108] sm:$0xff]  ;;  %5184 = vmatprep.subr.bf16.mxu1 %v14742_v9  ;;  %v14755_v19 = vcombine.low %v448_v7, %v456_v8 }
  0xf9   : > { %v472_v16 = vld [vmem:[%s17537_s26 + $0x140] sm:$0xff]  ;;  %v473_v18 = vld [vmem:[%s17537_s26 + $0x148] sm:$0xff]  ;;  %5062 = vmatpush1.bf16.msra.mxu0 %v14739_v6  ;;  %5185 = vmatpush1.bf16.msra.mxu1 %v14741_v10  ;;  %v14757_v20 = vcombine.low %v449_v12, %v457_v13 }
  0xfa   : > { %5063 = vmatprep.subr.bf16.mxu0 %v14756_v11  ;;  %v14772_v21 = vcombine.high %v464_v14, %v472_v16  ;;  %5186 = vmatprep.subr.bf16.mxu1 %v14758_v15  ;;  %v14774_v22 = vcombine.high %v465_v17, %v473_v18  ;;  %v480_v23 = vld [vmem:[%s17537_s26 + $0x180] sm:$0xff]  ;;  %v481_v25 = vld [vmem:[%s17537_s26 + $0x188] sm:$0xff]  ;;  %v14771_v27 = vcombine.low %v464_v14, %v472_v16 }
  0xfb   : > { %v488_v24 = vld [vmem:[%s17537_s26 + $0x1c0] sm:$0xff]  ;;  %v489_v26 = vld [vmem:[%s17537_s26 + $0x1c8] sm:$0xff]  ;;  %v14773_v28 = vcombine.low %v465_v17, %v473_v18 }
  0xfc   : > { %v14788_v29 = vcombine.high %v480_v23, %v488_v24  ;;  %v14790_v30 = vcombine.high %v481_v25, %v489_v26  ;;  %v496_v31 = vld [vmem:[%s17537_s26 + $0x200] sm:$0xff]  ;;  %v497_v33 = vld [vmem:[%s17537_s26 + $0x208] sm:$0xff]  ;;  %v14787_v35 = vcombine.low %v480_v23, %v488_v24  ;;  %v14789_v36 = vcombine.low %v481_v25, %v489_v26 }
  0xfd   : > { %5064 = vmatpush1.bf16.msra.mxu0 %v14755_v19  ;;  %5187 = vmatpush1.bf16.msra.mxu1 %v14757_v20  ;;  %v504_v32 = vld [vmem:[%s17537_s26 + $0x240] sm:$0xff]  ;;  %v505_v34 = vld [vmem:[%s17537_s26 + $0x248] sm:$0xff] }
  0xfe   : > { %5065 = vmatprep.subr.bf16.mxu0 %v14772_v21  ;;  %5188 = vmatprep.subr.bf16.mxu1 %v14774_v22  ;;  %v14804_v37 = vcombine.high %v496_v31, %v504_v32  ;;  %v14806_v38 = vcombine.high %v497_v33, %v505_v34  ;;  %v512_v39 = vld [vmem:[%s17537_s26 + $0x280] sm:$0xff]  ;;  %v513_v41 = vld [vmem:[%s17537_s26 + $0x288] sm:$0xff]  ;;  %v14803_v43 = vcombine.low %v496_v31, %v504_v32 }
  0xff   : > { %v520_v40 = vld [vmem:[%s17537_s26 + $0x2c0] sm:$0xff]  ;;  %v521_v42 = vld [vmem:[%s17537_s26 + $0x2c8] sm:$0xff]  ;;  %v14805_v44 = vcombine.low %v497_v33, %v505_v34 }
 0x100   : > { %v14820_v45 = vcombine.high %v512_v39, %v520_v40  ;;  %v14822_v46 = vcombine.high %v513_v41, %v521_v42  ;;  %v528_v47 = vld [vmem:[%s17537_s26 + $0x300] sm:$0xff]  ;;  %v529_v49 = vld [vmem:[%s17537_s26 + $0x308] sm:$0xff]  ;;  %v14819_v51 = vcombine.low %v512_v39, %v520_v40  ;;  %v14821_v52 = vcombine.low %v513_v41, %v521_v42 }
 0x101   : > { %5066 = vmatpush1.bf16.msra.mxu0 %v14771_v27  ;;  %5189 = vmatpush1.bf16.msra.mxu1 %v14773_v28  ;;  %v536_v48 = vld [vmem:[%s17537_s26 + $0x340] sm:$0xff]  ;;  %v537_v50 = vld [vmem:[%s17537_s26 + $0x348] sm:$0xff] }
 0x102   : > { %5067 = vmatprep.subr.bf16.mxu0 %v14788_v29  ;;  %5190 = vmatprep.subr.bf16.mxu1 %v14790_v30  ;;  %v14836_v53 = vcombine.high %v528_v47, %v536_v48  ;;  %v17589_v54 = vld [vmem:[#allocation3] sm:$0xff]  ;;  %v14838_v55 = vcombine.high %v529_v49, %v537_v50  ;;  %v544_v56 = vld [vmem:[%s17537_s26 + $0x380] sm:$0xff]  ;;  %v14835_v61 = vcombine.low %v528_v47, %v536_v48 }
 0x103   : > { %v552_v57 = vld [vmem:[%s17537_s26 + $0x3c0] sm:$0xff]  ;;  %v17595_v58 = vcombine.high %v17589_v54, %v17589_v54  ;;  %v545_v59 = vld [vmem:[%s17537_s26 + $0x388] sm:$0xff]  ;;  %v14837_v62 = vcombine.low %v529_v49, %v537_v50 }
 0x104   : > { %v553_v60 = vld [vmem:[%s17537_s26 + $0x3c8] sm:$0xff]  ;;  %v14852_v63 = vcombine.high %v544_v56, %v552_v57  ;;  %v560_v1 = vld [vmem:[%s17537_s26 + $0x400] sm:$0xff]  ;;  %v14851_v5 = vcombine.low %v544_v56, %v552_v57 }
 0x105   : > { %5068 = vmatpush1.bf16.msra.mxu0 %v14787_v35  ;;  %5191 = vmatpush1.bf16.msra.mxu1 %v14789_v36  ;;  %v14854_v0 = vcombine.high %v545_v59, %v553_v60  ;;  %v568_v2 = vld [vmem:[%s17537_s26 + $0x440] sm:$0xff]  ;;  %v561_v3 = vld [vmem:[%s17537_s26 + $0x408] sm:$0xff]  ;;  %v14853_v6 = vcombine.low %v545_v59, %v553_v60 }
 0x106   : > { %5069 = vmatprep.subr.bf16.mxu0 %v14804_v37  ;;  %5192 = vmatprep.subr.bf16.mxu1 %v14806_v38  ;;  %v569_v4 = vld [vmem:[%s17537_s26 + $0x448] sm:$0xff]  ;;  %v14868_v7 = vcombine.high %v560_v1, %v568_v2  ;;  %v576_v9 = vld [vmem:[%s17537_s26 + $0x480] sm:$0xff]  ;;  %v14867_v13 = vcombine.low %v560_v1, %v568_v2 }
 0x107   : > { %5093 = vmatprep.mubr.bf16.mxu0 %v17595_v58  ;;  %5216 = vmatprep.mubr.bf16.mxu1 %v17595_v58  ;;  %v14870_v8 = vcombine.high %v561_v3, %v569_v4  ;;  %v584_v10 = vld [vmem:[%s17537_s26 + $0x4c0] sm:$0xff]  ;;  %v577_v11 = vld [vmem:[%s17537_s26 + $0x488] sm:$0xff]  ;;  %v14869_v14 = vcombine.low %v561_v3, %v569_v4 }
 0x108   : > { %v585_v12 = vld [vmem:[%s17537_s26 + $0x4c8] sm:$0xff]  ;;  %v14884_v15 = vcombine.high %v576_v9, %v584_v10  ;;  %v592_v17 = vld [vmem:[%s17537_s26 + $0x500] sm:$0xff]  ;;  %v14883_v21 = vcombine.low %v576_v9, %v584_v10 }
 0x109   : > { %5070 = vmatpush1.bf16.msra.mxu0 %v14803_v43  ;;  %5193 = vmatpush1.bf16.msra.mxu1 %v14805_v44  ;;  %v14886_v16 = vcombine.high %v577_v11, %v585_v12  ;;  %v600_v18 = vld [vmem:[%s17537_s26 + $0x540] sm:$0xff]  ;;  %v593_v19 = vld [vmem:[%s17537_s26 + $0x508] sm:$0xff]  ;;  %v14885_v22 = vcombine.low %v577_v11, %v585_v12 }
 0x10a   : > { %5071 = vmatprep.subr.bf16.mxu0 %v14820_v45  ;;  %5194 = vmatprep.subr.bf16.mxu1 %v14822_v46  ;;  %v601_v20 = vld [vmem:[%s17537_s26 + $0x548] sm:$0xff]  ;;  %v14900_v23 = vcombine.high %v592_v17, %v600_v18  ;;  %v608_v25 = vld [vmem:[%s17537_s26 + $0x580] sm:$0xff]  ;;  %v14899_v29 = vcombine.low %v592_v17, %v600_v18 }
 0x10b   : > { %v14902_v24 = vcombine.high %v593_v19, %v601_v20  ;;  %v616_v26 = vld [vmem:[%s17537_s26 + $0x5c0] sm:$0xff]  ;;  %v609_v27 = vld [vmem:[%s17537_s26 + $0x588] sm:$0xff]  ;;  %v14901_v30 = vcombine.low %v593_v19, %v601_v20 }
 0x10c   : > { %v617_v28 = vld [vmem:[%s17537_s26 + $0x5c8] sm:$0xff]  ;;  %v14916_v31 = vcombine.high %v608_v25, %v616_v26  ;;  %v624_v33 = vld [vmem:[%s17537_s26 + $0x600] sm:$0xff]  ;;  %v14915_v37 = vcombine.low %v608_v25, %v616_v26 }
 0x10d   : > { %5072 = vmatpush1.bf16.msra.mxu0 %v14819_v51  ;;  %5195 = vmatpush1.bf16.msra.mxu1 %v14821_v52  ;;  %v14918_v32 = vcombine.high %v609_v27, %v617_v28  ;;  %v632_v34 = vld [vmem:[%s17537_s26 + $0x640] sm:$0xff]  ;;  %v625_v35 = vld [vmem:[%s17537_s26 + $0x608] sm:$0xff]  ;;  %v14917_v38 = vcombine.low %v609_v27, %v617_v28 }
 0x10e   : > { %5073 = vmatprep.subr.bf16.mxu0 %v14836_v53  ;;  %5196 = vmatprep.subr.bf16.mxu1 %v14838_v55  ;;  %v633_v36 = vld [vmem:[%s17537_s26 + $0x648] sm:$0xff]  ;;  %v14932_v39 = vcombine.high %v624_v33, %v632_v34  ;;  %v640_v41 = vld [vmem:[%s17537_s26 + $0x680] sm:$0xff]  ;;  %v14931_v45 = vcombine.low %v624_v33, %v632_v34 }
 0x10f   : > { %v14934_v40 = vcombine.high %v625_v35, %v633_v36  ;;  %v648_v42 = vld [vmem:[%s17537_s26 + $0x6c0] sm:$0xff]  ;;  %v641_v43 = vld [vmem:[%s17537_s26 + $0x688] sm:$0xff]  ;;  %v14933_v46 = vcombine.low %v625_v35, %v633_v36 }
 0x110   : > { %v649_v44 = vld [vmem:[%s17537_s26 + $0x6c8] sm:$0xff]  ;;  %v14948_v47 = vcombine.high %v640_v41, %v648_v42  ;;  %v656_v49 = vld [vmem:[%s17537_s26 + $0x700] sm:$0xff]  ;;  %v14947_v53 = vcombine.low %v640_v41, %v648_v42 }
 0x111   : > { %5074 = vmatpush1.bf16.msra.mxu0 %v14835_v61  ;;  %5197 = vmatpush1.bf16.msra.mxu1 %v14837_v62  ;;  %v14950_v48 = vcombine.high %v641_v43, %v649_v44  ;;  %v664_v50 = vld [vmem:[%s17537_s26 + $0x740] sm:$0xff]  ;;  %v657_v51 = vld [vmem:[%s17537_s26 + $0x708] sm:$0xff]  ;;  %v14949_v55 = vcombine.low %v641_v43, %v649_v44 }
 0x112   : > { %5075 = vmatprep.subr.bf16.mxu0 %v14852_v63  ;;  %5198 = vmatprep.subr.bf16.mxu1 %v14854_v0  ;;  %v665_v52 = vld [vmem:[%s17537_s26 + $0x748] sm:$0xff]  ;;  %v14964_v56 = vcombine.high %v656_v49, %v664_v50  ;;  %v672_v59 = vld [vmem:[%s17537_s26 + $0x780] sm:$0xff]  ;;  %v14963_v63 = vcombine.low %v656_v49, %v664_v50 }
 0x113   : > { %v14966_v57 = vcombine.high %v657_v51, %v665_v52  ;;  %v680_v60 = vld [vmem:[%s17537_s26 + $0x7c0] sm:$0xff]  ;;  %v673_v61 = vld [vmem:[%s17537_s26 + $0x788] sm:$0xff]  ;;  %v14965_v0 = vcombine.low %v657_v51, %v665_v52 }
 0x114   : > { %v681_v62 = vld [vmem:[%s17537_s26 + $0x7c8] sm:$0xff]  ;;  %v14980_v1 = vcombine.high %v672_v59, %v680_v60  ;;  %v688_v3 = vld [vmem:[%s17537_s26 + $0x800] sm:$0xff] }
 0x115   : > { %5076 = vmatpush1.bf16.msra.mxu0 %v14851_v5  ;;  %5199 = vmatpush1.bf16.msra.mxu1 %v14853_v6  ;;  %v14982_v2 = vcombine.high %v673_v61, %v681_v62  ;;  %v696_v4 = vld [vmem:[%s17537_s26 + $0x840] sm:$0xff]  ;;  %v689_v5 = vld [vmem:[%s17537_s26 + $0x808] sm:$0xff] }
 0x116   : > { %5077 = vmatprep.subr.bf16.mxu0 %v14868_v7  ;;  %5200 = vmatprep.subr.bf16.mxu1 %v14870_v8  ;;  %v697_v6 = vld [vmem:[%s17537_s26 + $0x848] sm:$0xff]  ;;  %v14979_v7 = vcombine.low %v672_v59, %v680_v60  ;;  %v14981_v8 = vcombine.low %v673_v61, %v681_v62  ;;  %v14996_v9 = vcombine.high %v688_v3, %v696_v4  ;;  %v704_v11 = vld [vmem:[%s17537_s26 + $0x880] sm:$0xff] }
 0x117   : > { %v14998_v10 = vcombine.high %v689_v5, %v697_v6  ;;  %v712_v12 = vld [vmem:[%s17537_s26 + $0x8c0] sm:$0xff]  ;;  %v14995_v17 = vcombine.low %v688_v3, %v696_v4  ;;  %v14997_v18 = vcombine.low %v689_v5, %v697_v6 }
 0x118   : > { %v15012_v19 = vcombine.high %v704_v11, %v712_v12  ;;  %v15011_v25 = vcombine.low %v704_v11, %v712_v12 }
 0x119   : > { %5078 = vmatpush1.bf16.msra.mxu0 %v14867_v13  ;;  %5201 = vmatpush1.bf16.msra.mxu1 %v14869_v14  ;;  %v17641_v13 = vcombine.low %v17589_v54, %v17589_v54  ;;  %v705_v14 = vld [vmem:[%s17537_s26 + $0x888] sm:$0xff] }
 0x11a   : > { %5079 = vmatprep.subr.bf16.mxu0 %v14884_v15  ;;  %5202 = vmatprep.subr.bf16.mxu1 %v14886_v16  ;;  %v713_v15 = vld [vmem:[%s17537_s26 + $0x8c8] sm:$0xff]  ;;  %v17645_v16 = vld [vmem:[#allocation3 + $0x8] sm:$0xff] }
 0x11b   : > { %v15014_v20 = vcombine.high %v705_v14, %v713_v15  ;;  %v17651_v54 = vcombine.high %v17645_v16, %v17645_v16  ;;  %v15013_v26 = vcombine.low %v705_v14, %v713_v15 }
 0x11d   : > { %5080 = vmatpush1.bf16.msra.mxu0 %v14883_v21  ;;  %5203 = vmatpush1.bf16.msra.mxu1 %v14885_v22  ;;  %v720_v21 = vld [vmem:[%s17537_s26 + $0x900] sm:$0xff] }
 0x11e   : > { %5081 = vmatprep.subr.bf16.mxu0 %v14900_v23  ;;  %5204 = vmatprep.subr.bf16.mxu1 %v14902_v24  ;;  %v728_v22 = vld [vmem:[%s17537_s26 + $0x940] sm:$0xff]  ;;  %v721_v23 = vld [vmem:[%s17537_s26 + $0x908] sm:$0xff] }
 0x11f   : > { %v729_v24 = vld [vmem:[%s17537_s26 + $0x948] sm:$0xff]  ;;  %v15028_v27 = vcombine.high %v720_v21, %v728_v22  ;;  %v15027_v33 = vcombine.low %v720_v21, %v728_v22 }
 0x120   : > { %v15030_v28 = vcombine.high %v721_v23, %v729_v24  ;;  %v15029_v34 = vcombine.low %v721_v23, %v729_v24 }
 0x121   : > { %5082 = vmatpush1.bf16.msra.mxu0 %v14899_v29  ;;  %5205 = vmatpush1.bf16.msra.mxu1 %v14901_v30  ;;  %v736_v29 = vld [vmem:[%s17537_s26 + $0x980] sm:$0xff] }
 0x122   : > { %5083 = vmatprep.subr.bf16.mxu0 %v14916_v31  ;;  %5206 = vmatprep.subr.bf16.mxu1 %v14918_v32  ;;  %v744_v30 = vld [vmem:[%s17537_s26 + $0x9c0] sm:$0xff]  ;;  %v737_v31 = vld [vmem:[%s17537_s26 + $0x988] sm:$0xff] }
 0x123   : > { %v745_v32 = vld [vmem:[%s17537_s26 + $0x9c8] sm:$0xff]  ;;  %v15044_v35 = vcombine.high %v736_v29, %v744_v30  ;;  %v15043_v41 = vcombine.low %v736_v29, %v744_v30 }
 0x124   : > { %v15046_v36 = vcombine.high %v737_v31, %v745_v32  ;;  %v15045_v42 = vcombine.low %v737_v31, %v745_v32 }
 0x125   : > { %5084 = vmatpush1.bf16.msra.mxu0 %v14915_v37  ;;  %5207 = vmatpush1.bf16.msra.mxu1 %v14917_v38  ;;  %v752_v37 = vld [vmem:[%s17537_s26 + $0xa00] sm:$0xff] }
 0x126   : > { %5085 = vmatprep.subr.bf16.mxu0 %v14932_v39  ;;  %5208 = vmatprep.subr.bf16.mxu1 %v14934_v40  ;;  %v760_v38 = vld [vmem:[%s17537_s26 + $0xa40] sm:$0xff]  ;;  %v753_v39 = vld [vmem:[%s17537_s26 + $0xa08] sm:$0xff] }
 0x127   : > { %v761_v40 = vld [vmem:[%s17537_s26 + $0xa48] sm:$0xff]  ;;  %v15060_v43 = vcombine.high %v752_v37, %v760_v38  ;;  %v15059_v49 = vcombine.low %v752_v37, %v760_v38 }
 0x128   : > { %v15062_v44 = vcombine.high %v753_v39, %v761_v40  ;;  %v15061_v50 = vcombine.low %v753_v39, %v761_v40 }
 0x129   : > { %5086 = vmatpush1.bf16.msra.mxu0 %v14931_v45  ;;  %5209 = vmatpush1.bf16.msra.mxu1 %v14933_v46  ;;  %v768_v45 = vld [vmem:[%s17537_s26 + $0xa80] sm:$0xff] }
 0x12a   : > { %5087 = vmatprep.subr.bf16.mxu0 %v14948_v47  ;;  %5210 = vmatprep.subr.bf16.mxu1 %v14950_v48  ;;  %v776_v46 = vld [vmem:[%s17537_s26 + $0xac0] sm:$0xff]  ;;  %v769_v47 = vld [vmem:[%s17537_s26 + $0xa88] sm:$0xff] }
 0x12b   : > { %v777_v48 = vld [vmem:[%s17537_s26 + $0xac8] sm:$0xff]  ;;  %v15076_v51 = vcombine.high %v768_v45, %v776_v46  ;;  %v15075_v59 = vcombine.low %v768_v45, %v776_v46 }
 0x12c   : > { %v15078_v52 = vcombine.high %v769_v47, %v777_v48  ;;  %v15077_v60 = vcombine.low %v769_v47, %v777_v48 }
 0x12d   : > { %5088 = vmatpush1.bf16.msra.mxu0 %v14947_v53  ;;  %5211 = vmatpush1.bf16.msra.mxu1 %v14949_v55  ;;  %v784_v53 = vld [vmem:[%s17537_s26 + $0xb00] sm:$0xff] }
 0x12e   : > { %5089 = vmatprep.subr.bf16.mxu0 %v14964_v56  ;;  %5212 = vmatprep.subr.bf16.mxu1 %v14966_v57  ;;  %v792_v55 = vld [vmem:[%s17537_s26 + $0xb40] sm:$0xff]  ;;  %v785_v56 = vld [vmem:[%s17537_s26 + $0xb08] sm:$0xff] }
 0x12f   : > { %v793_v57 = vld [vmem:[%s17537_s26 + $0xb48] sm:$0xff]  ;;  %v15092_v61 = vcombine.high %v784_v53, %v792_v55  ;;  %v15091_v3 = vcombine.low %v784_v53, %v792_v55 }
 0x130   : > { %v15094_v62 = vcombine.high %v785_v56, %v793_v57  ;;  %v15093_v4 = vcombine.low %v785_v56, %v793_v57 }
 0x131   : > { %5090 = vmatpush1.bf16.msra.mxu0 %v14963_v63  ;;  %5213 = vmatpush1.bf16.msra.mxu1 %v14965_v0  ;;  %v800_v63 = vld [vmem:[%s17537_s26 + $0xb80] sm:$0xff] }
 0x132   : > { %5091 = vmatprep.subr.bf16.mxu0 %v14980_v1  ;;  %5214 = vmatprep.subr.bf16.mxu1 %v14982_v2  ;;  %v808_v0 = vld [vmem:[%s17537_s26 + $0xbc0] sm:$0xff]  ;;  %v801_v1 = vld [vmem:[%s17537_s26 + $0xb88] sm:$0xff] }
 0x133   : > { %v809_v2 = vld [vmem:[%s17537_s26 + $0xbc8] sm:$0xff]  ;;  %v15108_v5 = vcombine.high %v800_v63, %v808_v0  ;;  %v15107_v11 = vcombine.low %v800_v63, %v808_v0 }
 0x134   : > { %v15110_v6 = vcombine.high %v801_v1, %v809_v2  ;;  %v15109_v12 = vcombine.low %v801_v1, %v809_v2 }
 0x135   : > { %5092 = vmatpush1.bf16.msra.mxu0 %v14979_v7  ;;  %5215 = vmatpush1.bf16.msra.mxu1 %v14981_v8  ;;  %v816_v7 = vld [vmem:[%s17537_s26 + $0xc00] sm:$0xff] }
 0x136   : > { %5102 = vmatprep.subr.bf16.mxu0 %v14996_v9  ;;  %5225 = vmatprep.subr.bf16.mxu1 %v14998_v10  ;;  %v824_v8 = vld [vmem:[%s17537_s26 + $0xc40] sm:$0xff]  ;;  %v817_v9 = vld [vmem:[%s17537_s26 + $0xc08] sm:$0xff] }
 0x137   : > { %v825_v10 = vld [vmem:[%s17537_s26 + $0xc48] sm:$0xff]  ;;  %v15124_v14 = vcombine.high %v816_v7, %v824_v8  ;;  %v15123_v21 = vcombine.low %v816_v7, %v824_v8 }
 0x138   : > { %5094 = vmatmul.mubr.bf16.vlgmr.msra.gmra.mrb[0].mxu0 %v17641_v13  ;;  %5217 = vmatmul.mubr.bf16.vlgmr.msra.gmra.mrb[0].mxu1 %v17641_v13  ;;  %v15126_v15 = vcombine.high %v817_v9, %v825_v10  ;;  %v15125_v22 = vcombine.low %v817_v9, %v825_v10 }
 0x139   : > { %5103 = vmatpush1.bf16.msra.mxu0 %v14995_v17  ;;  %5226 = vmatpush1.bf16.msra.mxu1 %v14997_v18  ;;  %v832_v17 = vld [vmem:[%s17537_s26 + $0xc80] sm:$0xff] }
 0x13a   : > { %5104 = vmatprep.subr.bf16.mxu0 %v15012_v19  ;;  %5227 = vmatprep.subr.bf16.mxu1 %v15014_v20  ;;  %v840_v18 = vld [vmem:[%s17537_s26 + $0xcc0] sm:$0xff]  ;;  %v833_v19 = vld [vmem:[%s17537_s26 + $0xc88] sm:$0xff] }
 0x13b   : > { %5134 = vmatprep.mubr.bf16.mxu0 %v17651_v54  ;;  %5257 = vmatprep.mubr.bf16.mxu1 %v17651_v54  ;;  %v841_v20 = vld [vmem:[%s17537_s26 + $0xcc8] sm:$0xff]  ;;  %v15140_v23 = vcombine.high %v832_v17, %v840_v18  ;;  %v15139_v29 = vcombine.low %v832_v17, %v840_v18 }
 0x13c   : > { %v15142_v24 = vcombine.high %v833_v19, %v841_v20  ;;  %v15141_v30 = vcombine.low %v833_v19, %v841_v20 }
 0x13d   : > { %5105 = vmatpush1.bf16.msra.mxu0 %v15011_v25  ;;  %5228 = vmatpush1.bf16.msra.mxu1 %v15013_v26  ;;  %v848_v25 = vld [vmem:[%s17537_s26 + $0xd00] sm:$0xff] }
 0x13e   : > { %5106 = vmatprep.subr.bf16.mxu0 %v15028_v27  ;;  %5229 = vmatprep.subr.bf16.mxu1 %v15030_v28  ;;  %v856_v26 = vld [vmem:[%s17537_s26 + $0xd40] sm:$0xff]  ;;  %v849_v27 = vld [vmem:[%s17537_s26 + $0xd08] sm:$0xff] }
 0x13f   : > { %v857_v28 = vld [vmem:[%s17537_s26 + $0xd48] sm:$0xff]  ;;  %v15156_v31 = vcombine.high %v848_v25, %v856_v26  ;;  %v15155_v37 = vcombine.low %v848_v25, %v856_v26  ;;  %v17723_v26 = vld [vmem:[#allocation3 + $0x10] sm:$0xff] }
 0x140   : > { %v15158_v32 = vcombine.high %v849_v27, %v857_v28  ;;  %v15157_v38 = vcombine.low %v849_v27, %v857_v28  ;;  %v969_v25 = vld [vmem:[%s17537_s26 + $0x10c8] sm:$0xff] }
 0x141   : > { %5107 = vmatpush1.bf16.msra.mxu0 %v15027_v33  ;;  %5230 = vmatpush1.bf16.msra.mxu1 %v15029_v34  ;;  %v864_v33 = vld [vmem:[%s17537_s26 + $0xd80] sm:$0xff] }
 0x142   : > { %5108 = vmatprep.subr.bf16.mxu0 %v15044_v35  ;;  %5231 = vmatprep.subr.bf16.mxu1 %v15046_v36  ;;  %v872_v34 = vld [vmem:[%s17537_s26 + $0xdc0] sm:$0xff]  ;;  %v865_v35 = vld [vmem:[%s17537_s26 + $0xd88] sm:$0xff] }
 0x143   : > { %v873_v36 = vld [vmem:[%s17537_s26 + $0xdc8] sm:$0xff]  ;;  %v15172_v39 = vcombine.high %v864_v33, %v872_v34  ;;  %v15171_v45 = vcombine.low %v864_v33, %v872_v34 }
 0x144   : > { %v15174_v40 = vcombine.high %v865_v35, %v873_v36  ;;  %v15173_v46 = vcombine.low %v865_v35, %v873_v36  ;;  %v977_v33 = vld [vmem:[%s17537_s26 + $0x1108] sm:$0xff] }
 0x145   : > { %5109 = vmatpush1.bf16.msra.mxu0 %v15043_v41  ;;  %5232 = vmatpush1.bf16.msra.mxu1 %v15045_v42  ;;  %v880_v41 = vld [vmem:[%s17537_s26 + $0xe00] sm:$0xff]  ;;  %v985_v34 = vld [vmem:[%s17537_s26 + $0x1148] sm:$0xff] }
 0x146   : > { %5110 = vmatprep.subr.bf16.mxu0 %v15060_v43  ;;  %5233 = vmatprep.subr.bf16.mxu1 %v15062_v44  ;;  %v888_v42 = vld [vmem:[%s17537_s26 + $0xe40] sm:$0xff]  ;;  %v881_v43 = vld [vmem:[%s17537_s26 + $0xe08] sm:$0xff] }
 0x147   : > { %v889_v44 = vld [vmem:[%s17537_s26 + $0xe48] sm:$0xff]  ;;  %v15188_v47 = vcombine.high %v880_v41, %v888_v42  ;;  %v15187_v53 = vcombine.low %v880_v41, %v888_v42 }
 0x148   : > { %v15190_v48 = vcombine.high %v881_v43, %v889_v44  ;;  %v15189_v55 = vcombine.low %v881_v43, %v889_v44  ;;  %v993_v41 = vld [vmem:[%s17537_s26 + $0x1188] sm:$0xff]  ;;  %v15285_v44 = vcombine.low %v977_v33, %v985_v34 }
 0x149   : > { %5111 = vmatpush1.bf16.msra.mxu0 %v15059_v49  ;;  %5234 = vmatpush1.bf16.msra.mxu1 %v15061_v50  ;;  %v896_v49 = vld [vmem:[%s17537_s26 + $0xe80] sm:$0xff]  ;;  %v1001_v42 = vld [vmem:[%s17537_s26 + $0x11c8] sm:$0xff] }
 0x14a   : > { %5112 = vmatprep.subr.bf16.mxu0 %v15076_v51  ;;  %5235 = vmatprep.subr.bf16.mxu1 %v15078_v52  ;;  %v904_v50 = vld [vmem:[%s17537_s26 + $0xec0] sm:$0xff]  ;;  %v897_v51 = vld [vmem:[%s17537_s26 + $0xe88] sm:$0xff] }
 0x14b   : > { %v905_v52 = vld [vmem:[%s17537_s26 + $0xec8] sm:$0xff]  ;;  %v15204_v56 = vcombine.high %v896_v49, %v904_v50  ;;  %v15203_v63 = vcombine.low %v896_v49, %v904_v50 }
 0x14c   : > { %v15206_v57 = vcombine.high %v897_v51, %v905_v52  ;;  %v15205_v0 = vcombine.low %v897_v51, %v905_v52  ;;  %v1009_v49 = vld [vmem:[%s17537_s26 + $0x1208] sm:$0xff]  ;;  %v15301_v52 = vcombine.low %v993_v41, %v1001_v42 }
 0x14d   : > { %5113 = vmatpush1.bf16.msra.mxu0 %v15075_v59  ;;  %5236 = vmatpush1.bf16.msra.mxu1 %v15077_v60  ;;  %v912_v59 = vld [vmem:[%s17537_s26 + $0xf00] sm:$0xff]  ;;  %v1017_v50 = vld [vmem:[%s17537_s26 + $0x1248] sm:$0xff] }
 0x14e   : > { %5114 = vmatprep.subr.bf16.mxu0 %v15092_v61  ;;  %5237 = vmatprep.subr.bf16.mxu1 %v15094_v62  ;;  %v920_v60 = vld [vmem:[%s17537_s26 + $0xf40] sm:$0xff]  ;;  %v913_v61 = vld [vmem:[%s17537_s26 + $0xf08] sm:$0xff] }
 0x14f   : > { %v921_v62 = vld [vmem:[%s17537_s26 + $0xf48] sm:$0xff]  ;;  %v15220_v1 = vcombine.high %v912_v59, %v920_v60  ;;  %v15219_v7 = vcombine.low %v912_v59, %v920_v60 }
 0x150   : > { %v15222_v2 = vcombine.high %v913_v61, %v921_v62  ;;  %v15221_v8 = vcombine.low %v913_v61, %v921_v62  ;;  %v1025_v59 = vld [vmem:[%s17537_s26 + $0x1288] sm:$0xff]  ;;  %v15317_v62 = vcombine.low %v1009_v49, %v1017_v50 }
 0x151   : > { %5115 = vmatpush1.bf16.msra.mxu0 %v15091_v3  ;;  %5238 = vmatpush1.bf16.msra.mxu1 %v15093_v4  ;;  %v928_v3 = vld [vmem:[%s17537_s26 + $0xf80] sm:$0xff]  ;;  %v1033_v60 = vld [vmem:[%s17537_s26 + $0x12c8] sm:$0xff] }
 0x152   : > { %5116 = vmatprep.subr.bf16.mxu0 %v15108_v5  ;;  %5239 = vmatprep.subr.bf16.mxu1 %v15110_v6  ;;  %v936_v4 = vld [vmem:[%s17537_s26 + $0xfc0] sm:$0xff]  ;;  %v929_v5 = vld [vmem:[%s17537_s26 + $0xf88] sm:$0xff] }
 0x153   : > { %v937_v6 = vld [vmem:[%s17537_s26 + $0xfc8] sm:$0xff]  ;;  %v15236_v9 = vcombine.high %v928_v3, %v936_v4  ;;  %v15235_v17 = vcombine.low %v928_v3, %v936_v4 }
 0x154   : > { %v15238_v10 = vcombine.high %v929_v5, %v937_v6  ;;  %v15237_v18 = vcombine.low %v929_v5, %v937_v6  ;;  %v1041_v3 = vld [vmem:[%s17537_s26 + $0x1308] sm:$0xff]  ;;  %v15333_v6 = vcombine.low %v1025_v59, %v1033_v60 }
 0x155   : > { %5117 = vmatpush1.bf16.msra.mxu0 %v15107_v11  ;;  %5240 = vmatpush1.bf16.msra.mxu1 %v15109_v12  ;;  %v944_v11 = vld [vmem:[%s17537_s26 + $0x1000] sm:$0xff]  ;;  %v1049_v4 = vld [vmem:[%s17537_s26 + $0x1348] sm:$0xff] }
 0x156   : > { %5118 = vmatprep.subr.bf16.mxu0 %v15124_v14  ;;  %5241 = vmatprep.subr.bf16.mxu1 %v15126_v15  ;;  %v952_v12 = vld [vmem:[%s17537_s26 + $0x1040] sm:$0xff]  ;;  %v945_v14 = vld [vmem:[%s17537_s26 + $0x1008] sm:$0xff] }
 0x157   : > { %v953_v15 = vld [vmem:[%s17537_s26 + $0x1048] sm:$0xff]  ;;  %v15252_v19 = vcombine.high %v944_v11, %v952_v12  ;;  %v15251_v27 = vcombine.low %v944_v11, %v952_v12 }
 0x158   : > { %v15254_v20 = vcombine.high %v945_v14, %v953_v15  ;;  %v15253_v28 = vcombine.low %v945_v14, %v953_v15  ;;  %v1057_v11 = vld [vmem:[%s17537_s26 + $0x1388] sm:$0xff]  ;;  %v15349_v15 = vcombine.low %v1041_v3, %v1049_v4 }
 0x159   : > { %5119 = vmatpush1.bf16.msra.mxu0 %v15123_v21  ;;  %5242 = vmatpush1.bf16.msra.mxu1 %v15125_v22  ;;  %v960_v21 = vld [vmem:[%s17537_s26 + $0x1080] sm:$0xff]  ;;  %v1065_v12 = vld [vmem:[%s17537_s26 + $0x13c8] sm:$0xff] }
 0x15a   : > { %5120 = vmatprep.subr.bf16.mxu0 %v15140_v23  ;;  %5243 = vmatprep.subr.bf16.mxu1 %v15142_v24  ;;  %v968_v22 = vld [vmem:[%s17537_s26 + $0x10c0] sm:$0xff]  ;;  %v17719_v23 = vcombine.low %v17645_v16, %v17645_v16  ;;  %v961_v24 = vld [vmem:[%s17537_s26 + $0x1088] sm:$0xff]  ;;  %v17729_v16 = vcombine.high %v17723_v26, %v17723_v26 }
 0x15b   : > { %v15267_v35 = vcombine.low %v960_v21, %v968_v22  ;;  %v15269_v36 = vcombine.low %v961_v24, %v969_v25 }
 0x15d   : > { %5121 = vmatpush1.bf16.msra.mxu0 %v15139_v29  ;;  %5244 = vmatpush1.bf16.msra.mxu1 %v15141_v30  ;;  %v15268_v29 = vcombine.high %v960_v21, %v968_v22  ;;  %v15270_v30 = vcombine.high %v961_v24, %v969_v25  ;;  %v1073_v21 = vld [vmem:[%s17537_s26 + $0x1408] sm:$0xff]  ;;  %v15365_v25 = vcombine.low %v1057_v11, %v1065_v12 }
 0x15e   : > { %5122 = vmatprep.subr.bf16.mxu0 %v15156_v31  ;;  %5245 = vmatprep.subr.bf16.mxu1 %v15158_v32  ;;  %v976_v31 = vld [vmem:[%s17537_s26 + $0x1100] sm:$0xff]  ;;  %v1081_v22 = vld [vmem:[%s17537_s26 + $0x1448] sm:$0xff] }
 0x15f   : > { %v984_v32 = vld [vmem:[%s17537_s26 + $0x1140] sm:$0xff] }
 0x160   : > { %v15283_v43 = vcombine.low %v976_v31, %v984_v32 }
 0x161   : > { %5123 = vmatpush1.bf16.msra.mxu0 %v15155_v37  ;;  %5246 = vmatpush1.bf16.msra.mxu1 %v15157_v38  ;;  %v15284_v37 = vcombine.high %v976_v31, %v984_v32  ;;  %v15286_v38 = vcombine.high %v977_v33, %v985_v34  ;;  %v1089_v31 = vld [vmem:[%s17537_s26 + $0x1488] sm:$0xff]  ;;  %v15381_v34 = vcombine.low %v1073_v21, %v1081_v22 }
 0x162   : > { %5124 = vmatprep.subr.bf16.mxu0 %v15172_v39  ;;  %5247 = vmatprep.subr.bf16.mxu1 %v15174_v40  ;;  %v992_v39 = vld [vmem:[%s17537_s26 + $0x1180] sm:$0xff]  ;;  %v1097_v32 = vld [vmem:[%s17537_s26 + $0x14c8] sm:$0xff] }
 0x163   : > { %v1000_v40 = vld [vmem:[%s17537_s26 + $0x11c0] sm:$0xff] }
 0x164   : > { %v15299_v51 = vcombine.low %v992_v39, %v1000_v40 }
 0x165   : > { %5125 = vmatpush1.bf16.msra.mxu0 %v15171_v45  ;;  %5248 = vmatpush1.bf16.msra.mxu1 %v15173_v46  ;;  %v15300_v45 = vcombine.high %v992_v39, %v1000_v40  ;;  %v15302_v46 = vcombine.high %v993_v41, %v1001_v42  ;;  %v1105_v39 = vld [vmem:[%s17537_s26 + $0x1508] sm:$0xff]  ;;  %v15397_v42 = vcombine.low %v1089_v31, %v1097_v32 }
 0x166   : > { %5126 = vmatprep.subr.bf16.mxu0 %v15188_v47  ;;  %5249 = vmatprep.subr.bf16.mxu1 %v15190_v48  ;;  %v1008_v47 = vld [vmem:[%s17537_s26 + $0x1200] sm:$0xff]  ;;  %v1113_v40 = vld [vmem:[%s17537_s26 + $0x1548] sm:$0xff] }
 0x167   : > { %v1016_v48 = vld [vmem:[%s17537_s26 + $0x1240] sm:$0xff] }
 0x168   : > { %v15315_v61 = vcombine.low %v1008_v47, %v1016_v48 }
 0x169   : > { %5127 = vmatpush1.bf16.msra.mxu0 %v15187_v53  ;;  %5250 = vmatpush1.bf16.msra.mxu1 %v15189_v55  ;;  %v15316_v53 = vcombine.high %v1008_v47, %v1016_v48  ;;  %v15318_v55 = vcombine.high %v1009_v49, %v1017_v50  ;;  %v1121_v47 = vld [vmem:[%s17537_s26 + $0x1588] sm:$0xff]  ;;  %v15413_v50 = vcombine.low %v1105_v39, %v1113_v40 }
 0x16a   : > { %5128 = vmatprep.subr.bf16.mxu0 %v15204_v56  ;;  %5251 = vmatprep.subr.bf16.mxu1 %v15206_v57  ;;  %v1024_v56 = vld [vmem:[%s17537_s26 + $0x1280] sm:$0xff]  ;;  %v1129_v48 = vld [vmem:[%s17537_s26 + $0x15c8] sm:$0xff] }
 0x16b   : > { %v1032_v57 = vld [vmem:[%s17537_s26 + $0x12c0] sm:$0xff] }
 0x16c   : > { %v15331_v5 = vcombine.low %v1024_v56, %v1032_v57 }
 0x16d   : > { %5129 = vmatpush1.bf16.msra.mxu0 %v15203_v63  ;;  %5252 = vmatpush1.bf16.msra.mxu1 %v15205_v0  ;;  %v15332_v63 = vcombine.high %v1024_v56, %v1032_v57  ;;  %v15334_v0 = vcombine.high %v1025_v59, %v1033_v60  ;;  %v1137_v56 = vld [vmem:[%s17537_s26 + $0x1608] sm:$0xff]  ;;  %v15429_v60 = vcombine.low %v1121_v47, %v1129_v48 }
 0x16e   : > { %5130 = vmatprep.subr.bf16.mxu0 %v15220_v1  ;;  %5253 = vmatprep.subr.bf16.mxu1 %v15222_v2  ;;  %v1040_v1 = vld [vmem:[%s17537_s26 + $0x1300] sm:$0xff]  ;;  %v1145_v57 = vld [vmem:[%s17537_s26 + $0x1648] sm:$0xff] }
 0x16f   : > { %v1048_v2 = vld [vmem:[%s17537_s26 + $0x1340] sm:$0xff] }
 0x170   : > { %v15347_v14 = vcombine.low %v1040_v1, %v1048_v2 }
 0x171   : > { %5131 = vmatpush1.bf16.msra.mxu0 %v15219_v7  ;;  %5254 = vmatpush1.bf16.msra.mxu1 %v15221_v8  ;;  %v15348_v7 = vcombine.high %v1040_v1, %v1048_v2  ;;  %v15350_v8 = vcombine.high %v1041_v3, %v1049_v4  ;;  %v1153_v1 = vld [vmem:[%s17537_s26 + $0x1688] sm:$0xff]  ;;  %v15445_v4 = vcombine.low %v1137_v56, %v1145_v57 }
 0x172   : > { %5132 = vmatprep.subr.bf16.mxu0 %v15236_v9  ;;  %5255 = vmatprep.subr.bf16.mxu1 %v15238_v10  ;;  %v1056_v9 = vld [vmem:[%s17537_s26 + $0x1380] sm:$0xff]  ;;  %v1161_v2 = vld [vmem:[%s17537_s26 + $0x16c8] sm:$0xff] }
 0x173   : > { %v1064_v10 = vld [vmem:[%s17537_s26 + $0x13c0] sm:$0xff] }
 0x174   : > { %v15363_v24 = vcombine.low %v1056_v9, %v1064_v10 }
 0x175   : > { %5133 = vmatpush1.bf16.msra.mxu0 %v15235_v17  ;;  %5256 = vmatpush1.bf16.msra.mxu1 %v15237_v18  ;;  %v15364_v17 = vcombine.high %v1056_v9, %v1064_v10  ;;  %v15366_v18 = vcombine.high %v1057_v11, %v1065_v12  ;;  %v1169_v9 = vld [vmem:[%s17537_s26 + $0x1708] sm:$0xff]  ;;  %v15461_v12 = vcombine.low %v1153_v1, %v1161_v2 }
 0x176   : > { %5143 = vmatprep.subr.bf16.mxu0 %v15252_v19  ;;  %5266 = vmatprep.subr.bf16.mxu1 %v15254_v20  ;;  %v1072_v19 = vld [vmem:[%s17537_s26 + $0x1400] sm:$0xff]  ;;  %v1177_v10 = vld [vmem:[%s17537_s26 + $0x1748] sm:$0xff] }
 0x177   : > { %v1080_v20 = vld [vmem:[%s17537_s26 + $0x1440] sm:$0xff] }
 0x178   : > { %5135 = vmatmul.mubr.bf16.vlgmr.msra.gmra.mrb[0].mxu0 %v17719_v23  ;;  %5258 = vmatmul.mubr.bf16.vlgmr.msra.gmra.mrb[0].mxu1 %v17719_v23  ;;  %v15379_v33 = vcombine.low %v1072_v19, %v1080_v20 }
 0x179   : > { %5144 = vmatpush1.bf16.msra.mxu0 %v15251_v27  ;;  %5267 = vmatpush1.bf16.msra.mxu1 %v15253_v28  ;;  %v15380_v27 = vcombine.high %v1072_v19, %v1080_v20  ;;  %v15382_v28 = vcombine.high %v1073_v21, %v1081_v22  ;;  %v1185_v19 = vld [vmem:[%s17537_s26 + $0x1788] sm:$0xff]  ;;  %v15477_v22 = vcombine.low %v1169_v9, %v1177_v10 }
 0x17a   : > { %5145 = vmatprep.subr.bf16.mxu0 %v15268_v29  ;;  %5268 = vmatprep.subr.bf16.mxu1 %v15270_v30  ;;  %v1088_v29 = vld [vmem:[%s17537_s26 + $0x1480] sm:$0xff]  ;;  %v1193_v20 = vld [vmem:[%s17537_s26 + $0x17c8] sm:$0xff] }
 0x17b   : > { %5175 = vmatprep.mubr.bf16.mxu0 %v17729_v16  ;;  %5298 = vmatprep.mubr.bf16.mxu1 %v17729_v16  ;;  %v1096_v30 = vld [vmem:[%s17537_s26 + $0x14c0] sm:$0xff] }
 0x17c   : > { %v15395_v41 = vcombine.low %v1088_v29, %v1096_v30 }
 0x17d   : > { %5146 = vmatpush1.bf16.msra.mxu0 %v15267_v35  ;;  %5269 = vmatpush1.bf16.msra.mxu1 %v15269_v36  ;;  %v15396_v35 = vcombine.high %v1088_v29, %v1096_v30  ;;  %v15398_v36 = vcombine.high %v1089_v31, %v1097_v32  ;;  %v435_v29 = vld [vmem:[%s17537_s26 + $0x18] sm:$0xff]  ;;  %v15493_v32 = vcombine.low %v1185_v19, %v1193_v20 }
 0x17e   : > { %5147 = vmatprep.subr.bf16.mxu0 %v15284_v37  ;;  %5270 = vmatprep.subr.bf16.mxu1 %v15286_v38  ;;  %v1104_v37 = vld [vmem:[%s17537_s26 + $0x1500] sm:$0xff]  ;;  %v443_v30 = vld [vmem:[%s17537_s26 + $0x58] sm:$0xff] }
 0x17f   : > { %v1112_v38 = vld [vmem:[%s17537_s26 + $0x1540] sm:$0xff] }
 0x180   : > { %v15411_v49 = vcombine.low %v1104_v37, %v1112_v38 }
 0x181   : > { %5148 = vmatpush1.bf16.msra.mxu0 %v15283_v43  ;;  %5271 = vmatpush1.bf16.msra.mxu1 %v15285_v44  ;;  %v15412_v43 = vcombine.high %v1104_v37, %v1112_v38  ;;  %v15414_v44 = vcombine.high %v1105_v39, %v1113_v40  ;;  %v17797_v37 = vcombine.low %v17723_v26, %v17723_v26  ;;  %v451_v38 = vld [vmem:[%s17537_s26 + $0x98] sm:$0xff] }
 0x182   : > { %5149 = vmatprep.subr.bf16.mxu0 %v15300_v45  ;;  %5272 = vmatprep.subr.bf16.mxu1 %v15302_v46  ;;  %v1120_v45 = vld [vmem:[%s17537_s26 + $0x1580] sm:$0xff]  ;;  %v459_v39 = vld [vmem:[%s17537_s26 + $0xd8] sm:$0xff] }
 0x183   : > { %v1128_v46 = vld [vmem:[%s17537_s26 + $0x15c0] sm:$0xff]  ;;  %v467_v26 = vld [vmem:[%s17537_s26 + $0x118] sm:$0xff] }
 0x184   : > { %v15427_v59 = vcombine.low %v1120_v45, %v1128_v46 }
 0x185   : > { %5150 = vmatpush1.bf16.msra.mxu0 %v15299_v51  ;;  %5273 = vmatpush1.bf16.msra.mxu1 %v15301_v52  ;;  %v15428_v51 = vcombine.high %v1120_v45, %v1128_v46  ;;  %v15430_v52 = vcombine.high %v1121_v47, %v1129_v48  ;;  %v474_v45 = vld [vmem:[%s17537_s26 + $0x150] sm:$0xff]  ;;  %v475_v46 = vld [vmem:[%s17537_s26 + $0x158] sm:$0xff]  ;;  %v14761_v48 = vcombine.low %v451_v38, %v459_v39 }
 0x186   : > { %5151 = vmatprep.subr.bf16.mxu0 %v15316_v53  ;;  %5274 = vmatprep.subr.bf16.mxu1 %v15318_v55  ;;  %v1136_v53 = vld [vmem:[%s17537_s26 + $0x1600] sm:$0xff] }
 0x187   : > { %v1144_v55 = vld [vmem:[%s17537_s26 + $0x1640] sm:$0xff] }
 0x188   : > { %v15443_v3 = vcombine.low %v1136_v53, %v1144_v55 }
 0x189   : > { %5152 = vmatpush1.bf16.msra.mxu0 %v15315_v61  ;;  %5275 = vmatpush1.bf16.msra.mxu1 %v15317_v62  ;;  %v15444_v61 = vcombine.high %v1136_v53, %v1144_v55  ;;  %v15446_v62 = vcombine.high %v1137_v56, %v1145_v57  ;;  %v483_v53 = vld [vmem:[%s17537_s26 + $0x198] sm:$0xff]  ;;  %v14777_v57 = vcombine.low %v467_v26, %v475_v46 }
 0x18a   : > { %5153 = vmatprep.subr.bf16.mxu0 %v15332_v63  ;;  %5276 = vmatprep.subr.bf16.mxu1 %v15334_v0  ;;  %v1152_v63 = vld [vmem:[%s17537_s26 + $0x1680] sm:$0xff]  ;;  %v491_v55 = vld [vmem:[%s17537_s26 + $0x1d8] sm:$0xff] }
 0x18b   : > { %v1160_v0 = vld [vmem:[%s17537_s26 + $0x16c0] sm:$0xff] }
 0x18c   : > { %v15459_v11 = vcombine.low %v1152_v63, %v1160_v0 }
 0x18d   : > { %5154 = vmatpush1.bf16.msra.mxu0 %v15331_v5  ;;  %5277 = vmatpush1.bf16.msra.mxu1 %v15333_v6  ;;  %v15460_v5 = vcombine.high %v1152_v63, %v1160_v0  ;;  %v15462_v6 = vcombine.high %v1153_v1, %v1161_v2  ;;  %v499_v63 = vld [vmem:[%s17537_s26 + $0x218] sm:$0xff]  ;;  %v14793_v2 = vcombine.low %v483_v53, %v491_v55 }
 0x18e   : > { %5155 = vmatprep.subr.bf16.mxu0 %v15348_v7  ;;  %5278 = vmatprep.subr.bf16.mxu1 %v15350_v8  ;;  %v1168_v7 = vld [vmem:[%s17537_s26 + $0x1700] sm:$0xff]  ;;  %v507_v0 = vld [vmem:[%s17537_s26 + $0x258] sm:$0xff] }
 0x18f   : > { %v1176_v8 = vld [vmem:[%s17537_s26 + $0x1740] sm:$0xff] }
 0x190   : > { %v15475_v21 = vcombine.low %v1168_v7, %v1176_v8 }
 0x191   : > { %5156 = vmatpush1.bf16.msra.mxu0 %v15347_v14  ;;  %5279 = vmatpush1.bf16.msra.mxu1 %v15349_v15  ;;  %v15476_v14 = vcombine.high %v1168_v7, %v1176_v8  ;;  %v15478_v15 = vcombine.high %v1169_v9, %v1177_v10  ;;  %v515_v7 = vld [vmem:[%s17537_s26 + $0x298] sm:$0xff]  ;;  %v14809_v10 = vcombine.low %v499_v63, %v507_v0 }
 0x192   : > { %5157 = vmatprep.subr.bf16.mxu0 %v15364_v17  ;;  %5280 = vmatprep.subr.bf16.mxu1 %v15366_v18  ;;  %v1184_v17 = vld [vmem:[%s17537_s26 + $0x1780] sm:$0xff]  ;;  %v523_v8 = vld [vmem:[%s17537_s26 + $0x2d8] sm:$0xff] }
 0x193   : > { %v1192_v18 = vld [vmem:[%s17537_s26 + $0x17c0] sm:$0xff] }
 0x194   : > { %v15491_v31 = vcombine.low %v1184_v17, %v1192_v18 }
 0x195   : > { %5158 = vmatpush1.bf16.msra.mxu0 %v15363_v24  ;;  %5281 = vmatpush1.bf16.msra.mxu1 %v15365_v25  ;;  %v15492_v24 = vcombine.high %v1184_v17, %v1192_v18  ;;  %v15494_v25 = vcombine.high %v1185_v19, %v1193_v20  ;;  %v531_v17 = vld [vmem:[%s17537_s26 + $0x318] sm:$0xff]  ;;  %v14825_v20 = vcombine.low %v515_v7, %v523_v8 }
 0x196   : > { %5159 = vmatprep.subr.bf16.mxu0 %v15380_v27  ;;  %5282 = vmatprep.subr.bf16.mxu1 %v15382_v28  ;;  %v434_v27 = vld [vmem:[%s17537_s26 + $0x10] sm:$0xff]  ;;  %v539_v18 = vld [vmem:[%s17537_s26 + $0x358] sm:$0xff] }
 0x197   : > { %v442_v28 = vld [vmem:[%s17537_s26 + $0x50] sm:$0xff] }
 0x198   : > { %v14743_v40 = vcombine.low %v434_v27, %v442_v28 }
 0x199   : > { %5160 = vmatpush1.bf16.msra.mxu0 %v15379_v33  ;;  %5283 = vmatpush1.bf16.msra.mxu1 %v15381_v34  ;;  %v14744_v33 = vcombine.high %v434_v27, %v442_v28  ;;  %v14746_v34 = vcombine.high %v435_v29, %v443_v30  ;;  %v547_v27 = vld [vmem:[%s17537_s26 + $0x398] sm:$0xff] }
 0x19a   : > { %5161 = vmatprep.subr.bf16.mxu0 %v15396_v35  ;;  %5284 = vmatprep.subr.bf16.mxu1 %v15398_v36  ;;  %v450_v35 = vld [vmem:[%s17537_s26 + $0x90] sm:$0xff]  ;;  %v555_v28 = vld [vmem:[%s17537_s26 + $0x3d8] sm:$0xff] }
 0x19b   : > { %v458_v36 = vld [vmem:[%s17537_s26 + $0xd0] sm:$0xff] }
 0x19c   : > { %v14759_v47 = vcombine.low %v450_v35, %v458_v36 }
 0x19d   : > { %5162 = vmatpush1.bf16.msra.mxu0 %v15395_v41  ;;  %5285 = vmatpush1.bf16.msra.mxu1 %v15397_v42  ;;  %v14745_v41 = vcombine.low %v435_v29, %v443_v30  ;;  %v14760_v42 = vcombine.high %v450_v35, %v458_v36  ;;  %v14841_v30 = vcombine.low %v531_v17, %v539_v18  ;;  %v563_v35 = vld [vmem:[%s17537_s26 + $0x418] sm:$0xff] }
 0x19e   : > { %5163 = vmatprep.subr.bf16.mxu0 %v15412_v43  ;;  %5286 = vmatprep.subr.bf16.mxu1 %v15414_v44  ;;  %v14762_v43 = vcombine.high %v451_v38, %v459_v39  ;;  %v466_v44 = vld [vmem:[%s17537_s26 + $0x110] sm:$0xff]  ;;  %v571_v36 = vld [vmem:[%s17537_s26 + $0x458] sm:$0xff]  ;;  %v14857_v39 = vcombine.low %v547_v27, %v555_v28 }
 0x19f   : > { %v14775_v56 = vcombine.low %v466_v44, %v474_v45 }
 0x1a1   : > { %5164 = vmatpush1.bf16.msra.mxu0 %v15411_v49  ;;  %5287 = vmatpush1.bf16.msra.mxu1 %v15413_v50  ;;  %v14776_v49 = vcombine.high %v466_v44, %v474_v45  ;;  %v14778_v50 = vcombine.high %v467_v26, %v475_v46  ;;  %v579_v44 = vld [vmem:[%s17537_s26 + $0x498] sm:$0xff]  ;;  %v14873_v46 = vcombine.low %v563_v35, %v571_v36 }
 0x1a2   : > { %5165 = vmatprep.subr.bf16.mxu0 %v15428_v51  ;;  %5288 = vmatprep.subr.bf16.mxu1 %v15430_v52  ;;  %v482_v51 = vld [vmem:[%s17537_s26 + $0x190] sm:$0xff]  ;;  %v587_v45 = vld [vmem:[%s17537_s26 + $0x4d8] sm:$0xff] }
 0x1a3   : > { %v490_v52 = vld [vmem:[%s17537_s26 + $0x1d0] sm:$0xff] }
 0x1a4   : > { %v14791_v1 = vcombine.low %v482_v51, %v490_v52 }
 0x1a5   : > { %5166 = vmatpush1.bf16.msra.mxu0 %v15427_v59  ;;  %5289 = vmatpush1.bf16.msra.mxu1 %v15429_v60  ;;  %v14792_v59 = vcombine.high %v482_v51, %v490_v52  ;;  %v14794_v60 = vcombine.high %v483_v53, %v491_v55  ;;  %v595_v51 = vld [vmem:[%s17537_s26 + $0x518] sm:$0xff]  ;;  %v14889_v55 = vcombine.low %v579_v44, %v587_v45 }
 0x1a6   : > { %5167 = vmatprep.subr.bf16.mxu0 %v15444_v61  ;;  %5290 = vmatprep.subr.bf16.mxu1 %v15446_v62  ;;  %v498_v61 = vld [vmem:[%s17537_s26 + $0x210] sm:$0xff]  ;;  %v603_v52 = vld [vmem:[%s17537_s26 + $0x558] sm:$0xff] }
 0x1a7   : > { %v506_v62 = vld [vmem:[%s17537_s26 + $0x250] sm:$0xff] }
 0x1a8   : > { %v14807_v9 = vcombine.low %v498_v61, %v506_v62 }
 0x1a9   : > { %5168 = vmatpush1.bf16.msra.mxu0 %v15443_v3  ;;  %5291 = vmatpush1.bf16.msra.mxu1 %v15445_v4  ;;  %v14808_v3 = vcombine.high %v498_v61, %v506_v62  ;;  %v14810_v4 = vcombine.high %v499_v63, %v507_v0  ;;  %v611_v61 = vld [vmem:[%s17537_s26 + $0x598] sm:$0xff]  ;;  %v14905_v0 = vcombine.low %v595_v51, %v603_v52 }
 0x1aa   : > { %5169 = vmatprep.subr.bf16.mxu0 %v15460_v5  ;;  %5292 = vmatprep.subr.bf16.mxu1 %v15462_v6  ;;  %v514_v5 = vld [vmem:[%s17537_s26 + $0x290] sm:$0xff]  ;;  %v619_v62 = vld [vmem:[%s17537_s26 + $0x5d8] sm:$0xff] }
 0x1ab   : > { %v522_v6 = vld [vmem:[%s17537_s26 + $0x2d0] sm:$0xff] }
 0x1ac   : > { %v14823_v19 = vcombine.low %v514_v5, %v522_v6 }
 0x1ad   : > { %5170 = vmatpush1.bf16.msra.mxu0 %v15459_v11  ;;  %5293 = vmatpush1.bf16.msra.mxu1 %v15461_v12  ;;  %v14824_v11 = vcombine.high %v514_v5, %v522_v6  ;;  %v14826_v12 = vcombine.high %v515_v7, %v523_v8  ;;  %v627_v5 = vld [vmem:[%s17537_s26 + $0x618] sm:$0xff]  ;;  %v14921_v8 = vcombine.low %v611_v61, %v619_v62 }
 0x1ae   : > { %5171 = vmatprep.subr.bf16.mxu0 %v15476_v14  ;;  %5294 = vmatprep.subr.bf16.mxu1 %v15478_v15  ;;  %v530_v14 = vld [vmem:[%s17537_s26 + $0x310] sm:$0xff]  ;;  %v635_v6 = vld [vmem:[%s17537_s26 + $0x658] sm:$0xff] }
 0x1af   : > { %v538_v15 = vld [vmem:[%s17537_s26 + $0x350] sm:$0xff] }
 0x1b0   : > { %v14839_v29 = vcombine.low %v530_v14, %v538_v15 }
 0x1b1   : > { %5172 = vmatpush1.bf16.msra.mxu0 %v15475_v21  ;;  %5295 = vmatpush1.bf16.msra.mxu1 %v15477_v22  ;;  %v14840_v21 = vcombine.high %v530_v14, %v538_v15  ;;  %v14842_v22 = vcombine.high %v531_v17, %v539_v18  ;;  %v643_v14 = vld [vmem:[%s17537_s26 + $0x698] sm:$0xff]  ;;  %v14937_v18 = vcombine.low %v627_v5, %v635_v6 }
 0x1b2   : > { %5173 = vmatprep.subr.bf16.mxu0 %v15492_v24  ;;  %5296 = vmatprep.subr.bf16.mxu1 %v15494_v25  ;;  %v546_v24 = vld [vmem:[%s17537_s26 + $0x390] sm:$0xff]  ;;  %v651_v15 = vld [vmem:[%s17537_s26 + $0x6d8] sm:$0xff] }
 0x1b3   : > { %v554_v25 = vld [vmem:[%s17537_s26 + $0x3d0] sm:$0xff] }
 0x1b4   : > { %v14855_v38 = vcombine.low %v546_v24, %v554_v25 }
 0x1b5   : > { %5174 = vmatpush1.bf16.msra.mxu0 %v15491_v31  ;;  %5297 = vmatpush1.bf16.msra.mxu1 %v15493_v32  ;;  %v14856_v31 = vcombine.high %v546_v24, %v554_v25  ;;  %v14858_v32 = vcombine.high %v547_v27, %v555_v28  ;;  %v659_v24 = vld [vmem:[%s17537_s26 + $0x718] sm:$0xff]  ;;  %v14953_v28 = vcombine.low %v643_v14, %v651_v15 }
 0x1b6   : > { %5307 = vmatprep.subr.bf16.mxu0 %v14744_v33  ;;  %5430 = vmatprep.subr.bf16.mxu1 %v14746_v34  ;;  %v562_v33 = vld [vmem:[%s17537_s26 + $0x410] sm:$0xff]  ;;  %v667_v25 = vld [vmem:[%s17537_s26 + $0x758] sm:$0xff] }
 0x1b7   : > { %v570_v34 = vld [vmem:[%s17537_s26 + $0x450] sm:$0xff] }
 0x1b8   : > { %5176 = vmatmul.mubr.bf16.vlgmr.msra.gmra.mrb[0].mxu0 %v17797_v37  ;;  %5299 = vmatmul.mubr.bf16.vlgmr.msra.gmra.mrb[0].mxu1 %v17797_v37  ;;  %v14871_v26 = vcombine.low %v562_v33, %v570_v34 }
 0x1b9   : > { %5308 = vmatpush1.bf16.msra.mxu0 %v14743_v40  ;;  %5431 = vmatpush1.bf16.msra.mxu1 %v14745_v41  ;;  %v14872_v40 = vcombine.high %v562_v33, %v570_v34  ;;  %v14874_v41 = vcombine.high %v563_v35, %v571_v36  ;;  %v675_v33 = vld [vmem:[%s17537_s26 + $0x798] sm:$0xff]  ;;  %v14969_v36 = vcombine.low %v659_v24, %v667_v25 }
 0x1ba   : > { %5309 = vmatprep.subr.bf16.mxu0 %v14760_v42  ;;  %5432 = vmatprep.subr.bf16.mxu1 %v14762_v43  ;;  %v578_v42 = vld [vmem:[%s17537_s26 + $0x490] sm:$0xff]  ;;  %v683_v34 = vld [vmem:[%s17537_s26 + $0x7d8] sm:$0xff] }
 0x1bb   : > { %5339 = vmatprep.mubr.bf16.mxu0 %v17595_v58  ;;  %5462 = vmatprep.mubr.bf16.mxu1 %v17595_v58  ;;  %v586_v43 = vld [vmem:[%s17537_s26 + $0x4d0] sm:$0xff] }
 0x1bc   : > { %v14887_v53 = vcombine.low %v578_v42, %v586_v43 }
 0x1bd   : > { %5310 = vmatpush1.bf16.msra.mxu0 %v14759_v47  ;;  %5433 = vmatpush1.bf16.msra.mxu1 %v14761_v48  ;;  %v14888_v47 = vcombine.high %v578_v42, %v586_v43  ;;  %v14890_v48 = vcombine.high %v579_v44, %v587_v45  ;;  %v691_v42 = vld [vmem:[%s17537_s26 + $0x818] sm:$0xff]  ;;  %v14985_v45 = vcombine.low %v675_v33, %v683_v34 }
 0x1be   : > { %5311 = vmatprep.subr.bf16.mxu0 %v14776_v49  ;;  %5434 = vmatprep.subr.bf16.mxu1 %v14778_v50  ;;  %v594_v49 = vld [vmem:[%s17537_s26 + $0x510] sm:$0xff]  ;;  %v699_v43 = vld [vmem:[%s17537_s26 + $0x858] sm:$0xff] }
 0x1bf   : > { %v602_v50 = vld [vmem:[%s17537_s26 + $0x550] sm:$0xff] }
 0x1c0   : > { %v14903_v63 = vcombine.low %v594_v49, %v602_v50 }
 0x1c1   : > { %5312 = vmatpush1.bf16.msra.mxu0 %v14775_v56  ;;  %5435 = vmatpush1.bf16.msra.mxu1 %v14777_v57  ;;  %v14904_v56 = vcombine.high %v594_v49, %v602_v50  ;;  %v14906_v57 = vcombine.high %v595_v51, %v603_v52  ;;  %v707_v49 = vld [vmem:[%s17537_s26 + $0x898] sm:$0xff]  ;;  %v15001_v52 = vcombine.low %v691_v42, %v699_v43 }
 0x1c2   : > { %5313 = vmatprep.subr.bf16.mxu0 %v14792_v59  ;;  %5436 = vmatprep.subr.bf16.mxu1 %v14794_v60  ;;  %v610_v59 = vld [vmem:[%s17537_s26 + $0x590] sm:$0xff]  ;;  %v715_v50 = vld [vmem:[%s17537_s26 + $0x8d8] sm:$0xff] }
 0x1c3   : > { %v618_v60 = vld [vmem:[%s17537_s26 + $0x5d0] sm:$0xff] }
 0x1c4   : > { %v14919_v7 = vcombine.low %v610_v59, %v618_v60 }
 0x1c5   : > { %5314 = vmatpush1.bf16.msra.mxu0 %v14791_v1  ;;  %5437 = vmatpush1.bf16.msra.mxu1 %v14793_v2  ;;  %v14920_v1 = vcombine.high %v610_v59, %v618_v60  ;;  %v14922_v2 = vcombine.high %v611_v61, %v619_v62  ;;  %v723_v59 = vld [vmem:[%s17537_s26 + $0x918] sm:$0xff]  ;;  %v15017_v62 = vcombine.low %v707_v49, %v715_v50 }
 0x1c6   : > { %5315 = vmatprep.subr.bf16.mxu0 %v14808_v3  ;;  %5438 = vmatprep.subr.bf16.mxu1 %v14810_v4  ;;  %v626_v3 = vld [vmem:[%s17537_s26 + $0x610] sm:$0xff]  ;;  %v731_v60 = vld [vmem:[%s17537_s26 + $0x958] sm:$0xff] }
 0x1c7   : > { %v634_v4 = vld [vmem:[%s17537_s26 + $0x650] sm:$0xff] }
 0x1c8   : > { %v14935_v17 = vcombine.low %v626_v3, %v634_v4 }
 0x1c9   : > { %5316 = vmatpush1.bf16.msra.mxu0 %v14807_v9  ;;  %5439 = vmatpush1.bf16.msra.mxu1 %v14809_v10  ;;  %v14936_v9 = vcombine.high %v626_v3, %v634_v4  ;;  %v14938_v10 = vcombine.high %v627_v5, %v635_v6  ;;  %v739_v3 = vld [vmem:[%s17537_s26 + $0x998] sm:$0xff]  ;;  %v15033_v6 = vcombine.low %v723_v59, %v731_v60 }
 0x1ca   : > { %5317 = vmatprep.subr.bf16.mxu0 %v14824_v11  ;;  %5440 = vmatprep.subr.bf16.mxu1 %v14826_v12  ;;  %v642_v11 = vld [vmem:[%s17537_s26 + $0x690] sm:$0xff]  ;;  %v747_v4 = vld [vmem:[%s17537_s26 + $0x9d8] sm:$0xff] }
 0x1cb   : > { %v650_v12 = vld [vmem:[%s17537_s26 + $0x6d0] sm:$0xff] }
 0x1cc   : > { %v14951_v27 = vcombine.low %v642_v11, %v650_v12 }
 0x1cd   : > { %5318 = vmatpush1.bf16.msra.mxu0 %v14823_v19  ;;  %5441 = vmatpush1.bf16.msra.mxu1 %v14825_v20  ;;  %v14952_v19 = vcombine.high %v642_v11, %v650_v12  ;;  %v14954_v20 = vcombine.high %v643_v14, %v651_v15  ;;  %v755_v11 = vld [vmem:[%s17537_s26 + $0xa18] sm:$0xff]  ;;  %v15049_v15 = vcombine.low %v739_v3, %v747_v4 }
 0x1ce   : > { %5319 = vmatprep.subr.bf16.mxu0 %v14840_v21  ;;  %5442 = vmatprep.subr.bf16.mxu1 %v14842_v22  ;;  %v658_v21 = vld [vmem:[%s17537_s26 + $0x710] sm:$0xff]  ;;  %v763_v12 = vld [vmem:[%s17537_s26 + $0xa58] sm:$0xff] }
 0x1cf   : > { %v666_v22 = vld [vmem:[%s17537_s26 + $0x750] sm:$0xff] }
 0x1d0   : > { %v14967_v35 = vcombine.low %v658_v21, %v666_v22 }
 0x1d1   : > { %5320 = vmatpush1.bf16.msra.mxu0 %v14839_v29  ;;  %5443 = vmatpush1.bf16.msra.mxu1 %v14841_v30  ;;  %v14968_v29 = vcombine.high %v658_v21, %v666_v22  ;;  %v14970_v30 = vcombine.high %v659_v24, %v667_v25  ;;  %v771_v21 = vld [vmem:[%s17537_s26 + $0xa98] sm:$0xff]  ;;  %v15065_v25 = vcombine.low %v755_v11, %v763_v12 }
 0x1d2   : > { %5321 = vmatprep.subr.bf16.mxu0 %v14856_v31  ;;  %5444 = vmatprep.subr.bf16.mxu1 %v14858_v32  ;;  %v674_v31 = vld [vmem:[%s17537_s26 + $0x790] sm:$0xff]  ;;  %v779_v22 = vld [vmem:[%s17537_s26 + $0xad8] sm:$0xff] }
 0x1d3   : > { %v682_v32 = vld [vmem:[%s17537_s26 + $0x7d0] sm:$0xff] }
 0x1d4   : > { %v14983_v44 = vcombine.low %v674_v31, %v682_v32 }
 0x1d5   : > { %5322 = vmatpush1.bf16.msra.mxu0 %v14855_v38  ;;  %5445 = vmatpush1.bf16.msra.mxu1 %v14857_v39  ;;  %v14984_v38 = vcombine.high %v674_v31, %v682_v32  ;;  %v14986_v39 = vcombine.high %v675_v33, %v683_v34  ;;  %v787_v31 = vld [vmem:[%s17537_s26 + $0xb18] sm:$0xff]  ;;  %v15081_v34 = vcombine.low %v771_v21, %v779_v22 }
 0x1d6   : > { %5323 = vmatprep.subr.bf16.mxu0 %v14872_v40  ;;  %5446 = vmatprep.subr.bf16.mxu1 %v14874_v41  ;;  %v690_v40 = vld [vmem:[%s17537_s26 + $0x810] sm:$0xff]  ;;  %v795_v32 = vld [vmem:[%s17537_s26 + $0xb58] sm:$0xff] }
 0x1d7   : > { %v698_v41 = vld [vmem:[%s17537_s26 + $0x850] sm:$0xff] }
 0x1d8   : > { %v14999_v51 = vcombine.low %v690_v40, %v698_v41 }
 0x1d9   : > { %5324 = vmatpush1.bf16.msra.mxu0 %v14871_v26  ;;  %5447 = vmatpush1.bf16.msra.mxu1 %v14873_v46  ;;  %v15000_v26 = vcombine.high %v690_v40, %v698_v41  ;;  %v15002_v46 = vcombine.high %v691_v42, %v699_v43  ;;  %v803_v40 = vld [vmem:[%s17537_s26 + $0xb98] sm:$0xff]  ;;  %v15097_v43 = vcombine.low %v787_v31, %v795_v32 }
 0x1da   : > { %5325 = vmatprep.subr.bf16.mxu0 %v14888_v47  ;;  %5448 = vmatprep.subr.bf16.mxu1 %v14890_v48  ;;  %v706_v47 = vld [vmem:[%s17537_s26 + $0x890] sm:$0xff]  ;;  %v811_v41 = vld [vmem:[%s17537_s26 + $0xbd8] sm:$0xff] }
 0x1db   : > { %v714_v48 = vld [vmem:[%s17537_s26 + $0x8d0] sm:$0xff] }
 0x1dc   : > { %v15015_v61 = vcombine.low %v706_v47, %v714_v48 }
 0x1dd   : > { %5326 = vmatpush1.bf16.msra.mxu0 %v14887_v53  ;;  %5449 = vmatpush1.bf16.msra.mxu1 %v14889_v55  ;;  %v15016_v53 = vcombine.high %v706_v47, %v714_v48  ;;  %v15018_v55 = vcombine.high %v707_v49, %v715_v50  ;;  %v819_v47 = vld [vmem:[%s17537_s26 + $0xc18] sm:$0xff]  ;;  %v15113_v50 = vcombine.low %v803_v40, %v811_v41 }
 0x1de   : > { %5327 = vmatprep.subr.bf16.mxu0 %v14904_v56  ;;  %5450 = vmatprep.subr.bf16.mxu1 %v14906_v57  ;;  %v722_v56 = vld [vmem:[%s17537_s26 + $0x910] sm:$0xff]  ;;  %v827_v48 = vld [vmem:[%s17537_s26 + $0xc58] sm:$0xff] }
 0x1df   : > { %v730_v57 = vld [vmem:[%s17537_s26 + $0x950] sm:$0xff] }
 0x1e0   : > { %v15031_v5 = vcombine.low %v722_v56, %v730_v57 }
 0x1e1   : > { %5328 = vmatpush1.bf16.msra.mxu0 %v14903_v63  ;;  %5451 = vmatpush1.bf16.msra.mxu1 %v14905_v0  ;;  %v15032_v63 = vcombine.high %v722_v56, %v730_v57  ;;  %v15034_v0 = vcombine.high %v723_v59, %v731_v60  ;;  %v835_v56 = vld [vmem:[%s17537_s26 + $0xc98] sm:$0xff]  ;;  %v15129_v60 = vcombine.low %v819_v47, %v827_v48 }
 0x1e2   : > { %5329 = vmatprep.subr.bf16.mxu0 %v14920_v1  ;;  %5452 = vmatprep.subr.bf16.mxu1 %v14922_v2  ;;  %v738_v1 = vld [vmem:[%s17537_s26 + $0x990] sm:$0xff]  ;;  %v843_v57 = vld [vmem:[%s17537_s26 + $0xcd8] sm:$0xff] }
 0x1e3   : > { %v746_v2 = vld [vmem:[%s17537_s26 + $0x9d0] sm:$0xff] }
 0x1e4   : > { %v15047_v14 = vcombine.low %v738_v1, %v746_v2 }
 0x1e5   : > { %5330 = vmatpush1.bf16.msra.mxu0 %v14919_v7  ;;  %5453 = vmatpush1.bf16.msra.mxu1 %v14921_v8  ;;  %v15048_v7 = vcombine.high %v738_v1, %v746_v2  ;;  %v15050_v8 = vcombine.high %v739_v3, %v747_v4  ;;  %v851_v1 = vld [vmem:[%s17537_s26 + $0xd18] sm:$0xff]  ;;  %v15145_v4 = vcombine.low %v835_v56, %v843_v57 }
 0x1e6   : > { %5331 = vmatprep.subr.bf16.mxu0 %v14936_v9  ;;  %5454 = vmatprep.subr.bf16.mxu1 %v14938_v10  ;;  %v754_v9 = vld [vmem:[%s17537_s26 + $0xa10] sm:$0xff]  ;;  %v859_v2 = vld [vmem:[%s17537_s26 + $0xd58] sm:$0xff] }
 0x1e7   : > { %v762_v10 = vld [vmem:[%s17537_s26 + $0xa50] sm:$0xff] }
 0x1e8   : > { %v15063_v24 = vcombine.low %v754_v9, %v762_v10 }
 0x1e9   : > { %5332 = vmatpush1.bf16.msra.mxu0 %v14935_v17  ;;  %5455 = vmatpush1.bf16.msra.mxu1 %v14937_v18  ;;  %v15064_v17 = vcombine.high %v754_v9, %v762_v10  ;;  %v15066_v18 = vcombine.high %v755_v11, %v763_v12  ;;  %v867_v9 = vld [vmem:[%s17537_s26 + $0xd98] sm:$0xff]  ;;  %v15161_v12 = vcombine.low %v851_v1, %v859_v2 }
 0x1ea   : > { %5333 = vmatprep.subr.bf16.mxu0 %v14952_v19  ;;  %5456 = vmatprep.subr.bf16.mxu1 %v14954_v20  ;;  %v770_v19 = vld [vmem:[%s17537_s26 + $0xa90] sm:$0xff]  ;;  %v875_v10 = vld [vmem:[%s17537_s26 + $0xdd8] sm:$0xff] }
 0x1eb   : > { %v778_v20 = vld [vmem:[%s17537_s26 + $0xad0] sm:$0xff] }
 0x1ec   : > { %v15079_v33 = vcombine.low %v770_v19, %v778_v20 }
 0x1ed   : > { %5334 = vmatpush1.bf16.msra.mxu0 %v14951_v27  ;;  %5457 = vmatpush1.bf16.msra.mxu1 %v14953_v28  ;;  %v15080_v27 = vcombine.high %v770_v19, %v778_v20  ;;  %v15082_v28 = vcombine.high %v771_v21, %v779_v22  ;;  %v883_v19 = vld [vmem:[%s17537_s26 + $0xe18] sm:$0xff]  ;;  %v15177_v22 = vcombine.low %v867_v9, %v875_v10 }
 0x1ee   : > { %5335 = vmatprep.subr.bf16.mxu0 %v14968_v29  ;;  %5458 = vmatprep.subr.bf16.mxu1 %v14970_v30  ;;  %v786_v29 = vld [vmem:[%s17537_s26 + $0xb10] sm:$0xff]  ;;  %v891_v20 = vld [vmem:[%s17537_s26 + $0xe58] sm:$0xff] }
 0x1ef   : > { %v794_v30 = vld [vmem:[%s17537_s26 + $0xb50] sm:$0xff] }
 0x1f0   : > { %v15095_v42 = vcombine.low %v786_v29, %v794_v30 }
 0x1f1   : > { %5336 = vmatpush1.bf16.msra.mxu0 %v14967_v35  ;;  %5459 = vmatpush1.bf16.msra.mxu1 %v14969_v36  ;;  %v15096_v35 = vcombine.high %v786_v29, %v794_v30  ;;  %v15098_v36 = vcombine.high %v787_v31, %v795_v32  ;;  %v899_v29 = vld [vmem:[%s17537_s26 + $0xe98] sm:$0xff]  ;;  %v15193_v32 = vcombine.low %v883_v19, %v891_v20 }
 0x1f2   : > { %5337 = vmatprep.subr.bf16.mxu0 %v14984_v38  ;;  %5460 = vmatprep.subr.bf16.mxu1 %v14986_v39  ;;  %v802_v38 = vld [vmem:[%s17537_s26 + $0xb90] sm:$0xff]  ;;  %v907_v30 = vld [vmem:[%s17537_s26 + $0xed8] sm:$0xff] }
 0x1f3   : > { %v810_v39 = vld [vmem:[%s17537_s26 + $0xbd0] sm:$0xff] }
 0x1f4   : > { %v15111_v49 = vcombine.low %v802_v38, %v810_v39 }
 0x1f5   : > { %5338 = vmatpush1.bf16.msra.mxu0 %v14983_v44  ;;  %5461 = vmatpush1.bf16.msra.mxu1 %v14985_v45  ;;  %v15112_v44 = vcombine.high %v802_v38, %v810_v39  ;;  %v15114_v45 = vcombine.high %v803_v40, %v811_v41  ;;  %v915_v38 = vld [vmem:[%s17537_s26 + $0xf18] sm:$0xff]  ;;  %v15209_v41 = vcombine.low %v899_v29, %v907_v30 }
 0x1f6   : > { %5348 = vmatprep.subr.bf16.mxu0 %v15000_v26  ;;  %5471 = vmatprep.subr.bf16.mxu1 %v15002_v46  ;;  %v818_v26 = vld [vmem:[%s17537_s26 + $0xc10] sm:$0xff]  ;;  %v923_v39 = vld [vmem:[%s17537_s26 + $0xf58] sm:$0xff] }
 0x1f7   : > { %v826_v46 = vld [vmem:[%s17537_s26 + $0xc50] sm:$0xff] }
 0x1f8   : > { %5340 = vmatmul.mubr.bf16.vlgmr.msra.gmra.mrb[4].mxu0 %v17641_v13  ;;  %5463 = vmatmul.mubr.bf16.vlgmr.msra.gmra.mrb[4].mxu1 %v17641_v13  ;;  %v15127_v59 = vcombine.low %v818_v26, %v826_v46 }
 0x1f9   : > { %5349 = vmatpush1.bf16.msra.mxu0 %v14999_v51  ;;  %5472 = vmatpush1.bf16.msra.mxu1 %v15001_v52  ;;  %v15128_v51 = vcombine.high %v818_v26, %v826_v46  ;;  %v15130_v52 = vcombine.high %v819_v47, %v827_v48  ;;  %v931_v26 = vld [vmem:[%s17537_s26 + $0xf98] sm:$0xff]  ;;  %v15225_v48 = vcombine.low %v915_v38, %v923_v39 }
 0x1fa   : > { %5350 = vmatprep.subr.bf16.mxu0 %v15016_v53  ;;  %5473 = vmatprep.subr.bf16.mxu1 %v15018_v55  ;;  %v834_v53 = vld [vmem:[%s17537_s26 + $0xc90] sm:$0xff]  ;;  %v939_v46 = vld [vmem:[%s17537_s26 + $0xfd8] sm:$0xff] }
 0x1fb   : > { %5380 = vmatprep.mubr.bf16.mxu0 %v17651_v54  ;;  %5503 = vmatprep.mubr.bf16.mxu1 %v17651_v54  ;;  %v842_v55 = vld [vmem:[%s17537_s26 + $0xcd0] sm:$0xff] }
 0x1fc   : > { %v15143_v3 = vcombine.low %v834_v53, %v842_v55 }
 0x1fd   : > { %5351 = vmatpush1.bf16.msra.mxu0 %v15015_v61  ;;  %5474 = vmatpush1.bf16.msra.mxu1 %v15017_v62  ;;  %v15144_v61 = vcombine.high %v834_v53, %v842_v55  ;;  %v15146_v62 = vcombine.high %v835_v56, %v843_v57  ;;  %v947_v53 = vld [vmem:[%s17537_s26 + $0x1018] sm:$0xff]  ;;  %v15241_v57 = vcombine.low %v931_v26, %v939_v46 }
 0x1fe   : > { %5352 = vmatprep.subr.bf16.mxu0 %v15032_v63  ;;  %5475 = vmatprep.subr.bf16.mxu1 %v15034_v0  ;;  %v850_v63 = vld [vmem:[%s17537_s26 + $0xd10] sm:$0xff]  ;;  %v955_v55 = vld [vmem:[%s17537_s26 + $0x1058] sm:$0xff] }
 0x1ff   : > { %v858_v0 = vld [vmem:[%s17537_s26 + $0xd50] sm:$0xff] }
 0x200   : > { %v15159_v11 = vcombine.low %v850_v63, %v858_v0 }
 0x201   : > { %5353 = vmatpush1.bf16.msra.mxu0 %v15031_v5  ;;  %5476 = vmatpush1.bf16.msra.mxu1 %v15033_v6  ;;  %v15160_v5 = vcombine.high %v850_v63, %v858_v0  ;;  %v15162_v6 = vcombine.high %v851_v1, %v859_v2  ;;  %v963_v63 = vld [vmem:[%s17537_s26 + $0x1098] sm:$0xff]  ;;  %v15257_v2 = vcombine.low %v947_v53, %v955_v55 }
 0x202   : > { %5354 = vmatprep.subr.bf16.mxu0 %v15048_v7  ;;  %5477 = vmatprep.subr.bf16.mxu1 %v15050_v8  ;;  %v866_v7 = vld [vmem:[%s17537_s26 + $0xd90] sm:$0xff]  ;;  %v971_v0 = vld [vmem:[%s17537_s26 + $0x10d8] sm:$0xff] }
 0x203   : > { %v874_v8 = vld [vmem:[%s17537_s26 + $0xdd0] sm:$0xff] }
 0x204   : > { %v15175_v21 = vcombine.low %v866_v7, %v874_v8 }
 0x205   : > { %5355 = vmatpush1.bf16.msra.mxu0 %v15047_v14  ;;  %5478 = vmatpush1.bf16.msra.mxu1 %v15049_v15  ;;  %v15176_v14 = vcombine.high %v866_v7, %v874_v8  ;;  %v15178_v15 = vcombine.high %v867_v9, %v875_v10  ;;  %v979_v7 = vld [vmem:[%s17537_s26 + $0x1118] sm:$0xff]  ;;  %v15273_v10 = vcombine.low %v963_v63, %v971_v0 }
 0x206   : > { %5356 = vmatprep.subr.bf16.mxu0 %v15064_v17  ;;  %5479 = vmatprep.subr.bf16.mxu1 %v15066_v18  ;;  %v882_v17 = vld [vmem:[%s17537_s26 + $0xe10] sm:$0xff]  ;;  %v987_v8 = vld [vmem:[%s17537_s26 + $0x1158] sm:$0xff] }
 0x207   : > { %v890_v18 = vld [vmem:[%s17537_s26 + $0xe50] sm:$0xff] }
 0x208   : > { %v15191_v31 = vcombine.low %v882_v17, %v890_v18 }
 0x209   : > { %5357 = vmatpush1.bf16.msra.mxu0 %v15063_v24  ;;  %5480 = vmatpush1.bf16.msra.mxu1 %v15065_v25  ;;  %v15192_v24 = vcombine.high %v882_v17, %v890_v18  ;;  %v15194_v25 = vcombine.high %v883_v19, %v891_v20  ;;  %v995_v17 = vld [vmem:[%s17537_s26 + $0x1198] sm:$0xff]  ;;  %v15289_v20 = vcombine.low %v979_v7, %v987_v8 }
 0x20a   : > { %5358 = vmatprep.subr.bf16.mxu0 %v15080_v27  ;;  %5481 = vmatprep.subr.bf16.mxu1 %v15082_v28  ;;  %v898_v27 = vld [vmem:[%s17537_s26 + $0xe90] sm:$0xff]  ;;  %v1003_v18 = vld [vmem:[%s17537_s26 + $0x11d8] sm:$0xff] }
 0x20b   : > { %v906_v28 = vld [vmem:[%s17537_s26 + $0xed0] sm:$0xff] }
 0x20c   : > { %v15207_v40 = vcombine.low %v898_v27, %v906_v28 }
 0x20d   : > { %5359 = vmatpush1.bf16.msra.mxu0 %v15079_v33  ;;  %5482 = vmatpush1.bf16.msra.mxu1 %v15081_v34  ;;  %v15208_v33 = vcombine.high %v898_v27, %v906_v28  ;;  %v15210_v34 = vcombine.high %v899_v29, %v907_v30  ;;  %v1011_v27 = vld [vmem:[%s17537_s26 + $0x1218] sm:$0xff]  ;;  %v15305_v30 = vcombine.low %v995_v17, %v1003_v18 }
 0x20e   : > { %5360 = vmatprep.subr.bf16.mxu0 %v15096_v35  ;;  %5483 = vmatprep.subr.bf16.mxu1 %v15098_v36  ;;  %v914_v35 = vld [vmem:[%s17537_s26 + $0xf10] sm:$0xff]  ;;  %v1019_v28 = vld [vmem:[%s17537_s26 + $0x1258] sm:$0xff] }
 0x20f   : > { %v922_v36 = vld [vmem:[%s17537_s26 + $0xf50] sm:$0xff] }
 0x210   : > { %v15223_v47 = vcombine.low %v914_v35, %v922_v36 }
 0x211   : > { %5361 = vmatpush1.bf16.msra.mxu0 %v15095_v42  ;;  %5484 = vmatpush1.bf16.msra.mxu1 %v15097_v43  ;;  %v15224_v42 = vcombine.high %v914_v35, %v922_v36  ;;  %v15226_v43 = vcombine.high %v915_v38, %v923_v39  ;;  %v1027_v35 = vld [vmem:[%s17537_s26 + $0x1298] sm:$0xff]  ;;  %v15321_v39 = vcombine.low %v1011_v27, %v1019_v28 }
 0x212   : > { %5362 = vmatprep.subr.bf16.mxu0 %v15112_v44  ;;  %5485 = vmatprep.subr.bf16.mxu1 %v15114_v45  ;;  %v930_v44 = vld [vmem:[%s17537_s26 + $0xf90] sm:$0xff]  ;;  %v1035_v36 = vld [vmem:[%s17537_s26 + $0x12d8] sm:$0xff] }
 0x213   : > { %v938_v45 = vld [vmem:[%s17537_s26 + $0xfd0] sm:$0xff] }
 0x214   : > { %v15239_v56 = vcombine.low %v930_v44, %v938_v45 }
 0x215   : > { %5363 = vmatpush1.bf16.msra.mxu0 %v15111_v49  ;;  %5486 = vmatpush1.bf16.msra.mxu1 %v15113_v50  ;;  %v15240_v49 = vcombine.high %v930_v44, %v938_v45  ;;  %v15242_v50 = vcombine.high %v931_v26, %v939_v46  ;;  %v1043_v44 = vld [vmem:[%s17537_s26 + $0x1318] sm:$0xff]  ;;  %v15337_v46 = vcombine.low %v1027_v35, %v1035_v36 }
 0x216   : > { %5364 = vmatprep.subr.bf16.mxu0 %v15128_v51  ;;  %5487 = vmatprep.subr.bf16.mxu1 %v15130_v52  ;;  %v946_v51 = vld [vmem:[%s17537_s26 + $0x1010] sm:$0xff]  ;;  %v1051_v45 = vld [vmem:[%s17537_s26 + $0x1358] sm:$0xff] }
 0x217   : > { %v954_v52 = vld [vmem:[%s17537_s26 + $0x1050] sm:$0xff] }
 0x218   : > { %v15255_v1 = vcombine.low %v946_v51, %v954_v52 }
 0x219   : > { %5365 = vmatpush1.bf16.msra.mxu0 %v15127_v59  ;;  %5488 = vmatpush1.bf16.msra.mxu1 %v15129_v60  ;;  %v15256_v59 = vcombine.high %v946_v51, %v954_v52  ;;  %v15258_v60 = vcombine.high %v947_v53, %v955_v55  ;;  %v1059_v51 = vld [vmem:[%s17537_s26 + $0x1398] sm:$0xff]  ;;  %v15353_v55 = vcombine.low %v1043_v44, %v1051_v45 }
 0x21a   : > { %5366 = vmatprep.subr.bf16.mxu0 %v15144_v61  ;;  %5489 = vmatprep.subr.bf16.mxu1 %v15146_v62  ;;  %v962_v61 = vld [vmem:[%s17537_s26 + $0x1090] sm:$0xff]  ;;  %v1067_v52 = vld [vmem:[%s17537_s26 + $0x13d8] sm:$0xff] }
 0x21b   : > { %v970_v62 = vld [vmem:[%s17537_s26 + $0x10d0] sm:$0xff] }
 0x21c   : > { %v15271_v9 = vcombine.low %v962_v61, %v970_v62 }
 0x21d   : > { %5367 = vmatpush1.bf16.msra.mxu0 %v15143_v3  ;;  %5490 = vmatpush1.bf16.msra.mxu1 %v15145_v4  ;;  %v15272_v3 = vcombine.high %v962_v61, %v970_v62  ;;  %v15274_v4 = vcombine.high %v963_v63, %v971_v0  ;;  %v1075_v61 = vld [vmem:[%s17537_s26 + $0x1418] sm:$0xff]  ;;  %v15369_v0 = vcombine.low %v1059_v51, %v1067_v52 }
 0x21e   : > { %5368 = vmatprep.subr.bf16.mxu0 %v15160_v5  ;;  %5491 = vmatprep.subr.bf16.mxu1 %v15162_v6  ;;  %v978_v5 = vld [vmem:[%s17537_s26 + $0x1110] sm:$0xff]  ;;  %v1083_v62 = vld [vmem:[%s17537_s26 + $0x1458] sm:$0xff] }
 0x21f   : > { %v986_v6 = vld [vmem:[%s17537_s26 + $0x1150] sm:$0xff] }
 0x220   : > { %v15287_v19 = vcombine.low %v978_v5, %v986_v6 }
 0x221   : > { %5369 = vmatpush1.bf16.msra.mxu0 %v15159_v11  ;;  %5492 = vmatpush1.bf16.msra.mxu1 %v15161_v12  ;;  %v15288_v11 = vcombine.high %v978_v5, %v986_v6  ;;  %v15290_v12 = vcombine.high %v979_v7, %v987_v8  ;;  %v1091_v5 = vld [vmem:[%s17537_s26 + $0x1498] sm:$0xff]  ;;  %v15385_v8 = vcombine.low %v1075_v61, %v1083_v62 }
 0x222   : > { %5370 = vmatprep.subr.bf16.mxu0 %v15176_v14  ;;  %5493 = vmatprep.subr.bf16.mxu1 %v15178_v15  ;;  %v994_v14 = vld [vmem:[%s17537_s26 + $0x1190] sm:$0xff]  ;;  %v1099_v6 = vld [vmem:[%s17537_s26 + $0x14d8] sm:$0xff] }
 0x223   : > { %v1002_v15 = vld [vmem:[%s17537_s26 + $0x11d0] sm:$0xff] }
 0x224   : > { %v15303_v29 = vcombine.low %v994_v14, %v1002_v15 }
 0x225   : > { %5371 = vmatpush1.bf16.msra.mxu0 %v15175_v21  ;;  %5494 = vmatpush1.bf16.msra.mxu1 %v15177_v22  ;;  %v15304_v21 = vcombine.high %v994_v14, %v1002_v15  ;;  %v15306_v22 = vcombine.high %v995_v17, %v1003_v18  ;;  %v1107_v14 = vld [vmem:[%s17537_s26 + $0x1518] sm:$0xff]  ;;  %v15401_v18 = vcombine.low %v1091_v5, %v1099_v6 }
 0x226   : > { %5372 = vmatprep.subr.bf16.mxu0 %v15192_v24  ;;  %5495 = vmatprep.subr.bf16.mxu1 %v15194_v25  ;;  %v1010_v24 = vld [vmem:[%s17537_s26 + $0x1210] sm:$0xff]  ;;  %v1115_v15 = vld [vmem:[%s17537_s26 + $0x1558] sm:$0xff] }
 0x227   : > { %v1018_v25 = vld [vmem:[%s17537_s26 + $0x1250] sm:$0xff] }
 0x228   : > { %v15319_v38 = vcombine.low %v1010_v24, %v1018_v25 }
 0x229   : > { %5373 = vmatpush1.bf16.msra.mxu0 %v15191_v31  ;;  %5496 = vmatpush1.bf16.msra.mxu1 %v15193_v32  ;;  %v15320_v31 = vcombine.high %v1010_v24, %v1018_v25  ;;  %v15322_v32 = vcombine.high %v1011_v27, %v1019_v28  ;;  %v1123_v24 = vld [vmem:[%s17537_s26 + $0x1598] sm:$0xff]  ;;  %v15417_v28 = vcombine.low %v1107_v14, %v1115_v15 }
 0x22a   : > { %5374 = vmatprep.subr.bf16.mxu0 %v15208_v33  ;;  %5497 = vmatprep.subr.bf16.mxu1 %v15210_v34  ;;  %v1026_v33 = vld [vmem:[%s17537_s26 + $0x1290] sm:$0xff]  ;;  %v1131_v25 = vld [vmem:[%s17537_s26 + $0x15d8] sm:$0xff] }
 0x22b   : > { %v1034_v34 = vld [vmem:[%s17537_s26 + $0x12d0] sm:$0xff] }
 0x22c   : > { %v15335_v26 = vcombine.low %v1026_v33, %v1034_v34 }
 0x22d   : > { %5375 = vmatpush1.bf16.msra.mxu0 %v15207_v40  ;;  %5498 = vmatpush1.bf16.msra.mxu1 %v15209_v41  ;;  %v15336_v40 = vcombine.high %v1026_v33, %v1034_v34  ;;  %v15338_v41 = vcombine.high %v1027_v35, %v1035_v36  ;;  %v1139_v33 = vld [vmem:[%s17537_s26 + $0x1618] sm:$0xff]  ;;  %v15433_v36 = vcombine.low %v1123_v24, %v1131_v25 }
 0x22e   : > { %5376 = vmatprep.subr.bf16.mxu0 %v15224_v42  ;;  %5499 = vmatprep.subr.bf16.mxu1 %v15226_v43  ;;  %v1042_v42 = vld [vmem:[%s17537_s26 + $0x1310] sm:$0xff]  ;;  %v1147_v34 = vld [vmem:[%s17537_s26 + $0x1658] sm:$0xff] }
 0x22f   : > { %v1050_v43 = vld [vmem:[%s17537_s26 + $0x1350] sm:$0xff] }
 0x230   : > { %v15351_v53 = vcombine.low %v1042_v42, %v1050_v43 }
 0x231   : > { %5377 = vmatpush1.bf16.msra.mxu0 %v15223_v47  ;;  %5500 = vmatpush1.bf16.msra.mxu1 %v15225_v48  ;;  %v15352_v47 = vcombine.high %v1042_v42, %v1050_v43  ;;  %v15354_v48 = vcombine.high %v1043_v44, %v1051_v45  ;;  %v1155_v42 = vld [vmem:[%s17537_s26 + $0x1698] sm:$0xff]  ;;  %v15449_v45 = vcombine.low %v1139_v33, %v1147_v34 }
 0x232   : > { %5378 = vmatprep.subr.bf16.mxu0 %v15240_v49  ;;  %5501 = vmatprep.subr.bf16.mxu1 %v15242_v50  ;;  %v1058_v49 = vld [vmem:[%s17537_s26 + $0x1390] sm:$0xff]  ;;  %v1163_v43 = vld [vmem:[%s17537_s26 + $0x16d8] sm:$0xff] }
 0x233   : > { %v1066_v50 = vld [vmem:[%s17537_s26 + $0x13d0] sm:$0xff] }
 0x234   : > { %v15367_v63 = vcombine.low %v1058_v49, %v1066_v50 }
 0x235   : > { %5379 = vmatpush1.bf16.msra.mxu0 %v15239_v56  ;;  %5502 = vmatpush1.bf16.msra.mxu1 %v15241_v57  ;;  %v15368_v56 = vcombine.high %v1058_v49, %v1066_v50  ;;  %v15370_v57 = vcombine.high %v1059_v51, %v1067_v52  ;;  %v1171_v49 = vld [vmem:[%s17537_s26 + $0x1718] sm:$0xff]  ;;  %v15465_v52 = vcombine.low %v1155_v42, %v1163_v43 }
 0x236   : > { %5389 = vmatprep.subr.bf16.mxu0 %v15256_v59  ;;  %5512 = vmatprep.subr.bf16.mxu1 %v15258_v60  ;;  %v1074_v59 = vld [vmem:[%s17537_s26 + $0x1410] sm:$0xff]  ;;  %v1179_v50 = vld [vmem:[%s17537_s26 + $0x1758] sm:$0xff] }
 0x237   : > { %v1082_v60 = vld [vmem:[%s17537_s26 + $0x1450] sm:$0xff] }
 0x238   : > { %5381 = vmatmul.mubr.bf16.vlgmr.msra.gmra.mrb[4].mxu0 %v17719_v23  ;;  %5504 = vmatmul.mubr.bf16.vlgmr.msra.gmra.mrb[4].mxu1 %v17719_v23  ;;  %v15383_v7 = vcombine.low %v1074_v59, %v1082_v60 }
 0x239   : > { %5390 = vmatpush1.bf16.msra.mxu0 %v15255_v1  ;;  %5513 = vmatpush1.bf16.msra.mxu1 %v15257_v2  ;;  %v15384_v1 = vcombine.high %v1074_v59, %v1082_v60  ;;  %v15386_v2 = vcombine.high %v1075_v61, %v1083_v62  ;;  %v1187_v59 = vld [vmem:[%s17537_s26 + $0x1798] sm:$0xff]  ;;  %v15481_v62 = vcombine.low %v1171_v49, %v1179_v50 }
 0x23a   : > { %5391 = vmatprep.subr.bf16.mxu0 %v15272_v3  ;;  %5514 = vmatprep.subr.bf16.mxu1 %v15274_v4  ;;  %v1090_v3 = vld [vmem:[%s17537_s26 + $0x1490] sm:$0xff]  ;;  %v1195_v60 = vld [vmem:[%s17537_s26 + $0x17d8] sm:$0xff] }
 0x23b   : > { %5421 = vmatprep.mubr.bf16.mxu0 %v17729_v16  ;;  %5544 = vmatprep.mubr.bf16.mxu1 %v17729_v16  ;;  %v1098_v4 = vld [vmem:[%s17537_s26 + $0x14d0] sm:$0xff] }
 0x23c   : > { %v15399_v17 = vcombine.low %v1090_v3, %v1098_v4 }
 0x23d   : > { %5392 = vmatpush1.bf16.msra.mxu0 %v15271_v9  ;;  %5515 = vmatpush1.bf16.msra.mxu1 %v15273_v10  ;;  %v15400_v9 = vcombine.high %v1090_v3, %v1098_v4  ;;  %v15402_v10 = vcombine.high %v1091_v5, %v1099_v6  ;;  %v437_v3 = vld [vmem:[%s17537_s26 + $0x28] sm:$0xff]  ;;  %v15497_v6 = vcombine.low %v1187_v59, %v1195_v60 }
 0x23e   : > { %5393 = vmatprep.subr.bf16.mxu0 %v15288_v11  ;;  %5516 = vmatprep.subr.bf16.mxu1 %v15290_v12  ;;  %v1106_v11 = vld [vmem:[%s17537_s26 + $0x1510] sm:$0xff]  ;;  %v445_v4 = vld [vmem:[%s17537_s26 + $0x68] sm:$0xff] }
 0x23f   : > { %v1114_v12 = vld [vmem:[%s17537_s26 + $0x1550] sm:$0xff] }
 0x240   : > { %v15415_v27 = vcombine.low %v1106_v11, %v1114_v12 }
 0x241   : > { %5394 = vmatpush1.bf16.msra.mxu0 %v15287_v19  ;;  %5517 = vmatpush1.bf16.msra.mxu1 %v15289_v20  ;;  %v15416_v19 = vcombine.high %v1106_v11, %v1114_v12  ;;  %v15418_v20 = vcombine.high %v1107_v14, %v1115_v15  ;;  %v453_v11 = vld [vmem:[%s17537_s26 + $0xa8] sm:$0xff]  ;;  %v14749_v15 = vcombine.low %v437_v3, %v445_v4 }
 0x242   : > { %5395 = vmatprep.subr.bf16.mxu0 %v15304_v21  ;;  %5518 = vmatprep.subr.bf16.mxu1 %v15306_v22  ;;  %v1122_v21 = vld [vmem:[%s17537_s26 + $0x1590] sm:$0xff]  ;;  %v461_v12 = vld [vmem:[%s17537_s26 + $0xe8] sm:$0xff] }
 0x243   : > { %v1130_v22 = vld [vmem:[%s17537_s26 + $0x15d0] sm:$0xff] }
 0x244   : > { %v15431_v35 = vcombine.low %v1122_v21, %v1130_v22 }
 0x245   : > { %5396 = vmatpush1.bf16.msra.mxu0 %v15303_v29  ;;  %5519 = vmatpush1.bf16.msra.mxu1 %v15305_v30  ;;  %v15432_v29 = vcombine.high %v1122_v21, %v1130_v22  ;;  %v15434_v30 = vcombine.high %v1123_v24, %v1131_v25  ;;  %v469_v21 = vld [vmem:[%s17537_s26 + $0x128] sm:$0xff]  ;;  %v14765_v25 = vcombine.low %v453_v11, %v461_v12 }
 0x246   : > { %5397 = vmatprep.subr.bf16.mxu0 %v15320_v31  ;;  %5520 = vmatprep.subr.bf16.mxu1 %v15322_v32  ;;  %v1138_v31 = vld [vmem:[%s17537_s26 + $0x1610] sm:$0xff]  ;;  %v477_v22 = vld [vmem:[%s17537_s26 + $0x168] sm:$0xff] }
 0x247   : > { %v1146_v32 = vld [vmem:[%s17537_s26 + $0x1650] sm:$0xff] }
 0x248   : > { %v15447_v44 = vcombine.low %v1138_v31, %v1146_v32 }
 0x249   : > { %5398 = vmatpush1.bf16.msra.mxu0 %v15319_v38  ;;  %5521 = vmatpush1.bf16.msra.mxu1 %v15321_v39  ;;  %v15448_v38 = vcombine.high %v1138_v31, %v1146_v32  ;;  %v15450_v39 = vcombine.high %v1139_v33, %v1147_v34  ;;  %v485_v31 = vld [vmem:[%s17537_s26 + $0x1a8] sm:$0xff]  ;;  %v14781_v34 = vcombine.low %v469_v21, %v477_v22 }
 0x24a   : > { %5399 = vmatprep.subr.bf16.mxu0 %v15336_v40  ;;  %5522 = vmatprep.subr.bf16.mxu1 %v15338_v41  ;;  %v1154_v40 = vld [vmem:[%s17537_s26 + $0x1690] sm:$0xff]  ;;  %v493_v32 = vld [vmem:[%s17537_s26 + $0x1e8] sm:$0xff] }
 0x24b   : > { %v1162_v41 = vld [vmem:[%s17537_s26 + $0x16d0] sm:$0xff] }
 0x24c   : > { %v15463_v51 = vcombine.low %v1154_v40, %v1162_v41 }
 0x24d   : > { %5400 = vmatpush1.bf16.msra.mxu0 %v15335_v26  ;;  %5523 = vmatpush1.bf16.msra.mxu1 %v15337_v46  ;;  %v15464_v26 = vcombine.high %v1154_v40, %v1162_v41  ;;  %v15466_v46 = vcombine.high %v1155_v42, %v1163_v43  ;;  %v501_v40 = vld [vmem:[%s17537_s26 + $0x228] sm:$0xff]  ;;  %v14797_v43 = vcombine.low %v485_v31, %v493_v32 }
 0x24e   : > { %5401 = vmatprep.subr.bf16.mxu0 %v15352_v47  ;;  %5524 = vmatprep.subr.bf16.mxu1 %v15354_v48  ;;  %v1170_v47 = vld [vmem:[%s17537_s26 + $0x1710] sm:$0xff]  ;;  %v509_v41 = vld [vmem:[%s17537_s26 + $0x268] sm:$0xff] }
 0x24f   : > { %v1178_v48 = vld [vmem:[%s17537_s26 + $0x1750] sm:$0xff] }
 0x250   : > { %v15479_v61 = vcombine.low %v1170_v47, %v1178_v48 }
 0x251   : > { %5402 = vmatpush1.bf16.msra.mxu0 %v15351_v53  ;;  %5525 = vmatpush1.bf16.msra.mxu1 %v15353_v55  ;;  %v15480_v53 = vcombine.high %v1170_v47, %v1178_v48  ;;  %v15482_v55 = vcombine.high %v1171_v49, %v1179_v50  ;;  %v517_v47 = vld [vmem:[%s17537_s26 + $0x2a8] sm:$0xff]  ;;  %v14813_v50 = vcombine.low %v501_v40, %v509_v41 }
 0x252   : > { %5403 = vmatprep.subr.bf16.mxu0 %v15368_v56  ;;  %5526 = vmatprep.subr.bf16.mxu1 %v15370_v57  ;;  %v1186_v56 = vld [vmem:[%s17537_s26 + $0x1790] sm:$0xff]  ;;  %v525_v48 = vld [vmem:[%s17537_s26 + $0x2e8] sm:$0xff] }
 0x253   : > { %v1194_v57 = vld [vmem:[%s17537_s26 + $0x17d0] sm:$0xff] }
 0x254   : > { %v15495_v5 = vcombine.low %v1186_v56, %v1194_v57 }
 0x255   : > { %5404 = vmatpush1.bf16.msra.mxu0 %v15367_v63  ;;  %5527 = vmatpush1.bf16.msra.mxu1 %v15369_v0  ;;  %v15496_v63 = vcombine.high %v1186_v56, %v1194_v57  ;;  %v15498_v0 = vcombine.high %v1187_v59, %v1195_v60  ;;  %v533_v56 = vld [vmem:[%s17537_s26 + $0x328] sm:$0xff]  ;;  %v14829_v60 = vcombine.low %v517_v47, %v525_v48 }
 0x256   : > { %5405 = vmatprep.subr.bf16.mxu0 %v15384_v1  ;;  %5528 = vmatprep.subr.bf16.mxu1 %v15386_v2  ;;  %v436_v1 = vld [vmem:[%s17537_s26 + $0x20] sm:$0xff]  ;;  %v541_v57 = vld [vmem:[%s17537_s26 + $0x368] sm:$0xff] }
 0x257   : > { %v444_v2 = vld [vmem:[%s17537_s26 + $0x60] sm:$0xff] }
 0x258   : > { %v14747_v14 = vcombine.low %v436_v1, %v444_v2 }
 0x259   : > { %5406 = vmatpush1.bf16.msra.mxu0 %v15383_v7  ;;  %5529 = vmatpush1.bf16.msra.mxu1 %v15385_v8  ;;  %v14748_v7 = vcombine.high %v436_v1, %v444_v2  ;;  %v14750_v8 = vcombine.high %v437_v3, %v445_v4  ;;  %v556_v1 = vld [vmem:[%s17537_s26 + $0x3e0] sm:$0xff]  ;;  %v549_v4 = vld [vmem:[%s17537_s26 + $0x3a8] sm:$0xff] }
 0x25a   : > { %5407 = vmatprep.subr.bf16.mxu0 %v15400_v9  ;;  %5530 = vmatprep.subr.bf16.mxu1 %v15402_v10  ;;  %v452_v9 = vld [vmem:[%s17537_s26 + $0xa0] sm:$0xff] }
 0x25b   : > { %v460_v10 = vld [vmem:[%s17537_s26 + $0xe0] sm:$0xff] }
 0x25c   : > { %v14763_v24 = vcombine.low %v452_v9, %v460_v10 }
 0x25d   : > { %5408 = vmatpush1.bf16.msra.mxu0 %v15399_v17  ;;  %5531 = vmatpush1.bf16.msra.mxu1 %v15401_v18  ;;  %v14764_v17 = vcombine.high %v452_v9, %v460_v10  ;;  %v14766_v18 = vcombine.high %v453_v11, %v461_v12  ;;  %v14845_v11 = vcombine.low %v533_v56, %v541_v57 }
 0x25e   : > { %5409 = vmatprep.subr.bf16.mxu0 %v15416_v19  ;;  %5532 = vmatprep.subr.bf16.mxu1 %v15418_v20  ;;  %v468_v19 = vld [vmem:[%s17537_s26 + $0x120] sm:$0xff] }
 0x25f   : > { %v476_v20 = vld [vmem:[%s17537_s26 + $0x160] sm:$0xff] }
 0x260   : > { %v14779_v33 = vcombine.low %v468_v19, %v476_v20 }
 0x261   : > { %5410 = vmatpush1.bf16.msra.mxu0 %v15415_v27  ;;  %5533 = vmatpush1.bf16.msra.mxu1 %v15417_v28  ;;  %v14780_v27 = vcombine.high %v468_v19, %v476_v20  ;;  %v14782_v28 = vcombine.high %v469_v21, %v477_v22  ;;  %v565_v19 = vld [vmem:[%s17537_s26 + $0x428] sm:$0xff] }
 0x262   : > { %5411 = vmatprep.subr.bf16.mxu0 %v15432_v29  ;;  %5534 = vmatprep.subr.bf16.mxu1 %v15434_v30  ;;  %v484_v29 = vld [vmem:[%s17537_s26 + $0x1a0] sm:$0xff]  ;;  %v573_v20 = vld [vmem:[%s17537_s26 + $0x468] sm:$0xff] }
 0x263   : > { %v492_v30 = vld [vmem:[%s17537_s26 + $0x1e0] sm:$0xff] }
 0x264   : > { %v14795_v42 = vcombine.low %v484_v29, %v492_v30 }
 0x265   : > { %5412 = vmatpush1.bf16.msra.mxu0 %v15431_v35  ;;  %5535 = vmatpush1.bf16.msra.mxu1 %v15433_v36  ;;  %v14796_v35 = vcombine.high %v484_v29, %v492_v30  ;;  %v14798_v36 = vcombine.high %v485_v31, %v493_v32  ;;  %v581_v29 = vld [vmem:[%s17537_s26 + $0x4a8] sm:$0xff]  ;;  %v14877_v32 = vcombine.low %v565_v19, %v573_v20 }
 0x266   : > { %5413 = vmatprep.subr.bf16.mxu0 %v15448_v38  ;;  %5536 = vmatprep.subr.bf16.mxu1 %v15450_v39  ;;  %v500_v38 = vld [vmem:[%s17537_s26 + $0x220] sm:$0xff]  ;;  %v589_v30 = vld [vmem:[%s17537_s26 + $0x4e8] sm:$0xff] }
 0x267   : > { %v508_v39 = vld [vmem:[%s17537_s26 + $0x260] sm:$0xff] }
 0x268   : > { %v14811_v49 = vcombine.low %v500_v38, %v508_v39 }
 0x269   : > { %5414 = vmatpush1.bf16.msra.mxu0 %v15447_v44  ;;  %5537 = vmatpush1.bf16.msra.mxu1 %v15449_v45  ;;  %v14812_v44 = vcombine.high %v500_v38, %v508_v39  ;;  %v14814_v45 = vcombine.high %v501_v40, %v509_v41  ;;  %v597_v38 = vld [vmem:[%s17537_s26 + $0x528] sm:$0xff]  ;;  %v14893_v41 = vcombine.low %v581_v29, %v589_v30 }
 0x26a   : > { %5415 = vmatprep.subr.bf16.mxu0 %v15464_v26  ;;  %5538 = vmatprep.subr.bf16.mxu1 %v15466_v46  ;;  %v516_v26 = vld [vmem:[%s17537_s26 + $0x2a0] sm:$0xff]  ;;  %v605_v39 = vld [vmem:[%s17537_s26 + $0x568] sm:$0xff] }
 0x26b   : > { %v524_v46 = vld [vmem:[%s17537_s26 + $0x2e0] sm:$0xff] }
 0x26c   : > { %v14827_v59 = vcombine.low %v516_v26, %v524_v46 }
 0x26d   : > { %5416 = vmatpush1.bf16.msra.mxu0 %v15463_v51  ;;  %5539 = vmatpush1.bf16.msra.mxu1 %v15465_v52  ;;  %v14828_v51 = vcombine.high %v516_v26, %v524_v46  ;;  %v14830_v52 = vcombine.high %v517_v47, %v525_v48  ;;  %v613_v26 = vld [vmem:[%s17537_s26 + $0x5a8] sm:$0xff]  ;;  %v14909_v48 = vcombine.low %v597_v38, %v605_v39 }
 0x26e   : > { %5417 = vmatprep.subr.bf16.mxu0 %v15480_v53  ;;  %5540 = vmatprep.subr.bf16.mxu1 %v15482_v55  ;;  %v532_v53 = vld [vmem:[%s17537_s26 + $0x320] sm:$0xff]  ;;  %v621_v46 = vld [vmem:[%s17537_s26 + $0x5e8] sm:$0xff] }
 0x26f   : > { %v540_v55 = vld [vmem:[%s17537_s26 + $0x360] sm:$0xff] }
 0x271   : > { %5418 = vmatpush1.bf16.msra.mxu0 %v15479_v61  ;;  %5541 = vmatpush1.bf16.msra.mxu1 %v15481_v62  ;;  %v14844_v61 = vcombine.high %v532_v53, %v540_v55 }
 0x272   : > { %5419 = vmatprep.subr.bf16.mxu0 %v15496_v63  ;;  %5542 = vmatprep.subr.bf16.mxu1 %v15498_v0  ;;  %v14846_v63 = vcombine.high %v533_v56, %v541_v57  ;;  %v548_v0 = vld [vmem:[%s17537_s26 + $0x3a0] sm:$0xff]  ;;  %v14925_v57 = vcombine.low %v613_v26, %v621_v46 }
 0x273   : > { %v14860_v12 = vcombine.high %v548_v0, %v556_v1  ;;  %v14859_v21 = vcombine.low %v548_v0, %v556_v1  ;;  %v645_v0 = vld [vmem:[%s17537_s26 + $0x6a8] sm:$0xff] }
 0x274   : > { %v653_v1 = vld [vmem:[%s17537_s26 + $0x6e8] sm:$0xff] }
 0x275   : > { %5420 = vmatpush1.bf16.msra.mxu0 %v15495_v5  ;;  %5543 = vmatpush1.bf16.msra.mxu1 %v15497_v6  ;;  %v557_v5 = vld [vmem:[%s17537_s26 + $0x3e8] sm:$0xff] }
 0x276   : > { %5553 = vmatprep.subr.bf16.mxu0 %v14748_v7  ;;  %5676 = vmatprep.subr.bf16.mxu1 %v14750_v8  ;;  %v14843_v8 = vcombine.low %v532_v53, %v540_v55  ;;  %v14861_v22 = vcombine.low %v549_v4, %v557_v5  ;;  %v629_v53 = vld [vmem:[%s17537_s26 + $0x628] sm:$0xff] }
 0x277   : > { %v637_v55 = vld [vmem:[%s17537_s26 + $0x668] sm:$0xff] }
 0x278   : > { %5422 = vmatmul.mubr.bf16.vlgmr.msra.gmra.mrb[4].mxu0 %v17797_v37  ;;  %5545 = vmatmul.mubr.bf16.vlgmr.msra.gmra.mrb[4].mxu1 %v17797_v37 }
 0x279   : > { %5554 = vmatpush1.bf16.msra.mxu0 %v14747_v14  ;;  %5677 = vmatpush1.bf16.msra.mxu1 %v14749_v15  ;;  %v14862_v15 = vcombine.high %v549_v4, %v557_v5  ;;  %v14941_v5 = vcombine.low %v629_v53, %v637_v55 }
 0x27a   : > { %5555 = vmatprep.subr.bf16.mxu0 %v14764_v17  ;;  %5678 = vmatprep.subr.bf16.mxu1 %v14766_v18  ;;  %v564_v17 = vld [vmem:[%s17537_s26 + $0x420] sm:$0xff] }
 0x27b   : > { %5585 = vmatprep.mubr.bf16.mxu0 %v17595_v58  ;;  %5708 = vmatprep.mubr.bf16.mxu1 %v17595_v58  ;;  %v572_v18 = vld [vmem:[%s17537_s26 + $0x460] sm:$0xff] }
 0x27c   : > { %v14875_v31 = vcombine.low %v564_v17, %v572_v18 }
 0x27d   : > { %5556 = vmatpush1.bf16.msra.mxu0 %v14763_v24  ;;  %5679 = vmatpush1.bf16.msra.mxu1 %v14765_v25  ;;  %v14876_v24 = vcombine.high %v564_v17, %v572_v18  ;;  %v14878_v25 = vcombine.high %v565_v19, %v573_v20  ;;  %v676_v19 = vld [vmem:[%s17537_s26 + $0x7a0] sm:$0xff] }
 0x27e   : > { %5557 = vmatprep.subr.bf16.mxu0 %v14780_v27  ;;  %5680 = vmatprep.subr.bf16.mxu1 %v14782_v28  ;;  %v580_v27 = vld [vmem:[%s17537_s26 + $0x4a0] sm:$0xff] }
 0x27f   : > { %v588_v28 = vld [vmem:[%s17537_s26 + $0x4e0] sm:$0xff] }
 0x280   : > { %v14891_v40 = vcombine.low %v580_v27, %v588_v28  ;;  %v684_v20 = vld [vmem:[%s17537_s26 + $0x7e0] sm:$0xff] }
 0x281   : > { %5558 = vmatpush1.bf16.msra.mxu0 %v14779_v33  ;;  %5681 = vmatpush1.bf16.msra.mxu1 %v14781_v34  ;;  %v14892_v33 = vcombine.high %v580_v27, %v588_v28  ;;  %v14894_v34 = vcombine.high %v581_v29, %v589_v30  ;;  %v14988_v27 = vcombine.high %v676_v19, %v684_v20  ;;  %v692_v29 = vld [vmem:[%s17537_s26 + $0x820] sm:$0xff] }
 0x282   : > { %5559 = vmatprep.subr.bf16.mxu0 %v14796_v35  ;;  %5682 = vmatprep.subr.bf16.mxu1 %v14798_v36  ;;  %v596_v35 = vld [vmem:[%s17537_s26 + $0x520] sm:$0xff] }
 0x283   : > { %v604_v36 = vld [vmem:[%s17537_s26 + $0x560] sm:$0xff] }
 0x284   : > { %v14907_v47 = vcombine.low %v596_v35, %v604_v36  ;;  %v700_v30 = vld [vmem:[%s17537_s26 + $0x860] sm:$0xff] }
 0x285   : > { %5560 = vmatpush1.bf16.msra.mxu0 %v14795_v42  ;;  %5683 = vmatpush1.bf16.msra.mxu1 %v14797_v43  ;;  %v14908_v42 = vcombine.high %v596_v35, %v604_v36  ;;  %v14910_v43 = vcombine.high %v597_v38, %v605_v39  ;;  %v15004_v35 = vcombine.high %v692_v29, %v700_v30  ;;  %v708_v38 = vld [vmem:[%s17537_s26 + $0x8a0] sm:$0xff] }
 0x286   : > { %5561 = vmatprep.subr.bf16.mxu0 %v14812_v44  ;;  %5684 = vmatprep.subr.bf16.mxu1 %v14814_v45  ;;  %v612_v44 = vld [vmem:[%s17537_s26 + $0x5a0] sm:$0xff] }
 0x287   : > { %v620_v45 = vld [vmem:[%s17537_s26 + $0x5e0] sm:$0xff] }
 0x288   : > { %v14923_v56 = vcombine.low %v612_v44, %v620_v45  ;;  %v716_v39 = vld [vmem:[%s17537_s26 + $0x8e0] sm:$0xff] }
 0x289   : > { %5562 = vmatpush1.bf16.msra.mxu0 %v14811_v49  ;;  %5685 = vmatpush1.bf16.msra.mxu1 %v14813_v50  ;;  %v14924_v49 = vcombine.high %v612_v44, %v620_v45  ;;  %v14926_v50 = vcombine.high %v613_v26, %v621_v46  ;;  %v15020_v44 = vcombine.high %v708_v38, %v716_v39  ;;  %v724_v26 = vld [vmem:[%s17537_s26 + $0x920] sm:$0xff] }
 0x28a   : > { %5563 = vmatprep.subr.bf16.mxu0 %v14828_v51  ;;  %5686 = vmatprep.subr.bf16.mxu1 %v14830_v52  ;;  %v628_v51 = vld [vmem:[%s17537_s26 + $0x620] sm:$0xff] }
 0x28b   : > { %v18029_v62 = vpop.f32.mrb[0].mxu0  ;;  %v18033_v2 = vpop.f32.mrb[0].mxu1  ;;  %v636_v52 = vld [vmem:[%s17537_s26 + $0x660] sm:$0xff] }
 0x28c   : > { %v18035_v3 = vpop.f32.mrb[1].mxu0  ;;  %v18039_v6 = vpop.f32.mrb[1].mxu1  ;;  %v14939_v4 = vcombine.low %v628_v51, %v636_v52  ;;  %v732_v46 = vld [vmem:[%s17537_s26 + $0x960] sm:$0xff] }
 0x28d   : > { %v5181_v7 = vpop.f32.mrb[2].mxu0  ;;  %5564 = vmatpush1.bf16.msra.mxu0 %v14827_v59  ;;  %v5304_v9 = vpop.f32.mrb[2].mxu1  ;;  %5687 = vmatpush1.bf16.msra.mxu1 %v14829_v60  ;;  %v14940_v59 = vcombine.high %v628_v51, %v636_v52  ;;  %v14942_v60 = vcombine.high %v629_v53, %v637_v55  ;;  %v15036_v51 = vcombine.high %v724_v26, %v732_v46  ;;  %v740_v53 = vld [vmem:[%s17537_s26 + $0x9a0] sm:$0xff] }
 0x28e   : > { %v5182_v10 = vpop.f32.mrb[3].mxu0  ;;  %5565 = vmatprep.subr.bf16.mxu0 %v14844_v61  ;;  %v5305_v14 = vpop.f32.mrb[3].mxu1  ;;  %5688 = vmatprep.subr.bf16.mxu1 %v14846_v63  ;;  %v644_v61 = vld [vmem:[%s17537_s26 + $0x6a0] sm:$0xff] }
 0x28f   : > { %v652_v63 = vld [vmem:[%s17537_s26 + $0x6e0] sm:$0xff] }
 0x290   : > { %v14956_v7 = vcombine.high %v644_v61, %v652_v63  ;;  %v660_v9 = vld [vmem:[%s17537_s26 + $0x720] sm:$0xff]  ;;  %v14955_v14 = vcombine.low %v644_v61, %v652_v63 }
 0x291   : > { %5566 = vmatpush1.bf16.msra.mxu0 %v14843_v8  ;;  %5689 = vmatpush1.bf16.msra.mxu1 %v14845_v11  ;;  %v14958_v8 = vcombine.high %v645_v0, %v653_v1  ;;  %v668_v10 = vld [vmem:[%s17537_s26 + $0x760] sm:$0xff]  ;;  %v661_v11 = vld [vmem:[%s17537_s26 + $0x728] sm:$0xff] }
 0x292   : > { %5567 = vmatprep.subr.bf16.mxu0 %v14860_v12  ;;  %5690 = vmatprep.subr.bf16.mxu1 %v14862_v15  ;;  %v669_v12 = vld [vmem:[%s17537_s26 + $0x768] sm:$0xff]  ;;  %v14957_v15 = vcombine.low %v645_v0, %v653_v1  ;;  %v14972_v17 = vcombine.high %v660_v9, %v668_v10  ;;  %v748_v55 = vld [vmem:[%s17537_s26 + $0x9e0] sm:$0xff] }
 0x293   : > { %v14974_v18 = vcombine.high %v661_v11, %v669_v12  ;;  %v15052_v61 = vcombine.high %v740_v53, %v748_v55  ;;  %v756_v0 = vld [vmem:[%s17537_s26 + $0xa20] sm:$0xff] }
 0x294   : > { %v764_v1 = vld [vmem:[%s17537_s26 + $0xa60] sm:$0xff] }
 0x295   : > { %5568 = vmatpush1.bf16.msra.mxu0 %v14859_v21  ;;  %5691 = vmatpush1.bf16.msra.mxu1 %v14861_v22  ;;  %v677_v21 = vld [vmem:[%s17537_s26 + $0x7a8] sm:$0xff] }
 0x296   : > { %5569 = vmatprep.subr.bf16.mxu0 %v14876_v24  ;;  %5692 = vmatprep.subr.bf16.mxu1 %v14878_v25  ;;  %v685_v22 = vld [vmem:[%s17537_s26 + $0x7e8] sm:$0xff]  ;;  %v14971_v24 = vcombine.low %v660_v9, %v668_v10  ;;  %v14973_v25 = vcombine.low %v661_v11, %v669_v12  ;;  %v15068_v9 = vcombine.high %v756_v0, %v764_v1  ;;  %v772_v11 = vld [vmem:[%s17537_s26 + $0xaa0] sm:$0xff] }
 0x297   : > { %v14990_v28 = vcombine.high %v677_v21, %v685_v22  ;;  %v780_v12 = vld [vmem:[%s17537_s26 + $0xae0] sm:$0xff] }
 0x299   : > { %5570 = vmatpush1.bf16.msra.mxu0 %v14875_v31  ;;  %5693 = vmatpush1.bf16.msra.mxu1 %v14877_v32  ;;  %v693_v31 = vld [vmem:[%s17537_s26 + $0x828] sm:$0xff] }
 0x29a   : > { %5571 = vmatprep.subr.bf16.mxu0 %v14892_v33  ;;  %5694 = vmatprep.subr.bf16.mxu1 %v14894_v34  ;;  %v701_v32 = vld [vmem:[%s17537_s26 + $0x868] sm:$0xff]  ;;  %v14987_v33 = vcombine.low %v676_v19, %v684_v20  ;;  %v14989_v34 = vcombine.low %v677_v21, %v685_v22  ;;  %v15084_v19 = vcombine.high %v772_v11, %v780_v12  ;;  %v788_v21 = vld [vmem:[%s17537_s26 + $0xb20] sm:$0xff] }
 0x29b   : > { %v15006_v36 = vcombine.high %v693_v31, %v701_v32  ;;  %v796_v22 = vld [vmem:[%s17537_s26 + $0xb60] sm:$0xff] }
 0x29d   : > { %5572 = vmatpush1.bf16.msra.mxu0 %v14891_v40  ;;  %5695 = vmatpush1.bf16.msra.mxu1 %v14893_v41  ;;  %v709_v40 = vld [vmem:[%s17537_s26 + $0x8a8] sm:$0xff] }
 0x29e   : > { %5573 = vmatprep.subr.bf16.mxu0 %v14908_v42  ;;  %5696 = vmatprep.subr.bf16.mxu1 %v14910_v43  ;;  %v717_v41 = vld [vmem:[%s17537_s26 + $0x8e8] sm:$0xff]  ;;  %v15003_v42 = vcombine.low %v692_v29, %v700_v30  ;;  %v15005_v43 = vcombine.low %v693_v31, %v701_v32  ;;  %v15100_v29 = vcombine.high %v788_v21, %v796_v22  ;;  %v804_v31 = vld [vmem:[%s17537_s26 + $0xba0] sm:$0xff] }
 0x29f   : > { %v15022_v45 = vcombine.high %v709_v40, %v717_v41  ;;  %v812_v32 = vld [vmem:[%s17537_s26 + $0xbe0] sm:$0xff] }
 0x2a1   : > { %5574 = vmatpush1.bf16.msra.mxu0 %v14907_v47  ;;  %5697 = vmatpush1.bf16.msra.mxu1 %v14909_v48  ;;  %v725_v47 = vld [vmem:[%s17537_s26 + $0x928] sm:$0xff] }
 0x2a2   : > { %5575 = vmatprep.subr.bf16.mxu0 %v14924_v49  ;;  %5698 = vmatprep.subr.bf16.mxu1 %v14926_v50  ;;  %v733_v48 = vld [vmem:[%s17537_s26 + $0x968] sm:$0xff]  ;;  %v15019_v49 = vcombine.low %v708_v38, %v716_v39  ;;  %v15021_v50 = vcombine.low %v709_v40, %v717_v41  ;;  %v15116_v38 = vcombine.high %v804_v31, %v812_v32  ;;  %v820_v40 = vld [vmem:[%s17537_s26 + $0xc20] sm:$0xff] }
 0x2a3   : > { %v15038_v52 = vcombine.high %v725_v47, %v733_v48  ;;  %v828_v41 = vld [vmem:[%s17537_s26 + $0xc60] sm:$0xff] }
 0x2a5   : > { %5576 = vmatpush1.bf16.msra.mxu0 %v14923_v56  ;;  %5699 = vmatpush1.bf16.msra.mxu1 %v14925_v57  ;;  %v741_v56 = vld [vmem:[%s17537_s26 + $0x9a8] sm:$0xff] }
 0x2a6   : > { %5577 = vmatprep.subr.bf16.mxu0 %v14940_v59  ;;  %5700 = vmatprep.subr.bf16.mxu1 %v14942_v60  ;;  %v749_v57 = vld [vmem:[%s17537_s26 + $0x9e8] sm:$0xff]  ;;  %v15035_v59 = vcombine.low %v724_v26, %v732_v46  ;;  %v15037_v60 = vcombine.low %v725_v47, %v733_v48  ;;  %v15132_v26 = vcombine.high %v820_v40, %v828_v41  ;;  %v836_v47 = vld [vmem:[%s17537_s26 + $0xca0] sm:$0xff] }
 0x2a7   : > { %v15054_v63 = vcombine.high %v741_v56, %v749_v57  ;;  %v844_v48 = vld [vmem:[%s17537_s26 + $0xce0] sm:$0xff] }
 0x2a9   : > { %5578 = vmatpush1.bf16.msra.mxu0 %v14939_v4  ;;  %5701 = vmatpush1.bf16.msra.mxu1 %v14941_v5  ;;  %v757_v4 = vld [vmem:[%s17537_s26 + $0xa28] sm:$0xff] }
 0x2aa   : > { %5579 = vmatprep.subr.bf16.mxu0 %v14956_v7  ;;  %5702 = vmatprep.subr.bf16.mxu1 %v14958_v8  ;;  %v765_v5 = vld [vmem:[%s17537_s26 + $0xa68] sm:$0xff]  ;;  %v15051_v7 = vcombine.low %v740_v53, %v748_v55  ;;  %v15053_v8 = vcombine.low %v741_v56, %v749_v57  ;;  %v15148_v53 = vcombine.high %v836_v47, %v844_v48  ;;  %v852_v56 = vld [vmem:[%s17537_s26 + $0xd20] sm:$0xff] }
 0x2ab   : > { %v15070_v10 = vcombine.high %v757_v4, %v765_v5  ;;  %v860_v57 = vld [vmem:[%s17537_s26 + $0xd60] sm:$0xff] }
 0x2ad   : > { %5580 = vmatpush1.bf16.msra.mxu0 %v14955_v14  ;;  %5703 = vmatpush1.bf16.msra.mxu1 %v14957_v15  ;;  %v773_v14 = vld [vmem:[%s17537_s26 + $0xaa8] sm:$0xff] }
 0x2ae   : > { %5581 = vmatprep.subr.bf16.mxu0 %v14972_v17  ;;  %5704 = vmatprep.subr.bf16.mxu1 %v14974_v18  ;;  %v781_v15 = vld [vmem:[%s17537_s26 + $0xae8] sm:$0xff]  ;;  %v15067_v17 = vcombine.low %v756_v0, %v764_v1  ;;  %v15069_v18 = vcombine.low %v757_v4, %v765_v5  ;;  %v15164_v0 = vcombine.high %v852_v56, %v860_v57  ;;  %v868_v4 = vld [vmem:[%s17537_s26 + $0xda0] sm:$0xff] }
 0x2af   : > { %v15086_v20 = vcombine.high %v773_v14, %v781_v15  ;;  %v876_v5 = vld [vmem:[%s17537_s26 + $0xde0] sm:$0xff] }
 0x2b1   : > { %5582 = vmatpush1.bf16.msra.mxu0 %v14971_v24  ;;  %5705 = vmatpush1.bf16.msra.mxu1 %v14973_v25  ;;  %v789_v24 = vld [vmem:[%s17537_s26 + $0xb28] sm:$0xff] }
 0x2b2   : > { %5583 = vmatprep.subr.bf16.mxu0 %v14988_v27  ;;  %5706 = vmatprep.subr.bf16.mxu1 %v14990_v28  ;;  %v797_v25 = vld [vmem:[%s17537_s26 + $0xb68] sm:$0xff]  ;;  %v15083_v27 = vcombine.low %v772_v11, %v780_v12  ;;  %v15085_v28 = vcombine.low %v773_v14, %v781_v15  ;;  %v15180_v11 = vcombine.high %v868_v4, %v876_v5  ;;  %v884_v14 = vld [vmem:[%s17537_s26 + $0xe20] sm:$0xff] }
 0x2b3   : > { %v15102_v30 = vcombine.high %v789_v24, %v797_v25  ;;  %v892_v15 = vld [vmem:[%s17537_s26 + $0xe60] sm:$0xff] }
 0x2b5   : > { %5584 = vmatpush1.bf16.msra.mxu0 %v14987_v33  ;;  %5707 = vmatpush1.bf16.msra.mxu1 %v14989_v34  ;;  %v805_v33 = vld [vmem:[%s17537_s26 + $0xba8] sm:$0xff] }
 0x2b6   : > { %5594 = vmatprep.subr.bf16.mxu0 %v15004_v35  ;;  %5717 = vmatprep.subr.bf16.mxu1 %v15006_v36  ;;  %v813_v34 = vld [vmem:[%s17537_s26 + $0xbe8] sm:$0xff]  ;;  %v15099_v35 = vcombine.low %v788_v21, %v796_v22  ;;  %v15101_v36 = vcombine.low %v789_v24, %v797_v25  ;;  %v15196_v21 = vcombine.high %v884_v14, %v892_v15  ;;  %v900_v24 = vld [vmem:[%s17537_s26 + $0xea0] sm:$0xff] }
 0x2b7   : > { %v15118_v39 = vcombine.high %v805_v33, %v813_v34  ;;  %v908_v25 = vld [vmem:[%s17537_s26 + $0xee0] sm:$0xff] }
 0x2b8   : > { %5586 = vmatmul.mubr.bf16.vlgmr.msra.gmra.mrb[8].mxu0 %v17641_v13  ;;  %5709 = vmatmul.mubr.bf16.vlgmr.msra.gmra.mrb[8].mxu1 %v17641_v13 }
 0x2b9   : > { %5595 = vmatpush1.bf16.msra.mxu0 %v15003_v42  ;;  %5718 = vmatpush1.bf16.msra.mxu1 %v15005_v43  ;;  %v821_v42 = vld [vmem:[%s17537_s26 + $0xc28] sm:$0xff] }
 0x2ba   : > { %5596 = vmatprep.subr.bf16.mxu0 %v15020_v44  ;;  %5719 = vmatprep.subr.bf16.mxu1 %v15022_v45  ;;  %v829_v43 = vld [vmem:[%s17537_s26 + $0xc68] sm:$0xff]  ;;  %v15115_v44 = vcombine.low %v804_v31, %v812_v32  ;;  %v15117_v45 = vcombine.low %v805_v33, %v813_v34  ;;  %v15212_v31 = vcombine.high %v900_v24, %v908_v25  ;;  %v916_v33 = vld [vmem:[%s17537_s26 + $0xf20] sm:$0xff] }
 0x2bb   : > { %5626 = vmatprep.mubr.bf16.mxu0 %v17651_v54  ;;  %5749 = vmatprep.mubr.bf16.mxu1 %v17651_v54  ;;  %v15134_v46 = vcombine.high %v821_v42, %v829_v43  ;;  %v924_v34 = vld [vmem:[%s17537_s26 + $0xf60] sm:$0xff] }
 0x2bd   : > { %5597 = vmatpush1.bf16.msra.mxu0 %v15019_v49  ;;  %5720 = vmatpush1.bf16.msra.mxu1 %v15021_v50  ;;  %v837_v49 = vld [vmem:[%s17537_s26 + $0xca8] sm:$0xff] }
 0x2be   : > { %5598 = vmatprep.subr.bf16.mxu0 %v15036_v51  ;;  %5721 = vmatprep.subr.bf16.mxu1 %v15038_v52  ;;  %v845_v50 = vld [vmem:[%s17537_s26 + $0xce8] sm:$0xff]  ;;  %v15131_v51 = vcombine.low %v820_v40, %v828_v41  ;;  %v15133_v52 = vcombine.low %v821_v42, %v829_v43  ;;  %v15228_v40 = vcombine.high %v916_v33, %v924_v34  ;;  %v932_v42 = vld [vmem:[%s17537_s26 + $0xfa0] sm:$0xff] }
 0x2bf   : > { %v15150_v55 = vcombine.high %v837_v49, %v845_v50  ;;  %v940_v43 = vld [vmem:[%s17537_s26 + $0xfe0] sm:$0xff] }
 0x2c1   : > { %5599 = vmatpush1.bf16.msra.mxu0 %v15035_v59  ;;  %5722 = vmatpush1.bf16.msra.mxu1 %v15037_v60  ;;  %v853_v59 = vld [vmem:[%s17537_s26 + $0xd28] sm:$0xff] }
 0x2c2   : > { %5600 = vmatprep.subr.bf16.mxu0 %v15052_v61  ;;  %5723 = vmatprep.subr.bf16.mxu1 %v15054_v63  ;;  %v861_v60 = vld [vmem:[%s17537_s26 + $0xd68] sm:$0xff]  ;;  %v15147_v61 = vcombine.low %v836_v47, %v844_v48  ;;  %v15149_v63 = vcombine.low %v837_v49, %v845_v50  ;;  %v15244_v47 = vcombine.high %v932_v42, %v940_v43  ;;  %v948_v49 = vld [vmem:[%s17537_s26 + $0x1020] sm:$0xff] }
 0x2c3   : > { %v15166_v1 = vcombine.high %v853_v59, %v861_v60  ;;  %v956_v50 = vld [vmem:[%s17537_s26 + $0x1060] sm:$0xff] }
 0x2c5   : > { %5601 = vmatpush1.bf16.msra.mxu0 %v15051_v7  ;;  %5724 = vmatpush1.bf16.msra.mxu1 %v15053_v8  ;;  %v869_v7 = vld [vmem:[%s17537_s26 + $0xda8] sm:$0xff] }
 0x2c6   : > { %5602 = vmatprep.subr.bf16.mxu0 %v15068_v9  ;;  %5725 = vmatprep.subr.bf16.mxu1 %v15070_v10  ;;  %v877_v8 = vld [vmem:[%s17537_s26 + $0xde8] sm:$0xff]  ;;  %v15163_v9 = vcombine.low %v852_v56, %v860_v57  ;;  %v15165_v10 = vcombine.low %v853_v59, %v861_v60  ;;  %v15260_v56 = vcombine.high %v948_v49, %v956_v50  ;;  %v964_v59 = vld [vmem:[%s17537_s26 + $0x10a0] sm:$0xff] }
 0x2c7   : > { %v15182_v12 = vcombine.high %v869_v7, %v877_v8  ;;  %v972_v60 = vld [vmem:[%s17537_s26 + $0x10e0] sm:$0xff] }
 0x2c9   : > { %5603 = vmatpush1.bf16.msra.mxu0 %v15067_v17  ;;  %5726 = vmatpush1.bf16.msra.mxu1 %v15069_v18  ;;  %v885_v17 = vld [vmem:[%s17537_s26 + $0xe28] sm:$0xff] }
 0x2ca   : > { %5604 = vmatprep.subr.bf16.mxu0 %v15084_v19  ;;  %5727 = vmatprep.subr.bf16.mxu1 %v15086_v20  ;;  %v893_v18 = vld [vmem:[%s17537_s26 + $0xe68] sm:$0xff]  ;;  %v15179_v19 = vcombine.low %v868_v4, %v876_v5  ;;  %v15181_v20 = vcombine.low %v869_v7, %v877_v8  ;;  %v15276_v4 = vcombine.high %v964_v59, %v972_v60  ;;  %v980_v7 = vld [vmem:[%s17537_s26 + $0x1120] sm:$0xff] }
 0x2cb   : > { %v15198_v22 = vcombine.high %v885_v17, %v893_v18  ;;  %v988_v8 = vld [vmem:[%s17537_s26 + $0x1160] sm:$0xff] }
 0x2cd   : > { %5605 = vmatpush1.bf16.msra.mxu0 %v15083_v27  ;;  %5728 = vmatpush1.bf16.msra.mxu1 %v15085_v28  ;;  %v901_v27 = vld [vmem:[%s17537_s26 + $0xea8] sm:$0xff] }
 0x2ce   : > { %5606 = vmatprep.subr.bf16.mxu0 %v15100_v29  ;;  %5729 = vmatprep.subr.bf16.mxu1 %v15102_v30  ;;  %v909_v28 = vld [vmem:[%s17537_s26 + $0xee8] sm:$0xff]  ;;  %v15195_v29 = vcombine.low %v884_v14, %v892_v15  ;;  %v15197_v30 = vcombine.low %v885_v17, %v893_v18  ;;  %v15292_v14 = vcombine.high %v980_v7, %v988_v8  ;;  %v996_v17 = vld [vmem:[%s17537_s26 + $0x11a0] sm:$0xff] }
 0x2cf   : > { %v15214_v32 = vcombine.high %v901_v27, %v909_v28  ;;  %v1004_v18 = vld [vmem:[%s17537_s26 + $0x11e0] sm:$0xff] }
 0x2d1   : > { %5607 = vmatpush1.bf16.msra.mxu0 %v15099_v35  ;;  %5730 = vmatpush1.bf16.msra.mxu1 %v15101_v36  ;;  %v917_v35 = vld [vmem:[%s17537_s26 + $0xf28] sm:$0xff] }
 0x2d2   : > { %5608 = vmatprep.subr.bf16.mxu0 %v15116_v38  ;;  %5731 = vmatprep.subr.bf16.mxu1 %v15118_v39  ;;  %v925_v36 = vld [vmem:[%s17537_s26 + $0xf68] sm:$0xff]  ;;  %v15211_v38 = vcombine.low %v900_v24, %v908_v25  ;;  %v15213_v39 = vcombine.low %v901_v27, %v909_v28  ;;  %v15308_v24 = vcombine.high %v996_v17, %v1004_v18  ;;  %v1012_v27 = vld [vmem:[%s17537_s26 + $0x1220] sm:$0xff] }
 0x2d3   : > { %v15230_v41 = vcombine.high %v917_v35, %v925_v36  ;;  %v1020_v28 = vld [vmem:[%s17537_s26 + $0x1260] sm:$0xff] }
 0x2d5   : > { %5609 = vmatpush1.bf16.msra.mxu0 %v15115_v44  ;;  %5732 = vmatpush1.bf16.msra.mxu1 %v15117_v45  ;;  %v933_v44 = vld [vmem:[%s17537_s26 + $0xfa8] sm:$0xff] }
 0x2d6   : > { %5610 = vmatprep.subr.bf16.mxu0 %v15132_v26  ;;  %5733 = vmatprep.subr.bf16.mxu1 %v15134_v46  ;;  %v941_v45 = vld [vmem:[%s17537_s26 + $0xfe8] sm:$0xff]  ;;  %v15227_v26 = vcombine.low %v916_v33, %v924_v34  ;;  %v15229_v46 = vcombine.low %v917_v35, %v925_v36  ;;  %v15324_v33 = vcombine.high %v1012_v27, %v1020_v28  ;;  %v1028_v35 = vld [vmem:[%s17537_s26 + $0x12a0] sm:$0xff] }
 0x2d7   : > { %v15246_v48 = vcombine.high %v933_v44, %v941_v45  ;;  %v1036_v36 = vld [vmem:[%s17537_s26 + $0x12e0] sm:$0xff] }
 0x2d9   : > { %5611 = vmatpush1.bf16.msra.mxu0 %v15131_v51  ;;  %5734 = vmatpush1.bf16.msra.mxu1 %v15133_v52  ;;  %v949_v51 = vld [vmem:[%s17537_s26 + $0x1028] sm:$0xff] }
 0x2da   : > { %5612 = vmatprep.subr.bf16.mxu0 %v15148_v53  ;;  %5735 = vmatprep.subr.bf16.mxu1 %v15150_v55  ;;  %v957_v52 = vld [vmem:[%s17537_s26 + $0x1068] sm:$0xff]  ;;  %v15243_v53 = vcombine.low %v932_v42, %v940_v43  ;;  %v15245_v55 = vcombine.low %v933_v44, %v941_v45  ;;  %v15340_v42 = vcombine.high %v1028_v35, %v1036_v36  ;;  %v1044_v44 = vld [vmem:[%s17537_s26 + $0x1320] sm:$0xff] }
 0x2db   : > { %v15262_v57 = vcombine.high %v949_v51, %v957_v52  ;;  %v1052_v45 = vld [vmem:[%s17537_s26 + $0x1360] sm:$0xff] }
 0x2dd   : > { %5613 = vmatpush1.bf16.msra.mxu0 %v15147_v61  ;;  %5736 = vmatpush1.bf16.msra.mxu1 %v15149_v63  ;;  %v965_v61 = vld [vmem:[%s17537_s26 + $0x10a8] sm:$0xff] }
 0x2de   : > { %5614 = vmatprep.subr.bf16.mxu0 %v15164_v0  ;;  %5737 = vmatprep.subr.bf16.mxu1 %v15166_v1  ;;  %v973_v63 = vld [vmem:[%s17537_s26 + $0x10e8] sm:$0xff]  ;;  %v15259_v0 = vcombine.low %v948_v49, %v956_v50  ;;  %v15261_v1 = vcombine.low %v949_v51, %v957_v52  ;;  %v15356_v49 = vcombine.high %v1044_v44, %v1052_v45  ;;  %v1060_v51 = vld [vmem:[%s17537_s26 + $0x13a0] sm:$0xff] }
 0x2df   : > { %v15278_v5 = vcombine.high %v965_v61, %v973_v63  ;;  %v1068_v52 = vld [vmem:[%s17537_s26 + $0x13e0] sm:$0xff] }
 0x2e1   : > { %5615 = vmatpush1.bf16.msra.mxu0 %v15163_v9  ;;  %5738 = vmatpush1.bf16.msra.mxu1 %v15165_v10  ;;  %v981_v9 = vld [vmem:[%s17537_s26 + $0x1128] sm:$0xff] }
 0x2e2   : > { %5616 = vmatprep.subr.bf16.mxu0 %v15180_v11  ;;  %5739 = vmatprep.subr.bf16.mxu1 %v15182_v12  ;;  %v989_v10 = vld [vmem:[%s17537_s26 + $0x1168] sm:$0xff]  ;;  %v15275_v11 = vcombine.low %v964_v59, %v972_v60  ;;  %v15277_v12 = vcombine.low %v965_v61, %v973_v63  ;;  %v15372_v59 = vcombine.high %v1060_v51, %v1068_v52  ;;  %v1076_v61 = vld [vmem:[%s17537_s26 + $0x1420] sm:$0xff] }
 0x2e3   : > { %v15294_v15 = vcombine.high %v981_v9, %v989_v10  ;;  %v1084_v63 = vld [vmem:[%s17537_s26 + $0x1460] sm:$0xff] }
 0x2e5   : > { %5617 = vmatpush1.bf16.msra.mxu0 %v15179_v19  ;;  %5740 = vmatpush1.bf16.msra.mxu1 %v15181_v20  ;;  %v997_v19 = vld [vmem:[%s17537_s26 + $0x11a8] sm:$0xff] }
 0x2e6   : > { %5618 = vmatprep.subr.bf16.mxu0 %v15196_v21  ;;  %5741 = vmatprep.subr.bf16.mxu1 %v15198_v22  ;;  %v1005_v20 = vld [vmem:[%s17537_s26 + $0x11e8] sm:$0xff]  ;;  %v15291_v21 = vcombine.low %v980_v7, %v988_v8  ;;  %v15293_v22 = vcombine.low %v981_v9, %v989_v10  ;;  %v15388_v7 = vcombine.high %v1076_v61, %v1084_v63  ;;  %v1092_v9 = vld [vmem:[%s17537_s26 + $0x14a0] sm:$0xff] }
 0x2e7   : > { %v15310_v25 = vcombine.high %v997_v19, %v1005_v20  ;;  %v1100_v10 = vld [vmem:[%s17537_s26 + $0x14e0] sm:$0xff] }
 0x2e9   : > { %5619 = vmatpush1.bf16.msra.mxu0 %v15195_v29  ;;  %5742 = vmatpush1.bf16.msra.mxu1 %v15197_v30  ;;  %v1013_v29 = vld [vmem:[%s17537_s26 + $0x1228] sm:$0xff] }
 0x2ea   : > { %5620 = vmatprep.subr.bf16.mxu0 %v15212_v31  ;;  %5743 = vmatprep.subr.bf16.mxu1 %v15214_v32  ;;  %v1021_v30 = vld [vmem:[%s17537_s26 + $0x1268] sm:$0xff]  ;;  %v15307_v31 = vcombine.low %v996_v17, %v1004_v18  ;;  %v15309_v32 = vcombine.low %v997_v19, %v1005_v20  ;;  %v15404_v17 = vcombine.high %v1092_v9, %v1100_v10  ;;  %v1108_v19 = vld [vmem:[%s17537_s26 + $0x1520] sm:$0xff] }
 0x2eb   : > { %v15326_v34 = vcombine.high %v1013_v29, %v1021_v30  ;;  %v1116_v20 = vld [vmem:[%s17537_s26 + $0x1560] sm:$0xff] }
 0x2ed   : > { %5621 = vmatpush1.bf16.msra.mxu0 %v15211_v38  ;;  %5744 = vmatpush1.bf16.msra.mxu1 %v15213_v39  ;;  %v1029_v38 = vld [vmem:[%s17537_s26 + $0x12a8] sm:$0xff] }
 0x2ee   : > { %5622 = vmatprep.subr.bf16.mxu0 %v15228_v40  ;;  %5745 = vmatprep.subr.bf16.mxu1 %v15230_v41  ;;  %v1037_v39 = vld [vmem:[%s17537_s26 + $0x12e8] sm:$0xff]  ;;  %v15323_v40 = vcombine.low %v1012_v27, %v1020_v28  ;;  %v15325_v41 = vcombine.low %v1013_v29, %v1021_v30  ;;  %v15420_v27 = vcombine.high %v1108_v19, %v1116_v20  ;;  %v1124_v29 = vld [vmem:[%s17537_s26 + $0x15a0] sm:$0xff] }
 0x2ef   : > { %v15342_v43 = vcombine.high %v1029_v38, %v1037_v39  ;;  %v1132_v30 = vld [vmem:[%s17537_s26 + $0x15e0] sm:$0xff] }
 0x2f1   : > { %5623 = vmatpush1.bf16.msra.mxu0 %v15227_v26  ;;  %5746 = vmatpush1.bf16.msra.mxu1 %v15229_v46  ;;  %v1045_v26 = vld [vmem:[%s17537_s26 + $0x1328] sm:$0xff] }
 0x2f2   : > { %5624 = vmatprep.subr.bf16.mxu0 %v15244_v47  ;;  %5747 = vmatprep.subr.bf16.mxu1 %v15246_v48  ;;  %v1053_v46 = vld [vmem:[%s17537_s26 + $0x1368] sm:$0xff]  ;;  %v15339_v47 = vcombine.low %v1028_v35, %v1036_v36  ;;  %v15341_v48 = vcombine.low %v1029_v38, %v1037_v39  ;;  %v15436_v35 = vcombine.high %v1124_v29, %v1132_v30  ;;  %v1140_v38 = vld [vmem:[%s17537_s26 + $0x1620] sm:$0xff] }
 0x2f3   : > { %v15358_v50 = vcombine.high %v1045_v26, %v1053_v46  ;;  %v1148_v39 = vld [vmem:[%s17537_s26 + $0x1660] sm:$0xff] }
 0x2f5   : > { %5625 = vmatpush1.bf16.msra.mxu0 %v15243_v53  ;;  %5748 = vmatpush1.bf16.msra.mxu1 %v15245_v55  ;;  %v1061_v53 = vld [vmem:[%s17537_s26 + $0x13a8] sm:$0xff] }
 0x2f6   : > { %5635 = vmatprep.subr.bf16.mxu0 %v15260_v56  ;;  %5758 = vmatprep.subr.bf16.mxu1 %v15262_v57  ;;  %v1069_v55 = vld [vmem:[%s17537_s26 + $0x13e8] sm:$0xff]  ;;  %v15355_v56 = vcombine.low %v1044_v44, %v1052_v45  ;;  %v15357_v57 = vcombine.low %v1045_v26, %v1053_v46  ;;  %v15452_v44 = vcombine.high %v1140_v38, %v1148_v39  ;;  %v1156_v26 = vld [vmem:[%s17537_s26 + $0x16a0] sm:$0xff] }
 0x2f7   : > { %v15374_v60 = vcombine.high %v1061_v53, %v1069_v55  ;;  %v1164_v46 = vld [vmem:[%s17537_s26 + $0x16e0] sm:$0xff] }
 0x2f8   : > { %5627 = vmatmul.mubr.bf16.vlgmr.msra.gmra.mrb[8].mxu0 %v17719_v23  ;;  %5750 = vmatmul.mubr.bf16.vlgmr.msra.gmra.mrb[8].mxu1 %v17719_v23 }
 0x2f9   : > { %5636 = vmatpush1.bf16.msra.mxu0 %v15259_v0  ;;  %5759 = vmatpush1.bf16.msra.mxu1 %v15261_v1  ;;  %v1077_v0 = vld [vmem:[%s17537_s26 + $0x1428] sm:$0xff] }
 0x2fa   : > { %5637 = vmatprep.subr.bf16.mxu0 %v15276_v4  ;;  %5760 = vmatprep.subr.bf16.mxu1 %v15278_v5  ;;  %v1085_v1 = vld [vmem:[%s17537_s26 + $0x1468] sm:$0xff]  ;;  %v15371_v4 = vcombine.low %v1060_v51, %v1068_v52  ;;  %v15373_v5 = vcombine.low %v1061_v53, %v1069_v55  ;;  %v15468_v51 = vcombine.high %v1156_v26, %v1164_v46  ;;  %v1172_v53 = vld [vmem:[%s17537_s26 + $0x1720] sm:$0xff] }
 0x2fb   : > { %5667 = vmatprep.mubr.bf16.mxu0 %v17729_v16  ;;  %5790 = vmatprep.mubr.bf16.mxu1 %v17729_v16  ;;  %v15390_v8 = vcombine.high %v1077_v0, %v1085_v1  ;;  %v1180_v55 = vld [vmem:[%s17537_s26 + $0x1760] sm:$0xff] }
 0x2fd   : > { %5638 = vmatpush1.bf16.msra.mxu0 %v15275_v11  ;;  %5761 = vmatpush1.bf16.msra.mxu1 %v15277_v12  ;;  %v1093_v11 = vld [vmem:[%s17537_s26 + $0x14a8] sm:$0xff] }
 0x2fe   : > { %5639 = vmatprep.subr.bf16.mxu0 %v15292_v14  ;;  %5762 = vmatprep.subr.bf16.mxu1 %v15294_v15  ;;  %v1101_v12 = vld [vmem:[%s17537_s26 + $0x14e8] sm:$0xff]  ;;  %v15387_v14 = vcombine.low %v1076_v61, %v1084_v63  ;;  %v15389_v15 = vcombine.low %v1077_v0, %v1085_v1  ;;  %v15484_v61 = vcombine.high %v1172_v53, %v1180_v55  ;;  %v1188_v0 = vld [vmem:[%s17537_s26 + $0x17a0] sm:$0xff] }
 0x2ff   : > { %v15406_v18 = vcombine.high %v1093_v11, %v1101_v12  ;;  %v1196_v1 = vld [vmem:[%s17537_s26 + $0x17e0] sm:$0xff] }
 0x301   : > { %5640 = vmatpush1.bf16.msra.mxu0 %v15291_v21  ;;  %5763 = vmatpush1.bf16.msra.mxu1 %v15293_v22  ;;  %v1109_v21 = vld [vmem:[%s17537_s26 + $0x1528] sm:$0xff] }
 0x302   : > { %5641 = vmatprep.subr.bf16.mxu0 %v15308_v24  ;;  %5764 = vmatprep.subr.bf16.mxu1 %v15310_v25  ;;  %v1117_v22 = vld [vmem:[%s17537_s26 + $0x1568] sm:$0xff]  ;;  %v15403_v24 = vcombine.low %v1092_v9, %v1100_v10  ;;  %v15405_v25 = vcombine.low %v1093_v11, %v1101_v12  ;;  %v15500_v9 = vcombine.high %v1188_v0, %v1196_v1  ;;  %v438_v11 = vld [vmem:[%s17537_s26 + $0x30] sm:$0xff] }
 0x303   : > { %v15422_v28 = vcombine.high %v1109_v21, %v1117_v22  ;;  %v446_v12 = vld [vmem:[%s17537_s26 + $0x70] sm:$0xff] }
 0x305   : > { %5642 = vmatpush1.bf16.msra.mxu0 %v15307_v31  ;;  %5765 = vmatpush1.bf16.msra.mxu1 %v15309_v32  ;;  %v1125_v31 = vld [vmem:[%s17537_s26 + $0x15a8] sm:$0xff] }
 0x306   : > { %5643 = vmatprep.subr.bf16.mxu0 %v15324_v33  ;;  %5766 = vmatprep.subr.bf16.mxu1 %v15326_v34  ;;  %v1133_v32 = vld [vmem:[%s17537_s26 + $0x15e8] sm:$0xff]  ;;  %v15419_v33 = vcombine.low %v1108_v19, %v1116_v20  ;;  %v15421_v34 = vcombine.low %v1109_v21, %v1117_v22  ;;  %v14752_v19 = vcombine.high %v438_v11, %v446_v12  ;;  %v454_v21 = vld [vmem:[%s17537_s26 + $0xb0] sm:$0xff] }
 0x307   : > { %v15438_v36 = vcombine.high %v1125_v31, %v1133_v32  ;;  %v462_v22 = vld [vmem:[%s17537_s26 + $0xf0] sm:$0xff] }
 0x309   : > { %5644 = vmatpush1.bf16.msra.mxu0 %v15323_v40  ;;  %5767 = vmatpush1.bf16.msra.mxu1 %v15325_v41  ;;  %v1141_v40 = vld [vmem:[%s17537_s26 + $0x1628] sm:$0xff] }
 0x30a   : > { %5645 = vmatprep.subr.bf16.mxu0 %v15340_v42  ;;  %5768 = vmatprep.subr.bf16.mxu1 %v15342_v43  ;;  %v1149_v41 = vld [vmem:[%s17537_s26 + $0x1668] sm:$0xff]  ;;  %v15435_v42 = vcombine.low %v1124_v29, %v1132_v30  ;;  %v15437_v43 = vcombine.low %v1125_v31, %v1133_v32  ;;  %v14768_v29 = vcombine.high %v454_v21, %v462_v22  ;;  %v470_v31 = vld [vmem:[%s17537_s26 + $0x130] sm:$0xff] }
 0x30b   : > { %v15454_v45 = vcombine.high %v1141_v40, %v1149_v41  ;;  %v478_v32 = vld [vmem:[%s17537_s26 + $0x170] sm:$0xff] }
 0x30d   : > { %5646 = vmatpush1.bf16.msra.mxu0 %v15339_v47  ;;  %5769 = vmatpush1.bf16.msra.mxu1 %v15341_v48  ;;  %v1157_v47 = vld [vmem:[%s17537_s26 + $0x16a8] sm:$0xff] }
 0x30e   : > { %5647 = vmatprep.subr.bf16.mxu0 %v15356_v49  ;;  %5770 = vmatprep.subr.bf16.mxu1 %v15358_v50  ;;  %v1165_v48 = vld [vmem:[%s17537_s26 + $0x16e8] sm:$0xff]  ;;  %v15451_v49 = vcombine.low %v1140_v38, %v1148_v39  ;;  %v15453_v50 = vcombine.low %v1141_v40, %v1149_v41  ;;  %v14784_v38 = vcombine.high %v470_v31, %v478_v32  ;;  %v486_v40 = vld [vmem:[%s17537_s26 + $0x1b0] sm:$0xff] }
 0x30f   : > { %v15470_v52 = vcombine.high %v1157_v47, %v1165_v48  ;;  %v494_v41 = vld [vmem:[%s17537_s26 + $0x1f0] sm:$0xff] }
 0x311   : > { %5648 = vmatpush1.bf16.msra.mxu0 %v15355_v56  ;;  %5771 = vmatpush1.bf16.msra.mxu1 %v15357_v57  ;;  %v1173_v56 = vld [vmem:[%s17537_s26 + $0x1728] sm:$0xff] }
 0x312   : > { %5649 = vmatprep.subr.bf16.mxu0 %v15372_v59  ;;  %5772 = vmatprep.subr.bf16.mxu1 %v15374_v60  ;;  %v1181_v57 = vld [vmem:[%s17537_s26 + $0x1768] sm:$0xff]  ;;  %v15467_v59 = vcombine.low %v1156_v26, %v1164_v46  ;;  %v15469_v60 = vcombine.low %v1157_v47, %v1165_v48  ;;  %v14800_v26 = vcombine.high %v486_v40, %v494_v41  ;;  %v502_v47 = vld [vmem:[%s17537_s26 + $0x230] sm:$0xff] }
 0x313   : > { %v15486_v63 = vcombine.high %v1173_v56, %v1181_v57  ;;  %v510_v48 = vld [vmem:[%s17537_s26 + $0x270] sm:$0xff] }
 0x315   : > { %5650 = vmatpush1.bf16.msra.mxu0 %v15371_v4  ;;  %5773 = vmatpush1.bf16.msra.mxu1 %v15373_v5  ;;  %v1189_v4 = vld [vmem:[%s17537_s26 + $0x17a8] sm:$0xff] }
 0x316   : > { %5651 = vmatprep.subr.bf16.mxu0 %v15388_v7  ;;  %5774 = vmatprep.subr.bf16.mxu1 %v15390_v8  ;;  %v1197_v5 = vld [vmem:[%s17537_s26 + $0x17e8] sm:$0xff]  ;;  %v15483_v7 = vcombine.low %v1172_v53, %v1180_v55  ;;  %v15485_v8 = vcombine.low %v1173_v56, %v1181_v57  ;;  %v518_v55 = vld [vmem:[%s17537_s26 + $0x2b0] sm:$0xff]  ;;  %v519_v57 = vld [vmem:[%s17537_s26 + $0x2b8] sm:$0xff] }
 0x317   : > { %v15502_v10 = vcombine.high %v1189_v4, %v1197_v5  ;;  %v526_v56 = vld [vmem:[%s17537_s26 + $0x2f0] sm:$0xff] }
 0x319   : > { %5652 = vmatpush1.bf16.msra.mxu0 %v15387_v14  ;;  %5775 = vmatpush1.bf16.msra.mxu1 %v15389_v15  ;;  %v439_v14 = vld [vmem:[%s17537_s26 + $0x38] sm:$0xff] }
 0x31a   : > { %5653 = vmatprep.subr.bf16.mxu0 %v15404_v17  ;;  %5776 = vmatprep.subr.bf16.mxu1 %v15406_v18  ;;  %v447_v15 = vld [vmem:[%s17537_s26 + $0x78] sm:$0xff]  ;;  %v15499_v17 = vcombine.low %v1188_v0, %v1196_v1  ;;  %v15501_v18 = vcombine.low %v1189_v4, %v1197_v5  ;;  %v534_v1 = vld [vmem:[%s17537_s26 + $0x330] sm:$0xff] }
 0x31b   : > { %v14754_v20 = vcombine.high %v439_v14, %v447_v15  ;;  %v542_v4 = vld [vmem:[%s17537_s26 + $0x370] sm:$0xff]  ;;  %v535_v5 = vld [vmem:[%s17537_s26 + $0x338] sm:$0xff] }
 0x31d   : > { %5654 = vmatpush1.bf16.msra.mxu0 %v15403_v24  ;;  %5777 = vmatpush1.bf16.msra.mxu1 %v15405_v25  ;;  %v455_v24 = vld [vmem:[%s17537_s26 + $0xb8] sm:$0xff] }
 0x31e   : > { %5655 = vmatprep.subr.bf16.mxu0 %v15420_v27  ;;  %5778 = vmatprep.subr.bf16.mxu1 %v15422_v28  ;;  %v463_v25 = vld [vmem:[%s17537_s26 + $0xf8] sm:$0xff]  ;;  %v14751_v27 = vcombine.low %v438_v11, %v446_v12  ;;  %v14753_v28 = vcombine.low %v439_v14, %v447_v15  ;;  %v550_v14 = vld [vmem:[%s17537_s26 + $0x3b0] sm:$0xff] }
 0x31f   : > { %v14770_v30 = vcombine.high %v455_v24, %v463_v25  ;;  %v558_v15 = vld [vmem:[%s17537_s26 + $0x3f0] sm:$0xff] }
 0x321   : > { %5656 = vmatpush1.bf16.msra.mxu0 %v15419_v33  ;;  %5779 = vmatpush1.bf16.msra.mxu1 %v15421_v34  ;;  %v471_v33 = vld [vmem:[%s17537_s26 + $0x138] sm:$0xff] }
 0x322   : > { %5657 = vmatprep.subr.bf16.mxu0 %v15436_v35  ;;  %5780 = vmatprep.subr.bf16.mxu1 %v15438_v36  ;;  %v479_v34 = vld [vmem:[%s17537_s26 + $0x178] sm:$0xff]  ;;  %v14767_v35 = vcombine.low %v454_v21, %v462_v22  ;;  %v14769_v36 = vcombine.low %v455_v24, %v463_v25  ;;  %v14847_v24 = vcombine.low %v534_v1, %v542_v4 }
 0x323   : > { %v14786_v39 = vcombine.high %v471_v33, %v479_v34 }
 0x325   : > { %5658 = vmatpush1.bf16.msra.mxu0 %v15435_v42  ;;  %5781 = vmatpush1.bf16.msra.mxu1 %v15437_v43  ;;  %v487_v42 = vld [vmem:[%s17537_s26 + $0x1b8] sm:$0xff] }
 0x326   : > { %5659 = vmatprep.subr.bf16.mxu0 %v15452_v44  ;;  %5782 = vmatprep.subr.bf16.mxu1 %v15454_v45  ;;  %v495_v43 = vld [vmem:[%s17537_s26 + $0x1f8] sm:$0xff]  ;;  %v14783_v44 = vcombine.low %v470_v31, %v478_v32  ;;  %v14785_v45 = vcombine.low %v471_v33, %v479_v34  ;;  %v566_v32 = vld [vmem:[%s17537_s26 + $0x430] sm:$0xff] }
 0x327   : > { %v14802_v46 = vcombine.high %v487_v42, %v495_v43  ;;  %v574_v33 = vld [vmem:[%s17537_s26 + $0x470] sm:$0xff]  ;;  %v567_v34 = vld [vmem:[%s17537_s26 + $0x438] sm:$0xff] }
 0x329   : > { %5660 = vmatpush1.bf16.msra.mxu0 %v15451_v49  ;;  %5783 = vmatpush1.bf16.msra.mxu1 %v15453_v50  ;;  %v503_v49 = vld [vmem:[%s17537_s26 + $0x238] sm:$0xff] }
 0x32a   : > { %5661 = vmatprep.subr.bf16.mxu0 %v15468_v51  ;;  %5784 = vmatprep.subr.bf16.mxu1 %v15470_v52  ;;  %v511_v50 = vld [vmem:[%s17537_s26 + $0x278] sm:$0xff]  ;;  %v14799_v51 = vcombine.low %v486_v40, %v494_v41  ;;  %v14816_v52 = vcombine.high %v502_v47, %v510_v48  ;;  %v582_v41 = vld [vmem:[%s17537_s26 + $0x4b0] sm:$0xff] }
 0x32b   : > { %v14818_v53 = vcombine.high %v503_v49, %v511_v50 }
 0x32d   : > { %5662 = vmatpush1.bf16.msra.mxu0 %v15467_v59  ;;  %5785 = vmatpush1.bf16.msra.mxu1 %v15469_v60  ;;  %v527_v59 = vld [vmem:[%s17537_s26 + $0x2f8] sm:$0xff]  ;;  %v14815_v60 = vcombine.low %v502_v47, %v510_v48  ;;  %v598_v48 = vld [vmem:[%s17537_s26 + $0x530] sm:$0xff] }
 0x32e   : > { %5663 = vmatprep.subr.bf16.mxu0 %v15484_v61  ;;  %5786 = vmatprep.subr.bf16.mxu1 %v15486_v63  ;;  %v14817_v61 = vcombine.low %v503_v49, %v511_v50  ;;  %v14832_v63 = vcombine.high %v518_v55, %v526_v56  ;;  %v14834_v0 = vcombine.high %v519_v57, %v527_v59  ;;  %v606_v49 = vld [vmem:[%s17537_s26 + $0x570] sm:$0xff]  ;;  %v599_v50 = vld [vmem:[%s17537_s26 + $0x538] sm:$0xff] }
 0x331   : > { %5664 = vmatpush1.bf16.msra.mxu0 %v15483_v7  ;;  %5787 = vmatpush1.bf16.msra.mxu1 %v15485_v8  ;;  %v543_v7 = vld [vmem:[%s17537_s26 + $0x378] sm:$0xff]  ;;  %v14831_v8 = vcombine.low %v518_v55, %v526_v56  ;;  %v614_v56 = vld [vmem:[%s17537_s26 + $0x5b0] sm:$0xff] }
 0x332   : > { %5665 = vmatprep.subr.bf16.mxu0 %v15500_v9  ;;  %5788 = vmatprep.subr.bf16.mxu1 %v15502_v10  ;;  %v14833_v9 = vcombine.low %v519_v57, %v527_v59  ;;  %v14848_v10 = vcombine.high %v534_v1, %v542_v4  ;;  %v14850_v12 = vcombine.high %v535_v5, %v543_v7  ;;  %v622_v57 = vld [vmem:[%s17537_s26 + $0x5f0] sm:$0xff]  ;;  %v615_v59 = vld [vmem:[%s17537_s26 + $0x5b8] sm:$0xff] }
 0x333   : > { %v630_v4 = vld [vmem:[%s17537_s26 + $0x630] sm:$0xff] }
 0x335   : > { %5666 = vmatpush1.bf16.msra.mxu0 %v15499_v17  ;;  %5789 = vmatpush1.bf16.msra.mxu1 %v15501_v18 }
 0x336   : > { %5799 = vmatprep.subr.bf16.mxu0 %v14752_v19  ;;  %5922 = vmatprep.subr.bf16.mxu1 %v14754_v20  ;;  %v551_v19 = vld [vmem:[%s17537_s26 + $0x3b8] sm:$0xff] }
 0x337   : > { %v559_v20 = vld [vmem:[%s17537_s26 + $0x3f8] sm:$0xff] }
 0x338   : > { %5668 = vmatmul.mubr.bf16.vlgmr.msra.gmra.mrb[8].mxu0 %v17797_v37  ;;  %5791 = vmatmul.mubr.bf16.vlgmr.msra.gmra.mrb[8].mxu1 %v17797_v37  ;;  %v14866_v31 = vcombine.high %v551_v19, %v559_v20 }
 0x339   : > { %5800 = vmatpush1.bf16.msra.mxu0 %v14751_v27  ;;  %5923 = vmatpush1.bf16.msra.mxu1 %v14753_v28  ;;  %v14849_v28 = vcombine.low %v535_v5, %v543_v7  ;;  %v638_v5 = vld [vmem:[%s17537_s26 + $0x670] sm:$0xff]  ;;  %v631_v7 = vld [vmem:[%s17537_s26 + $0x638] sm:$0xff] }
 0x33a   : > { %5801 = vmatprep.subr.bf16.mxu0 %v14768_v29  ;;  %5924 = vmatprep.subr.bf16.mxu1 %v14770_v30  ;;  %v14864_v29 = vcombine.high %v550_v14, %v558_v15 }
 0x33b   : > { %5831 = vmatprep.mubr.bf16.mxu0 %v17595_v58  ;;  %5954 = vmatprep.mubr.bf16.mxu1 %v17595_v58  ;;  %v14801_v58 = vcombine.low %v487_v42, %v495_v43  ;;  %v590_v42 = vld [vmem:[%s17537_s26 + $0x4f0] sm:$0xff]  ;;  %v583_v43 = vld [vmem:[%s17537_s26 + $0x4b8] sm:$0xff] }
 0x33d   : > { %5802 = vmatpush1.bf16.msra.mxu0 %v14767_v35  ;;  %5925 = vmatpush1.bf16.msra.mxu1 %v14769_v36  ;;  %v575_v35 = vld [vmem:[%s17537_s26 + $0x478] sm:$0xff]  ;;  %v14863_v36 = vcombine.low %v550_v14, %v558_v15  ;;  %v646_v15 = vld [vmem:[%s17537_s26 + $0x6b0] sm:$0xff] }
 0x33e   : > { %5803 = vmatprep.subr.bf16.mxu0 %v14784_v38  ;;  %5926 = vmatprep.subr.bf16.mxu1 %v14786_v39  ;;  %v14865_v38 = vcombine.low %v551_v19, %v559_v20  ;;  %v14880_v39 = vcombine.high %v566_v32, %v574_v33  ;;  %v14882_v40 = vcombine.high %v567_v34, %v575_v35  ;;  %v654_v19 = vld [vmem:[%s17537_s26 + $0x6f0] sm:$0xff]  ;;  %v647_v20 = vld [vmem:[%s17537_s26 + $0x6b8] sm:$0xff] }
 0x341   : > { %5804 = vmatpush1.bf16.msra.mxu0 %v14783_v44  ;;  %5927 = vmatpush1.bf16.msra.mxu1 %v14785_v45  ;;  %v591_v44 = vld [vmem:[%s17537_s26 + $0x4f8] sm:$0xff]  ;;  %v14879_v45 = vcombine.low %v566_v32, %v574_v33  ;;  %v14959_v33 = vcombine.low %v646_v15, %v654_v19 }
 0x342   : > { %5805 = vmatprep.subr.bf16.mxu0 %v14800_v26  ;;  %5928 = vmatprep.subr.bf16.mxu1 %v14802_v46  ;;  %v14881_v26 = vcombine.low %v567_v34, %v575_v35  ;;  %v14896_v46 = vcombine.high %v582_v41, %v590_v42  ;;  %v14898_v47 = vcombine.high %v583_v43, %v591_v44  ;;  %v671_v32 = vld [vmem:[%s17537_s26 + $0x778] sm:$0xff] }
 0x345   : > { %5806 = vmatpush1.bf16.msra.mxu0 %v14799_v51  ;;  %5929 = vmatpush1.bf16.msra.mxu1 %v14801_v58  ;;  %v607_v51 = vld [vmem:[%s17537_s26 + $0x578] sm:$0xff]  ;;  %v14895_v58 = vcombine.low %v582_v41, %v590_v42 }
 0x346   : > { %5807 = vmatprep.subr.bf16.mxu0 %v14816_v52  ;;  %5930 = vmatprep.subr.bf16.mxu1 %v14818_v53  ;;  %v14897_v52 = vcombine.low %v583_v43, %v591_v44  ;;  %v14912_v53 = vcombine.high %v598_v48, %v606_v49  ;;  %v14914_v55 = vcombine.high %v599_v50, %v607_v51  ;;  %v687_v41 = vld [vmem:[%s17537_s26 + $0x7f8] sm:$0xff] }
 0x349   : > { %5808 = vmatpush1.bf16.msra.mxu0 %v14815_v60  ;;  %5931 = vmatpush1.bf16.msra.mxu1 %v14817_v61  ;;  %v623_v60 = vld [vmem:[%s17537_s26 + $0x5f8] sm:$0xff]  ;;  %v14911_v61 = vcombine.low %v598_v48, %v606_v49 }
 0x34a   : > { %5809 = vmatprep.subr.bf16.mxu0 %v14832_v63  ;;  %5932 = vmatprep.subr.bf16.mxu1 %v14834_v0  ;;  %v14913_v63 = vcombine.low %v599_v50, %v607_v51  ;;  %v14928_v0 = vcombine.high %v614_v56, %v622_v57  ;;  %v14930_v1 = vcombine.high %v615_v59, %v623_v60  ;;  %v703_v48 = vld [vmem:[%s17537_s26 + $0x878] sm:$0xff] }
 0x34b   : > { %v18241_v11 = vpop.f32.mrb[4].mxu0  ;;  %v18245_v17 = vpop.f32.mrb[4].mxu1 }
 0x34c   : > { %v18247_v18 = vpop.f32.mrb[5].mxu0  ;;  %v18251_v21 = vpop.f32.mrb[5].mxu1 }
 0x34d   : > { %v5427_v22 = vpop.f32.mrb[6].mxu0  ;;  %5810 = vmatpush1.bf16.msra.mxu0 %v14831_v8  ;;  %v5550_v25 = vpop.f32.mrb[6].mxu1  ;;  %5933 = vmatpush1.bf16.msra.mxu1 %v14833_v9  ;;  %v639_v8 = vld [vmem:[%s17537_s26 + $0x678] sm:$0xff]  ;;  %v14927_v9 = vcombine.low %v614_v56, %v622_v57 }
 0x34e   : > { %v5428_v27 = vpop.f32.mrb[7].mxu0  ;;  %5811 = vmatprep.subr.bf16.mxu0 %v14848_v10  ;;  %v5551_v30 = vpop.f32.mrb[7].mxu1  ;;  %5934 = vmatprep.subr.bf16.mxu1 %v14850_v12  ;;  %v14929_v10 = vcombine.low %v615_v59, %v623_v60  ;;  %v14944_v12 = vcombine.high %v630_v4, %v638_v5  ;;  %v14946_v14 = vcombine.high %v631_v7, %v639_v8  ;;  %v655_v22 = vld [vmem:[%s17537_s26 + $0x6f8] sm:$0xff] }
 0x34f   : > { %v14945_v25 = vcombine.low %v631_v7, %v639_v8  ;;  %v14960_v27 = vcombine.high %v646_v15, %v654_v19  ;;  %v670_v30 = vld [vmem:[%s17537_s26 + $0x770] sm:$0xff]  ;;  %v14961_v34 = vcombine.low %v647_v20, %v655_v22  ;;  %v719_v56 = vld [vmem:[%s17537_s26 + $0x8f8] sm:$0xff] }
 0x350   : > { %v751_v15 = vld [vmem:[%s17537_s26 + $0x9f8] sm:$0xff] }
 0x351   : > { %5812 = vmatpush1.bf16.msra.mxu0 %v14847_v24  ;;  %5935 = vmatpush1.bf16.msra.mxu1 %v14849_v28  ;;  %v14943_v24 = vcombine.low %v630_v4, %v638_v5  ;;  %v14962_v28 = vcombine.high %v647_v20, %v655_v22  ;;  %v735_v4 = vld [vmem:[%s17537_s26 + $0x978] sm:$0xff] }
 0x352   : > { %5813 = vmatprep.subr.bf16.mxu0 %v14864_v29  ;;  %5936 = vmatprep.subr.bf16.mxu1 %v14866_v31  ;;  %v662_v29 = vld [vmem:[%s17537_s26 + $0x730] sm:$0xff]  ;;  %v663_v31 = vld [vmem:[%s17537_s26 + $0x738] sm:$0xff] }
 0x353   : > { %v14976_v35 = vcombine.high %v662_v29, %v670_v30  ;;  %v14975_v42 = vcombine.low %v662_v29, %v670_v30  ;;  %v14977_v43 = vcombine.low %v663_v31, %v671_v32 }
 0x355   : > { %5814 = vmatpush1.bf16.msra.mxu0 %v14863_v36  ;;  %5937 = vmatpush1.bf16.msra.mxu1 %v14865_v38  ;;  %v14978_v36 = vcombine.high %v663_v31, %v671_v32  ;;  %v678_v38 = vld [vmem:[%s17537_s26 + $0x7b0] sm:$0xff] }
 0x356   : > { %5815 = vmatprep.subr.bf16.mxu0 %v14880_v39  ;;  %5938 = vmatprep.subr.bf16.mxu1 %v14882_v40  ;;  %v686_v39 = vld [vmem:[%s17537_s26 + $0x7f0] sm:$0xff]  ;;  %v679_v40 = vld [vmem:[%s17537_s26 + $0x7b8] sm:$0xff] }
 0x357   : > { %v14992_v44 = vcombine.high %v678_v38, %v686_v39  ;;  %v14991_v49 = vcombine.low %v678_v38, %v686_v39  ;;  %v14993_v50 = vcombine.low %v679_v40, %v687_v41  ;;  %v774_v32 = vld [vmem:[%s17537_s26 + $0xab0] sm:$0xff] }
 0x359   : > { %5816 = vmatpush1.bf16.msra.mxu0 %v14879_v45  ;;  %5939 = vmatpush1.bf16.msra.mxu1 %v14881_v26  ;;  %v14994_v45 = vcombine.high %v679_v40, %v687_v41  ;;  %v694_v26 = vld [vmem:[%s17537_s26 + $0x830] sm:$0xff] }
 0x35a   : > { %5817 = vmatprep.subr.bf16.mxu0 %v14896_v46  ;;  %5940 = vmatprep.subr.bf16.mxu1 %v14898_v47  ;;  %v702_v46 = vld [vmem:[%s17537_s26 + $0x870] sm:$0xff]  ;;  %v695_v47 = vld [vmem:[%s17537_s26 + $0x838] sm:$0xff] }
 0x35b   : > { %v15008_v51 = vcombine.high %v694_v26, %v702_v46  ;;  %v15007_v57 = vcombine.low %v694_v26, %v702_v46  ;;  %v15009_v59 = vcombine.low %v695_v47, %v703_v48  ;;  %v790_v41 = vld [vmem:[%s17537_s26 + $0xb30] sm:$0xff] }
 0x35d   : > { %5818 = vmatpush1.bf16.msra.mxu0 %v14895_v58  ;;  %5941 = vmatpush1.bf16.msra.mxu1 %v14897_v52  ;;  %v15010_v58 = vcombine.high %v695_v47, %v703_v48  ;;  %v710_v52 = vld [vmem:[%s17537_s26 + $0x8b0] sm:$0xff] }
 0x35e   : > { %5819 = vmatprep.subr.bf16.mxu0 %v14912_v53  ;;  %5942 = vmatprep.subr.bf16.mxu1 %v14914_v55  ;;  %v718_v53 = vld [vmem:[%s17537_s26 + $0x8f0] sm:$0xff]  ;;  %v711_v55 = vld [vmem:[%s17537_s26 + $0x8b8] sm:$0xff] }
 0x35f   : > { %v15024_v60 = vcombine.high %v710_v52, %v718_v53  ;;  %v15023_v5 = vcombine.low %v710_v52, %v718_v53  ;;  %v15025_v7 = vcombine.low %v711_v55, %v719_v56  ;;  %v806_v48 = vld [vmem:[%s17537_s26 + $0xbb0] sm:$0xff] }
 0x361   : > { %5820 = vmatpush1.bf16.msra.mxu0 %v14911_v61  ;;  %5943 = vmatpush1.bf16.msra.mxu1 %v14913_v63  ;;  %v15026_v61 = vcombine.high %v711_v55, %v719_v56  ;;  %v726_v63 = vld [vmem:[%s17537_s26 + $0x930] sm:$0xff] }
 0x362   : > { %5821 = vmatprep.subr.bf16.mxu0 %v14928_v0  ;;  %5944 = vmatprep.subr.bf16.mxu1 %v14930_v1  ;;  %v734_v0 = vld [vmem:[%s17537_s26 + $0x970] sm:$0xff]  ;;  %v727_v1 = vld [vmem:[%s17537_s26 + $0x938] sm:$0xff] }
 0x363   : > { %v15040_v8 = vcombine.high %v726_v63, %v734_v0  ;;  %v15041_v19 = vcombine.low %v727_v1, %v735_v4  ;;  %v822_v56 = vld [vmem:[%s17537_s26 + $0xc30] sm:$0xff] }
 0x365   : > { %5822 = vmatpush1.bf16.msra.mxu0 %v14927_v9  ;;  %5945 = vmatpush1.bf16.msra.mxu1 %v14929_v10  ;;  %v15042_v9 = vcombine.high %v727_v1, %v735_v4  ;;  %v742_v10 = vld [vmem:[%s17537_s26 + $0x9b0] sm:$0xff] }
 0x366   : > { %5823 = vmatprep.subr.bf16.mxu0 %v14944_v12  ;;  %5946 = vmatprep.subr.bf16.mxu1 %v14946_v14  ;;  %v750_v12 = vld [vmem:[%s17537_s26 + $0x9f0] sm:$0xff]  ;;  %v743_v14 = vld [vmem:[%s17537_s26 + $0x9b8] sm:$0xff] }
 0x367   : > { %v15056_v20 = vcombine.high %v742_v10, %v750_v12  ;;  %v15058_v22 = vcombine.high %v743_v14, %v751_v15  ;;  %v15055_v29 = vcombine.low %v742_v10, %v750_v12  ;;  %v838_v4 = vld [vmem:[%s17537_s26 + $0xcb0] sm:$0xff] }
 0x369   : > { %5824 = vmatpush1.bf16.msra.mxu0 %v14943_v24  ;;  %5947 = vmatpush1.bf16.msra.mxu1 %v14945_v25  ;;  %v758_v24 = vld [vmem:[%s17537_s26 + $0xa30] sm:$0xff] }
 0x36a   : > { %5825 = vmatprep.subr.bf16.mxu0 %v14960_v27  ;;  %5948 = vmatprep.subr.bf16.mxu1 %v14962_v28  ;;  %v766_v25 = vld [vmem:[%s17537_s26 + $0xa70] sm:$0xff]  ;;  %v759_v27 = vld [vmem:[%s17537_s26 + $0xa38] sm:$0xff] }
 0x36b   : > { %v767_v28 = vld [vmem:[%s17537_s26 + $0xa78] sm:$0xff]  ;;  %v15072_v30 = vcombine.high %v758_v24, %v766_v25 }
 0x36c   : > { %v15074_v31 = vcombine.high %v759_v27, %v767_v28  ;;  %v15073_v38 = vcombine.low %v759_v27, %v767_v28  ;;  %v870_v28 = vld [vmem:[%s17537_s26 + $0xdb0] sm:$0xff] }
 0x36d   : > { %5826 = vmatpush1.bf16.msra.mxu0 %v14959_v33  ;;  %5949 = vmatpush1.bf16.msra.mxu1 %v14961_v34  ;;  %v782_v33 = vld [vmem:[%s17537_s26 + $0xaf0] sm:$0xff]  ;;  %v775_v34 = vld [vmem:[%s17537_s26 + $0xab8] sm:$0xff] }
 0x36e   : > { %5827 = vmatprep.subr.bf16.mxu0 %v14976_v35  ;;  %5950 = vmatprep.subr.bf16.mxu1 %v14978_v36  ;;  %v783_v35 = vld [vmem:[%s17537_s26 + $0xaf8] sm:$0xff]  ;;  %v15071_v36 = vcombine.low %v758_v24, %v766_v25  ;;  %v15088_v39 = vcombine.high %v774_v32, %v782_v33 }
 0x36f   : > { %v15090_v40 = vcombine.high %v775_v34, %v783_v35  ;;  %v15089_v26 = vcombine.low %v775_v34, %v783_v35  ;;  %v886_v35 = vld [vmem:[%s17537_s26 + $0xe30] sm:$0xff] }
 0x371   : > { %5828 = vmatpush1.bf16.msra.mxu0 %v14975_v42  ;;  %5951 = vmatpush1.bf16.msra.mxu1 %v14977_v43  ;;  %v798_v42 = vld [vmem:[%s17537_s26 + $0xb70] sm:$0xff]  ;;  %v791_v43 = vld [vmem:[%s17537_s26 + $0xb38] sm:$0xff] }
 0x372   : > { %5829 = vmatprep.subr.bf16.mxu0 %v14992_v44  ;;  %5952 = vmatprep.subr.bf16.mxu1 %v14994_v45  ;;  %v799_v44 = vld [vmem:[%s17537_s26 + $0xb78] sm:$0xff]  ;;  %v15087_v45 = vcombine.low %v774_v32, %v782_v33  ;;  %v15104_v46 = vcombine.high %v790_v41, %v798_v42 }
 0x373   : > { %v15106_v47 = vcombine.high %v791_v43, %v799_v44  ;;  %v15105_v52 = vcombine.low %v791_v43, %v799_v44  ;;  %v902_v44 = vld [vmem:[%s17537_s26 + $0xeb0] sm:$0xff] }
 0x375   : > { %5830 = vmatpush1.bf16.msra.mxu0 %v14991_v49  ;;  %5953 = vmatpush1.bf16.msra.mxu1 %v14993_v50  ;;  %v814_v49 = vld [vmem:[%s17537_s26 + $0xbf0] sm:$0xff]  ;;  %v807_v50 = vld [vmem:[%s17537_s26 + $0xbb8] sm:$0xff] }
 0x376   : > { %5840 = vmatprep.subr.bf16.mxu0 %v15008_v51  ;;  %5963 = vmatprep.subr.bf16.mxu1 %v15010_v58  ;;  %v815_v51 = vld [vmem:[%s17537_s26 + $0xbf8] sm:$0xff]  ;;  %v15103_v58 = vcombine.low %v790_v41, %v798_v42  ;;  %v15120_v53 = vcombine.high %v806_v48, %v814_v49 }
 0x377   : > { %v15122_v55 = vcombine.high %v807_v50, %v815_v51 }
 0x378   : > { %5832 = vmatmul.mubr.bf16.vlgmr.msra.gmra.mrb[12].mxu0 %v17641_v13  ;;  %5955 = vmatmul.mubr.bf16.vlgmr.msra.gmra.mrb[12].mxu1 %v17641_v13  ;;  %v15039_v13 = vcombine.low %v726_v63, %v734_v0  ;;  %v15121_v63 = vcombine.low %v807_v50, %v815_v51  ;;  %v918_v51 = vld [vmem:[%s17537_s26 + $0xf30] sm:$0xff] }
 0x379   : > { %5841 = vmatpush1.bf16.msra.mxu0 %v15007_v57  ;;  %5964 = vmatpush1.bf16.msra.mxu1 %v15009_v59  ;;  %v830_v57 = vld [vmem:[%s17537_s26 + $0xc70] sm:$0xff]  ;;  %v823_v59 = vld [vmem:[%s17537_s26 + $0xc38] sm:$0xff] }
 0x37a   : > { %5842 = vmatprep.subr.bf16.mxu0 %v15024_v60  ;;  %5965 = vmatprep.subr.bf16.mxu1 %v15026_v61  ;;  %v831_v60 = vld [vmem:[%s17537_s26 + $0xc78] sm:$0xff]  ;;  %v15119_v61 = vcombine.low %v806_v48, %v814_v49  ;;  %v15136_v0 = vcombine.high %v822_v56, %v830_v57 }
 0x37b   : > { %5872 = vmatprep.mubr.bf16.mxu0 %v17651_v54  ;;  %5995 = vmatprep.mubr.bf16.mxu1 %v17651_v54  ;;  %v15057_v54 = vcombine.low %v743_v14, %v751_v15  ;;  %v15138_v1 = vcombine.high %v823_v59, %v831_v60  ;;  %v15137_v10 = vcombine.low %v823_v59, %v831_v60  ;;  %v854_v15 = vld [vmem:[%s17537_s26 + $0xd30] sm:$0xff] }
 0x37c   : > { %v934_v60 = vld [vmem:[%s17537_s26 + $0xfb0] sm:$0xff] }
 0x37d   : > { %5843 = vmatpush1.bf16.msra.mxu0 %v15023_v5  ;;  %5966 = vmatpush1.bf16.msra.mxu1 %v15025_v7  ;;  %v846_v5 = vld [vmem:[%s17537_s26 + $0xcf0] sm:$0xff]  ;;  %v839_v7 = vld [vmem:[%s17537_s26 + $0xcb8] sm:$0xff] }
 0x37e   : > { %5844 = vmatprep.subr.bf16.mxu0 %v15040_v8  ;;  %5967 = vmatprep.subr.bf16.mxu1 %v15042_v9  ;;  %v847_v8 = vld [vmem:[%s17537_s26 + $0xcf8] sm:$0xff]  ;;  %v15135_v9 = vcombine.low %v822_v56, %v830_v57  ;;  %v15152_v12 = vcombine.high %v838_v4, %v846_v5 }
 0x37f   : > { %v15154_v14 = vcombine.high %v839_v7, %v847_v8  ;;  %v15153_v24 = vcombine.low %v839_v7, %v847_v8  ;;  %v950_v8 = vld [vmem:[%s17537_s26 + $0x1030] sm:$0xff] }
 0x381   : > { %5845 = vmatpush1.bf16.msra.mxu0 %v15039_v13  ;;  %5968 = vmatpush1.bf16.msra.mxu1 %v15041_v19  ;;  %v862_v13 = vld [vmem:[%s17537_s26 + $0xd70] sm:$0xff]  ;;  %v855_v19 = vld [vmem:[%s17537_s26 + $0xd38] sm:$0xff] }
 0x382   : > { %5846 = vmatprep.subr.bf16.mxu0 %v15056_v20  ;;  %5969 = vmatprep.subr.bf16.mxu1 %v15058_v22  ;;  %v863_v20 = vld [vmem:[%s17537_s26 + $0xd78] sm:$0xff]  ;;  %v15151_v22 = vcombine.low %v838_v4, %v846_v5  ;;  %v15168_v25 = vcombine.high %v854_v15, %v862_v13 }
 0x383   : > { %v15170_v27 = vcombine.high %v855_v19, %v863_v20  ;;  %v15169_v32 = vcombine.low %v855_v19, %v863_v20  ;;  %v966_v20 = vld [vmem:[%s17537_s26 + $0x10b0] sm:$0xff] }
 0x385   : > { %5847 = vmatpush1.bf16.msra.mxu0 %v15055_v29  ;;  %5970 = vmatpush1.bf16.msra.mxu1 %v15057_v54  ;;  %v878_v29 = vld [vmem:[%s17537_s26 + $0xdf0] sm:$0xff]  ;;  %v871_v54 = vld [vmem:[%s17537_s26 + $0xdb8] sm:$0xff] }
 0x386   : > { %5848 = vmatprep.subr.bf16.mxu0 %v15072_v30  ;;  %5971 = vmatprep.subr.bf16.mxu1 %v15074_v31  ;;  %v879_v30 = vld [vmem:[%s17537_s26 + $0xdf8] sm:$0xff]  ;;  %v15167_v31 = vcombine.low %v854_v15, %v862_v13  ;;  %v15184_v33 = vcombine.high %v870_v28, %v878_v29 }
 0x387   : > { %v15186_v34 = vcombine.high %v871_v54, %v879_v30  ;;  %v15185_v41 = vcombine.low %v871_v54, %v879_v30  ;;  %v982_v30 = vld [vmem:[%s17537_s26 + $0x1130] sm:$0xff] }
 0x389   : > { %5849 = vmatpush1.bf16.msra.mxu0 %v15071_v36  ;;  %5972 = vmatpush1.bf16.msra.mxu1 %v15073_v38  ;;  %v894_v36 = vld [vmem:[%s17537_s26 + $0xe70] sm:$0xff]  ;;  %v887_v38 = vld [vmem:[%s17537_s26 + $0xe38] sm:$0xff] }
 0x38a   : > { %5850 = vmatprep.subr.bf16.mxu0 %v15088_v39  ;;  %5973 = vmatprep.subr.bf16.mxu1 %v15090_v40  ;;  %v895_v39 = vld [vmem:[%s17537_s26 + $0xe78] sm:$0xff]  ;;  %v15183_v40 = vcombine.low %v870_v28, %v878_v29  ;;  %v15200_v42 = vcombine.high %v886_v35, %v894_v36 }
 0x38b   : > { %v15202_v43 = vcombine.high %v887_v38, %v895_v39  ;;  %v15201_v48 = vcombine.low %v887_v38, %v895_v39  ;;  %v998_v39 = vld [vmem:[%s17537_s26 + $0x11b0] sm:$0xff] }
 0x38d   : > { %5851 = vmatpush1.bf16.msra.mxu0 %v15087_v45  ;;  %5974 = vmatpush1.bf16.msra.mxu1 %v15089_v26  ;;  %v910_v45 = vld [vmem:[%s17537_s26 + $0xef0] sm:$0xff]  ;;  %v903_v26 = vld [vmem:[%s17537_s26 + $0xeb8] sm:$0xff] }
 0x38e   : > { %5852 = vmatprep.subr.bf16.mxu0 %v15104_v46  ;;  %5975 = vmatprep.subr.bf16.mxu1 %v15106_v47  ;;  %v911_v46 = vld [vmem:[%s17537_s26 + $0xef8] sm:$0xff]  ;;  %v15199_v47 = vcombine.low %v886_v35, %v894_v36  ;;  %v15216_v49 = vcombine.high %v902_v44, %v910_v45 }
 0x38f   : > { %v15218_v50 = vcombine.high %v903_v26, %v911_v46  ;;  %v15217_v56 = vcombine.low %v903_v26, %v911_v46  ;;  %v1014_v26 = vld [vmem:[%s17537_s26 + $0x1230] sm:$0xff] }
 0x390   : > { %v1022_v46 = vld [vmem:[%s17537_s26 + $0x1270] sm:$0xff] }
 0x391   : > { %5853 = vmatpush1.bf16.msra.mxu0 %v15103_v58  ;;  %5976 = vmatpush1.bf16.msra.mxu1 %v15105_v52  ;;  %v926_v58 = vld [vmem:[%s17537_s26 + $0xf70] sm:$0xff]  ;;  %v919_v52 = vld [vmem:[%s17537_s26 + $0xf38] sm:$0xff] }
 0x392   : > { %5854 = vmatprep.subr.bf16.mxu0 %v15120_v53  ;;  %5977 = vmatprep.subr.bf16.mxu1 %v15122_v55  ;;  %v927_v53 = vld [vmem:[%s17537_s26 + $0xf78] sm:$0xff]  ;;  %v15215_v55 = vcombine.low %v902_v44, %v910_v45  ;;  %v15232_v57 = vcombine.high %v918_v51, %v926_v58 }
 0x393   : > { %v15234_v59 = vcombine.high %v919_v52, %v927_v53  ;;  %v15233_v4 = vcombine.low %v919_v52, %v927_v53  ;;  %v1038_v52 = vld [vmem:[%s17537_s26 + $0x12f0] sm:$0xff]  ;;  %v1031_v53 = vld [vmem:[%s17537_s26 + $0x12b8] sm:$0xff] }
 0x395   : > { %5855 = vmatpush1.bf16.msra.mxu0 %v15119_v61  ;;  %5978 = vmatpush1.bf16.msra.mxu1 %v15121_v63  ;;  %v942_v61 = vld [vmem:[%s17537_s26 + $0xff0] sm:$0xff]  ;;  %v935_v63 = vld [vmem:[%s17537_s26 + $0xfb8] sm:$0xff] }
 0x396   : > { %5856 = vmatprep.subr.bf16.mxu0 %v15136_v0  ;;  %5979 = vmatprep.subr.bf16.mxu1 %v15138_v1  ;;  %v943_v0 = vld [vmem:[%s17537_s26 + $0xff8] sm:$0xff]  ;;  %v15231_v1 = vcombine.low %v918_v51, %v926_v58  ;;  %v15248_v5 = vcombine.high %v934_v60, %v942_v61  ;;  %v1030_v58 = vld [vmem:[%s17537_s26 + $0x12b0] sm:$0xff] }
 0x397   : > { %v15250_v7 = vcombine.high %v935_v63, %v943_v0  ;;  %v15249_v15 = vcombine.low %v935_v63, %v943_v0  ;;  %v1054_v63 = vld [vmem:[%s17537_s26 + $0x1370] sm:$0xff]  ;;  %v1047_v0 = vld [vmem:[%s17537_s26 + $0x1338] sm:$0xff] }
 0x399   : > { %5857 = vmatpush1.bf16.msra.mxu0 %v15135_v9  ;;  %5980 = vmatpush1.bf16.msra.mxu1 %v15137_v10  ;;  %v958_v9 = vld [vmem:[%s17537_s26 + $0x1070] sm:$0xff]  ;;  %v951_v10 = vld [vmem:[%s17537_s26 + $0x1038] sm:$0xff] }
 0x39a   : > { %5858 = vmatprep.subr.bf16.mxu0 %v15152_v12  ;;  %5981 = vmatprep.subr.bf16.mxu1 %v15154_v14  ;;  %v959_v12 = vld [vmem:[%s17537_s26 + $0x1078] sm:$0xff]  ;;  %v15247_v14 = vcombine.low %v934_v60, %v942_v61  ;;  %v15264_v13 = vcombine.high %v950_v8, %v958_v9  ;;  %v1046_v61 = vld [vmem:[%s17537_s26 + $0x1330] sm:$0xff] }
 0x39b   : > { %v15266_v19 = vcombine.high %v951_v10, %v959_v12  ;;  %v15265_v28 = vcombine.low %v951_v10, %v959_v12  ;;  %v1070_v10 = vld [vmem:[%s17537_s26 + $0x13f0] sm:$0xff]  ;;  %v1063_v12 = vld [vmem:[%s17537_s26 + $0x13b8] sm:$0xff] }
 0x39d   : > { %5859 = vmatpush1.bf16.msra.mxu0 %v15151_v22  ;;  %5982 = vmatpush1.bf16.msra.mxu1 %v15153_v24  ;;  %v974_v22 = vld [vmem:[%s17537_s26 + $0x10f0] sm:$0xff]  ;;  %v967_v24 = vld [vmem:[%s17537_s26 + $0x10b8] sm:$0xff] }
 0x39e   : > { %5860 = vmatprep.subr.bf16.mxu0 %v15168_v25  ;;  %5983 = vmatprep.subr.bf16.mxu1 %v15170_v27  ;;  %v975_v25 = vld [vmem:[%s17537_s26 + $0x10f8] sm:$0xff]  ;;  %v15263_v27 = vcombine.low %v950_v8, %v958_v9  ;;  %v15280_v29 = vcombine.high %v966_v20, %v974_v22  ;;  %v1062_v9 = vld [vmem:[%s17537_s26 + $0x13b0] sm:$0xff] }
 0x39f   : > { %v15282_v54 = vcombine.high %v967_v24, %v975_v25  ;;  %v15281_v35 = vcombine.low %v967_v24, %v975_v25  ;;  %v1086_v24 = vld [vmem:[%s17537_s26 + $0x1470] sm:$0xff]  ;;  %v1079_v25 = vld [vmem:[%s17537_s26 + $0x1438] sm:$0xff] }
 0x3a1   : > { %5861 = vmatpush1.bf16.msra.mxu0 %v15167_v31  ;;  %5984 = vmatpush1.bf16.msra.mxu1 %v15169_v32  ;;  %v990_v31 = vld [vmem:[%s17537_s26 + $0x1170] sm:$0xff]  ;;  %v983_v32 = vld [vmem:[%s17537_s26 + $0x1138] sm:$0xff] }
 0x3a2   : > { %5862 = vmatprep.subr.bf16.mxu0 %v15184_v33  ;;  %5985 = vmatprep.subr.bf16.mxu1 %v15186_v34  ;;  %v991_v33 = vld [vmem:[%s17537_s26 + $0x1178] sm:$0xff]  ;;  %v15279_v34 = vcombine.low %v966_v20, %v974_v22  ;;  %v15296_v36 = vcombine.high %v982_v30, %v990_v31  ;;  %v1078_v22 = vld [vmem:[%s17537_s26 + $0x1430] sm:$0xff] }
 0x3a3   : > { %v15298_v38 = vcombine.high %v983_v32, %v991_v33 }
 0x3a5   : > { %5863 = vmatpush1.bf16.msra.mxu0 %v15183_v40  ;;  %5986 = vmatpush1.bf16.msra.mxu1 %v15185_v41  ;;  %v1006_v40 = vld [vmem:[%s17537_s26 + $0x11f0] sm:$0xff]  ;;  %v999_v41 = vld [vmem:[%s17537_s26 + $0x11b8] sm:$0xff] }
 0x3a6   : > { %5864 = vmatprep.subr.bf16.mxu0 %v15200_v42  ;;  %5987 = vmatprep.subr.bf16.mxu1 %v15202_v43  ;;  %v1007_v42 = vld [vmem:[%s17537_s26 + $0x11f8] sm:$0xff]  ;;  %v15297_v43 = vcombine.low %v983_v32, %v991_v33  ;;  %v15312_v44 = vcombine.high %v998_v39, %v1006_v40  ;;  %v1102_v32 = vld [vmem:[%s17537_s26 + $0x14f0] sm:$0xff] }
 0x3a7   : > { %v15314_v45 = vcombine.high %v999_v41, %v1007_v42  ;;  %v1095_v33 = vld [vmem:[%s17537_s26 + $0x14b8] sm:$0xff] }
 0x3a9   : > { %5865 = vmatpush1.bf16.msra.mxu0 %v15199_v47  ;;  %5988 = vmatpush1.bf16.msra.mxu1 %v15201_v48  ;;  %v1015_v47 = vld [vmem:[%s17537_s26 + $0x1238] sm:$0xff] }
 0x3aa   : > { %5866 = vmatprep.subr.bf16.mxu0 %v15216_v49  ;;  %5989 = vmatprep.subr.bf16.mxu1 %v15218_v50  ;;  %v1023_v48 = vld [vmem:[%s17537_s26 + $0x1278] sm:$0xff]  ;;  %v15311_v49 = vcombine.low %v998_v39, %v1006_v40  ;;  %v15328_v50 = vcombine.high %v1014_v26, %v1022_v46  ;;  %v1110_v40 = vld [vmem:[%s17537_s26 + $0x1530] sm:$0xff] }
 0x3ab   : > { %v15330_v51 = vcombine.high %v1015_v47, %v1023_v48 }
 0x3ad   : > { %5867 = vmatpush1.bf16.msra.mxu0 %v15215_v55  ;;  %5990 = vmatpush1.bf16.msra.mxu1 %v15217_v56  ;;  %v1039_v55 = vld [vmem:[%s17537_s26 + $0x12f8] sm:$0xff]  ;;  %v15327_v56 = vcombine.low %v1014_v26, %v1022_v46  ;;  %v1126_v46 = vld [vmem:[%s17537_s26 + $0x15b0] sm:$0xff] }
 0x3ae   : > { %5868 = vmatprep.subr.bf16.mxu0 %v15232_v57  ;;  %5991 = vmatprep.subr.bf16.mxu1 %v15234_v59  ;;  %v15329_v57 = vcombine.low %v1015_v47, %v1023_v48  ;;  %v15344_v59 = vcombine.high %v1030_v58, %v1038_v52  ;;  %v15346_v60 = vcombine.high %v1031_v53, %v1039_v55  ;;  %v1134_v47 = vld [vmem:[%s17537_s26 + $0x15f0] sm:$0xff]  ;;  %v6050_v48 = vlaneseq }
 0x3b1   : > { %5869 = vmatpush1.bf16.msra.mxu0 %v15231_v1  ;;  %5992 = vmatpush1.bf16.msra.mxu1 %v15233_v4  ;;  %v1055_v1 = vld [vmem:[%s17537_s26 + $0x1378] sm:$0xff]  ;;  %v15343_v4 = vcombine.low %v1030_v58, %v1038_v52  ;;  %v15440_v58 = vcombine.high %v1126_v46, %v1134_v47 }
 0x3b2   : > { %5870 = vmatprep.subr.bf16.mxu0 %v15248_v5  ;;  %5993 = vmatprep.subr.bf16.mxu1 %v15250_v7  ;;  %v15345_v5 = vcombine.low %v1031_v53, %v1039_v55  ;;  %v15360_v7 = vcombine.high %v1046_v61, %v1054_v63  ;;  %v15362_v8 = vcombine.high %v1047_v0, %v1055_v1  ;;  %v1142_v53 = vld [vmem:[%s17537_s26 + $0x1630] sm:$0xff] }
 0x3b3   : > { %v1150_v55 = vld [vmem:[%s17537_s26 + $0x1670] sm:$0xff] }
 0x3b5   : > { %5871 = vmatpush1.bf16.msra.mxu0 %v15247_v14  ;;  %5994 = vmatpush1.bf16.msra.mxu1 %v15249_v15  ;;  %v1071_v14 = vld [vmem:[%s17537_s26 + $0x13f8] sm:$0xff]  ;;  %v15359_v15 = vcombine.low %v1046_v61, %v1054_v63  ;;  %v15456_v63 = vcombine.high %v1142_v53, %v1150_v55 }
 0x3b6   : > { %5881 = vmatprep.subr.bf16.mxu0 %v15264_v13  ;;  %6004 = vmatprep.subr.bf16.mxu1 %v15266_v19  ;;  %v15361_v13 = vcombine.low %v1047_v0, %v1055_v1  ;;  %v15376_v19 = vcombine.high %v1062_v9, %v1070_v10  ;;  %v15378_v20 = vcombine.high %v1063_v12, %v1071_v14  ;;  %v1158_v1 = vld [vmem:[%s17537_s26 + $0x16b0] sm:$0xff] }
 0x3b8   : > { %5873 = vmatmul.mubr.bf16.vlgmr.msra.gmra.mrb[12].mxu0 %v17719_v23  ;;  %5996 = vmatmul.mubr.bf16.vlgmr.msra.gmra.mrb[12].mxu1 %v17719_v23  ;;  %v15295_v23 = vcombine.low %v982_v30, %v990_v31  ;;  %v1094_v31 = vld [vmem:[%s17537_s26 + $0x14b0] sm:$0xff] }
 0x3b9   : > { %5882 = vmatpush1.bf16.msra.mxu0 %v15263_v27  ;;  %6005 = vmatpush1.bf16.msra.mxu1 %v15265_v28  ;;  %v1087_v27 = vld [vmem:[%s17537_s26 + $0x1478] sm:$0xff]  ;;  %v15375_v28 = vcombine.low %v1062_v9, %v1070_v10  ;;  %v18419_v9 = vld [vmem:[%s17543_s10] ss:$2 sm:$0xff] }
 0x3ba   : > { %5883 = vmatprep.subr.bf16.mxu0 %v15280_v29  ;;  %6006 = vmatprep.subr.bf16.mxu1 %v15282_v54  ;;  %v15377_v29 = vcombine.low %v1063_v12, %v1071_v14  ;;  %v15392_v54 = vcombine.high %v1078_v22, %v1086_v24  ;;  %v15394_v30 = vcombine.high %v1079_v25, %v1087_v27 }
 0x3bb   : > { %5913 = vmatprep.mubr.bf16.mxu0 %v17729_v16  ;;  %6036 = vmatprep.mubr.bf16.mxu1 %v17729_v16  ;;  %v15313_v16 = vcombine.low %v999_v41, %v1007_v42  ;;  %v1118_v41 = vld [vmem:[%s17537_s26 + $0x1570] sm:$0xff]  ;;  %v1111_v42 = vld [vmem:[%s17537_s26 + $0x1538] sm:$0xff]  ;;  %v15455_v12 = vcombine.low %v1142_v53, %v1150_v55  ;;  %v6424_v55 = vld [vmem:[%s17545_s12 + $0x440] sm:$0xff] }
 0x3bd   : > { %5884 = vmatpush1.bf16.msra.mxu0 %v15279_v34  ;;  %6007 = vmatpush1.bf16.msra.mxu1 %v15281_v35  ;;  %v1103_v34 = vld [vmem:[%s17537_s26 + $0x14f8] sm:$0xff]  ;;  %v15391_v35 = vcombine.low %v1078_v22, %v1086_v24 }
 0x3be   : > { %5885 = vmatprep.subr.bf16.mxu0 %v15296_v36  ;;  %6008 = vmatprep.subr.bf16.mxu1 %v15298_v38  ;;  %v15393_v36 = vcombine.low %v1079_v25, %v1087_v27  ;;  %v15408_v38 = vcombine.high %v1094_v31, %v1102_v32  ;;  %v15410_v39 = vcombine.high %v1095_v33, %v1103_v34  ;;  %v1175_v24 = vld [vmem:[%s17537_s26 + $0x1738] sm:$0xff]  ;;  %v18431_v27 = vld [vmem:[%s17543_s10 + $0x1] ss:$2 sm:$0xff] }
 0x3bf   : > { %v1183_v25 = vld [vmem:[%s17537_s26 + $0x1778] sm:$0xff] }
 0x3c1   : > { %5886 = vmatpush1.bf16.msra.mxu0 %v15295_v23  ;;  %6009 = vmatpush1.bf16.msra.mxu1 %v15297_v43  ;;  %v1119_v23 = vld [vmem:[%s17537_s26 + $0x1578] sm:$0xff]  ;;  %v15407_v43 = vcombine.low %v1094_v31, %v1102_v32  ;;  %v15490_v31 = vcombine.high %v1175_v24, %v1183_v25  ;;  %v1190_v32 = vld [vmem:[%s17537_s26 + $0x17b0] sm:$0xff] }
 0x3c2   : > { %5887 = vmatprep.subr.bf16.mxu0 %v15312_v44  ;;  %6010 = vmatprep.subr.bf16.mxu1 %v15314_v45  ;;  %v15409_v44 = vcombine.low %v1095_v33, %v1103_v34  ;;  %v15424_v45 = vcombine.high %v1110_v40, %v1118_v41  ;;  %v15426_v26 = vcombine.high %v1111_v42, %v1119_v23  ;;  %v1198_v33 = vld [vmem:[%s17537_s26 + $0x17f0] sm:$0xff] }
 0x3c5   : > { %5888 = vmatpush1.bf16.msra.mxu0 %v15311_v49  ;;  %6011 = vmatpush1.bf16.msra.mxu1 %v15313_v16  ;;  %v1127_v49 = vld [vmem:[%s17537_s26 + $0x15b8] sm:$0xff] }
 0x3c6   : > { %5889 = vmatprep.subr.bf16.mxu0 %v15328_v50  ;;  %6012 = vmatprep.subr.bf16.mxu1 %v15330_v51  ;;  %v1135_v16 = vld [vmem:[%s17537_s26 + $0x15f8] sm:$0xff]  ;;  %v15423_v50 = vcombine.low %v1110_v40, %v1118_v41  ;;  %v15425_v51 = vcombine.low %v1111_v42, %v1119_v23  ;;  %v15489_v42 = vcombine.low %v1175_v24, %v1183_v25 }
 0x3c7   : > { %v15442_v52 = vcombine.high %v1127_v49, %v1135_v16  ;;  %v15441_v61 = vcombine.low %v1127_v49, %v1135_v16  ;;  %v15504_v23 = vcombine.high %v1190_v32, %v1198_v33 }
 0x3c9   : > { %5890 = vmatpush1.bf16.msra.mxu0 %v15327_v56  ;;  %6013 = vmatpush1.bf16.msra.mxu1 %v15329_v57  ;;  %v18407_v56 = vshrl.u32 %v6050_v48, 7  ;;  %v1143_v57 = vld [vmem:[%s17537_s26 + $0x1638] sm:$0xff] }
 0x3ca   : > { %5891 = vmatprep.subr.bf16.mxu0 %v15344_v59  ;;  %6014 = vmatprep.subr.bf16.mxu1 %v15346_v60  ;;  %v1151_v59 = vld [vmem:[%s17537_s26 + $0x1678] sm:$0xff]  ;;  %v15439_v60 = vcombine.low %v1126_v46, %v1134_v47  ;;  %v6420_v46 = vld [vmem:[%s17545_s12 + $0x420] sm:$0xff]  ;;  %v15503_v47 = vcombine.low %v1190_v32, %v1198_v33 }
 0x3cb   : > { %v15458_v0 = vcombine.high %v1143_v57, %v1151_v59  ;;  %v18422_v10 = vsub.s32 3, %v18407_v56  ;;  %v15457_v14 = vcombine.low %v1143_v57, %v1151_v59  ;;  %v6428_v57 = vld [vmem:[%s17545_s12 + $0x460] sm:$0xff] }
 0x3cc   : > { %v6452_v32 = vld [vmem:[%s17545_s12 + $0x520] sm:$0xff] }
 0x3cd   : > { %5892 = vmatpush1.bf16.msra.mxu0 %v15343_v4  ;;  %6015 = vmatpush1.bf16.msra.mxu1 %v15345_v5  ;;  %v1166_v4 = vld [vmem:[%s17537_s26 + $0x16f0] sm:$0xff]  ;;  %v18414_v5 = vsub.s32 1, %v18407_v56  ;;  %v6167_v40 = vrot.slane %v18431_v27, %v18422_v10 }
 0x3ce   : > { %5893 = vmatprep.subr.bf16.mxu0 %v15360_v7  ;;  %6016 = vmatprep.subr.bf16.mxu1 %v15362_v8  ;;  %v1159_v7 = vld [vmem:[%s17537_s26 + $0x16b8] sm:$0xff] }
 0x3cf   : > { %v1167_v8 = vld [vmem:[%s17537_s26 + $0x16f8] sm:$0xff]  ;;  %v6057_v22 = vrot.slane %v18419_v9, %v18414_v5 }
 0x3d1   : > { %5894 = vmatpush1.bf16.msra.mxu0 %v15359_v15  ;;  %6017 = vmatpush1.bf16.msra.mxu1 %v15361_v13  ;;  %v15472_v15 = vcombine.high %v1158_v1, %v1166_v4  ;;  %v15474_v13 = vcombine.high %v1159_v7, %v1167_v8  ;;  %v6131_v34 = vmul.f32 %v6057_v22, %v18035_v3  ;;  %v6440_v22 = vld [vmem:[%s17545_s12 + $0x4c0] sm:$0xff] }
 0x3d2   : > { %5895 = vmatprep.subr.bf16.mxu0 %v15376_v19  ;;  %6018 = vmatprep.subr.bf16.mxu1 %v15378_v20  ;;  %v1174_v19 = vld [vmem:[%s17537_s26 + $0x1730] sm:$0xff] }
 0x3d3   : > { %v1182_v20 = vld [vmem:[%s17537_s26 + $0x1770] sm:$0xff] }
 0x3d4   : > { %v15487_v41 = vcombine.low %v1174_v19, %v1182_v20 }
 0x3d5   : > { %5896 = vmatpush1.bf16.msra.mxu0 %v15375_v28  ;;  %6019 = vmatpush1.bf16.msra.mxu1 %v15377_v29  ;;  %v6065_v28 = vrot.slane %v18419_v9, %v18422_v10  ;;  %v15471_v29 = vcombine.low %v1158_v1, %v1166_v4  ;;  %v15647_v1 = vcombine.high %v6424_v55, %v6428_v57  ;;  %v6432_v4 = vld [vmem:[%s17545_s12 + $0x480] sm:$0xff] }
 0x3d6   : > { %5897 = vmatprep.subr.bf16.mxu0 %v15392_v54  ;;  %6020 = vmatprep.subr.bf16.mxu1 %v15394_v30  ;;  %v15473_v54 = vcombine.low %v1159_v7, %v1167_v8  ;;  %v15488_v30 = vcombine.high %v1174_v19, %v1182_v20  ;;  %v6436_v7 = vld [vmem:[%s17545_s12 + $0x4a0] sm:$0xff] }
 0x3d7   : > { %v6312_v19 = vld [vmem:[%s17545_s12 + $0xc0] sm:$0xff]  ;;  %v15654_v25 = vcombine.low %v6432_v4, %v6436_v7 }
 0x3d8   : > { %v6316_v20 = vld [vmem:[%s17545_s12 + $0xe0] sm:$0xff] }
 0x3d9   : > { %5898 = vmatpush1.bf16.msra.mxu0 %v15391_v35  ;;  %6021 = vmatpush1.bf16.msra.mxu1 %v15393_v36  ;;  %v6159_v35 = vrot.slane %v18431_v27, %v18414_v5  ;;  %v1191_v36 = vld [vmem:[%s17537_s26 + $0x17b8] sm:$0xff]  ;;  %v15534_v33 = vcombine.low %v6312_v19, %v6316_v20 }
 0x3da   : > { %5899 = vmatprep.subr.bf16.mxu0 %v15408_v38  ;;  %6022 = vmatprep.subr.bf16.mxu1 %v15410_v39  ;;  %v1199_v38 = vld [vmem:[%s17537_s26 + $0x17f8] sm:$0xff]  ;;  %v6133_v39 = vmul.f32 %v6065_v28, %v18039_v6  ;;  %v15535_v28 = vcombine.high %v6312_v19, %v6316_v20  ;;  %v6484_v19 = vld [vmem:[%s17545_s12 + $0x620] sm:$0xff] }
 0x3db   : > { %v15506_v3 = vcombine.high %v1191_v36, %v1199_v38  ;;  %v15505_v48 = vcombine.low %v1191_v36, %v1199_v38  ;;  %v6328_v38 = vld [vmem:[%s17545_s12 + $0x140] sm:$0xff] }
 0x3dc   : > { %v6235_v6 = vadd.f32 %v6167_v40, %v6133_v39  ;;  %v6332_v39 = vld [vmem:[%s17545_s12 + $0x160] sm:$0xff] }
 0x3dd   : > { %5900 = vmatpush1.bf16.msra.mxu0 %v15407_v43  ;;  %6023 = vmatpush1.bf16.msra.mxu1 %v15409_v44  ;;  %v6288_v43 = vld [vmem:[%s17545_s12] sm:$0xff] }
 0x3de   : > { %5901 = vmatprep.subr.bf16.mxu0 %v15424_v45  ;;  %6024 = vmatprep.subr.bf16.mxu1 %v15426_v26  ;;  %v6292_v44 = vld [vmem:[%s17545_s12 + $0x20] sm:$0xff]  ;;  %v6233_v45 = vadd.f32 %v6159_v35, %v6131_v34 }
 0x3df   : > { %v6416_v26 = vld [vmem:[%s17545_s12 + $0x400] sm:$0xff]  ;;  %v15511_v49 = vcombine.high %v6288_v43, %v6292_v44  ;;  %v15510_v53 = vcombine.low %v6288_v43, %v6292_v44 }
 0x3e0   : > { %v15639_v16 = vcombine.high %v6416_v26, %v6420_v46  ;;  %v15638_v59 = vcombine.low %v6416_v26, %v6420_v46  ;;  %v6456_v40 = vld [vmem:[%s17545_s12 + $0x540] sm:$0xff] }
 0x3e1   : > { %5902 = vmatpush1.bf16.msra.mxu0 %v15423_v50  ;;  %6025 = vmatpush1.bf16.msra.mxu1 %v15425_v51  ;;  %v6249_v50 = vmax.f32 %v6233_v45, 0.0  ;;  %v6296_v51 = vld [vmem:[%s17545_s12 + $0x40] sm:$0xff] }
 0x3e2   : > { %5903 = vmatprep.subr.bf16.mxu0 %v15440_v58  ;;  %6026 = vmatprep.subr.bf16.mxu1 %v15442_v52  ;;  %v6300_v58 = vld [vmem:[%s17545_s12 + $0x60] sm:$0xff]  ;;  %v6251_v52 = vmax.f32 %v6235_v6, 0.0  ;;  %v15550_v6 = vcombine.low %v6328_v38, %v6332_v39 }
 0x3e3   : > { %v6336_v44 = vld [vmem:[%s17545_s12 + $0x180] sm:$0xff] }
 0x3e4   : > { %v18460_v8 = vpack.c.bf16 %v6251_v52, %v6251_v52  ;;  %v6340_v45 = vld [vmem:[%s17545_s12 + $0x1a0] sm:$0xff] }
 0x3e5   : > { %5904 = vmatpush1.bf16.msra.mxu0 %v15439_v60  ;;  %6027 = vmatpush1.bf16.msra.mxu1 %v15441_v61  ;;  %v15519_v60 = vcombine.high %v6296_v51, %v6300_v58  ;;  %v6304_v61 = vld [vmem:[%s17545_s12 + $0x80] sm:$0xff] }
 0x3e6   : > { %5905 = vmatprep.subr.bf16.mxu0 %v15456_v63  ;;  %6028 = vmatprep.subr.bf16.mxu1 %v15458_v0  ;;  %v6308_v63 = vld [vmem:[%s17545_s12 + $0xa0] sm:$0xff]  ;;  %v18455_v0 = vpack.c.bf16 %v6249_v50, %v6249_v50 }
 0x3e7   : > { %v15526_v24 = vcombine.low %v6304_v61, %v6308_v63  ;;  %v6464_v26 = vld [vmem:[%s17545_s12 + $0x580] sm:$0xff] }
 0x3e8   : > { %v6468_v46 = vld [vmem:[%s17545_s12 + $0x5a0] sm:$0xff] }
 0x3e9   : > { %5906 = vmatpush1.bf16.msra.mxu0 %v15455_v12  ;;  %6029 = vmatpush1.bf16.msra.mxu1 %v15457_v14  ;;  %v15518_v12 = vcombine.low %v6296_v51, %v6300_v58  ;;  %v15646_v14 = vcombine.low %v6424_v55, %v6428_v57  ;;  %v6344_v50 = vld [vmem:[%s17545_s12 + $0x1c0] sm:$0xff] }
 0x3ea   : > { %5907 = vmatprep.subr.bf16.mxu0 %v15472_v15  ;;  %6030 = vmatprep.subr.bf16.mxu1 %v15474_v13  ;;  %v15527_v15 = vcombine.high %v6304_v61, %v6308_v63  ;;  %v15655_v13 = vcombine.high %v6432_v4, %v6436_v7  ;;  %v6348_v51 = vld [vmem:[%s17545_s12 + $0x1e0] sm:$0xff] }
 0x3eb   : > { %v6476_v55 = vld [vmem:[%s17545_s12 + $0x5e0] sm:$0xff]  ;;  %v15567_v4 = vcombine.high %v6344_v50, %v6348_v51  ;;  %v15566_v20 = vcombine.low %v6344_v50, %v6348_v51 }
 0x3ec   : > { %v6516_v50 = vld [vmem:[%s17545_s12 + $0x720] sm:$0xff] }
 0x3ed   : > { %5908 = vmatpush1.bf16.msra.mxu0 %v15471_v29  ;;  %6031 = vmatpush1.bf16.msra.mxu1 %v15473_v54  ;;  %v6320_v54 = vld [vmem:[%s17545_s12 + $0x100] sm:$0xff] }
 0x3ee   : > { %5909 = vmatprep.subr.bf16.mxu0 %v15488_v30  ;;  %6032 = vmatprep.subr.bf16.mxu1 %v15490_v31  ;;  %v6324_v30 = vld [vmem:[%s17545_s12 + $0x120] sm:$0xff] }
 0x3ef   : > { %v6448_v31 = vld [vmem:[%s17545_s12 + $0x500] sm:$0xff]  ;;  %v15543_v35 = vcombine.high %v6320_v54, %v6324_v30 }
 0x3f0   : > { %v15671_v36 = vcombine.high %v6448_v31, %v6452_v32 }
 0x3f1   : > { %5910 = vmatpush1.bf16.msra.mxu0 %v15487_v41  ;;  %6033 = vmatpush1.bf16.msra.mxu1 %v15489_v42  ;;  %v6460_v41 = vld [vmem:[%s17545_s12 + $0x560] sm:$0xff]  ;;  %v15542_v42 = vcombine.low %v6320_v54, %v6324_v30 }
 0x3f2   : > { %5911 = vmatprep.subr.bf16.mxu0 %v15504_v23  ;;  %6034 = vmatprep.subr.bf16.mxu1 %v15506_v3  ;;  %v15670_v23 = vcombine.low %v6448_v31, %v6452_v32  ;;  %v15551_v3 = vcombine.high %v6328_v38, %v6332_v39  ;;  %v15679_v43 = vcombine.high %v6456_v40, %v6460_v41  ;;  %v6492_v54 = vld [vmem:[%s17545_s12 + $0x660] sm:$0xff] }
 0x3f3   : > { %v6500_v38 = vld [vmem:[%s17545_s12 + $0x6a0] sm:$0xff] }
 0x3f5   : > { %5912 = vmatpush1.bf16.msra.mxu0 %v15503_v47  ;;  %6035 = vmatpush1.bf16.msra.mxu1 %v15505_v48  ;;  %v15678_v47 = vcombine.low %v6456_v40, %v6460_v41  ;;  %v15559_v48 = vcombine.high %v6336_v44, %v6340_v45 }
 0x3f6   : > { %12432 = vmatprep.subr.bf16.mxu0 %v15511_v49  ;;  %12473 = vmatprep.subr.bf16.mxu1 %v15639_v16  ;;  %v15687_v16 = vcombine.high %v6464_v26, %v6468_v46 }
 0x3f8   : > { %5914 = vmatmul.mubr.bf16.vlgmr.msra.gmra.mrb[12].mxu0 %v17797_v37  ;;  %6037 = vmatmul.mubr.bf16.vlgmr.msra.gmra.mrb[12].mxu1 %v17797_v37  ;;  %v6444_v37 = vld [vmem:[%s17545_s12 + $0x4e0] sm:$0xff] }
 0x3f9   : > { %12433 = vmatpush1.bf16.msra.mxu0 %v15510_v53  ;;  %12464 = vmatprep.mubr.bf16.mxu0 %v18455_v0  ;;  %v15663_v29 = vcombine.high %v6440_v22, %v6444_v37  ;;  %v15662_v34 = vcombine.low %v6440_v22, %v6444_v37  ;;  %v6472_v53 = vld [vmem:[%s17545_s12 + $0x5c0] sm:$0xff] }
 0x3fa   : > { %12474 = vmatpush1.bf16.msra.mxu1 %v15638_v59  ;;  %12505 = vmatprep.mubr.bf16.mxu1 %v18460_v8  ;;  %v15694_v22 = vcombine.low %v6472_v53, %v6476_v55 }
 0x3fb   : > { %12434 = vmatprep.subr.bf16.mxu0 %v15519_v60  ;;  %12475 = vmatprep.subr.bf16.mxu1 %v15647_v1  ;;  %v15558_v60 = vcombine.low %v6336_v44, %v6340_v45  ;;  %v15686_v1 = vcombine.low %v6464_v26, %v6468_v46  ;;  %v6508_v44 = vld [vmem:[%s17545_s12 + $0x6e0] sm:$0xff] }
 0x3fd   : > { %12435 = vmatpush1.bf16.msra.mxu0 %v15518_v12  ;;  %v15695_v12 = vcombine.high %v6472_v53, %v6476_v55  ;;  %v18514_v53 = vsub.s32 0, %v18407_v56 }
 0x3fe   : > { %12476 = vmatpush1.bf16.msra.mxu1 %v15646_v14  ;;  %12436 = vmatprep.subr.bf16.mxu0 %v15527_v15  ;;  %v6352_v14 = vld [vmem:[%s17545_s12 + $0x200] sm:$0xff] }
 0x3ff   : > { %12477 = vmatprep.subr.bf16.mxu1 %v15655_v13  ;;  %v6356_v15 = vld [vmem:[%s17545_s12 + $0x220] sm:$0xff] }
 0x400   : > { %v6480_v13 = vld [vmem:[%s17545_s12 + $0x600] sm:$0xff]  ;;  %v15575_v37 = vcombine.high %v6352_v14, %v6356_v15  ;;  %v15574_v30 = vcombine.low %v6352_v14, %v6356_v15  ;;  %v18527_v14 = vsub.s32 7, %v18407_v56 }
 0x401   : > { %12437 = vmatpush1.bf16.msra.mxu0 %v15526_v24  ;;  %v15703_v24 = vcombine.high %v6480_v13, %v6484_v19  ;;  %v15702_v31 = vcombine.low %v6480_v13, %v6484_v19  ;;  %v6053_v13 = vrot.slane %v18419_v9, %v18514_v53 }
 0x402   : > { %12478 = vmatpush1.bf16.msra.mxu1 %v15654_v25  ;;  %12438 = vmatprep.subr.bf16.mxu0 %v15535_v28  ;;  %v6360_v25 = vld [vmem:[%s17545_s12 + $0x240] sm:$0xff] }
 0x403   : > { %12479 = vmatprep.subr.bf16.mxu1 %v15663_v29  ;;  %v6364_v28 = vld [vmem:[%s17545_s12 + $0x260] sm:$0xff] }
 0x404   : > { %v6488_v29 = vld [vmem:[%s17545_s12 + $0x640] sm:$0xff]  ;;  %v15583_v32 = vcombine.high %v6360_v25, %v6364_v28  ;;  %v15582_v39 = vcombine.low %v6360_v25, %v6364_v28 }
 0x405   : > { %12439 = vmatpush1.bf16.msra.mxu0 %v15534_v33  ;;  %v15711_v33 = vcombine.high %v6488_v29, %v6492_v54  ;;  %v15710_v40 = vcombine.low %v6488_v29, %v6492_v54  ;;  %v6404_v25 = vld [vmem:[%s17545_s12 + $0x3a0] sm:$0xff] }
 0x406   : > { %12480 = vmatpush1.bf16.msra.mxu1 %v15662_v34  ;;  %12440 = vmatprep.subr.bf16.mxu0 %v15543_v35  ;;  %v6368_v34 = vld [vmem:[%s17545_s12 + $0x280] sm:$0xff] }
 0x407   : > { %12481 = vmatprep.subr.bf16.mxu1 %v15671_v36  ;;  %v6372_v35 = vld [vmem:[%s17545_s12 + $0x2a0] sm:$0xff] }
 0x408   : > { %v6496_v36 = vld [vmem:[%s17545_s12 + $0x680] sm:$0xff]  ;;  %v15591_v41 = vcombine.high %v6368_v34, %v6372_v35  ;;  %v15590_v45 = vcombine.low %v6368_v34, %v6372_v35 }
 0x409   : > { %12441 = vmatpush1.bf16.msra.mxu0 %v15542_v42  ;;  %v15719_v42 = vcombine.high %v6496_v36, %v6500_v38  ;;  %v15718_v26 = vcombine.low %v6496_v36, %v6500_v38  ;;  %v6528_v29 = vld [vmem:[%s17545_s12 + $0x780] sm:$0xff] }
 0x40a   : > { %12482 = vmatpush1.bf16.msra.mxu1 %v15670_v23  ;;  %12442 = vmatprep.subr.bf16.mxu0 %v15551_v3  ;;  %v6376_v23 = vld [vmem:[%s17545_s12 + $0x2c0] sm:$0xff] }
 0x40b   : > { %v18481_v49 = vpop.f32.mrb[8].mxu0  ;;  %12483 = vmatprep.subr.bf16.mxu1 %v15679_v43  ;;  %v18485_v58 = vpop.f32.mrb[8].mxu1  ;;  %v6380_v3 = vld [vmem:[%s17545_s12 + $0x2e0] sm:$0xff] }
 0x40c   : > { %v18487_v52 = vpop.f32.mrb[9].mxu0  ;;  %v18491_v57 = vpop.f32.mrb[9].mxu1  ;;  %v6504_v43 = vld [vmem:[%s17545_s12 + $0x6c0] sm:$0xff]  ;;  %v15599_v46 = vcombine.high %v6376_v23, %v6380_v3  ;;  %v15598_v51 = vcombine.low %v6376_v23, %v6380_v3 }
 0x40d   : > { %v5673_v59 = vpop.f32.mrb[10].mxu0  ;;  %12443 = vmatpush1.bf16.msra.mxu0 %v15550_v6  ;;  %v5796_v61 = vpop.f32.mrb[10].mxu1  ;;  %v15727_v6 = vcombine.high %v6504_v43, %v6508_v44  ;;  %v15726_v55 = vcombine.low %v6504_v43, %v6508_v44  ;;  %v6532_v54 = vld [vmem:[%s17545_s12 + $0x7a0] sm:$0xff] }
 0x40e   : > { %12484 = vmatpush1.bf16.msra.mxu1 %v15678_v47  ;;  %v5674_v63 = vpop.f32.mrb[11].mxu0  ;;  %12444 = vmatprep.subr.bf16.mxu0 %v15559_v48  ;;  %v5797_v7 = vpop.f32.mrb[11].mxu1  ;;  %v6384_v47 = vld [vmem:[%s17545_s12 + $0x300] sm:$0xff] }
 0x40f   : > { %12485 = vmatprep.subr.bf16.mxu1 %v15687_v16  ;;  %v6388_v48 = vld [vmem:[%s17545_s12 + $0x320] sm:$0xff] }
 0x410   : > { %v6512_v16 = vld [vmem:[%s17545_s12 + $0x700] sm:$0xff]  ;;  %v15607_v59 = vcombine.high %v6384_v47, %v6388_v48  ;;  %v15606_v15 = vcombine.low %v6384_v47, %v6388_v48 }
 0x411   : > { %12445 = vmatpush1.bf16.msra.mxu0 %v15558_v60  ;;  %v18517_v60 = vsub.s32 2, %v18407_v56  ;;  %v15735_v61 = vcombine.high %v6512_v16, %v6516_v50  ;;  %v6392_v63 = vld [vmem:[%s17545_s12 + $0x340] sm:$0xff]  ;;  %v15734_v19 = vcombine.low %v6512_v16, %v6516_v50 }
 0x412   : > { %12486 = vmatpush1.bf16.msra.mxu1 %v15686_v1  ;;  %12446 = vmatprep.subr.bf16.mxu0 %v15567_v4  ;;  %v6396_v1 = vld [vmem:[%s17545_s12 + $0x360] sm:$0xff]  ;;  %v18522_v4 = vsub.s32 5, %v18407_v56 }
 0x413   : > { %12487 = vmatprep.subr.bf16.mxu1 %v15695_v12  ;;  %v6520_v7 = vld [vmem:[%s17545_s12 + $0x740] sm:$0xff]  ;;  %v6163_v38 = vrot.slane %v18431_v27, %v18517_v60 }
 0x414   : > { %v6524_v12 = vld [vmem:[%s17545_s12 + $0x760] sm:$0xff]  ;;  %v6073_v28 = vrot.slane %v18419_v9, %v18522_v4  ;;  %v6175_v23 = vrot.slane %v18431_v27, %v18522_v4 }
 0x415   : > { %12447 = vmatpush1.bf16.msra.mxu0 %v15566_v20  ;;  %v15615_v20 = vcombine.high %v6392_v63, %v6396_v1  ;;  %v15742_v34 = vcombine.low %v6520_v7, %v6524_v12  ;;  %v6540_v3 = vld [vmem:[%s17545_s12 + $0x7e0] sm:$0xff] }
 0x416   : > { %12488 = vmatpush1.bf16.msra.mxu1 %v15694_v22  ;;  %12448 = vmatprep.subr.bf16.mxu0 %v15575_v37  ;;  %v6061_v22 = vrot.slane %v18419_v9, %v18517_v60  ;;  %v15743_v37 = vcombine.high %v6520_v7, %v6524_v12  ;;  %v6544_v47 = vld [vmem:[%s17545_s12 + $0x800] sm:$0xff] }
 0x417   : > { %12489 = vmatprep.subr.bf16.mxu1 %v15703_v24  ;;  %v6400_v24 = vld [vmem:[%s17545_s12 + $0x380] sm:$0xff] }
 0x418   : > { %v15623_v35 = vcombine.high %v6400_v24, %v6404_v25  ;;  %v6132_v36 = vmul.f32 %v6061_v22, %v18033_v2  ;;  %v6183_v2 = vrot.slane %v18431_v27, %v18527_v14  ;;  %v15622_v44 = vcombine.low %v6400_v24, %v6404_v25  ;;  %v6548_v48 = vld [vmem:[%s17545_s12 + $0x820] sm:$0xff] }
 0x419   : > { %12449 = vmatpush1.bf16.msra.mxu0 %v15574_v30  ;;  %v6155_v30 = vrot.slane %v18431_v27, %v18514_v53  ;;  %v6676_v50 = vld [vmem:[%s17545_s12 + $0xc20] sm:$0xff] }
 0x41a   : > { %12490 = vmatpush1.bf16.msra.mxu1 %v15702_v31  ;;  %12450 = vmatprep.subr.bf16.mxu0 %v15583_v32  ;;  %v6081_v31 = vrot.slane %v18419_v9, %v18527_v14  ;;  %v15614_v32 = vcombine.low %v6392_v63, %v6396_v1  ;;  %v15767_v63 = vcombine.high %v6544_v47, %v6548_v48  ;;  %v6680_v22 = vld [vmem:[%s17545_s12 + $0xc40] sm:$0xff] }
 0x41b   : > { %12491 = vmatprep.subr.bf16.mxu1 %v15711_v33  ;;  %v6130_v33 = vmul.f32 %v6053_v13, %v18029_v62  ;;  %v6536_v62 = vld [vmem:[%s17545_s12 + $0x7c0] sm:$0xff] }
 0x41c   : > { %v6137_v43 = vmul.f32 %v6081_v31, %v18251_v21  ;;  %v6672_v21 = vld [vmem:[%s17545_s12 + $0xc00] sm:$0xff] }
 0x41d   : > { %12451 = vmatpush1.bf16.msra.mxu0 %v15582_v39  ;;  %v15751_v39 = vcombine.high %v6528_v29, %v6532_v54  ;;  %v15895_v7 = vcombine.high %v6672_v21, %v6676_v50  ;;  %v6556_v13 = vld [vmem:[%s17545_s12 + $0x860] sm:$0xff]  ;;  %v15894_v25 = vcombine.low %v6672_v21, %v6676_v50 }
 0x41e   : > { %12492 = vmatpush1.bf16.msra.mxu1 %v15710_v40  ;;  %12452 = vmatprep.subr.bf16.mxu0 %v15591_v41  ;;  %v6408_v40 = vld [vmem:[%s17545_s12 + $0x3c0] sm:$0xff] }
 0x41f   : > { %12493 = vmatprep.subr.bf16.mxu1 %v15719_v42  ;;  %v6412_v41 = vld [vmem:[%s17545_s12 + $0x3e0] sm:$0xff]  ;;  %v6135_v42 = vmul.f32 %v6073_v28, %v18247_v18  ;;  %v15750_v18 = vcombine.low %v6528_v29, %v6532_v54 }
 0x420   : > { %v6560_v54 = vld [vmem:[%s17545_s12 + $0x880] sm:$0xff] }
 0x421   : > { %12453 = vmatpush1.bf16.msra.mxu0 %v15590_v45  ;;  %v6232_v45 = vadd.f32 %v6155_v30, %v6130_v33  ;;  %v6237_v16 = vadd.f32 %v6175_v23, %v6135_v42  ;;  %v6564_v30 = vld [vmem:[%s17545_s12 + $0x8a0] sm:$0xff] }
 0x422   : > { %12494 = vmatpush1.bf16.msra.mxu1 %v15718_v26  ;;  %12454 = vmatprep.subr.bf16.mxu0 %v15599_v46  ;;  %v15631_v26 = vcombine.high %v6408_v40, %v6412_v41  ;;  %v6234_v46 = vadd.f32 %v6163_v38, %v6132_v36  ;;  %v6688_v33 = vld [vmem:[%s17545_s12 + $0xc80] sm:$0xff] }
 0x423   : > { %12495 = vmatprep.subr.bf16.mxu1 %v15727_v6  ;;  %v15759_v6 = vcombine.high %v6536_v62, %v6540_v3  ;;  %v6253_v12 = vmax.f32 %v6237_v16, 0.0  ;;  %v6572_v42 = vld [vmem:[%s17545_s12 + $0x8e0] sm:$0xff] }
 0x424   : > { %v6250_v1 = vmax.f32 %v6234_v46, 0.0  ;;  %v6696_v23 = vld [vmem:[%s17545_s12 + $0xcc0] sm:$0xff] }
 0x425   : > { %12455 = vmatpush1.bf16.msra.mxu0 %v15598_v51  ;;  %v6239_v51 = vadd.f32 %v6183_v2, %v6137_v43  ;;  %v18571_v31 = vpack.c.bf16 %v6253_v12, %v6253_v12  ;;  %v6708_v46 = vld [vmem:[%s17545_s12 + $0xd20] sm:$0xff] }
 0x426   : > { %12496 = vmatpush1.bf16.msra.mxu1 %v15726_v55  ;;  %12456 = vmatprep.subr.bf16.mxu0 %v15607_v59  ;;  %v15630_v55 = vcombine.low %v6408_v40, %v6412_v41  ;;  %v6248_v59 = vmax.f32 %v6232_v45, 0.0  ;;  %v18567_v28 = vpack.c.bf16 %v6250_v1, %v6250_v1  ;;  %v6568_v41 = vld [vmem:[%s17545_s12 + $0x8c0] sm:$0xff] }
 0x427   : > { %12497 = vmatprep.subr.bf16.mxu1 %v15735_v61  ;;  %v15758_v61 = vcombine.low %v6536_v62, %v6540_v3  ;;  %v6700_v62 = vld [vmem:[%s17545_s12 + $0xce0] sm:$0xff]  ;;  %v15782_v3 = vcombine.low %v6560_v54, %v6564_v30  ;;  %v15791_v2 = vcombine.high %v6568_v41, %v6572_v42 }
 0x428   : > { %v18565_v24 = vpack.c.bf16 %v6248_v59, %v6248_v59  ;;  %v6576_v45 = vld [vmem:[%s17545_s12 + $0x900] sm:$0xff] }
 0x429   : > { %12457 = vmatpush1.bf16.msra.mxu0 %v15606_v15  ;;  %v6552_v15 = vld [vmem:[%s17545_s12 + $0x840] sm:$0xff] }
 0x42a   : > { %12498 = vmatpush1.bf16.msra.mxu1 %v15734_v19  ;;  %12458 = vmatprep.subr.bf16.mxu0 %v15615_v20  ;;  %v6255_v19 = vmax.f32 %v6239_v51, 0.0  ;;  %v15766_v20 = vcombine.low %v6544_v47, %v6548_v48  ;;  %v15775_v29 = vcombine.high %v6552_v15, %v6556_v13  ;;  %v15774_v36 = vcombine.low %v6552_v15, %v6556_v13  ;;  %v6584_v21 = vld [vmem:[%s17545_s12 + $0x940] sm:$0xff] }
 0x42b   : > { %12499 = vmatprep.subr.bf16.mxu1 %v15743_v37  ;;  %v6684_v37 = vld [vmem:[%s17545_s12 + $0xc60] sm:$0xff]  ;;  %v15918_v47 = vcombine.low %v6696_v23, %v6700_v62 }
 0x42c   : > { %v15902_v38 = vcombine.low %v6680_v22, %v6684_v37  ;;  %v6588_v50 = vld [vmem:[%s17545_s12 + $0x960] sm:$0xff] }
 0x42d   : > { %12459 = vmatpush1.bf16.msra.mxu0 %v15614_v32  ;;  %v15903_v32 = vcombine.high %v6680_v22, %v6684_v37  ;;  %v6712_v51 = vld [vmem:[%s17545_s12 + $0xd40] sm:$0xff] }
 0x42e   : > { %12500 = vmatpush1.bf16.msra.mxu1 %v15742_v34  ;;  %12460 = vmatprep.subr.bf16.mxu0 %v15623_v35  ;;  %v6692_v34 = vld [vmem:[%s17545_s12 + $0xca0] sm:$0xff]  ;;  %v18576_v35 = vpack.c.bf16 %v6255_v19, %v6255_v19  ;;  %v15806_v19 = vcombine.low %v6584_v21, %v6588_v50 }
 0x42f   : > { %12501 = vmatprep.subr.bf16.mxu1 %v15751_v39  ;;  %v15783_v39 = vcombine.high %v6560_v54, %v6564_v30  ;;  %v15911_v40 = vcombine.high %v6688_v33, %v6692_v34  ;;  %v15910_v43 = vcombine.low %v6688_v33, %v6692_v34  ;;  %v6596_v12 = vld [vmem:[%s17545_s12 + $0x9a0] sm:$0xff] }
 0x430   : > { %v6720_v15 = vld [vmem:[%s17545_s12 + $0xd80] sm:$0xff] }
 0x431   : > { %12461 = vmatpush1.bf16.msra.mxu0 %v15622_v44  ;;  %v15919_v44 = vcombine.high %v6696_v23, %v6700_v62  ;;  %v6724_v13 = vld [vmem:[%s17545_s12 + $0xda0] sm:$0xff] }
 0x432   : > { %12502 = vmatpush1.bf16.msra.mxu1 %v15750_v18  ;;  %12462 = vmatprep.subr.bf16.mxu0 %v15631_v26  ;;  %v6580_v18 = vld [vmem:[%s17545_s12 + $0x920] sm:$0xff]  ;;  %v15943_v37 = vcombine.high %v6720_v15, %v6724_v13  ;;  %v15942_v33 = vcombine.low %v6720_v15, %v6724_v13 }
 0x433   : > { %12503 = vmatprep.subr.bf16.mxu1 %v15759_v6  ;;  %v6704_v26 = vld [vmem:[%s17545_s12 + $0xd00] sm:$0xff]  ;;  %v15790_v6 = vcombine.low %v6568_v41, %v6572_v42  ;;  %v15799_v48 = vcombine.high %v6576_v45, %v6580_v18  ;;  %v15798_v59 = vcombine.low %v6576_v45, %v6580_v18 }
 0x434   : > { %v15927_v16 = vcombine.high %v6704_v26, %v6708_v46  ;;  %v6728_v54 = vld [vmem:[%s17545_s12 + $0xdc0] sm:$0xff] }
 0x435   : > { %12463 = vmatpush1.bf16.msra.mxu0 %v15630_v55  ;;  %v6716_v55 = vld [vmem:[%s17545_s12 + $0xd60] sm:$0xff] }
 0x436   : > { %12504 = vmatpush1.bf16.msra.mxu1 %v15758_v61  ;;  %12514 = vmatprep.subr.bf16.mxu0 %v15767_v63  ;;  %v15926_v61 = vcombine.low %v6704_v26, %v6708_v46  ;;  %v15807_v63 = vcombine.high %v6584_v21, %v6588_v50  ;;  %v15935_v1 = vcombine.high %v6712_v51, %v6716_v55  ;;  %v6732_v30 = vld [vmem:[%s17545_s12 + $0xde0] sm:$0xff] }
 0x437   : > { %12555 = vmatprep.subr.bf16.mxu1 %v15895_v7  ;;  %v6592_v7 = vld [vmem:[%s17545_s12 + $0x980] sm:$0xff]  ;;  %v15950_v23 = vcombine.low %v6728_v54, %v6732_v30 }
 0x438   : > { %12465 = vmatmul.mubr.bf16.vlgmr.msra.gmra.mrb[16].mxu0 %v18565_v24  ;;  %v15815_v22 = vcombine.high %v6592_v7, %v6596_v12  ;;  %v6740_v41 = vld [vmem:[%s17545_s12 + $0xe20] sm:$0xff] }
 0x439   : > { %12506 = vmatmul.mubr.bf16.vlgmr.msra.gmra.mrb[16].mxu1 %v18567_v28  ;;  %12515 = vmatpush1.bf16.msra.mxu0 %v15766_v20  ;;  %v15934_v20 = vcombine.low %v6712_v51, %v6716_v55  ;;  %v6748_v45 = vld [vmem:[%s17545_s12 + $0xe60] sm:$0xff] }
 0x43a   : > { %12546 = vmatprep.mubr.bf16.mxu0 %v18571_v31  ;;  %12556 = vmatpush1.bf16.msra.mxu1 %v15894_v25  ;;  %v6600_v25 = vld [vmem:[%s17545_s12 + $0x9c0] sm:$0xff] }
 0x43b   : > { %12587 = vmatprep.mubr.bf16.mxu1 %v18576_v35  ;;  %12516 = vmatprep.subr.bf16.mxu0 %v15775_v29  ;;  %v6604_v29 = vld [vmem:[%s17545_s12 + $0x9e0] sm:$0xff] }
 0x43c   : > { %12557 = vmatprep.subr.bf16.mxu1 %v15903_v32  ;;  %v15814_v32 = vcombine.low %v6592_v7, %v6596_v12  ;;  %v15823_v34 = vcombine.high %v6600_v25, %v6604_v29  ;;  %v15822_v42 = vcombine.low %v6600_v25, %v6604_v29  ;;  %v6756_v21 = vld [vmem:[%s17545_s12 + $0xea0] sm:$0xff] }
 0x43d   : > { %12517 = vmatpush1.bf16.msra.mxu0 %v15774_v36  ;;  %v15951_v36 = vcombine.high %v6728_v54, %v6732_v30  ;;  %v6764_v7 = vld [vmem:[%s17545_s12 + $0xee0] sm:$0xff]  ;;  %v18622_v54 = vsub.s32 4, %v18407_v56 }
 0x43e   : > { %12558 = vmatpush1.bf16.msra.mxu1 %v15902_v38  ;;  %12518 = vmatprep.subr.bf16.mxu0 %v15783_v39  ;;  %v6608_v38 = vld [vmem:[%s17545_s12 + $0xa00] sm:$0xff] }
 0x43f   : > { %12559 = vmatprep.subr.bf16.mxu1 %v15911_v40  ;;  %v6612_v39 = vld [vmem:[%s17545_s12 + $0xa20] sm:$0xff] }
 0x440   : > { %v6736_v40 = vld [vmem:[%s17545_s12 + $0xe00] sm:$0xff]  ;;  %v15831_v62 = vcombine.high %v6608_v38, %v6612_v39  ;;  %v15830_v18 = vcombine.low %v6608_v38, %v6612_v39 }
 0x441   : > { %12519 = vmatpush1.bf16.msra.mxu0 %v15782_v3  ;;  %v15959_v3 = vcombine.high %v6736_v40, %v6740_v41  ;;  %v15958_v26 = vcombine.low %v6736_v40, %v6740_v41  ;;  %v6772_v25 = vld [vmem:[%s17545_s12 + $0xf20] sm:$0xff]  ;;  %v18632_v41 = vld [vmem:[%s17543_s10 + $0x10] ss:$2 sm:$0xff] }
 0x442   : > { %12560 = vmatpush1.bf16.msra.mxu1 %v15910_v43  ;;  %12520 = vmatprep.subr.bf16.mxu0 %v15791_v2  ;;  %v6616_v43 = vld [vmem:[%s17545_s12 + $0xa40] sm:$0xff] }
 0x443   : > { %12561 = vmatprep.subr.bf16.mxu1 %v15919_v44  ;;  %v6620_v2 = vld [vmem:[%s17545_s12 + $0xa60] sm:$0xff] }
 0x444   : > { %v6744_v44 = vld [vmem:[%s17545_s12 + $0xe40] sm:$0xff]  ;;  %v15839_v46 = vcombine.high %v6616_v43, %v6620_v2  ;;  %v15838_v50 = vcombine.low %v6616_v43, %v6620_v2 }
 0x445   : > { %12521 = vmatpush1.bf16.msra.mxu0 %v15790_v6  ;;  %v15967_v6 = vcombine.high %v6744_v44, %v6748_v45  ;;  %v15966_v51 = vcombine.low %v6744_v44, %v6748_v45  ;;  %v6652_v38 = vld [vmem:[%s17545_s12 + $0xb60] sm:$0xff]  ;;  %v6089_v45 = vrot.slane %v18632_v41, %v18414_v5 }
 0x446   : > { %12562 = vmatpush1.bf16.msra.mxu1 %v15918_v47  ;;  %12522 = vmatprep.subr.bf16.mxu0 %v15799_v48  ;;  %v6624_v47 = vld [vmem:[%s17545_s12 + $0xa80] sm:$0xff] }
 0x447   : > { %12563 = vmatprep.subr.bf16.mxu1 %v15927_v16  ;;  %v6628_v48 = vld [vmem:[%s17545_s12 + $0xaa0] sm:$0xff] }
 0x448   : > { %v6752_v16 = vld [vmem:[%s17545_s12 + $0xe80] sm:$0xff]  ;;  %v15847_v55 = vcombine.high %v6624_v47, %v6628_v48  ;;  %v15846_v12 = vcombine.low %v6624_v47, %v6628_v48  ;;  %v6097_v47 = vrot.slane %v18632_v41, %v18422_v10 }
 0x449   : > { %12523 = vmatpush1.bf16.msra.mxu0 %v15798_v59  ;;  %v15975_v59 = vcombine.high %v6752_v16, %v6756_v21  ;;  %v15974_v15 = vcombine.low %v6752_v16, %v6756_v21  ;;  %v6776_v39 = vld [vmem:[%s17545_s12 + $0xf40] sm:$0xff] }
 0x44a   : > { %12564 = vmatpush1.bf16.msra.mxu1 %v15926_v61  ;;  %12524 = vmatprep.subr.bf16.mxu0 %v15807_v63  ;;  %v6632_v61 = vld [vmem:[%s17545_s12 + $0xac0] sm:$0xff] }
 0x44b   : > { %12565 = vmatprep.subr.bf16.mxu1 %v15935_v1  ;;  %v6636_v63 = vld [vmem:[%s17545_s12 + $0xae0] sm:$0xff] }
 0x44c   : > { %v6760_v1 = vld [vmem:[%s17545_s12 + $0xec0] sm:$0xff]  ;;  %v15855_v13 = vcombine.high %v6632_v61, %v6636_v63  ;;  %v15854_v29 = vcombine.low %v6632_v61, %v6636_v63  ;;  %v6139_v63 = vmul.f32 %v6089_v45, %v18487_v52 }
 0x44d   : > { %12525 = vmatpush1.bf16.msra.mxu0 %v15806_v19  ;;  %v15983_v19 = vcombine.high %v6760_v1, %v6764_v7  ;;  %v15982_v30 = vcombine.low %v6760_v1, %v6764_v7  ;;  %v6780_v40 = vld [vmem:[%s17545_s12 + $0xf60] sm:$0xff] }
 0x44e   : > { %12566 = vmatpush1.bf16.msra.mxu1 %v15934_v20  ;;  %12526 = vmatprep.subr.bf16.mxu0 %v15815_v22  ;;  %v6640_v20 = vld [vmem:[%s17545_s12 + $0xb00] sm:$0xff]  ;;  %v15999_v43 = vcombine.high %v6776_v39, %v6780_v40  ;;  %v15998_v16 = vcombine.low %v6776_v39, %v6780_v40 }
 0x44f   : > { %12567 = vmatprep.subr.bf16.mxu1 %v15943_v37  ;;  %v6644_v22 = vld [vmem:[%s17545_s12 + $0xb20] sm:$0xff] }
 0x450   : > { %v6768_v37 = vld [vmem:[%s17545_s12 + $0xf00] sm:$0xff] }
 0x451   : > { %12527 = vmatpush1.bf16.msra.mxu0 %v15814_v32  ;;  %v15863_v32 = vcombine.high %v6640_v20, %v6644_v22  ;;  %v6656_v2 = vld [vmem:[%s17545_s12 + $0xb80] sm:$0xff] }
 0x452   : > { %12568 = vmatpush1.bf16.msra.mxu1 %v15942_v33  ;;  %12528 = vmatprep.subr.bf16.mxu0 %v15823_v34  ;;  %v18625_v33 = vsub.s32 6, %v18407_v56  ;;  %v15991_v34 = vcombine.high %v6768_v37, %v6772_v25  ;;  %v15990_v56 = vcombine.low %v6768_v37, %v6772_v25  ;;  %v6660_v44 = vld [vmem:[%s17545_s12 + $0xba0] sm:$0xff] }
 0x453   : > { %12569 = vmatprep.subr.bf16.mxu1 %v15951_v36  ;;  %v6648_v36 = vld [vmem:[%s17545_s12 + $0xb40] sm:$0xff]  ;;  %v15879_v21 = vcombine.high %v6656_v2, %v6660_v44 }
 0x454   : > { %v6668_v61 = vld [vmem:[%s17545_s12 + $0xbe0] sm:$0xff] }
 0x455   : > { %12529 = vmatpush1.bf16.msra.mxu0 %v15822_v42  ;;  %v15862_v42 = vcombine.low %v6640_v20, %v6644_v22  ;;  %v6796_v7 = vld [vmem:[%s17545_s12 + $0xfe0] sm:$0xff] }
 0x456   : > { %12570 = vmatpush1.bf16.msra.mxu1 %v15950_v23  ;;  %12530 = vmatprep.subr.bf16.mxu0 %v15831_v62  ;;  %v6069_v23 = vrot.slane %v18419_v9, %v18622_v54  ;;  %v15871_v62 = vcombine.high %v6648_v36, %v6652_v38  ;;  %v6800_v22 = vld [vmem:[%s17545_s12 + $0x1000] sm:$0xff] }
 0x457   : > { %12571 = vmatprep.subr.bf16.mxu1 %v15959_v3  ;;  %v6077_v3 = vrot.slane %v18419_v9, %v18625_v33  ;;  %v15870_v9 = vcombine.low %v6648_v36, %v6652_v38  ;;  %v6804_v37 = vld [vmem:[%s17545_s12 + $0x1020] sm:$0xff] }
 0x458   : > { %v6134_v48 = vmul.f32 %v6069_v23, %v18241_v11  ;;  %v6792_v11 = vld [vmem:[%s17545_s12 + $0xfc0] sm:$0xff]  ;;  %v16023_v38 = vcombine.high %v6800_v22, %v6804_v37 }
 0x459   : > { %12531 = vmatpush1.bf16.msra.mxu0 %v15830_v18  ;;  %v6784_v18 = vld [vmem:[%s17545_s12 + $0xf80] sm:$0xff]  ;;  %v16015_v20 = vcombine.high %v6792_v11, %v6796_v7  ;;  %v16014_v36 = vcombine.low %v6792_v11, %v6796_v7 }
 0x45a   : > { %12572 = vmatpush1.bf16.msra.mxu1 %v15958_v26  ;;  %12532 = vmatprep.subr.bf16.mxu0 %v15839_v46  ;;  %v6788_v26 = vld [vmem:[%s17545_s12 + $0xfa0] sm:$0xff]  ;;  %v6171_v46 = vrot.slane %v18431_v27, %v18622_v54 }
 0x45b   : > { %12573 = vmatprep.subr.bf16.mxu1 %v15967_v6  ;;  %v18647_v6 = vld [vmem:[%s17543_s10 + $0x11] ss:$2 sm:$0xff]  ;;  %v16006_v52 = vcombine.low %v6784_v18, %v6788_v26  ;;  %v6808_v23 = vld [vmem:[%s17545_s12 + $0x1040] sm:$0xff] }
 0x45c   : > { %v6191_v1 = vrot.slane %v18647_v6, %v18414_v5  ;;  %v6952_v11 = vld [vmem:[%s17545_s12 + $0x14c0] sm:$0xff] }
 0x45d   : > { %12533 = vmatpush1.bf16.msra.mxu0 %v15838_v50  ;;  %v6136_v50 = vmul.f32 %v6077_v3, %v18245_v17  ;;  %v6199_v17 = vrot.slane %v18647_v6, %v18422_v10  ;;  %v16022_v3 = vcombine.low %v6800_v22, %v6804_v37  ;;  %v6956_v7 = vld [vmem:[%s17545_s12 + $0x14e0] sm:$0xff] }
 0x45e   : > { %12574 = vmatpush1.bf16.msra.mxu1 %v15966_v51  ;;  %12534 = vmatprep.subr.bf16.mxu0 %v15847_v55  ;;  %v6179_v51 = vrot.slane %v18431_v27, %v18625_v33  ;;  %v16007_v55 = vcombine.high %v6784_v18, %v6788_v26  ;;  %v15878_v27 = vcombine.low %v6656_v2, %v6660_v44  ;;  %v6940_v2 = vld [vmem:[%s17545_s12 + $0x1460] sm:$0xff] }
 0x45f   : > { %12575 = vmatprep.subr.bf16.mxu1 %v15975_v59  ;;  %v6664_v59 = vld [vmem:[%s17545_s12 + $0xbc0] sm:$0xff]  ;;  %v6241_v25 = vadd.f32 %v6191_v1, %v6139_v63  ;;  %v16174_v37 = vcombine.low %v6952_v11, %v6956_v7 }
 0x460   : > { %v6824_v63 = vld [vmem:[%s17545_s12 + $0x10c0] sm:$0xff] }
 0x461   : > { %12535 = vmatpush1.bf16.msra.mxu0 %v15846_v12  ;;  %v6141_v12 = vmul.f32 %v6097_v47, %v18491_v57  ;;  %v6928_v57 = vld [vmem:[%s17545_s12 + $0x1400] sm:$0xff] }
 0x462   : > { %12576 = vmatpush1.bf16.msra.mxu1 %v15974_v15  ;;  %12536 = vmatprep.subr.bf16.mxu0 %v15855_v13  ;;  %v6236_v15 = vadd.f32 %v6171_v46, %v6134_v48  ;;  %v15887_v13 = vcombine.high %v6664_v59, %v6668_v61  ;;  %v6816_v46 = vld [vmem:[%s17545_s12 + $0x1080] sm:$0xff] }
 0x463   : > { %12577 = vmatprep.subr.bf16.mxu1 %v15983_v19  ;;  %v6238_v19 = vadd.f32 %v6179_v51, %v6136_v50  ;;  %v6820_v47 = vld [vmem:[%s17545_s12 + $0x10a0] sm:$0xff] }
 0x464   : > { %v6828_v1 = vld [vmem:[%s17545_s12 + $0x10e0] sm:$0xff] }
 0x465   : > { %12537 = vmatpush1.bf16.msra.mxu0 %v15854_v29  ;;  %v6932_v29 = vld [vmem:[%s17545_s12 + $0x1420] sm:$0xff]  ;;  %v6254_v39 = vmax.f32 %v6238_v19, 0.0  ;;  %v16046_v22 = vcombine.low %v6824_v63, %v6828_v1 }
 0x466   : > { %12578 = vmatpush1.bf16.msra.mxu1 %v15982_v30  ;;  %12538 = vmatprep.subr.bf16.mxu0 %v15863_v32  ;;  %v6243_v30 = vadd.f32 %v6199_v17, %v6141_v12  ;;  %v15886_v32 = vcombine.low %v6664_v59, %v6668_v61  ;;  %v16151_v40 = vcombine.high %v6928_v57, %v6932_v29  ;;  %v6960_v19 = vld [vmem:[%s17545_s12 + $0x1500] sm:$0xff] }
 0x467   : > { %12579 = vmatprep.subr.bf16.mxu1 %v15991_v34  ;;  %v6252_v34 = vmax.f32 %v6236_v15, 0.0  ;;  %v16150_v45 = vcombine.low %v6928_v57, %v6932_v29  ;;  %v18675_v18 = vpack.c.bf16 %v6254_v39, %v6254_v39  ;;  %v16039_v59 = vcombine.high %v6816_v46, %v6820_v47  ;;  %v6840_v29 = vld [vmem:[%s17545_s12 + $0x1140] sm:$0xff] }
 0x468   : > { %v16038_v12 = vcombine.low %v6816_v46, %v6820_v47  ;;  %v16175_v15 = vcombine.high %v6952_v11, %v6956_v7  ;;  %v6860_v46 = vld [vmem:[%s17545_s12 + $0x11e0] sm:$0xff] }
 0x469   : > { %12539 = vmatpush1.bf16.msra.mxu0 %v15862_v42  ;;  %v6257_v42 = vmax.f32 %v6241_v25, 0.0  ;;  %v18673_v44 = vpack.c.bf16 %v6252_v34, %v6252_v34  ;;  %v6972_v34 = vld [vmem:[%s17545_s12 + $0x1560] sm:$0xff] }
 0x46a   : > { %12580 = vmatpush1.bf16.msra.mxu1 %v15990_v56  ;;  %12540 = vmatprep.subr.bf16.mxu0 %v15871_v62  ;;  %v6812_v56 = vld [vmem:[%s17545_s12 + $0x1060] sm:$0xff]  ;;  %v6259_v62 = vmax.f32 %v6243_v30, 0.0 }
 0x46b   : > { %12581 = vmatprep.subr.bf16.mxu1 %v15999_v43  ;;  %v6936_v43 = vld [vmem:[%s17545_s12 + $0x1440] sm:$0xff]  ;;  %v16031_v26 = vcombine.high %v6808_v23, %v6812_v56  ;;  %v16030_v51 = vcombine.low %v6808_v23, %v6812_v56 }
 0x46c   : > { %v16159_v48 = vcombine.high %v6936_v43, %v6940_v2  ;;  %v18684_v50 = vpack.c.bf16 %v6259_v62, %v6259_v62  ;;  %v6844_v30 = vld [vmem:[%s17545_s12 + $0x1160] sm:$0xff] }
 0x46d   : > { %12541 = vmatpush1.bf16.msra.mxu0 %v15870_v9  ;;  %v18679_v9 = vpack.c.bf16 %v6257_v42, %v6257_v42  ;;  %v16063_v39 = vcombine.high %v6840_v29, %v6844_v30  ;;  %v6848_v42 = vld [vmem:[%s17545_s12 + $0x1180] sm:$0xff] }
 0x46e   : > { %12582 = vmatpush1.bf16.msra.mxu1 %v15998_v16  ;;  %12542 = vmatprep.subr.bf16.mxu0 %v15879_v21  ;;  %v6944_v16 = vld [vmem:[%s17545_s12 + $0x1480] sm:$0xff] }
 0x46f   : > { %12583 = vmatprep.subr.bf16.mxu1 %v16007_v55  ;;  %v6948_v21 = vld [vmem:[%s17545_s12 + $0x14a0] sm:$0xff]  ;;  %v16158_v55 = vcombine.low %v6936_v43, %v6940_v2 }
 0x470   : > { %v16167_v61 = vcombine.high %v6944_v16, %v6948_v21  ;;  %v16166_v17 = vcombine.low %v6944_v16, %v6948_v21  ;;  %v6852_v23 = vld [vmem:[%s17545_s12 + $0x11a0] sm:$0xff] }
 0x471   : > { %12543 = vmatpush1.bf16.msra.mxu0 %v15878_v27  ;;  %v16047_v27 = vcombine.high %v6824_v63, %v6828_v1  ;;  %v6976_v56 = vld [vmem:[%s17545_s12 + $0x1580] sm:$0xff]  ;;  %v16071_v2 = vcombine.high %v6848_v42, %v6852_v23  ;;  %v16070_v16 = vcombine.low %v6848_v42, %v6852_v23 }
 0x472   : > { %12584 = vmatpush1.bf16.msra.mxu1 %v16006_v52  ;;  %12544 = vmatprep.subr.bf16.mxu0 %v15887_v13  ;;  %v6832_v52 = vld [vmem:[%s17545_s12 + $0x1100] sm:$0xff] }
 0x473   : > { %12585 = vmatprep.subr.bf16.mxu1 %v16015_v20  ;;  %v6836_v13 = vld [vmem:[%s17545_s12 + $0x1120] sm:$0xff] }
 0x474   : > { %v6964_v20 = vld [vmem:[%s17545_s12 + $0x1520] sm:$0xff]  ;;  %v16055_v25 = vcombine.high %v6832_v52, %v6836_v13 }
 0x475   : > { %12545 = vmatpush1.bf16.msra.mxu0 %v15886_v32  ;;  %v16183_v57 = vcombine.high %v6960_v19, %v6964_v20  ;;  %v6968_v32 = vld [vmem:[%s17545_s12 + $0x1540] sm:$0xff] }
 0x476   : > { %12586 = vmatpush1.bf16.msra.mxu1 %v16014_v36  ;;  %12596 = vmatprep.subr.bf16.mxu0 %v16023_v38  ;;  %v16054_v36 = vcombine.low %v6832_v52, %v6836_v13  ;;  %v16182_v38 = vcombine.low %v6960_v19, %v6964_v20  ;;  %v6980_v62 = vld [vmem:[%s17545_s12 + $0x15a0] sm:$0xff]  ;;  %v16190_v43 = vcombine.low %v6968_v32, %v6972_v34 }
 0x477   : > { %12637 = vmatprep.subr.bf16.mxu1 %v16151_v40  ;;  %v16191_v40 = vcombine.high %v6968_v32, %v6972_v34  ;;  %v6984_v47 = vld [vmem:[%s17545_s12 + $0x15c0] sm:$0xff]  ;;  %v16198_v21 = vcombine.low %v6976_v56, %v6980_v62 }
 0x478   : > { %12547 = vmatmul.mubr.bf16.vlgmr.msra.gmra.mrb[20].mxu0 %v18673_v44  ;;  %v6992_v63 = vld [vmem:[%s17545_s12 + $0x1600] sm:$0xff] }
 0x479   : > { %12588 = vmatmul.mubr.bf16.vlgmr.msra.gmra.mrb[20].mxu1 %v18675_v18  ;;  %12597 = vmatpush1.bf16.msra.mxu0 %v16022_v3  ;;  %v16062_v3 = vcombine.low %v6840_v29, %v6844_v30  ;;  %v6996_v1 = vld [vmem:[%s17545_s12 + $0x1620] sm:$0xff] }
 0x47a   : > { %12628 = vmatprep.mubr.bf16.mxu0 %v18679_v9  ;;  %12638 = vmatpush1.bf16.msra.mxu1 %v16150_v45  ;;  %v16199_v45 = vcombine.high %v6976_v56, %v6980_v62  ;;  %v7000_v52 = vld [vmem:[%s17545_s12 + $0x1640] sm:$0xff]  ;;  %v16214_v20 = vcombine.low %v6992_v63, %v6996_v1 }
 0x47b   : > { %12669 = vmatprep.mubr.bf16.mxu1 %v18684_v50  ;;  %12598 = vmatprep.subr.bf16.mxu0 %v16031_v26  ;;  %v6856_v26 = vld [vmem:[%s17545_s12 + $0x11c0] sm:$0xff] }
 0x47c   : > { %12639 = vmatprep.subr.bf16.mxu1 %v16159_v48  ;;  %v6988_v48 = vld [vmem:[%s17545_s12 + $0x15e0] sm:$0xff]  ;;  %v16078_v11 = vcombine.low %v6856_v26, %v6860_v46 }
 0x47d   : > { %12599 = vmatpush1.bf16.msra.mxu0 %v16030_v51  ;;  %v16079_v51 = vcombine.high %v6856_v26, %v6860_v46  ;;  %v16206_v7 = vcombine.low %v6984_v47, %v6988_v48  ;;  %v7004_v13 = vld [vmem:[%s17545_s12 + $0x1660] sm:$0xff] }
 0x47e   : > { %12640 = vmatpush1.bf16.msra.mxu1 %v16158_v55  ;;  %12600 = vmatprep.subr.bf16.mxu0 %v16039_v59  ;;  %v16207_v55 = vcombine.high %v6984_v47, %v6988_v48  ;;  %v6864_v59 = vld [vmem:[%s17545_s12 + $0x1200] sm:$0xff]  ;;  %v16222_v34 = vcombine.low %v7000_v52, %v7004_v13 }
 0x47f   : > { %12641 = vmatprep.subr.bf16.mxu1 %v16167_v61  ;;  %v6868_v61 = vld [vmem:[%s17545_s12 + $0x1220] sm:$0xff] }
 0x480   : > { %v16086_v19 = vcombine.low %v6864_v59, %v6868_v61  ;;  %v7008_v29 = vld [vmem:[%s17545_s12 + $0x1680] sm:$0xff] }
 0x481   : > { %12601 = vmatpush1.bf16.msra.mxu0 %v16038_v12  ;;  %v16087_v12 = vcombine.high %v6864_v59, %v6868_v61  ;;  %v7012_v30 = vld [vmem:[%s17545_s12 + $0x16a0] sm:$0xff] }
 0x482   : > { %12642 = vmatpush1.bf16.msra.mxu1 %v16166_v17  ;;  %12602 = vmatprep.subr.bf16.mxu0 %v16047_v27  ;;  %v16215_v17 = vcombine.high %v6992_v63, %v6996_v1  ;;  %v6872_v27 = vld [vmem:[%s17545_s12 + $0x1240] sm:$0xff]  ;;  %v16230_v62 = vcombine.low %v7008_v29, %v7012_v30  ;;  %v6085_v1 = vrot.slane %v18632_v41, %v18514_v53 }
 0x483   : > { %12643 = vmatprep.subr.bf16.mxu1 %v16175_v15  ;;  %v6876_v15 = vld [vmem:[%s17545_s12 + $0x1260] sm:$0xff] }
 0x484   : > { %v16094_v32 = vcombine.low %v6872_v27, %v6876_v15  ;;  %v7016_v42 = vld [vmem:[%s17545_s12 + $0x16c0] sm:$0xff] }
 0x485   : > { %12603 = vmatpush1.bf16.msra.mxu0 %v16046_v22  ;;  %v16095_v22 = vcombine.high %v6872_v27, %v6876_v15  ;;  %v7020_v23 = vld [vmem:[%s17545_s12 + $0x16e0] sm:$0xff] }
 0x486   : > { %12644 = vmatpush1.bf16.msra.mxu1 %v16174_v37  ;;  %12604 = vmatprep.subr.bf16.mxu0 %v16055_v25  ;;  %v16223_v37 = vcombine.high %v7000_v52, %v7004_v13  ;;  %v6880_v25 = vld [vmem:[%s17545_s12 + $0x1280] sm:$0xff]  ;;  %v16238_v48 = vcombine.low %v7016_v42, %v7020_v23 }
 0x487   : > { %12645 = vmatprep.subr.bf16.mxu1 %v16183_v57  ;;  %v6884_v57 = vld [vmem:[%s17545_s12 + $0x12a0] sm:$0xff] }
 0x488   : > { %v16102_v56 = vcombine.low %v6880_v25, %v6884_v57  ;;  %v7024_v26 = vld [vmem:[%s17545_s12 + $0x1700] sm:$0xff] }
 0x489   : > { %12605 = vmatpush1.bf16.msra.mxu0 %v16054_v36  ;;  %v16103_v36 = vcombine.high %v6880_v25, %v6884_v57  ;;  %v7028_v46 = vld [vmem:[%s17545_s12 + $0x1720] sm:$0xff] }
 0x48a   : > { %12646 = vmatpush1.bf16.msra.mxu1 %v16182_v38  ;;  %12606 = vmatprep.subr.bf16.mxu0 %v16063_v39  ;;  %v16231_v38 = vcombine.high %v7008_v29, %v7012_v30  ;;  %v6888_v39 = vld [vmem:[%s17545_s12 + $0x12c0] sm:$0xff]  ;;  %v6195_v29 = vrot.slane %v18647_v6, %v18517_v60 }
 0x48b   : > { %12647 = vmatprep.subr.bf16.mxu1 %v16191_v40  ;;  %v6892_v40 = vld [vmem:[%s17545_s12 + $0x12e0] sm:$0xff] }
 0x48c   : > { %v16110_v47 = vcombine.low %v6888_v39, %v6892_v40  ;;  %v7032_v59 = vld [vmem:[%s17545_s12 + $0x1740] sm:$0xff] }
 0x48d   : > { %12607 = vmatpush1.bf16.msra.mxu0 %v16062_v3  ;;  %v16111_v3 = vcombine.high %v6888_v39, %v6892_v40  ;;  %v7036_v61 = vld [vmem:[%s17545_s12 + $0x1760] sm:$0xff] }
 0x48e   : > { %12648 = vmatpush1.bf16.msra.mxu1 %v16190_v43  ;;  %12608 = vmatprep.subr.bf16.mxu0 %v16071_v2  ;;  %v16239_v43 = vcombine.high %v7016_v42, %v7020_v23  ;;  %v6896_v2 = vld [vmem:[%s17545_s12 + $0x1300] sm:$0xff] }
 0x48f   : > { %12649 = vmatprep.subr.bf16.mxu1 %v16199_v45  ;;  %v6900_v45 = vld [vmem:[%s17545_s12 + $0x1320] sm:$0xff] }
 0x490   : > { %v16118_v63 = vcombine.low %v6896_v2, %v6900_v45  ;;  %v6912_v27 = vld [vmem:[%s17545_s12 + $0x1380] sm:$0xff] }
 0x491   : > { %12609 = vmatpush1.bf16.msra.mxu0 %v16070_v16  ;;  %v16119_v16 = vcombine.high %v6896_v2, %v6900_v45  ;;  %v6916_v15 = vld [vmem:[%s17545_s12 + $0x13a0] sm:$0xff] }
 0x492   : > { %12650 = vmatpush1.bf16.msra.mxu1 %v16198_v21  ;;  %12610 = vmatprep.subr.bf16.mxu0 %v16079_v51  ;;  %v16247_v21 = vcombine.high %v7024_v26, %v7028_v46  ;;  %v6904_v51 = vld [vmem:[%s17545_s12 + $0x1340] sm:$0xff]  ;;  %v16135_v25 = vcombine.high %v6912_v27, %v6916_v15 }
 0x493   : > { %12651 = vmatprep.subr.bf16.mxu1 %v16207_v55  ;;  %v6908_v55 = vld [vmem:[%s17545_s12 + $0x1360] sm:$0xff] }
 0x494   : > { %v7040_v52 = vld [vmem:[%s17545_s12 + $0x1780] sm:$0xff] }
 0x495   : > { %12611 = vmatpush1.bf16.msra.mxu0 %v16078_v11  ;;  %v16246_v11 = vcombine.low %v7024_v26, %v7028_v46  ;;  %v7044_v13 = vld [vmem:[%s17545_s12 + $0x17a0] sm:$0xff] }
 0x496   : > { %12652 = vmatpush1.bf16.msra.mxu1 %v16206_v7  ;;  %12612 = vmatprep.subr.bf16.mxu0 %v16087_v12  ;;  %v16127_v7 = vcombine.high %v6904_v51, %v6908_v55  ;;  %v6093_v12 = vrot.slane %v18632_v41, %v18517_v60  ;;  %v16263_v30 = vcombine.high %v7040_v52, %v7044_v13 }
 0x497   : > { %12653 = vmatprep.subr.bf16.mxu1 %v16215_v17  ;;  %v16255_v17 = vcombine.high %v7032_v59, %v7036_v61  ;;  %v16262_v40 = vcombine.low %v7040_v52, %v7044_v13 }
 0x498   : > { %v6140_v57 = vmul.f32 %v6093_v12, %v18485_v58  ;;  %v7072_v12 = vld [vmem:[%s17545_s12 + $0x1880] sm:$0xff] }
 0x499   : > { %12613 = vmatpush1.bf16.msra.mxu0 %v16086_v19  ;;  %v6187_v19 = vrot.slane %v18647_v6, %v18514_v53 }
 0x49a   : > { %12654 = vmatpush1.bf16.msra.mxu1 %v16214_v20  ;;  %12614 = vmatprep.subr.bf16.mxu0 %v16095_v22  ;;  %v16126_v20 = vcombine.low %v6904_v51, %v6908_v55  ;;  %v6138_v22 = vmul.f32 %v6085_v1, %v18481_v49  ;;  %v16134_v49 = vcombine.low %v6912_v27, %v6916_v15  ;;  %v7192_v51 = vld [vmem:[%s17545_s12 + $0x1c40] sm:$0xff] }
 0x49b   : > { %12655 = vmatprep.subr.bf16.mxu1 %v16223_v37  ;;  %v16254_v37 = vcombine.low %v7032_v59, %v7036_v61  ;;  %v6242_v42 = vadd.f32 %v6195_v29, %v6140_v57  ;;  %v7196_v55 = vld [vmem:[%s17545_s12 + $0x1c60] sm:$0xff] }
 0x49c   : > { %v6240_v39 = vadd.f32 %v6187_v19, %v6138_v22  ;;  %v7200_v27 = vld [vmem:[%s17545_s12 + $0x1c80] sm:$0xff]  ;;  %v16414_v13 = vcombine.low %v7192_v51, %v7196_v55 }
 0x49d   : > { %12615 = vmatpush1.bf16.msra.mxu0 %v16094_v32  ;;  %v6920_v32 = vld [vmem:[%s17545_s12 + $0x13c0] sm:$0xff] }
 0x49e   : > { %12656 = vmatpush1.bf16.msra.mxu1 %v16222_v34  ;;  %12616 = vmatprep.subr.bf16.mxu0 %v16103_v36  ;;  %v6924_v34 = vld [vmem:[%s17545_s12 + $0x13e0] sm:$0xff]  ;;  %v6256_v45 = vmax.f32 %v6240_v39, 0.0 }
 0x49f   : > { %12657 = vmatprep.subr.bf16.mxu1 %v16231_v38  ;;  %v7048_v36 = vld [vmem:[%s17545_s12 + $0x17c0] sm:$0xff]  ;;  %v16143_v58 = vcombine.high %v6920_v32, %v6924_v34  ;;  %v16142_v2 = vcombine.low %v6920_v32, %v6924_v34 }
 0x4a0   : > { %v7052_v38 = vld [vmem:[%s17545_s12 + $0x17e0] sm:$0xff]  ;;  %v18759_v61 = vpack.c.bf16 %v6256_v45, %v6256_v45 }
 0x4a1   : > { %12617 = vmatpush1.bf16.msra.mxu0 %v16102_v56  ;;  %v16271_v23 = vcombine.high %v7048_v36, %v7052_v38  ;;  %v7056_v56 = vld [vmem:[%s17545_s12 + $0x1800] sm:$0xff]  ;;  %v16270_v26 = vcombine.low %v7048_v36, %v7052_v38 }
 0x4a2   : > { %12658 = vmatpush1.bf16.msra.mxu1 %v16230_v62  ;;  %12618 = vmatprep.subr.bf16.mxu0 %v16111_v3  ;;  %v7060_v62 = vld [vmem:[%s17545_s12 + $0x1820] sm:$0xff] }
 0x4a3   : > { %12659 = vmatprep.subr.bf16.mxu1 %v16239_v43  ;;  %v7184_v3 = vld [vmem:[%s17545_s12 + $0x1c00] sm:$0xff]  ;;  %v16279_v46 = vcombine.high %v7056_v56, %v7060_v62  ;;  %v16278_v59 = vcombine.low %v7056_v56, %v7060_v62 }
 0x4a4   : > { %v7188_v43 = vld [vmem:[%s17545_s12 + $0x1c20] sm:$0xff] }
 0x4a5   : > { %12619 = vmatpush1.bf16.msra.mxu0 %v16110_v47  ;;  %v6258_v47 = vmax.f32 %v6242_v42, 0.0  ;;  %v7204_v15 = vld [vmem:[%s17545_s12 + $0x1ca0] sm:$0xff] }
 0x4a6   : > { %12660 = vmatpush1.bf16.msra.mxu1 %v16238_v48  ;;  %12620 = vmatprep.subr.bf16.mxu0 %v16119_v16  ;;  %v16407_v48 = vcombine.high %v7184_v3, %v7188_v43  ;;  %v7064_v16 = vld [vmem:[%s17545_s12 + $0x1840] sm:$0xff] }
 0x4a7   : > { %12661 = vmatprep.subr.bf16.mxu1 %v16247_v21  ;;  %v7068_v21 = vld [vmem:[%s17545_s12 + $0x1860] sm:$0xff] }
 0x4a8   : > { %v16287_v1 = vcombine.high %v7064_v16, %v7068_v21  ;;  %v16286_v52 = vcombine.low %v7064_v16, %v7068_v21  ;;  %v7080_v22 = vld [vmem:[%s17545_s12 + $0x18c0] sm:$0xff] }
 0x4a9   : > { %12621 = vmatpush1.bf16.msra.mxu0 %v16118_v63  ;;  %v16406_v63 = vcombine.low %v7184_v3, %v7188_v43  ;;  %v7212_v57 = vld [vmem:[%s17545_s12 + $0x1ce0] sm:$0xff] }
 0x4aa   : > { %12662 = vmatpush1.bf16.msra.mxu1 %v16246_v11  ;;  %12622 = vmatprep.subr.bf16.mxu0 %v16127_v7  ;;  %v18761_v11 = vpack.c.bf16 %v6258_v47, %v6258_v47  ;;  %v16415_v7 = vcombine.high %v7192_v51, %v7196_v55  ;;  %v7088_v36 = vld [vmem:[%s17545_s12 + $0x1900] sm:$0xff]  ;;  %v6105_v51 = vrot.slane %v18632_v41, %v18522_v4 }
 0x4ab   : > { %12663 = vmatprep.subr.bf16.mxu1 %v16255_v17  ;;  %v7076_v17 = vld [vmem:[%s17545_s12 + $0x18a0] sm:$0xff] }
 0x4ac   : > { %v16295_v19 = vcombine.high %v7072_v12, %v7076_v17  ;;  %v16294_v29 = vcombine.low %v7072_v12, %v7076_v17  ;;  %v7092_v38 = vld [vmem:[%s17545_s12 + $0x1920] sm:$0xff]  ;;  %v6207_v12 = vrot.slane %v18647_v6, %v18522_v4 }
 0x4ad   : > { %12623 = vmatpush1.bf16.msra.mxu0 %v16126_v20  ;;  %v16423_v20 = vcombine.high %v7200_v27, %v7204_v15  ;;  %v7220_v39 = vld [vmem:[%s17545_s12 + $0x1d20] sm:$0xff]  ;;  %v16311_v42 = vcombine.high %v7088_v36, %v7092_v38 }
 0x4ae   : > { %12664 = vmatpush1.bf16.msra.mxu1 %v16254_v37  ;;  %12624 = vmatprep.subr.bf16.mxu0 %v16135_v25  ;;  %v7084_v37 = vld [vmem:[%s17545_s12 + $0x18e0] sm:$0xff] }
 0x4af   : > { %12665 = vmatprep.subr.bf16.mxu1 %v16263_v30  ;;  %v7208_v25 = vld [vmem:[%s17545_s12 + $0x1cc0] sm:$0xff]  ;;  %v16422_v30 = vcombine.low %v7200_v27, %v7204_v15  ;;  %v16303_v32 = vcombine.high %v7080_v22, %v7084_v37 }
 0x4b0   : > { %v16431_v34 = vcombine.high %v7208_v25, %v7212_v57  ;;  %v7096_v56 = vld [vmem:[%s17545_s12 + $0x1940] sm:$0xff] }
 0x4b1   : > { %12625 = vmatpush1.bf16.msra.mxu0 %v16134_v49  ;;  %v7216_v49 = vld [vmem:[%s17545_s12 + $0x1d00] sm:$0xff] }
 0x4b2   : > { %12666 = vmatpush1.bf16.msra.mxu1 %v16262_v40  ;;  %12626 = vmatprep.subr.bf16.mxu0 %v16143_v58  ;;  %v16302_v40 = vcombine.low %v7080_v22, %v7084_v37  ;;  %v16430_v58 = vcombine.low %v7208_v25, %v7212_v57  ;;  %v7100_v62 = vld [vmem:[%s17545_s12 + $0x1960] sm:$0xff]  ;;  %v16438_v45 = vcombine.low %v7216_v49, %v7220_v39 }
 0x4b3   : > { %12667 = vmatprep.subr.bf16.mxu1 %v16271_v23  ;;  %v16439_v23 = vcombine.high %v7216_v49, %v7220_v39  ;;  %v7224_v3 = vld [vmem:[%s17545_s12 + $0x1d40] sm:$0xff]  ;;  %v16318_v55 = vcombine.low %v7096_v56, %v7100_v62 }
 0x4b4   : > { %v7228_v43 = vld [vmem:[%s17545_s12 + $0x1d60] sm:$0xff] }
 0x4b5   : > { %12627 = vmatpush1.bf16.msra.mxu0 %v16142_v2  ;;  %v16310_v2 = vcombine.low %v7088_v36, %v7092_v38  ;;  %v7104_v47 = vld [vmem:[%s17545_s12 + $0x1980] sm:$0xff] }
 0x4b6   : > { %12668 = vmatpush1.bf16.msra.mxu1 %v16270_v26  ;;  %12678 = vmatprep.subr.bf16.mxu0 %v16279_v46  ;;  %v16319_v26 = vcombine.high %v7096_v56, %v7100_v62  ;;  %v16447_v46 = vcombine.high %v7224_v3, %v7228_v43  ;;  %v7232_v16 = vld [vmem:[%s17545_s12 + $0x1d80] sm:$0xff] }
 0x4b7   : > { %12719 = vmatprep.subr.bf16.mxu1 %v16407_v48  ;;  %v7108_v48 = vld [vmem:[%s17545_s12 + $0x19a0] sm:$0xff] }
 0x4b8   : > { %12629 = vmatmul.mubr.bf16.vlgmr.msra.gmra.mrb[24].mxu0 %v18759_v61  ;;  %v7236_v21 = vld [vmem:[%s17545_s12 + $0x1da0] sm:$0xff] }
 0x4b9   : > { %12670 = vmatmul.mubr.bf16.vlgmr.msra.gmra.mrb[24].mxu1 %v18761_v11  ;;  %12679 = vmatpush1.bf16.msra.mxu0 %v16278_v59  ;;  %v6113_v59 = vrot.slane %v18632_v41, %v18527_v14  ;;  %v16455_v17 = vcombine.high %v7232_v16, %v7236_v21  ;;  %v7112_v27 = vld [vmem:[%s17545_s12 + $0x19c0] sm:$0xff]  ;;  %v16454_v36 = vcombine.low %v7232_v16, %v7236_v21 }
 0x4ba   : > { %12720 = vmatpush1.bf16.msra.mxu1 %v16406_v63  ;;  %12680 = vmatprep.subr.bf16.mxu0 %v16287_v1  ;;  %v16446_v63 = vcombine.low %v7224_v3, %v7228_v43  ;;  %v16327_v1 = vcombine.high %v7104_v47, %v7108_v48  ;;  %v7116_v15 = vld [vmem:[%s17545_s12 + $0x19e0] sm:$0xff] }
 0x4bb   : > { %12721 = vmatprep.subr.bf16.mxu1 %v16415_v7  ;;  %v7244_v22 = vld [vmem:[%s17545_s12 + $0x1de0] sm:$0xff]  ;;  %v16335_v38 = vcombine.high %v7112_v27, %v7116_v15  ;;  %v16334_v43 = vcombine.low %v7112_v27, %v7116_v15 }
 0x4bc   : > { %v7248_v56 = vld [vmem:[%s17545_s12 + $0x1e00] sm:$0xff] }
 0x4bd   : > { %12681 = vmatpush1.bf16.msra.mxu0 %v16286_v52  ;;  %v7252_v62 = vld [vmem:[%s17545_s12 + $0x1e20] sm:$0xff] }
 0x4be   : > { %12722 = vmatpush1.bf16.msra.mxu1 %v16414_v13  ;;  %12682 = vmatprep.subr.bf16.mxu0 %v16295_v19  ;;  %v6215_v19 = vrot.slane %v18647_v6, %v18527_v14  ;;  %v7132_v16 = vld [vmem:[%s17545_s12 + $0x1a60] sm:$0xff] }
 0x4bf   : > { %12723 = vmatprep.subr.bf16.mxu1 %v16423_v20  ;;  %v7240_v20 = vld [vmem:[%s17545_s12 + $0x1dc0] sm:$0xff] }
 0x4c0   : > { %v7140_v27 = vld [vmem:[%s17545_s12 + $0x1aa0] sm:$0xff] }
 0x4c1   : > { %12683 = vmatpush1.bf16.msra.mxu0 %v16294_v29  ;;  %v16326_v29 = vcombine.low %v7104_v47, %v7108_v48  ;;  %v16471_v47 = vcombine.high %v7248_v56, %v7252_v62  ;;  %v7128_v48 = vld [vmem:[%s17545_s12 + $0x1a40] sm:$0xff] }
 0x4c2   : > { %12724 = vmatpush1.bf16.msra.mxu1 %v16422_v30  ;;  %12684 = vmatprep.subr.bf16.mxu0 %v16303_v32  ;;  %v7264_v15 = vld [vmem:[%s17545_s12 + $0x1e80] sm:$0xff] }
 0x4c3   : > { %12725 = vmatprep.subr.bf16.mxu1 %v16431_v34 }
 0x4c5   : > { %12685 = vmatpush1.bf16.msra.mxu0 %v16302_v40  ;;  %v16463_v40 = vcombine.high %v7240_v20, %v7244_v22 }
 0x4c6   : > { %12726 = vmatpush1.bf16.msra.mxu1 %v16430_v58  ;;  %12686 = vmatprep.subr.bf16.mxu0 %v16311_v42  ;;  %v7120_v58 = vld [vmem:[%s17545_s12 + $0x1a00] sm:$0xff] }
 0x4c7   : > { %12727 = vmatprep.subr.bf16.mxu1 %v16439_v23  ;;  %v7124_v23 = vld [vmem:[%s17545_s12 + $0x1a20] sm:$0xff] }
 0x4c9   : > { %12687 = vmatpush1.bf16.msra.mxu0 %v16310_v2 }
 0x4ca   : > { %12728 = vmatpush1.bf16.msra.mxu1 %v16438_v45  ;;  %12688 = vmatprep.subr.bf16.mxu0 %v16319_v26  ;;  %v16462_v45 = vcombine.low %v7240_v20, %v7244_v22 }
 0x4cb   : > { %v18789_v7 = vpop.f32.mrb[12].mxu0  ;;  %12729 = vmatprep.subr.bf16.mxu1 %v16447_v46  ;;  %v18795_v52 = vpop.f32.mrb[12].mxu1  ;;  %v16343_v46 = vcombine.high %v7120_v58, %v7124_v23 }
 0x4cc   : > { %v5917_v13 = vpop.f32.mrb[13].mxu0  ;;  %v6040_v25 = vpop.f32.mrb[13].mxu1 }
 0x4cd   : > { %v6143_v37 = vmul.f32 %v6105_v51, %v5917_v13  ;;  %v5919_v57 = vpop.f32.mrb[14].mxu0  ;;  %12689 = vmatpush1.bf16.msra.mxu0 %v16318_v55  ;;  %v6145_v30 = vmul.f32 %v6113_v59, %v6040_v25  ;;  %v6042_v32 = vpop.f32.mrb[14].mxu1  ;;  %v7256_v51 = vld [vmem:[%s17545_s12 + $0x1e40] sm:$0xff]  ;;  %v16342_v59 = vcombine.low %v7120_v58, %v7124_v23 }
 0x4ce   : > { %12730 = vmatpush1.bf16.msra.mxu1 %v16446_v63  ;;  %v5920_v34 = vpop.f32.mrb[15].mxu0  ;;  %12690 = vmatprep.subr.bf16.mxu0 %v16327_v1  ;;  %v6043_v39 = vpop.f32.mrb[15].mxu1  ;;  %v7260_v55 = vld [vmem:[%s17545_s12 + $0x1e60] sm:$0xff]  ;;  %v16470_v63 = vcombine.low %v7248_v56, %v7252_v62  ;;  %v16351_v1 = vcombine.high %v7128_v48, %v7132_v16 }
 0x4cf   : > { %v6245_v49 = vadd.f32 %v6207_v12, %v6143_v37  ;;  %12731 = vmatprep.subr.bf16.mxu1 %v16455_v17  ;;  %v6247_v42 = vadd.f32 %v6215_v19, %v6145_v30  ;;  %v16479_v12 = vcombine.high %v7256_v51, %v7260_v55  ;;  %v7136_v17 = vld [vmem:[%s17545_s12 + $0x1a80] sm:$0xff]  ;;  %v16350_v19 = vcombine.low %v7128_v48, %v7132_v16 }
 0x4d0   : > { %v7268_v13 = vld [vmem:[%s17545_s12 + $0x1ea0] sm:$0xff]  ;;  %v16478_v20 = vcombine.low %v7256_v51, %v7260_v55  ;;  %v16359_v22 = vcombine.high %v7136_v17, %v7140_v27  ;;  %v16358_v32 = vcombine.low %v7136_v17, %v7140_v27  ;;  %v6109_v51 = vrot.slane %v18632_v41, %v18625_v33 }
 0x4d1   : > { %v6261_v3 = vmax.f32 %v6245_v49, 0.0  ;;  %12691 = vmatpush1.bf16.msra.mxu0 %v16326_v29  ;;  %v6263_v2 = vmax.f32 %v6247_v42, 0.0  ;;  %v16487_v37 = vcombine.high %v7264_v15, %v7268_v13  ;;  %v7144_v25 = vld [vmem:[%s17545_s12 + $0x1ac0] sm:$0xff]  ;;  %v16486_v34 = vcombine.low %v7264_v15, %v7268_v13 }
 0x4d2   : > { %12732 = vmatpush1.bf16.msra.mxu1 %v16454_v36  ;;  %12692 = vmatprep.subr.bf16.mxu0 %v16335_v38  ;;  %v7148_v57 = vld [vmem:[%s17545_s12 + $0x1ae0] sm:$0xff]  ;;  %v6203_v17 = vrot.slane %v18647_v6, %v18622_v54 }
 0x4d3   : > { %v18805_v26 = vpack.c.bf16 %v6261_v3, %v6261_v3  ;;  %12733 = vmatprep.subr.bf16.mxu1 %v16463_v40  ;;  %v18809_v21 = vpack.c.bf16 %v6263_v2, %v6263_v2  ;;  %v7272_v29 = vld [vmem:[%s17545_s12 + $0x1ec0] sm:$0xff]  ;;  %v16367_v36 = vcombine.high %v7144_v25, %v7148_v57  ;;  %v16366_v42 = vcombine.low %v7144_v25, %v7148_v57 }
 0x4d4   : > { %v7276_v30 = vld [vmem:[%s17545_s12 + $0x1ee0] sm:$0xff] }
 0x4d5   : > { %12693 = vmatpush1.bf16.msra.mxu0 %v16334_v43  ;;  %12710 = vmatprep.mubr.bf16.mxu0 %v18805_v26  ;;  %v16495_v38 = vcombine.high %v7272_v29, %v7276_v30  ;;  %v7152_v49 = vld [vmem:[%s17545_s12 + $0x1b00] sm:$0xff]  ;;  %v16494_v23 = vcombine.low %v7272_v29, %v7276_v30 }
 0x4d6   : > { %12734 = vmatpush1.bf16.msra.mxu1 %v16462_v45  ;;  %12751 = vmatprep.mubr.bf16.mxu1 %v18809_v21  ;;  %v7156_v39 = vld [vmem:[%s17545_s12 + $0x1b20] sm:$0xff] }
 0x4d7   : > { %12694 = vmatprep.subr.bf16.mxu0 %v16343_v46  ;;  %12735 = vmatprep.subr.bf16.mxu1 %v16471_v47  ;;  %v7280_v40 = vld [vmem:[%s17545_s12 + $0x1f00] sm:$0xff]  ;;  %v16375_v56 = vcombine.high %v7152_v49, %v7156_v39  ;;  %v16374_v46 = vcombine.low %v7152_v49, %v7156_v39  ;;  %v6101_v47 = vrot.slane %v18632_v41, %v18622_v54  ;;  %v6417_v49 = vld [vmem:[%s17545_s12 + $0x408] sm:$0xff] }
 0x4d8   : > { %v7284_v58 = vld [vmem:[%s17545_s12 + $0x1f20] sm:$0xff]  ;;  %v6421_v39 = vld [vmem:[%s17545_s12 + $0x428] sm:$0xff] }
 0x4d9   : > { %12695 = vmatpush1.bf16.msra.mxu0 %v16342_v59  ;;  %v16503_v62 = vcombine.high %v7280_v40, %v7284_v58  ;;  %v7160_v3 = vld [vmem:[%s17545_s12 + $0x1b40] sm:$0xff]  ;;  %v16502_v48 = vcombine.low %v7280_v40, %v7284_v58  ;;  %v6142_v15 = vmul.f32 %v6101_v47, %v18789_v7 }
 0x4da   : > { %12736 = vmatpush1.bf16.msra.mxu1 %v16470_v63  ;;  %12696 = vmatprep.subr.bf16.mxu0 %v16351_v1  ;;  %v7164_v43 = vld [vmem:[%s17545_s12 + $0x1b60] sm:$0xff] }
 0x4db   : > { %12737 = vmatprep.subr.bf16.mxu1 %v16479_v12  ;;  %v7288_v2 = vld [vmem:[%s17545_s12 + $0x1f40] sm:$0xff]  ;;  %v16383_v16 = vcombine.high %v7160_v3, %v7164_v43  ;;  %v16382_v27 = vcombine.low %v7160_v3, %v7164_v43  ;;  %v6244_v30 = vadd.f32 %v6203_v17, %v6142_v15  ;;  %v6297_v3 = vld [vmem:[%s17545_s12 + $0x48] sm:$0xff] }
 0x4dc   : > { %v7292_v45 = vld [vmem:[%s17545_s12 + $0x1f60] sm:$0xff]  ;;  %v6301_v43 = vld [vmem:[%s17545_s12 + $0x68] sm:$0xff] }
 0x4dd   : > { %12697 = vmatpush1.bf16.msra.mxu0 %v16350_v19  ;;  %v16511_v55 = vcombine.high %v7288_v2, %v7292_v45  ;;  %v7168_v59 = vld [vmem:[%s17545_s12 + $0x1b80] sm:$0xff]  ;;  %v16510_v41 = vcombine.low %v7288_v2, %v7292_v45  ;;  %v6144_v19 = vmul.f32 %v6109_v51, %v18795_v52  ;;  %v6260_v58 = vmax.f32 %v6244_v30, 0.0  ;;  %v6425_v45 = vld [vmem:[%s17545_s12 + $0x448] sm:$0xff] }
 0x4de   : > { %12738 = vmatpush1.bf16.msra.mxu1 %v16478_v20  ;;  %12698 = vmatprep.subr.bf16.mxu0 %v16359_v22  ;;  %v7172_v63 = vld [vmem:[%s17545_s12 + $0x1ba0] sm:$0xff]  ;;  %v6211_v20 = vrot.slane %v18647_v6, %v18625_v33  ;;  %v15521_v51 = vcombine.high %v6297_v3, %v6301_v43  ;;  %v15520_v17 = vcombine.low %v6297_v3, %v6301_v43  ;;  %v6325_v30 = vld [vmem:[%s17545_s12 + $0x128] sm:$0xff] }
 0x4df   : > { %12739 = vmatprep.subr.bf16.mxu1 %v16487_v37  ;;  %v7296_v1 = vld [vmem:[%s17545_s12 + $0x1f80] sm:$0xff]  ;;  %v16391_v13 = vcombine.high %v7168_v59, %v7172_v63  ;;  %v16390_v7 = vcombine.low %v7168_v59, %v7172_v63  ;;  %v18857_v47 = vpack.c.bf16 %v6260_v58, %v6260_v58  ;;  %v6309_v59 = vld [vmem:[%s17545_s12 + $0xa8] sm:$0xff] }
 0x4e0   : > { %v7300_v12 = vld [vmem:[%s17545_s12 + $0x1fa0] sm:$0xff]  ;;  %v6461_v58 = vld [vmem:[%s17545_s12 + $0x568] sm:$0xff] }
 0x4e1   : > { %12699 = vmatpush1.bf16.msra.mxu0 %v16358_v32  ;;  %v16519_v22 = vcombine.high %v7296_v1, %v7300_v12  ;;  %v7176_v37 = vld [vmem:[%s17545_s12 + $0x1bc0] sm:$0xff]  ;;  %v16518_v32 = vcombine.low %v7296_v1, %v7300_v12  ;;  %v6433_v1 = vld [vmem:[%s17545_s12 + $0x488] sm:$0xff] }
 0x4e2   : > { %12740 = vmatpush1.bf16.msra.mxu1 %v16486_v34  ;;  %12700 = vmatprep.subr.bf16.mxu0 %v16367_v36  ;;  %v7180_v25 = vld [vmem:[%s17545_s12 + $0x1be0] sm:$0xff]  ;;  %v6246_v34 = vadd.f32 %v6211_v20, %v6144_v19  ;;  %v6289_v36 = vld [vmem:[%s17545_s12 + $0x8] sm:$0xff] }
 0x4e3   : > { %12741 = vmatprep.subr.bf16.mxu1 %v16495_v38  ;;  %v7304_v57 = vld [vmem:[%s17545_s12 + $0x1fc0] sm:$0xff]  ;;  %v16399_v52 = vcombine.high %v7176_v37, %v7180_v25  ;;  %v6293_v38 = vld [vmem:[%s17545_s12 + $0x28] sm:$0xff]  ;;  %v16398_v40 = vcombine.low %v7176_v37, %v7180_v25 }
 0x4e4   : > { %v7308_v29 = vld [vmem:[%s17545_s12 + $0x1fe0] sm:$0xff]  ;;  %v15512_v2 = vcombine.low %v6289_v36, %v6293_v38  ;;  %v6437_v12 = vld [vmem:[%s17545_s12 + $0x4a8] sm:$0xff] }
 0x4e5   : > { %12701 = vmatpush1.bf16.msra.mxu0 %v16366_v42  ;;  %v16527_v6 = vcombine.high %v7304_v57, %v7308_v29  ;;  %v16526_v42 = vcombine.low %v7304_v57, %v7308_v29  ;;  %v6317_v19 = vld [vmem:[%s17545_s12 + $0xe8] sm:$0xff]  ;;  %v15656_v25 = vcombine.low %v6433_v1, %v6437_v12 }
 0x4e6   : > { %12742 = vmatpush1.bf16.msra.mxu1 %v16494_v23  ;;  %12702 = vmatprep.subr.bf16.mxu0 %v16375_v56  ;;  %v15513_v23 = vcombine.high %v6289_v36, %v6293_v38  ;;  %v6262_v56 = vmax.f32 %v6246_v34, 0.0  ;;  %v6441_v20 = vld [vmem:[%s17545_s12 + $0x4c8] sm:$0xff] }
 0x4e7   : > { %12743 = vmatprep.subr.bf16.mxu1 %v16503_v62  ;;  %v15641_v62 = vcombine.high %v6417_v49, %v6421_v39  ;;  %v6337_v3 = vld [vmem:[%s17545_s12 + $0x188] sm:$0xff] }
 0x4e8   : > { %v6341_v43 = vld [vmem:[%s17545_s12 + $0x1a8] sm:$0xff] }
 0x4e9   : > { %12703 = vmatpush1.bf16.msra.mxu0 %v16374_v46  ;;  %v6429_v46 = vld [vmem:[%s17545_s12 + $0x468] sm:$0xff] }
 0x4ea   : > { %12744 = vmatpush1.bf16.msra.mxu1 %v16502_v48  ;;  %12704 = vmatprep.subr.bf16.mxu0 %v16383_v16  ;;  %v15640_v48 = vcombine.low %v6417_v49, %v6421_v39  ;;  %v18859_v16 = vpack.c.bf16 %v6262_v56, %v6262_v56  ;;  %v15649_v63 = vcombine.high %v6425_v45, %v6429_v46  ;;  %v6329_v49 = vld [vmem:[%s17545_s12 + $0x148] sm:$0xff] }
 0x4eb   : > { %12745 = vmatprep.subr.bf16.mxu1 %v16511_v55  ;;  %v6305_v55 = vld [vmem:[%s17545_s12 + $0x88] sm:$0xff] }
 0x4ec   : > { %v15529_v15 = vcombine.high %v6305_v55, %v6309_v59  ;;  %v15528_v37 = vcombine.low %v6305_v55, %v6309_v59  ;;  %v6333_v39 = vld [vmem:[%s17545_s12 + $0x168] sm:$0xff] }
 0x4ed   : > { %12705 = vmatpush1.bf16.msra.mxu0 %v16382_v27  ;;  %v15648_v27 = vcombine.low %v6425_v45, %v6429_v46  ;;  %v15553_v56 = vcombine.high %v6329_v49, %v6333_v39  ;;  %v6469_v45 = vld [vmem:[%s17545_s12 + $0x5a8] sm:$0xff]  ;;  %v15552_v46 = vcombine.low %v6329_v49, %v6333_v39 }
 0x4ee   : > { %12746 = vmatpush1.bf16.msra.mxu1 %v16510_v41  ;;  %12706 = vmatprep.subr.bf16.mxu0 %v16391_v13  ;;  %v15657_v41 = vcombine.high %v6433_v1, %v6437_v12  ;;  %v6313_v13 = vld [vmem:[%s17545_s12 + $0xc8] sm:$0xff] }
 0x4ef   : > { %12747 = vmatprep.subr.bf16.mxu1 %v16519_v22  ;;  %v6445_v22 = vld [vmem:[%s17545_s12 + $0x4e8] sm:$0xff]  ;;  %v15537_v57 = vcombine.high %v6313_v13, %v6317_v19  ;;  %v15536_v34 = vcombine.low %v6313_v13, %v6317_v19 }
 0x4f0   : > { %v15665_v29 = vcombine.high %v6441_v20, %v6445_v22  ;;  %v6349_v1 = vld [vmem:[%s17545_s12 + $0x1e8] sm:$0xff] }
 0x4f1   : > { %12707 = vmatpush1.bf16.msra.mxu0 %v16390_v7  ;;  %v6321_v7 = vld [vmem:[%s17545_s12 + $0x108] sm:$0xff] }
 0x4f2   : > { %12748 = vmatpush1.bf16.msra.mxu1 %v16518_v32  ;;  %12708 = vmatprep.subr.bf16.mxu0 %v16399_v52  ;;  %v6449_v32 = vld [vmem:[%s17545_s12 + $0x508] sm:$0xff]  ;;  %v15545_v36 = vcombine.high %v6321_v7, %v6325_v30 }
 0x4f3   : > { %12749 = vmatprep.subr.bf16.mxu1 %v16527_v6  ;;  %v6453_v52 = vld [vmem:[%s17545_s12 + $0x528] sm:$0xff]  ;;  %v15664_v6 = vcombine.low %v6441_v20, %v6445_v22  ;;  %v15560_v20 = vcombine.low %v6337_v3, %v6341_v43 }
 0x4f4   : > { %v15673_v38 = vcombine.high %v6449_v32, %v6453_v52 }
 0x4f5   : > { %12709 = vmatpush1.bf16.msra.mxu0 %v16398_v40  ;;  %v6457_v40 = vld [vmem:[%s17545_s12 + $0x548] sm:$0xff] }
 0x4f6   : > { %12750 = vmatpush1.bf16.msra.mxu1 %v16526_v42  ;;  %12760 = vmatprep.subr.bf16.mxu0 %v15513_v23  ;;  %v15544_v42 = vcombine.low %v6321_v7, %v6325_v30  ;;  %v15672_v23 = vcombine.low %v6449_v32, %v6453_v52  ;;  %v6353_v32 = vld [vmem:[%s17545_s12 + $0x208] sm:$0xff] }
 0x4f7   : > { %12801 = vmatprep.subr.bf16.mxu1 %v15641_v62  ;;  %v15681_v62 = vcombine.high %v6457_v40, %v6461_v58  ;;  %v6357_v52 = vld [vmem:[%s17545_s12 + $0x228] sm:$0xff] }
 0x4f8   : > { %12711 = vmatmul.mubr.bf16.vlgmr.msra.gmra.mrb[28].mxu0 %v18857_v47  ;;  %v15577_v49 = vcombine.high %v6353_v32, %v6357_v52 }
 0x4f9   : > { %12752 = vmatmul.mubr.bf16.vlgmr.msra.gmra.mrb[28].mxu1 %v18859_v16  ;;  %12761 = vmatpush1.bf16.msra.mxu0 %v15512_v2  ;;  %v6465_v2 = vld [vmem:[%s17545_s12 + $0x588] sm:$0xff] }
 0x4fa   : > { %12792 = vmatprep.mubr.bf16.mxu0 %v18455_v0  ;;  %12802 = vmatpush1.bf16.msra.mxu1 %v15640_v48  ;;  %v15680_v48 = vcombine.low %v6457_v40, %v6461_v58  ;;  %v15689_v59 = vcombine.high %v6465_v2, %v6469_v45  ;;  %v6361_v40 = vld [vmem:[%s17545_s12 + $0x248] sm:$0xff] }
 0x4fb   : > { %12833 = vmatprep.mubr.bf16.mxu1 %v18460_v8  ;;  %12762 = vmatprep.subr.bf16.mxu0 %v15521_v51  ;;  %v15561_v51 = vcombine.high %v6337_v3, %v6341_v43  ;;  %v6365_v58 = vld [vmem:[%s17545_s12 + $0x268] sm:$0xff] }
 0x4fc   : > { %12803 = vmatprep.subr.bf16.mxu1 %v15649_v63  ;;  %v6345_v63 = vld [vmem:[%s17545_s12 + $0x1c8] sm:$0xff]  ;;  %v15585_v3 = vcombine.high %v6361_v40, %v6365_v58 }
 0x4fd   : > { %12763 = vmatpush1.bf16.msra.mxu0 %v15520_v17 }
 0x4fe   : > { %12804 = vmatpush1.bf16.msra.mxu1 %v15648_v27  ;;  %12764 = vmatprep.subr.bf16.mxu0 %v15529_v15  ;;  %v6473_v27 = vld [vmem:[%s17545_s12 + $0x5c8] sm:$0xff] }
 0x4ff   : > { %12805 = vmatprep.subr.bf16.mxu1 %v15657_v41  ;;  %v6477_v15 = vld [vmem:[%s17545_s12 + $0x5e8] sm:$0xff] }
 0x500   : > { %v15697_v30 = vcombine.high %v6473_v27, %v6477_v15 }
 0x501   : > { %12765 = vmatpush1.bf16.msra.mxu0 %v15528_v37 }
 0x502   : > { %12806 = vmatpush1.bf16.msra.mxu1 %v15656_v25  ;;  %12766 = vmatprep.subr.bf16.mxu0 %v15537_v57  ;;  %v15688_v57 = vcombine.low %v6465_v2, %v6469_v45  ;;  %v6369_v2 = vld [vmem:[%s17545_s12 + $0x288] sm:$0xff] }
 0x503   : > { %12807 = vmatprep.subr.bf16.mxu1 %v15665_v29  ;;  %v15569_v29 = vcombine.high %v6345_v63, %v6349_v1  ;;  %v6373_v45 = vld [vmem:[%s17545_s12 + $0x2a8] sm:$0xff] }
 0x505   : > { %12767 = vmatpush1.bf16.msra.mxu0 %v15536_v34  ;;  %v6481_v34 = vld [vmem:[%s17545_s12 + $0x608] sm:$0xff] }
 0x506   : > { %12808 = vmatpush1.bf16.msra.mxu1 %v15664_v6  ;;  %12768 = vmatprep.subr.bf16.mxu0 %v15545_v36  ;;  %v6485_v6 = vld [vmem:[%s17545_s12 + $0x628] sm:$0xff]  ;;  %v15568_v36 = vcombine.low %v6345_v63, %v6349_v1 }
 0x507   : > { %12809 = vmatprep.subr.bf16.mxu1 %v15673_v38  ;;  %v15696_v38 = vcombine.low %v6473_v27, %v6477_v15  ;;  %v15705_v39 = vcombine.high %v6481_v34, %v6485_v6  ;;  %v6377_v1 = vld [vmem:[%s17545_s12 + $0x2c8] sm:$0xff]  ;;  %v15592_v15 = vcombine.low %v6369_v2, %v6373_v45 }
 0x508   : > { %v6509_v27 = vld [vmem:[%s17545_s12 + $0x6e8] sm:$0xff] }
 0x509   : > { %12769 = vmatpush1.bf16.msra.mxu0 %v15544_v42  ;;  %v6489_v42 = vld [vmem:[%s17545_s12 + $0x648] sm:$0xff] }
 0x50a   : > { %12810 = vmatpush1.bf16.msra.mxu1 %v15672_v23  ;;  %12770 = vmatprep.subr.bf16.mxu0 %v15553_v56  ;;  %v6493_v23 = vld [vmem:[%s17545_s12 + $0x668] sm:$0xff]  ;;  %v15576_v56 = vcombine.low %v6353_v32, %v6357_v52 }
 0x50b   : > { %v12466_v55 = vpop.f32.mrb[16].mxu0  ;;  %12811 = vmatprep.subr.bf16.mxu1 %v15681_v62  ;;  %v15704_v62 = vcombine.low %v6481_v34, %v6485_v6  ;;  %v15713_v43 = vcombine.high %v6489_v42, %v6493_v23  ;;  %v6393_v34 = vld [vmem:[%s17545_s12 + $0x348] sm:$0xff] }
 0x50c   : > { %v12507_v12 = vpop.f32.mrb[16].mxu1  ;;  %v12468_v17 = vpop.f32.mrb[17].mxu0  ;;  %v6397_v6 = vld [vmem:[%s17545_s12 + $0x368] sm:$0xff] }
 0x50d   : > { %v18889_v41 = vadd.f32 %v12507_v12, %v12466_v55  ;;  %v12509_v13 = vpop.f32.mrb[17].mxu1  ;;  %v12470_v19 = vpop.f32.mrb[18].mxu0  ;;  %12771 = vmatpush1.bf16.msra.mxu0 %v15552_v46  ;;  %v6497_v46 = vld [vmem:[%s17545_s12 + $0x688] sm:$0xff]  ;;  %v15712_v55 = vcombine.low %v6489_v42, %v6493_v23 }
 0x50e   : > { %v18891_v22 = vadd.f32 %v12509_v13, %v12468_v17  ;;  %v12511_v37 = vpop.f32.mrb[18].mxu1  ;;  %12812 = vmatpush1.bf16.msra.mxu1 %v15680_v48  ;;  %v12471_v25 = vpop.f32.mrb[19].mxu0  ;;  %12772 = vmatprep.subr.bf16.mxu0 %v15561_v51  ;;  %v6501_v48 = vld [vmem:[%s17545_s12 + $0x6a8] sm:$0xff]  ;;  %v15584_v51 = vcombine.low %v6361_v40, %v6365_v58  ;;  %v15617_v40 = vcombine.high %v6393_v34, %v6397_v6 }
 0x50f   : > { %v12512_v7 = vpop.f32.mrb[19].mxu1  ;;  %12813 = vmatprep.subr.bf16.mxu1 %v15689_v59  ;;  %v15593_v59 = vcombine.high %v6369_v2, %v6373_v45  ;;  %v15721_v63 = vcombine.high %v6497_v46, %v6501_v48  ;;  %v6381_v12 = vld [vmem:[%s17545_s12 + $0x2e8] sm:$0xff]  ;;  %v15720_v13 = vcombine.low %v6497_v46, %v6501_v48 }
 0x510   : > { %v6505_v17 = vld [vmem:[%s17545_s12 + $0x6c8] sm:$0xff]  ;;  %v15601_v19 = vcombine.high %v6377_v1, %v6381_v12  ;;  %v15600_v7 = vcombine.low %v6377_v1, %v6381_v12 }
 0x511   : > { %12773 = vmatpush1.bf16.msra.mxu0 %v15560_v20  ;;  %v15729_v20 = vcombine.high %v6505_v17, %v6509_v27  ;;  %v6385_v37 = vld [vmem:[%s17545_s12 + $0x308] sm:$0xff] }
 0x512   : > { %12814 = vmatpush1.bf16.msra.mxu1 %v15688_v57  ;;  %12774 = vmatprep.subr.bf16.mxu0 %v15569_v29  ;;  %v6389_v25 = vld [vmem:[%s17545_s12 + $0x328] sm:$0xff] }
 0x513   : > { %12815 = vmatprep.subr.bf16.mxu1 %v15697_v30  ;;  %v6513_v57 = vld [vmem:[%s17545_s12 + $0x708] sm:$0xff]  ;;  %v15728_v30 = vcombine.low %v6505_v17, %v6509_v27  ;;  %v15609_v32 = vcombine.high %v6385_v37, %v6389_v25 }
 0x514   : > { %v6517_v29 = vld [vmem:[%s17545_s12 + $0x728] sm:$0xff] }
 0x515   : > { %12775 = vmatpush1.bf16.msra.mxu0 %v15568_v36  ;;  %v15737_v52 = vcombine.high %v6513_v57, %v6517_v29  ;;  %v6521_v36 = vld [vmem:[%s17545_s12 + $0x748] sm:$0xff] }
 0x516   : > { %12816 = vmatpush1.bf16.msra.mxu1 %v15696_v38  ;;  %12776 = vmatprep.subr.bf16.mxu0 %v15577_v49  ;;  %v6525_v38 = vld [vmem:[%s17545_s12 + $0x768] sm:$0xff]  ;;  %v15608_v49 = vcombine.low %v6385_v37, %v6389_v25 }
 0x517   : > { %12817 = vmatprep.subr.bf16.mxu1 %v15705_v39  ;;  %v15736_v39 = vcombine.low %v6513_v57, %v6517_v29  ;;  %v15745_v58 = vcombine.high %v6521_v36, %v6525_v38  ;;  %v6401_v42 = vld [vmem:[%s17545_s12 + $0x388] sm:$0xff] }
 0x518   : > { %v6405_v23 = vld [vmem:[%s17545_s12 + $0x3a8] sm:$0xff] }
 0x519   : > { %12777 = vmatpush1.bf16.msra.mxu0 %v15576_v56  ;;  %v6529_v56 = vld [vmem:[%s17545_s12 + $0x788] sm:$0xff]  ;;  %v15625_v2 = vcombine.high %v6401_v42, %v6405_v23 }
 0x51a   : > { %12818 = vmatpush1.bf16.msra.mxu1 %v15704_v62  ;;  %12778 = vmatprep.subr.bf16.mxu0 %v15585_v3  ;;  %v6533_v62 = vld [vmem:[%s17545_s12 + $0x7a8] sm:$0xff]  ;;  %v15616_v3 = vcombine.low %v6393_v34, %v6397_v6 }
 0x51b   : > { %12819 = vmatprep.subr.bf16.mxu1 %v15713_v43  ;;  %v15744_v43 = vcombine.low %v6521_v36, %v6525_v38  ;;  %v15753_v45 = vcombine.high %v6529_v56, %v6533_v62  ;;  %v6409_v46 = vld [vmem:[%s17545_s12 + $0x3c8] sm:$0xff] }
 0x51c   : > { %v6413_v48 = vld [vmem:[%s17545_s12 + $0x3e8] sm:$0xff] }
 0x51d   : > { %12779 = vmatpush1.bf16.msra.mxu0 %v15584_v51  ;;  %v6537_v51 = vld [vmem:[%s17545_s12 + $0x7c8] sm:$0xff]  ;;  %v15633_v1 = vcombine.high %v6409_v46, %v6413_v48 }
 0x51e   : > { %12820 = vmatpush1.bf16.msra.mxu1 %v15712_v55  ;;  %12780 = vmatprep.subr.bf16.mxu0 %v15593_v59  ;;  %v6541_v55 = vld [vmem:[%s17545_s12 + $0x7e8] sm:$0xff]  ;;  %v15624_v59 = vcombine.low %v6401_v42, %v6405_v23 }
 0x51f   : > { %12821 = vmatprep.subr.bf16.mxu1 %v15721_v63  ;;  %v15752_v63 = vcombine.low %v6529_v56, %v6533_v62  ;;  %v15761_v12 = vcombine.high %v6537_v51, %v6541_v55  ;;  %v6545_v17 = vld [vmem:[%s17545_s12 + $0x808] sm:$0xff] }
 0x520   : > { %v6549_v27 = vld [vmem:[%s17545_s12 + $0x828] sm:$0xff] }
 0x521   : > { %12781 = vmatpush1.bf16.msra.mxu0 %v15592_v15  ;;  %v6673_v15 = vld [vmem:[%s17545_s12 + $0xc08] sm:$0xff]  ;;  %v15769_v37 = vcombine.high %v6545_v17, %v6549_v27 }
 0x522   : > { %12822 = vmatpush1.bf16.msra.mxu1 %v15720_v13  ;;  %12782 = vmatprep.subr.bf16.mxu0 %v15601_v19  ;;  %v6677_v13 = vld [vmem:[%s17545_s12 + $0xc28] sm:$0xff]  ;;  %v15632_v19 = vcombine.low %v6409_v46, %v6413_v48 }
 0x523   : > { %12823 = vmatprep.subr.bf16.mxu1 %v15729_v20  ;;  %v15760_v20 = vcombine.low %v6537_v51, %v6541_v55  ;;  %v15897_v25 = vcombine.high %v6673_v15, %v6677_v13  ;;  %v6553_v57 = vld [vmem:[%s17545_s12 + $0x848] sm:$0xff] }
 0x524   : > { %v6557_v29 = vld [vmem:[%s17545_s12 + $0x868] sm:$0xff] }
 0x525   : > { %12783 = vmatpush1.bf16.msra.mxu0 %v15600_v7  ;;  %v15768_v7 = vcombine.low %v6545_v17, %v6549_v27  ;;  %v15777_v34 = vcombine.high %v6553_v57, %v6557_v29  ;;  %v6561_v6 = vld [vmem:[%s17545_s12 + $0x888] sm:$0xff] }
 0x526   : > { %12824 = vmatpush1.bf16.msra.mxu1 %v15728_v30  ;;  %12784 = vmatprep.subr.bf16.mxu0 %v15609_v32  ;;  %v6681_v30 = vld [vmem:[%s17545_s12 + $0xc48] sm:$0xff] }
 0x527   : > { %12825 = vmatprep.subr.bf16.mxu1 %v15737_v52  ;;  %v6685_v32 = vld [vmem:[%s17545_s12 + $0xc68] sm:$0xff]  ;;  %v15896_v52 = vcombine.low %v6673_v15, %v6677_v13 }
 0x528   : > { %v6565_v36 = vld [vmem:[%s17545_s12 + $0x8a8] sm:$0xff]  ;;  %v15905_v38 = vcombine.high %v6681_v30, %v6685_v32 }
 0x529   : > { %12785 = vmatpush1.bf16.msra.mxu0 %v15608_v49  ;;  %v6689_v49 = vld [vmem:[%s17545_s12 + $0xc88] sm:$0xff]  ;;  %v15785_v42 = vcombine.high %v6561_v6, %v6565_v36 }
 0x52a   : > { %12826 = vmatpush1.bf16.msra.mxu1 %v15736_v39  ;;  %12786 = vmatprep.subr.bf16.mxu0 %v15617_v40  ;;  %v6693_v39 = vld [vmem:[%s17545_s12 + $0xca8] sm:$0xff]  ;;  %v15776_v40 = vcombine.low %v6553_v57, %v6557_v29 }
 0x52b   : > { %12827 = vmatprep.subr.bf16.mxu1 %v15745_v58  ;;  %v15904_v58 = vcombine.low %v6681_v30, %v6685_v32  ;;  %v15913_v23 = vcombine.high %v6689_v49, %v6693_v39  ;;  %v6569_v56 = vld [vmem:[%s17545_s12 + $0x8c8] sm:$0xff] }
 0x52c   : > { %v6573_v62 = vld [vmem:[%s17545_s12 + $0x8e8] sm:$0xff] }
 0x52d   : > { %12787 = vmatpush1.bf16.msra.mxu0 %v15616_v3  ;;  %v6697_v3 = vld [vmem:[%s17545_s12 + $0xcc8] sm:$0xff]  ;;  %v15793_v46 = vcombine.high %v6569_v56, %v6573_v62 }
 0x52e   : > { %12828 = vmatpush1.bf16.msra.mxu1 %v15744_v43  ;;  %12788 = vmatprep.subr.bf16.mxu0 %v15625_v2  ;;  %v6701_v43 = vld [vmem:[%s17545_s12 + $0xce8] sm:$0xff]  ;;  %v15784_v2 = vcombine.low %v6561_v6, %v6565_v36 }
 0x52f   : > { %12829 = vmatprep.subr.bf16.mxu1 %v15753_v45  ;;  %v15912_v45 = vcombine.low %v6689_v49, %v6693_v39  ;;  %v15921_v48 = vcombine.high %v6697_v3, %v6701_v43  ;;  %v6577_v51 = vld [vmem:[%s17545_s12 + $0x908] sm:$0xff] }
 0x530   : > { %v6581_v55 = vld [vmem:[%s17545_s12 + $0x928] sm:$0xff] }
 0x531   : > { %12789 = vmatpush1.bf16.msra.mxu0 %v15624_v59  ;;  %v6705_v59 = vld [vmem:[%s17545_s12 + $0xd08] sm:$0xff]  ;;  %v15801_v17 = vcombine.high %v6577_v51, %v6581_v55 }
 0x532   : > { %12830 = vmatpush1.bf16.msra.mxu1 %v15752_v63  ;;  %12790 = vmatprep.subr.bf16.mxu0 %v15633_v1  ;;  %v6709_v63 = vld [vmem:[%s17545_s12 + $0xd28] sm:$0xff]  ;;  %v15792_v1 = vcombine.low %v6569_v56, %v6573_v62 }
 0x533   : > { %12831 = vmatprep.subr.bf16.mxu1 %v15761_v12  ;;  %v15920_v12 = vcombine.low %v6697_v3, %v6701_v43  ;;  %v15929_v27 = vcombine.high %v6705_v59, %v6709_v63  ;;  %v6585_v15 = vld [vmem:[%s17545_s12 + $0x948] sm:$0xff] }
 0x534   : > { %v6589_v13 = vld [vmem:[%s17545_s12 + $0x968] sm:$0xff] }
 0x535   : > { %12791 = vmatpush1.bf16.msra.mxu0 %v15632_v19  ;;  %v6713_v19 = vld [vmem:[%s17545_s12 + $0xd48] sm:$0xff]  ;;  %v15809_v57 = vcombine.high %v6585_v15, %v6589_v13 }
 0x536   : > { %12832 = vmatpush1.bf16.msra.mxu1 %v15760_v20  ;;  %12842 = vmatprep.subr.bf16.mxu0 %v15769_v37  ;;  %v6717_v20 = vld [vmem:[%s17545_s12 + $0xd68] sm:$0xff]  ;;  %v15800_v37 = vcombine.low %v6577_v51, %v6581_v55 }
 0x537   : > { %12883 = vmatprep.subr.bf16.mxu1 %v15897_v25  ;;  %v15928_v25 = vcombine.low %v6705_v59, %v6709_v63  ;;  %v15937_v29 = vcombine.high %v6713_v19, %v6717_v20  ;;  %v6597_v30 = vld [vmem:[%s17545_s12 + $0x9a8] sm:$0xff]  ;;  %v15936_v6 = vcombine.low %v6713_v19, %v6717_v20 }
 0x538   : > { %12793 = vmatmul.mubr.bf16.vlgmr.msra.gmra.mrb[32].mxu0 %v18565_v24  ;;  %v6721_v32 = vld [vmem:[%s17545_s12 + $0xd88] sm:$0xff] }
 0x539   : > { %12834 = vmatmul.mubr.bf16.vlgmr.msra.gmra.mrb[32].mxu1 %v18567_v28  ;;  %12843 = vmatpush1.bf16.msra.mxu0 %v15768_v7  ;;  %v6593_v7 = vld [vmem:[%s17545_s12 + $0x988] sm:$0xff] }
 0x53a   : > { %12874 = vmatprep.mubr.bf16.mxu0 %v18571_v31  ;;  %12884 = vmatpush1.bf16.msra.mxu1 %v15896_v52  ;;  %v6725_v52 = vld [vmem:[%s17545_s12 + $0xda8] sm:$0xff]  ;;  %v15817_v36 = vcombine.high %v6593_v7, %v6597_v30 }
 0x53b   : > { %12915 = vmatprep.mubr.bf16.mxu1 %v18576_v35  ;;  %12844 = vmatprep.subr.bf16.mxu0 %v15777_v34  ;;  %v15808_v34 = vcombine.low %v6585_v15, %v6589_v13  ;;  %v15945_v49 = vcombine.high %v6721_v32, %v6725_v52  ;;  %v6601_v39 = vld [vmem:[%s17545_s12 + $0x9c8] sm:$0xff] }
 0x53c   : > { %12885 = vmatprep.subr.bf16.mxu1 %v15905_v38  ;;  %v6729_v56 = vld [vmem:[%s17545_s12 + $0xdc8] sm:$0xff] }
 0x53d   : > { %12845 = vmatpush1.bf16.msra.mxu0 %v15776_v40  ;;  %v6605_v40 = vld [vmem:[%s17545_s12 + $0x9e8] sm:$0xff] }
 0x53e   : > { %12886 = vmatpush1.bf16.msra.mxu1 %v15904_v58  ;;  %12846 = vmatprep.subr.bf16.mxu0 %v15785_v42  ;;  %v6733_v62 = vld [vmem:[%s17545_s12 + $0xde8] sm:$0xff]  ;;  %v15825_v55 = vcombine.high %v6601_v39, %v6605_v40  ;;  %v15824_v15 = vcombine.low %v6601_v39, %v6605_v40 }
 0x53f   : > { %12887 = vmatprep.subr.bf16.mxu1 %v15913_v23  ;;  %v15953_v63 = vcombine.high %v6729_v56, %v6733_v62  ;;  %v15952_v13 = vcombine.low %v6729_v56, %v6733_v62  ;;  %v6761_v56 = vld [vmem:[%s17545_s12 + $0xec8] sm:$0xff] }
 0x540   : > { %v6765_v62 = vld [vmem:[%s17545_s12 + $0xee8] sm:$0xff] }
 0x541   : > { %12847 = vmatpush1.bf16.msra.mxu0 %v15784_v2 }
 0x542   : > { %12888 = vmatpush1.bf16.msra.mxu1 %v15912_v45  ;;  %12848 = vmatprep.subr.bf16.mxu0 %v15793_v46  ;;  %v15816_v45 = vcombine.low %v6593_v7, %v6597_v30 }
 0x543   : > { %12889 = vmatprep.subr.bf16.mxu1 %v15921_v48 }
 0x545   : > { %12849 = vmatpush1.bf16.msra.mxu0 %v15792_v1  ;;  %v6609_v1 = vld [vmem:[%s17545_s12 + $0xa08] sm:$0xff] }
 0x546   : > { %12890 = vmatpush1.bf16.msra.mxu1 %v15920_v12  ;;  %12850 = vmatprep.subr.bf16.mxu0 %v15801_v17  ;;  %v6613_v12 = vld [vmem:[%s17545_s12 + $0xa28] sm:$0xff] }
 0x547   : > { %12891 = vmatprep.subr.bf16.mxu1 %v15929_v27  ;;  %v6737_v17 = vld [vmem:[%s17545_s12 + $0xe08] sm:$0xff]  ;;  %v15833_v19 = vcombine.high %v6609_v1, %v6613_v12  ;;  %v15832_v7 = vcombine.low %v6609_v1, %v6613_v12 }
 0x548   : > { %v6741_v27 = vld [vmem:[%s17545_s12 + $0xe28] sm:$0xff] }
 0x549   : > { %12851 = vmatpush1.bf16.msra.mxu0 %v15800_v37  ;;  %v15961_v20 = vcombine.high %v6737_v17, %v6741_v27  ;;  %v6617_v37 = vld [vmem:[%s17545_s12 + $0xa48] sm:$0xff]  ;;  %v15960_v30 = vcombine.low %v6737_v17, %v6741_v27 }
 0x54a   : > { %12892 = vmatpush1.bf16.msra.mxu1 %v15928_v25  ;;  %12852 = vmatprep.subr.bf16.mxu0 %v15809_v57  ;;  %v6621_v25 = vld [vmem:[%s17545_s12 + $0xa68] sm:$0xff] }
 0x54b   : > { %v12548_v38 = vpop.f32.mrb[20].mxu0  ;;  %12893 = vmatprep.subr.bf16.mxu1 %v15937_v29  ;;  %v6745_v57 = vld [vmem:[%s17545_s12 + $0xe48] sm:$0xff] }
 0x54c   : > { %v12549_v58 = vadd.f32 %v12548_v38, %v18889_v41  ;;  %v12589_v42 = vpop.f32.mrb[20].mxu1  ;;  %v12550_v23 = vpop.f32.mrb[21].mxu0  ;;  %v15944_v41 = vcombine.low %v6721_v32, %v6725_v52  ;;  %v6749_v29 = vld [vmem:[%s17545_s12 + $0xe68] sm:$0xff]  ;;  %v15841_v32 = vcombine.high %v6617_v37, %v6621_v25 }
 0x54d   : > { %v12551_v3 = vadd.f32 %v12550_v23, %v18891_v22  ;;  %v12591_v43 = vpop.f32.mrb[21].mxu1  ;;  %v12552_v2 = vpop.f32.mrb[22].mxu0  ;;  %12853 = vmatpush1.bf16.msra.mxu0 %v15808_v34  ;;  %v15969_v52 = vcombine.high %v6745_v57, %v6749_v29  ;;  %v6625_v34 = vld [vmem:[%s17545_s12 + $0xa88] sm:$0xff]  ;;  %v15968_v39 = vcombine.low %v6745_v57, %v6749_v29 }
 0x54e   : > { %v18963_v46 = vadd.f32 %v12589_v42, %v12549_v58  ;;  %v12593_v48 = vpop.f32.mrb[22].mxu1  ;;  %12894 = vmatpush1.bf16.msra.mxu1 %v15936_v6  ;;  %v12553_v51 = vpop.f32.mrb[23].mxu0  ;;  %12854 = vmatprep.subr.bf16.mxu0 %v15817_v36  ;;  %v6629_v6 = vld [vmem:[%s17545_s12 + $0xaa8] sm:$0xff] }
 0x54f   : > { %v18965_v59 = vadd.f32 %v12591_v43, %v12551_v3  ;;  %v12594_v22 = vpop.f32.mrb[23].mxu1  ;;  %12895 = vmatprep.subr.bf16.mxu1 %v15945_v49  ;;  %v6753_v36 = vld [vmem:[%s17545_s12 + $0xe88] sm:$0xff]  ;;  %v15840_v49 = vcombine.low %v6617_v37, %v6621_v25  ;;  %v15849_v40 = vcombine.high %v6625_v34, %v6629_v6  ;;  %v15848_v3 = vcombine.low %v6625_v34, %v6629_v6 }
 0x550   : > { %v6757_v38 = vld [vmem:[%s17545_s12 + $0xea8] sm:$0xff] }
 0x551   : > { %12855 = vmatpush1.bf16.msra.mxu0 %v15816_v45  ;;  %v15977_v58 = vcombine.high %v6753_v36, %v6757_v38  ;;  %v6633_v42 = vld [vmem:[%s17545_s12 + $0xac8] sm:$0xff]  ;;  %v15976_v43 = vcombine.low %v6753_v36, %v6757_v38  ;;  %v15985_v45 = vcombine.high %v6761_v56, %v6765_v62 }
 0x552   : > { %12896 = vmatpush1.bf16.msra.mxu1 %v15944_v41  ;;  %12856 = vmatprep.subr.bf16.mxu0 %v15825_v55  ;;  %v6637_v23 = vld [vmem:[%s17545_s12 + $0xae8] sm:$0xff] }
 0x553   : > { %12897 = vmatprep.subr.bf16.mxu1 %v15953_v63  ;;  %v15857_v2 = vcombine.high %v6633_v42, %v6637_v23  ;;  %v6641_v48 = vld [vmem:[%s17545_s12 + $0xb08] sm:$0xff]  ;;  %v15856_v22 = vcombine.low %v6633_v42, %v6637_v23  ;;  %v15984_v63 = vcombine.low %v6761_v56, %v6765_v62 }
 0x554   : > { %v6645_v51 = vld [vmem:[%s17545_s12 + $0xb28] sm:$0xff] }
 0x555   : > { %12857 = vmatpush1.bf16.msra.mxu0 %v15824_v15  ;;  %v6769_v41 = vld [vmem:[%s17545_s12 + $0xf08] sm:$0xff]  ;;  %v15865_v1 = vcombine.high %v6641_v48, %v6645_v51 }
 0x556   : > { %12898 = vmatpush1.bf16.msra.mxu1 %v15952_v13  ;;  %12858 = vmatprep.subr.bf16.mxu0 %v15833_v19  ;;  %v6773_v55 = vld [vmem:[%s17545_s12 + $0xf28] sm:$0xff]  ;;  %v15864_v19 = vcombine.low %v6641_v48, %v6645_v51 }
 0x557   : > { %12899 = vmatprep.subr.bf16.mxu1 %v15961_v20  ;;  %v15993_v12 = vcombine.high %v6769_v41, %v6773_v55  ;;  %v6649_v17 = vld [vmem:[%s17545_s12 + $0xb48] sm:$0xff]  ;;  %v15992_v20 = vcombine.low %v6769_v41, %v6773_v55 }
 0x558   : > { %v6653_v27 = vld [vmem:[%s17545_s12 + $0xb68] sm:$0xff] }
 0x559   : > { %12859 = vmatpush1.bf16.msra.mxu0 %v15832_v7  ;;  %v6777_v15 = vld [vmem:[%s17545_s12 + $0xf48] sm:$0xff]  ;;  %v15873_v37 = vcombine.high %v6649_v17, %v6653_v27 }
 0x55a   : > { %12900 = vmatpush1.bf16.msra.mxu1 %v15960_v30  ;;  %12860 = vmatprep.subr.bf16.mxu0 %v15841_v32  ;;  %v6781_v13 = vld [vmem:[%s17545_s12 + $0xf68] sm:$0xff]  ;;  %v15872_v32 = vcombine.low %v6649_v17, %v6653_v27 }
 0x55b   : > { %12901 = vmatprep.subr.bf16.mxu1 %v15969_v52  ;;  %v16001_v25 = vcombine.high %v6777_v15, %v6781_v13  ;;  %v6657_v57 = vld [vmem:[%s17545_s12 + $0xb88] sm:$0xff]  ;;  %v16000_v52 = vcombine.low %v6777_v15, %v6781_v13 }
 0x55c   : > { %v6661_v29 = vld [vmem:[%s17545_s12 + $0xba8] sm:$0xff] }
 0x55d   : > { %12861 = vmatpush1.bf16.msra.mxu0 %v15840_v49  ;;  %v6785_v7 = vld [vmem:[%s17545_s12 + $0xf88] sm:$0xff]  ;;  %v15881_v34 = vcombine.high %v6657_v57, %v6661_v29 }
 0x55e   : > { %12902 = vmatpush1.bf16.msra.mxu1 %v15968_v39  ;;  %12862 = vmatprep.subr.bf16.mxu0 %v15849_v40  ;;  %v6789_v30 = vld [vmem:[%s17545_s12 + $0xfa8] sm:$0xff]  ;;  %v15880_v40 = vcombine.low %v6657_v57, %v6661_v29 }
 0x55f   : > { %12903 = vmatprep.subr.bf16.mxu1 %v15977_v58  ;;  %v16009_v6 = vcombine.high %v6785_v7, %v6789_v30  ;;  %v6665_v36 = vld [vmem:[%s17545_s12 + $0xbc8] sm:$0xff]  ;;  %v16008_v58 = vcombine.low %v6785_v7, %v6789_v30 }
 0x560   : > { %v6669_v38 = vld [vmem:[%s17545_s12 + $0xbe8] sm:$0xff] }
 0x561   : > { %12863 = vmatpush1.bf16.msra.mxu0 %v15848_v3  ;;  %v6793_v49 = vld [vmem:[%s17545_s12 + $0xfc8] sm:$0xff]  ;;  %v15889_v42 = vcombine.high %v6665_v36, %v6669_v38 }
 0x562   : > { %12904 = vmatpush1.bf16.msra.mxu1 %v15976_v43  ;;  %12864 = vmatprep.subr.bf16.mxu0 %v15857_v2  ;;  %v6797_v39 = vld [vmem:[%s17545_s12 + $0xfe8] sm:$0xff]  ;;  %v15888_v2 = vcombine.low %v6665_v36, %v6669_v38 }
 0x563   : > { %12905 = vmatprep.subr.bf16.mxu1 %v15985_v45  ;;  %v16017_v23 = vcombine.high %v6793_v49, %v6797_v39  ;;  %v6801_v56 = vld [vmem:[%s17545_s12 + $0x1008] sm:$0xff]  ;;  %v16016_v45 = vcombine.low %v6793_v49, %v6797_v39 }
 0x564   : > { %v6805_v62 = vld [vmem:[%s17545_s12 + $0x1028] sm:$0xff] }
 0x565   : > { %12865 = vmatpush1.bf16.msra.mxu0 %v15856_v22  ;;  %v6929_v3 = vld [vmem:[%s17545_s12 + $0x1408] sm:$0xff]  ;;  %v16025_v48 = vcombine.high %v6801_v56, %v6805_v62  ;;  %v16024_v22 = vcombine.low %v6801_v56, %v6805_v62 }
 0x566   : > { %12906 = vmatpush1.bf16.msra.mxu1 %v15984_v63  ;;  %12866 = vmatprep.subr.bf16.mxu0 %v15865_v1  ;;  %v6933_v43 = vld [vmem:[%s17545_s12 + $0x1428] sm:$0xff] }
 0x567   : > { %12907 = vmatprep.subr.bf16.mxu1 %v15993_v12  ;;  %v16153_v51 = vcombine.high %v6929_v3, %v6933_v43  ;;  %v6809_v41 = vld [vmem:[%s17545_s12 + $0x1048] sm:$0xff]  ;;  %v16152_v12 = vcombine.low %v6929_v3, %v6933_v43 }
 0x568   : > { %v6813_v55 = vld [vmem:[%s17545_s12 + $0x1068] sm:$0xff] }
 0x569   : > { %12867 = vmatpush1.bf16.msra.mxu0 %v15864_v19  ;;  %v6937_v63 = vld [vmem:[%s17545_s12 + $0x1448] sm:$0xff]  ;;  %v16033_v17 = vcombine.high %v6809_v41, %v6813_v55 }
 0x56a   : > { %12908 = vmatpush1.bf16.msra.mxu1 %v15992_v20  ;;  %12868 = vmatprep.subr.bf16.mxu0 %v15873_v37  ;;  %v6941_v1 = vld [vmem:[%s17545_s12 + $0x1468] sm:$0xff]  ;;  %v16032_v37 = vcombine.low %v6809_v41, %v6813_v55 }
 0x56b   : > { %12909 = vmatprep.subr.bf16.mxu1 %v16001_v25  ;;  %v6817_v27 = vld [vmem:[%s17545_s12 + $0x1088] sm:$0xff]  ;;  %v16161_v13 = vcombine.high %v6937_v63, %v6941_v1  ;;  %v16160_v25 = vcombine.low %v6937_v63, %v6941_v1 }
 0x56c   : > { %v6821_v15 = vld [vmem:[%s17545_s12 + $0x10a8] sm:$0xff] }
 0x56d   : > { %12869 = vmatpush1.bf16.msra.mxu0 %v15872_v32  ;;  %v6945_v19 = vld [vmem:[%s17545_s12 + $0x1488] sm:$0xff]  ;;  %v16041_v57 = vcombine.high %v6817_v27, %v6821_v15 }
 0x56e   : > { %12910 = vmatpush1.bf16.msra.mxu1 %v16000_v52  ;;  %12870 = vmatprep.subr.bf16.mxu0 %v15881_v34  ;;  %v6949_v20 = vld [vmem:[%s17545_s12 + $0x14a8] sm:$0xff]  ;;  %v16040_v34 = vcombine.low %v6817_v27, %v6821_v15 }
 0x56f   : > { %12911 = vmatprep.subr.bf16.mxu1 %v16009_v6  ;;  %v16169_v29 = vcombine.high %v6945_v19, %v6949_v20  ;;  %v6825_v7 = vld [vmem:[%s17545_s12 + $0x10c8] sm:$0xff]  ;;  %v16168_v6 = vcombine.low %v6945_v19, %v6949_v20 }
 0x570   : > { %v6829_v30 = vld [vmem:[%s17545_s12 + $0x10e8] sm:$0xff] }
 0x571   : > { %12871 = vmatpush1.bf16.msra.mxu0 %v15880_v40  ;;  %v6953_v32 = vld [vmem:[%s17545_s12 + $0x14c8] sm:$0xff]  ;;  %v16049_v36 = vcombine.high %v6825_v7, %v6829_v30 }
 0x572   : > { %12912 = vmatpush1.bf16.msra.mxu1 %v16008_v58  ;;  %12872 = vmatprep.subr.bf16.mxu0 %v15889_v42  ;;  %v6957_v52 = vld [vmem:[%s17545_s12 + $0x14e8] sm:$0xff]  ;;  %v16048_v42 = vcombine.low %v6825_v7, %v6829_v30 }
 0x573   : > { %12913 = vmatprep.subr.bf16.mxu1 %v16017_v23  ;;  %v16177_v38 = vcombine.high %v6953_v32, %v6957_v52  ;;  %v6833_v49 = vld [vmem:[%s17545_s12 + $0x1108] sm:$0xff]  ;;  %v16176_v23 = vcombine.low %v6953_v32, %v6957_v52 }
 0x574   : > { %v6837_v39 = vld [vmem:[%s17545_s12 + $0x1128] sm:$0xff] }
 0x575   : > { %12873 = vmatpush1.bf16.msra.mxu0 %v15888_v2  ;;  %v6961_v40 = vld [vmem:[%s17545_s12 + $0x1508] sm:$0xff]  ;;  %v16057_v56 = vcombine.high %v6833_v49, %v6837_v39 }
 0x576   : > { %12914 = vmatpush1.bf16.msra.mxu1 %v16016_v45  ;;  %12924 = vmatprep.subr.bf16.mxu0 %v16025_v48  ;;  %v6965_v58 = vld [vmem:[%s17545_s12 + $0x1528] sm:$0xff]  ;;  %v16056_v48 = vcombine.low %v6833_v49, %v6837_v39 }
 0x577   : > { %12965 = vmatprep.subr.bf16.mxu1 %v16153_v51  ;;  %v16185_v62 = vcombine.high %v6961_v40, %v6965_v58  ;;  %v6841_v3 = vld [vmem:[%s17545_s12 + $0x1148] sm:$0xff]  ;;  %v16184_v51 = vcombine.low %v6961_v40, %v6965_v58 }
 0x578   : > { %12875 = vmatmul.mubr.bf16.vlgmr.msra.gmra.mrb[36].mxu0 %v18673_v44  ;;  %v6845_v43 = vld [vmem:[%s17545_s12 + $0x1168] sm:$0xff] }
 0x579   : > { %12916 = vmatmul.mubr.bf16.vlgmr.msra.gmra.mrb[36].mxu1 %v18675_v18  ;;  %12925 = vmatpush1.bf16.msra.mxu0 %v16024_v22  ;;  %v6969_v2 = vld [vmem:[%s17545_s12 + $0x1548] sm:$0xff]  ;;  %v16065_v41 = vcombine.high %v6841_v3, %v6845_v43 }
 0x57a   : > { %12956 = vmatprep.mubr.bf16.mxu0 %v18679_v9  ;;  %12966 = vmatpush1.bf16.msra.mxu1 %v16152_v12  ;;  %v6973_v45 = vld [vmem:[%s17545_s12 + $0x1568] sm:$0xff] }
 0x57b   : > { %12997 = vmatprep.mubr.bf16.mxu1 %v18684_v50  ;;  %12926 = vmatprep.subr.bf16.mxu0 %v16033_v17  ;;  %v16193_v55 = vcombine.high %v6969_v2, %v6973_v45  ;;  %v6849_v22 = vld [vmem:[%s17545_s12 + $0x1188] sm:$0xff]  ;;  %v16064_v17 = vcombine.low %v6841_v3, %v6845_v43  ;;  %v16192_v27 = vcombine.low %v6969_v2, %v6973_v45 }
 0x57c   : > { %12967 = vmatprep.subr.bf16.mxu1 %v16161_v13  ;;  %v6853_v63 = vld [vmem:[%s17545_s12 + $0x11a8] sm:$0xff] }
 0x57d   : > { %12927 = vmatpush1.bf16.msra.mxu0 %v16032_v37  ;;  %v6977_v1 = vld [vmem:[%s17545_s12 + $0x1588] sm:$0xff]  ;;  %v16073_v15 = vcombine.high %v6849_v22, %v6853_v63 }
 0x57e   : > { %12968 = vmatpush1.bf16.msra.mxu1 %v16160_v25  ;;  %12928 = vmatprep.subr.bf16.mxu0 %v16041_v57  ;;  %v6981_v12 = vld [vmem:[%s17545_s12 + $0x15a8] sm:$0xff] }
 0x57f   : > { %12969 = vmatprep.subr.bf16.mxu1 %v16169_v29  ;;  %v16201_v19 = vcombine.high %v6977_v1, %v6981_v12  ;;  %v6857_v20 = vld [vmem:[%s17545_s12 + $0x11c8] sm:$0xff] }
 0x580   : > { %v6861_v37 = vld [vmem:[%s17545_s12 + $0x11e8] sm:$0xff] }
 0x581   : > { %12929 = vmatpush1.bf16.msra.mxu0 %v16040_v34  ;;  %v6985_v7 = vld [vmem:[%s17545_s12 + $0x15c8] sm:$0xff]  ;;  %v16081_v39 = vcombine.high %v6857_v20, %v6861_v37  ;;  %v16080_v3 = vcombine.low %v6857_v20, %v6861_v37 }
 0x582   : > { %12970 = vmatpush1.bf16.msra.mxu1 %v16168_v6  ;;  %12930 = vmatprep.subr.bf16.mxu0 %v16049_v36  ;;  %v6989_v30 = vld [vmem:[%s17545_s12 + $0x15e8] sm:$0xff]  ;;  %v16072_v6 = vcombine.low %v6849_v22, %v6853_v63 }
 0x583   : > { %12971 = vmatprep.subr.bf16.mxu1 %v16177_v38  ;;  %v16209_v58 = vcombine.high %v6985_v7, %v6989_v30  ;;  %v16208_v43 = vcombine.low %v6985_v7, %v6989_v30  ;;  %v7017_v7 = vld [vmem:[%s17545_s12 + $0x16c8] sm:$0xff] }
 0x584   : > { %v7021_v30 = vld [vmem:[%s17545_s12 + $0x16e8] sm:$0xff] }
 0x585   : > { %12931 = vmatpush1.bf16.msra.mxu0 %v16048_v42  ;;  %v6865_v42 = vld [vmem:[%s17545_s12 + $0x1208] sm:$0xff] }
 0x586   : > { %12972 = vmatpush1.bf16.msra.mxu1 %v16176_v23  ;;  %12932 = vmatprep.subr.bf16.mxu0 %v16057_v56  ;;  %v6869_v23 = vld [vmem:[%s17545_s12 + $0x1228] sm:$0xff] }
 0x587   : > { %12973 = vmatprep.subr.bf16.mxu1 %v16185_v62  ;;  %v6993_v56 = vld [vmem:[%s17545_s12 + $0x1608] sm:$0xff]  ;;  %v16089_v2 = vcombine.high %v6865_v42, %v6869_v23  ;;  %v16088_v22 = vcombine.low %v6865_v42, %v6869_v23 }
 0x588   : > { %v6997_v62 = vld [vmem:[%s17545_s12 + $0x1628] sm:$0xff] }
 0x589   : > { %12933 = vmatpush1.bf16.msra.mxu0 %v16056_v48  ;;  %v16217_v45 = vcombine.high %v6993_v56, %v6997_v62  ;;  %v6873_v48 = vld [vmem:[%s17545_s12 + $0x1248] sm:$0xff]  ;;  %v16216_v63 = vcombine.low %v6993_v56, %v6997_v62 }
 0x58a   : > { %12974 = vmatpush1.bf16.msra.mxu1 %v16184_v51  ;;  %12934 = vmatprep.subr.bf16.mxu0 %v16065_v41  ;;  %v6877_v51 = vld [vmem:[%s17545_s12 + $0x1268] sm:$0xff] }
 0x58b   : > { %v12630_v13 = vpop.f32.mrb[24].mxu0  ;;  %12975 = vmatprep.subr.bf16.mxu1 %v16193_v55  ;;  %v7001_v41 = vld [vmem:[%s17545_s12 + $0x1648] sm:$0xff] }
 0x58c   : > { %v12631_v25 = vadd.f32 %v12630_v13, %v18963_v46  ;;  %v12671_v57 = vpop.f32.mrb[24].mxu1  ;;  %v12632_v29 = vpop.f32.mrb[25].mxu0  ;;  %v16200_v46 = vcombine.low %v6977_v1, %v6981_v12  ;;  %v7005_v55 = vld [vmem:[%s17545_s12 + $0x1668] sm:$0xff]  ;;  %v16097_v1 = vcombine.high %v6873_v48, %v6877_v51 }
 0x58d   : > { %v12633_v32 = vadd.f32 %v12632_v29, %v18965_v59  ;;  %v12673_v52 = vpop.f32.mrb[25].mxu1  ;;  %v12634_v34 = vpop.f32.mrb[26].mxu0  ;;  %12935 = vmatpush1.bf16.msra.mxu0 %v16064_v17  ;;  %v16225_v12 = vcombine.high %v7001_v41, %v7005_v55  ;;  %v6881_v17 = vld [vmem:[%s17545_s12 + $0x1288] sm:$0xff]  ;;  %v16224_v20 = vcombine.low %v7001_v41, %v7005_v55 }
 0x58e   : > { %v19037_v36 = vadd.f32 %v12671_v57, %v12631_v25  ;;  %v12675_v38 = vpop.f32.mrb[26].mxu1  ;;  %12976 = vmatpush1.bf16.msra.mxu1 %v16192_v27  ;;  %v12635_v49 = vpop.f32.mrb[27].mxu0  ;;  %12936 = vmatprep.subr.bf16.mxu0 %v16073_v15  ;;  %v6885_v27 = vld [vmem:[%s17545_s12 + $0x12a8] sm:$0xff] }
 0x58f   : > { %v19039_v40 = vadd.f32 %v12673_v52, %v12633_v32  ;;  %v12676_v59 = vpop.f32.mrb[27].mxu1  ;;  %12977 = vmatprep.subr.bf16.mxu1 %v16201_v19  ;;  %v7009_v15 = vld [vmem:[%s17545_s12 + $0x1688] sm:$0xff]  ;;  %v16096_v19 = vcombine.low %v6873_v48, %v6877_v51  ;;  %v16105_v37 = vcombine.high %v6881_v17, %v6885_v27  ;;  %v16104_v32 = vcombine.low %v6881_v17, %v6885_v27 }
 0x590   : > { %v7013_v13 = vld [vmem:[%s17545_s12 + $0x16a8] sm:$0xff] }
 0x591   : > { %12937 = vmatpush1.bf16.msra.mxu0 %v16072_v6  ;;  %v16233_v25 = vcombine.high %v7009_v15, %v7013_v13  ;;  %v6889_v57 = vld [vmem:[%s17545_s12 + $0x12c8] sm:$0xff]  ;;  %v16232_v52 = vcombine.low %v7009_v15, %v7013_v13  ;;  %v16241_v6 = vcombine.high %v7017_v7, %v7021_v30 }
 0x592   : > { %12978 = vmatpush1.bf16.msra.mxu1 %v16200_v46  ;;  %12938 = vmatprep.subr.bf16.mxu0 %v16081_v39  ;;  %v6893_v29 = vld [vmem:[%s17545_s12 + $0x12e8] sm:$0xff] }
 0x593   : > { %12979 = vmatprep.subr.bf16.mxu1 %v16209_v58  ;;  %v16113_v34 = vcombine.high %v6889_v57, %v6893_v29  ;;  %v6897_v38 = vld [vmem:[%s17545_s12 + $0x1308] sm:$0xff]  ;;  %v16112_v59 = vcombine.low %v6889_v57, %v6893_v29  ;;  %v16240_v58 = vcombine.low %v7017_v7, %v7021_v30 }
 0x594   : > { %v6901_v49 = vld [vmem:[%s17545_s12 + $0x1328] sm:$0xff] }
 0x595   : > { %12939 = vmatpush1.bf16.msra.mxu0 %v16080_v3  ;;  %v7025_v46 = vld [vmem:[%s17545_s12 + $0x1708] sm:$0xff]  ;;  %v16121_v42 = vcombine.high %v6897_v38, %v6901_v49 }
 0x596   : > { %12980 = vmatpush1.bf16.msra.mxu1 %v16208_v43  ;;  %12940 = vmatprep.subr.bf16.mxu0 %v16089_v2  ;;  %v7029_v39 = vld [vmem:[%s17545_s12 + $0x1728] sm:$0xff]  ;;  %v16120_v2 = vcombine.low %v6897_v38, %v6901_v49 }
 0x597   : > { %12981 = vmatprep.subr.bf16.mxu1 %v16217_v45  ;;  %v16249_v23 = vcombine.high %v7025_v46, %v7029_v39  ;;  %v6905_v56 = vld [vmem:[%s17545_s12 + $0x1348] sm:$0xff]  ;;  %v16248_v45 = vcombine.low %v7025_v46, %v7029_v39 }
 0x598   : > { %v6909_v62 = vld [vmem:[%s17545_s12 + $0x1368] sm:$0xff] }
 0x599   : > { %12941 = vmatpush1.bf16.msra.mxu0 %v16088_v22  ;;  %v7033_v3 = vld [vmem:[%s17545_s12 + $0x1748] sm:$0xff]  ;;  %v16129_v48 = vcombine.high %v6905_v56, %v6909_v62 }
 0x59a   : > { %12982 = vmatpush1.bf16.msra.mxu1 %v16216_v63  ;;  %12942 = vmatprep.subr.bf16.mxu0 %v16097_v1  ;;  %v7037_v43 = vld [vmem:[%s17545_s12 + $0x1768] sm:$0xff]  ;;  %v16128_v1 = vcombine.low %v6905_v56, %v6909_v62 }
 0x59b   : > { %12983 = vmatprep.subr.bf16.mxu1 %v16225_v12  ;;  %v16257_v51 = vcombine.high %v7033_v3, %v7037_v43  ;;  %v6913_v41 = vld [vmem:[%s17545_s12 + $0x1388] sm:$0xff]  ;;  %v16256_v12 = vcombine.low %v7033_v3, %v7037_v43 }
 0x59c   : > { %v6917_v55 = vld [vmem:[%s17545_s12 + $0x13a8] sm:$0xff] }
 0x59d   : > { %12943 = vmatpush1.bf16.msra.mxu0 %v16096_v19  ;;  %v7041_v22 = vld [vmem:[%s17545_s12 + $0x1788] sm:$0xff]  ;;  %v16137_v17 = vcombine.high %v6913_v41, %v6917_v55 }
 0x59e   : > { %12984 = vmatpush1.bf16.msra.mxu1 %v16224_v20  ;;  %12944 = vmatprep.subr.bf16.mxu0 %v16105_v37  ;;  %v7045_v63 = vld [vmem:[%s17545_s12 + $0x17a8] sm:$0xff]  ;;  %v16136_v37 = vcombine.low %v6913_v41, %v6917_v55 }
 0x59f   : > { %12985 = vmatprep.subr.bf16.mxu1 %v16233_v25  ;;  %v16265_v27 = vcombine.high %v7041_v22, %v7045_v63  ;;  %v6921_v15 = vld [vmem:[%s17545_s12 + $0x13c8] sm:$0xff]  ;;  %v16264_v25 = vcombine.low %v7041_v22, %v7045_v63 }
 0x5a0   : > { %v6925_v13 = vld [vmem:[%s17545_s12 + $0x13e8] sm:$0xff] }
 0x5a1   : > { %12945 = vmatpush1.bf16.msra.mxu0 %v16104_v32  ;;  %v7049_v19 = vld [vmem:[%s17545_s12 + $0x17c8] sm:$0xff]  ;;  %v16145_v57 = vcombine.high %v6921_v15, %v6925_v13 }
 0x5a2   : > { %12986 = vmatpush1.bf16.msra.mxu1 %v16232_v52  ;;  %12946 = vmatprep.subr.bf16.mxu0 %v16113_v34  ;;  %v7053_v20 = vld [vmem:[%s17545_s12 + $0x17e8] sm:$0xff]  ;;  %v16144_v34 = vcombine.low %v6921_v15, %v6925_v13 }
 0x5a3   : > { %12987 = vmatprep.subr.bf16.mxu1 %v16241_v6  ;;  %v16273_v29 = vcombine.high %v7049_v19, %v7053_v20  ;;  %v7057_v7 = vld [vmem:[%s17545_s12 + $0x1808] sm:$0xff]  ;;  %v16272_v6 = vcombine.low %v7049_v19, %v7053_v20 }
 0x5a4   : > { %v7061_v30 = vld [vmem:[%s17545_s12 + $0x1828] sm:$0xff] }
 0x5a5   : > { %12947 = vmatpush1.bf16.msra.mxu0 %v16112_v59  ;;  %v7185_v32 = vld [vmem:[%s17545_s12 + $0x1c08] sm:$0xff]  ;;  %v16281_v38 = vcombine.high %v7057_v7, %v7061_v30  ;;  %v16280_v59 = vcombine.low %v7057_v7, %v7061_v30 }
 0x5a6   : > { %12988 = vmatpush1.bf16.msra.mxu1 %v16240_v58  ;;  %12948 = vmatprep.subr.bf16.mxu0 %v16121_v42  ;;  %v7189_v52 = vld [vmem:[%s17545_s12 + $0x1c28] sm:$0xff] }
 0x5a7   : > { %12989 = vmatprep.subr.bf16.mxu1 %v16249_v23  ;;  %v16409_v49 = vcombine.high %v7185_v32, %v7189_v52  ;;  %v7065_v46 = vld [vmem:[%s17545_s12 + $0x1848] sm:$0xff]  ;;  %v16408_v23 = vcombine.low %v7185_v32, %v7189_v52 }
 0x5a8   : > { %v7069_v39 = vld [vmem:[%s17545_s12 + $0x1868] sm:$0xff] }
 0x5a9   : > { %12949 = vmatpush1.bf16.msra.mxu0 %v16120_v2  ;;  %v7193_v58 = vld [vmem:[%s17545_s12 + $0x1c48] sm:$0xff]  ;;  %v16289_v56 = vcombine.high %v7065_v46, %v7069_v39 }
 0x5aa   : > { %12990 = vmatpush1.bf16.msra.mxu1 %v16248_v45  ;;  %12950 = vmatprep.subr.bf16.mxu0 %v16129_v48  ;;  %v7197_v42 = vld [vmem:[%s17545_s12 + $0x1c68] sm:$0xff]  ;;  %v16288_v48 = vcombine.low %v7065_v46, %v7069_v39 }
 0x5ab   : > { %12991 = vmatprep.subr.bf16.mxu1 %v16257_v51  ;;  %v7073_v62 = vld [vmem:[%s17545_s12 + $0x1888] sm:$0xff]  ;;  %v16417_v43 = vcombine.high %v7193_v58, %v7197_v42  ;;  %v16416_v51 = vcombine.low %v7193_v58, %v7197_v42 }
 0x5ac   : > { %v7077_v3 = vld [vmem:[%s17545_s12 + $0x18a8] sm:$0xff] }
 0x5ad   : > { %12951 = vmatpush1.bf16.msra.mxu0 %v16128_v1  ;;  %v7201_v2 = vld [vmem:[%s17545_s12 + $0x1c88] sm:$0xff]  ;;  %v16297_v41 = vcombine.high %v7073_v62, %v7077_v3 }
 0x5ae   : > { %12992 = vmatpush1.bf16.msra.mxu1 %v16256_v12  ;;  %12952 = vmatprep.subr.bf16.mxu0 %v16137_v17  ;;  %v7205_v45 = vld [vmem:[%s17545_s12 + $0x1ca8] sm:$0xff]  ;;  %v16296_v17 = vcombine.low %v7073_v62, %v7077_v3 }
 0x5af   : > { %12993 = vmatprep.subr.bf16.mxu1 %v16265_v27  ;;  %v16425_v55 = vcombine.high %v7201_v2, %v7205_v45  ;;  %v7081_v22 = vld [vmem:[%s17545_s12 + $0x18c8] sm:$0xff]  ;;  %v16424_v27 = vcombine.low %v7201_v2, %v7205_v45 }
 0x5b0   : > { %v7085_v63 = vld [vmem:[%s17545_s12 + $0x18e8] sm:$0xff] }
 0x5b1   : > { %12953 = vmatpush1.bf16.msra.mxu0 %v16136_v37  ;;  %v7209_v1 = vld [vmem:[%s17545_s12 + $0x1cc8] sm:$0xff]  ;;  %v16305_v15 = vcombine.high %v7081_v22, %v7085_v63 }
 0x5b2   : > { %12994 = vmatpush1.bf16.msra.mxu1 %v16264_v25  ;;  %12954 = vmatprep.subr.bf16.mxu0 %v16145_v57  ;;  %v7213_v12 = vld [vmem:[%s17545_s12 + $0x1ce8] sm:$0xff]  ;;  %v16304_v57 = vcombine.low %v7081_v22, %v7085_v63 }
 0x5b3   : > { %12995 = vmatprep.subr.bf16.mxu1 %v16273_v29  ;;  %v16433_v13 = vcombine.high %v7209_v1, %v7213_v12  ;;  %v7089_v19 = vld [vmem:[%s17545_s12 + $0x1908] sm:$0xff]  ;;  %v16432_v29 = vcombine.low %v7209_v1, %v7213_v12 }
 0x5b4   : > { %v7093_v20 = vld [vmem:[%s17545_s12 + $0x1928] sm:$0xff] }
 0x5b5   : > { %12955 = vmatpush1.bf16.msra.mxu0 %v16144_v34  ;;  %v7217_v37 = vld [vmem:[%s17545_s12 + $0x1d08] sm:$0xff]  ;;  %v16313_v7 = vcombine.high %v7089_v19, %v7093_v20 }
 0x5b6   : > { %12996 = vmatpush1.bf16.msra.mxu1 %v16272_v6  ;;  %13006 = vmatprep.subr.bf16.mxu0 %v16281_v38  ;;  %v7221_v25 = vld [vmem:[%s17545_s12 + $0x1d28] sm:$0xff]  ;;  %v16312_v38 = vcombine.low %v7089_v19, %v7093_v20  ;;  %v6265_v19 = vld [vmem:[#allocation2 + $0x8] sm:$0xff] }
 0x5b7   : > { %13047 = vmatprep.subr.bf16.mxu1 %v16409_v49  ;;  %v16441_v30 = vcombine.high %v7217_v37, %v7221_v25  ;;  %v7097_v32 = vld [vmem:[%s17545_s12 + $0x1948] sm:$0xff]  ;;  %v16440_v49 = vcombine.low %v7217_v37, %v7221_v25 }
 0x5b8   : > { %12957 = vmatmul.mubr.bf16.vlgmr.msra.gmra.mrb[40].mxu0 %v18759_v61  ;;  %v7101_v52 = vld [vmem:[%s17545_s12 + $0x1968] sm:$0xff] }
 0x5b9   : > { %12998 = vmatmul.mubr.bf16.vlgmr.msra.gmra.mrb[40].mxu1 %v18761_v11  ;;  %13007 = vmatpush1.bf16.msra.mxu0 %v16280_v59  ;;  %v7225_v34 = vld [vmem:[%s17545_s12 + $0x1d48] sm:$0xff]  ;;  %v16321_v46 = vcombine.high %v7097_v32, %v7101_v52 }
 0x5ba   : > { %13038 = vmatprep.mubr.bf16.mxu0 %v18805_v26  ;;  %13048 = vmatpush1.bf16.msra.mxu1 %v16408_v23  ;;  %v7229_v6 = vld [vmem:[%s17545_s12 + $0x1d68] sm:$0xff] }
 0x5bb   : > { %13079 = vmatprep.mubr.bf16.mxu1 %v18809_v21  ;;  %13008 = vmatprep.subr.bf16.mxu0 %v16289_v56  ;;  %v16449_v39 = vcombine.high %v7225_v34, %v7229_v6  ;;  %v7105_v59 = vld [vmem:[%s17545_s12 + $0x1988] sm:$0xff]  ;;  %v16320_v56 = vcombine.low %v7097_v32, %v7101_v52  ;;  %v16448_v62 = vcombine.low %v7225_v34, %v7229_v6 }
 0x5bc   : > { %13049 = vmatprep.subr.bf16.mxu1 %v16417_v43  ;;  %v7109_v58 = vld [vmem:[%s17545_s12 + $0x19a8] sm:$0xff] }
 0x5bd   : > { %13009 = vmatpush1.bf16.msra.mxu0 %v16288_v48  ;;  %v7233_v42 = vld [vmem:[%s17545_s12 + $0x1d88] sm:$0xff]  ;;  %v16329_v3 = vcombine.high %v7105_v59, %v7109_v58 }
 0x5be   : > { %13050 = vmatpush1.bf16.msra.mxu1 %v16416_v51  ;;  %13010 = vmatprep.subr.bf16.mxu0 %v16297_v41  ;;  %v7237_v23 = vld [vmem:[%s17545_s12 + $0x1da8] sm:$0xff] }
 0x5bf   : > { %13051 = vmatprep.subr.bf16.mxu1 %v16425_v55  ;;  %v16457_v2 = vcombine.high %v7233_v42, %v7237_v23  ;;  %v7113_v45 = vld [vmem:[%s17545_s12 + $0x19c8] sm:$0xff]  ;;  %v16456_v37 = vcombine.low %v7233_v42, %v7237_v23 }
 0x5c0   : > { %v7117_v48 = vld [vmem:[%s17545_s12 + $0x19e8] sm:$0xff] }
 0x5c1   : > { %13011 = vmatpush1.bf16.msra.mxu0 %v16296_v17  ;;  %v7241_v22 = vld [vmem:[%s17545_s12 + $0x1dc8] sm:$0xff]  ;;  %v16337_v25 = vcombine.high %v7113_v45, %v7117_v48 }
 0x5c2   : > { %13052 = vmatpush1.bf16.msra.mxu1 %v16424_v27  ;;  %13012 = vmatprep.subr.bf16.mxu0 %v16305_v15  ;;  %v7245_v63 = vld [vmem:[%s17545_s12 + $0x1de8] sm:$0xff]  ;;  %v16328_v15 = vcombine.low %v7105_v59, %v7109_v58 }
 0x5c3   : > { %13053 = vmatprep.subr.bf16.mxu1 %v16433_v13  ;;  %v6264_v1 = vld [vmem:[#allocation2] sm:$0xff] }
 0x5c4   : > { %v7249_v52 = vld [vmem:[%s17545_s12 + $0x1e08] sm:$0xff] }
 0x5c5   : > { %13013 = vmatpush1.bf16.msra.mxu0 %v16304_v57  ;;  %v7253_v34 = vld [vmem:[%s17545_s12 + $0x1e28] sm:$0xff] }
 0x5c6   : > { %13054 = vmatpush1.bf16.msra.mxu1 %v16432_v29  ;;  %13014 = vmatprep.subr.bf16.mxu0 %v16313_v7  ;;  %v7121_v7 = vld [vmem:[%s17545_s12 + $0x1a08] sm:$0xff] }
 0x5c7   : > { %13055 = vmatprep.subr.bf16.mxu1 %v16441_v30  ;;  %v7125_v30 = vld [vmem:[%s17545_s12 + $0x1a28] sm:$0xff] }
 0x5c8   : > { %v7129_v59 = vld [vmem:[%s17545_s12 + $0x1a48] sm:$0xff] }
 0x5c9   : > { %13015 = vmatpush1.bf16.msra.mxu0 %v16312_v38  ;;  %v16336_v38 = vcombine.low %v7113_v45, %v7117_v48  ;;  %v7133_v58 = vld [vmem:[%s17545_s12 + $0x1a68] sm:$0xff] }
 0x5ca   : > { %13056 = vmatpush1.bf16.msra.mxu1 %v16440_v49  ;;  %13016 = vmatprep.subr.bf16.mxu0 %v16321_v46  ;;  %v16464_v49 = vcombine.low %v7241_v22, %v7245_v63  ;;  %v16345_v46 = vcombine.high %v7121_v7, %v7125_v30  ;;  %v7257_v42 = vld [vmem:[%s17545_s12 + $0x1e48] sm:$0xff] }
 0x5cb   : > { %v12712_v43 = vpop.f32.mrb[28].mxu0  ;;  %13057 = vmatprep.subr.bf16.mxu1 %v16449_v39  ;;  %v16473_v39 = vcombine.high %v7249_v52, %v7253_v34  ;;  %v7261_v23 = vld [vmem:[%s17545_s12 + $0x1e68] sm:$0xff] }
 0x5cc   : > { %v12713_v51 = vadd.f32 %v12712_v43, %v19037_v36  ;;  %v12753_v41 = vpop.f32.mrb[28].mxu1  ;;  %v12714_v55 = vpop.f32.mrb[29].mxu0  ;;  %v16481_v43 = vcombine.high %v7257_v42, %v7261_v23  ;;  %v7141_v45 = vld [vmem:[%s17545_s12 + $0x1aa8] sm:$0xff] }
 0x5cd   : > { %v12715_v12 = vadd.f32 %v12714_v55, %v19039_v40  ;;  %v12755_v17 = vpop.f32.mrb[29].mxu1  ;;  %v12716_v27 = vpop.f32.mrb[30].mxu0  ;;  %13017 = vmatpush1.bf16.msra.mxu0 %v16320_v56  ;;  %v16465_v40 = vcombine.high %v7241_v22, %v7245_v63  ;;  %v16344_v56 = vcombine.low %v7121_v7, %v7125_v30  ;;  %v7265_v48 = vld [vmem:[%s17545_s12 + $0x1e88] sm:$0xff]  ;;  %v16480_v55 = vcombine.low %v7257_v42, %v7261_v23 }
 0x5ce   : > { %v12754_v13 = vadd.f32 %v12753_v41, %v12713_v51  ;;  %v12757_v20 = vpop.f32.mrb[30].mxu1  ;;  %13058 = vmatpush1.bf16.msra.mxu1 %v16448_v62  ;;  %v12717_v36 = vpop.f32.mrb[31].mxu0  ;;  %13018 = vmatprep.subr.bf16.mxu0 %v16329_v3  ;;  %v16472_v62 = vcombine.low %v7249_v52, %v7253_v34  ;;  %v16353_v3 = vcombine.high %v7129_v59, %v7133_v58  ;;  %v7269_v51 = vld [vmem:[%s17545_s12 + $0x1ea8] sm:$0xff] }
 0x5cf   : > { %v12756_v57 = vadd.f32 %v12755_v17, %v12715_v12  ;;  %v12758_v29 = vpop.f32.mrb[31].mxu1  ;;  %13059 = vmatprep.subr.bf16.mxu1 %v16457_v2  ;;  %v7137_v2 = vld [vmem:[%s17545_s12 + $0x1a88] sm:$0xff]  ;;  %v16352_v41 = vcombine.low %v7129_v59, %v7133_v58  ;;  %v16489_v63 = vcombine.high %v7265_v48, %v7269_v51 }
 0x5d0   : > { %v13744_v32 = vadd.f32 %v12754_v13, %v6264_v1  ;;  %v16361_v22 = vcombine.high %v7137_v2, %v7141_v45  ;;  %v7145_v1 = vld [vmem:[%s17545_s12 + $0x1ac8] sm:$0xff]  ;;  %v16488_v13 = vcombine.low %v7265_v48, %v7269_v51 }
 0x5d1   : > { %v13745_v6 = vadd.f32 %v12756_v57, %v6265_v19  ;;  %13019 = vmatpush1.bf16.msra.mxu0 %v16328_v15  ;;  %v7149_v12 = vld [vmem:[%s17545_s12 + $0x1ae8] sm:$0xff]  ;;  %v16360_v15 = vcombine.low %v7137_v2, %v7141_v45 }
 0x5d2   : > { %13752 = vst [vmem:[#allocation2] sm:$0xff] %v13744_v32  ;;  %13060 = vmatpush1.bf16.msra.mxu1 %v16456_v37  ;;  %13020 = vmatprep.subr.bf16.mxu0 %v16337_v25  ;;  %v7273_v17 = vld [vmem:[%s17545_s12 + $0x1ec8] sm:$0xff]  ;;  %v16369_v19 = vcombine.high %v7145_v1, %v7149_v12  ;;  %v16368_v29 = vcombine.low %v7145_v1, %v7149_v12  ;;  %v6290_v1 = vld [vmem:[%s17545_s12 + $0x10] sm:$0xff] }
 0x5d3   : > { %13753 = vst [vmem:[#allocation2 + $0x8] sm:$0xff] %v13745_v6  ;;  %13061 = vmatprep.subr.bf16.mxu1 %v16465_v40  ;;  %v7277_v27 = vld [vmem:[%s17545_s12 + $0x1ee8] sm:$0xff]  ;;  %v6294_v12 = vld [vmem:[%s17545_s12 + $0x30] sm:$0xff] }
 0x5d4   : > { %v16497_v20 = vcombine.high %v7273_v17, %v7277_v27  ;;  %v7153_v36 = vld [vmem:[%s17545_s12 + $0x1b08] sm:$0xff]  ;;  %v16496_v40 = vcombine.low %v7273_v17, %v7277_v27  ;;  %v6418_v17 = vld [vmem:[%s17545_s12 + $0x410] sm:$0xff] }
 0x5d5   : > { %13021 = vmatpush1.bf16.msra.mxu0 %v16336_v38  ;;  %v7157_v37 = vld [vmem:[%s17545_s12 + $0x1b28] sm:$0xff]  ;;  %v6422_v27 = vld [vmem:[%s17545_s12 + $0x430] sm:$0xff] }
 0x5d6   : > { %13062 = vmatpush1.bf16.msra.mxu1 %v16464_v49  ;;  %13022 = vmatprep.subr.bf16.mxu0 %v16345_v46  ;;  %v7281_v25 = vld [vmem:[%s17545_s12 + $0x1f08] sm:$0xff]  ;;  %v16377_v7 = vcombine.high %v7153_v36, %v7157_v37  ;;  %v16376_v38 = vcombine.low %v7153_v36, %v7157_v37  ;;  %v6298_v36 = vld [vmem:[%s17545_s12 + $0x50] sm:$0xff] }
 0x5d7   : > { %13063 = vmatprep.subr.bf16.mxu1 %v16473_v39  ;;  %v7285_v57 = vld [vmem:[%s17545_s12 + $0x1f28] sm:$0xff]  ;;  %v6302_v37 = vld [vmem:[%s17545_s12 + $0x70] sm:$0xff] }
 0x5d8   : > { %v16505_v30 = vcombine.high %v7281_v25, %v7285_v57  ;;  %v7161_v32 = vld [vmem:[%s17545_s12 + $0x1b48] sm:$0xff]  ;;  %v16504_v49 = vcombine.low %v7281_v25, %v7285_v57  ;;  %v15514_v25 = vcombine.low %v6290_v1, %v6294_v12  ;;  %v6426_v57 = vld [vmem:[%s17545_s12 + $0x450] sm:$0xff] }
 0x5d9   : > { %13023 = vmatpush1.bf16.msra.mxu0 %v16344_v56  ;;  %v7165_v52 = vld [vmem:[%s17545_s12 + $0x1b68] sm:$0xff] }
 0x5da   : > { %13064 = vmatpush1.bf16.msra.mxu1 %v16472_v62  ;;  %13024 = vmatprep.subr.bf16.mxu0 %v16353_v3  ;;  %v7289_v34 = vld [vmem:[%s17545_s12 + $0x1f48] sm:$0xff]  ;;  %v16385_v46 = vcombine.high %v7161_v32, %v7165_v52  ;;  %v16384_v56 = vcombine.low %v7161_v32, %v7165_v52  ;;  %v6310_v32 = vld [vmem:[%s17545_s12 + $0xb0] sm:$0xff] }
 0x5db   : > { %13065 = vmatprep.subr.bf16.mxu1 %v16481_v43  ;;  %v7293_v6 = vld [vmem:[%s17545_s12 + $0x1f68] sm:$0xff] }
 0x5dc   : > { %v16513_v39 = vcombine.high %v7289_v34, %v7293_v6  ;;  %v7169_v59 = vld [vmem:[%s17545_s12 + $0x1b88] sm:$0xff]  ;;  %v16512_v62 = vcombine.low %v7289_v34, %v7293_v6  ;;  %v6434_v34 = vld [vmem:[%s17545_s12 + $0x490] sm:$0xff] }
 0x5dd   : > { %13025 = vmatpush1.bf16.msra.mxu0 %v16352_v41  ;;  %v7173_v58 = vld [vmem:[%s17545_s12 + $0x1ba8] sm:$0xff]  ;;  %v6438_v6 = vld [vmem:[%s17545_s12 + $0x4b0] sm:$0xff] }
 0x5de   : > { %13066 = vmatpush1.bf16.msra.mxu1 %v16480_v55  ;;  %13026 = vmatprep.subr.bf16.mxu0 %v16361_v22  ;;  %v7297_v42 = vld [vmem:[%s17545_s12 + $0x1f88] sm:$0xff]  ;;  %v16393_v3 = vcombine.high %v7169_v59, %v7173_v58  ;;  %v16392_v41 = vcombine.low %v7169_v59, %v7173_v58  ;;  %v6314_v59 = vld [vmem:[%s17545_s12 + $0xd0] sm:$0xff] }
 0x5df   : > { %13067 = vmatprep.subr.bf16.mxu1 %v16489_v63  ;;  %v7301_v23 = vld [vmem:[%s17545_s12 + $0x1fa8] sm:$0xff]  ;;  %v6318_v58 = vld [vmem:[%s17545_s12 + $0xf0] sm:$0xff] }
 0x5e0   : > { %v16521_v43 = vcombine.high %v7297_v42, %v7301_v23  ;;  %v7177_v2 = vld [vmem:[%s17545_s12 + $0x1bc8] sm:$0xff]  ;;  %v16520_v55 = vcombine.low %v7297_v42, %v7301_v23  ;;  %v6442_v42 = vld [vmem:[%s17545_s12 + $0x4d0] sm:$0xff] }
 0x5e1   : > { %13027 = vmatpush1.bf16.msra.mxu0 %v16360_v15  ;;  %v7181_v45 = vld [vmem:[%s17545_s12 + $0x1be8] sm:$0xff]  ;;  %v6446_v23 = vld [vmem:[%s17545_s12 + $0x4f0] sm:$0xff] }
 0x5e2   : > { %13068 = vmatpush1.bf16.msra.mxu1 %v16488_v13  ;;  %13028 = vmatprep.subr.bf16.mxu0 %v16369_v19  ;;  %v7305_v48 = vld [vmem:[%s17545_s12 + $0x1fc8] sm:$0xff]  ;;  %v16401_v22 = vcombine.high %v7177_v2, %v7181_v45  ;;  %v16400_v15 = vcombine.low %v7177_v2, %v7181_v45  ;;  %v15515_v19 = vcombine.high %v6290_v1, %v6294_v12  ;;  %v6322_v2 = vld [vmem:[%s17545_s12 + $0x110] sm:$0xff] }
 0x5e3   : > { %13069 = vmatprep.subr.bf16.mxu1 %v16497_v20  ;;  %v7309_v51 = vld [vmem:[%s17545_s12 + $0x1fe8] sm:$0xff]  ;;  %v15643_v20 = vcombine.high %v6418_v17, %v6422_v27  ;;  %v6326_v45 = vld [vmem:[%s17545_s12 + $0x130] sm:$0xff] }
 0x5e4   : > { %v16529_v63 = vcombine.high %v7305_v48, %v7309_v51  ;;  %v16528_v13 = vcombine.low %v7305_v48, %v7309_v51  ;;  %v6450_v48 = vld [vmem:[%s17545_s12 + $0x510] sm:$0xff] }
 0x5e5   : > { %13029 = vmatpush1.bf16.msra.mxu0 %v16368_v29  ;;  %v6430_v29 = vld [vmem:[%s17545_s12 + $0x470] sm:$0xff] }
 0x5e6   : > { %13070 = vmatpush1.bf16.msra.mxu1 %v16496_v40  ;;  %13030 = vmatprep.subr.bf16.mxu0 %v16377_v7  ;;  %v15642_v40 = vcombine.low %v6418_v17, %v6422_v27  ;;  %v15523_v7 = vcombine.high %v6298_v36, %v6302_v37  ;;  %v15651_v52 = vcombine.high %v6426_v57, %v6430_v29  ;;  %v6454_v51 = vld [vmem:[%s17545_s12 + $0x530] sm:$0xff] }
 0x5e7   : > { %13071 = vmatprep.subr.bf16.mxu1 %v16505_v30  ;;  %v6306_v30 = vld [vmem:[%s17545_s12 + $0x90] sm:$0xff] }
 0x5e8   : > { %v6330_v1 = vld [vmem:[%s17545_s12 + $0x150] sm:$0xff] }
 0x5e9   : > { %13031 = vmatpush1.bf16.msra.mxu0 %v16376_v38  ;;  %v15522_v38 = vcombine.low %v6298_v36, %v6302_v37  ;;  %v6334_v12 = vld [vmem:[%s17545_s12 + $0x170] sm:$0xff] }
 0x5ea   : > { %13072 = vmatpush1.bf16.msra.mxu1 %v16504_v49  ;;  %13032 = vmatprep.subr.bf16.mxu0 %v16385_v46  ;;  %v15650_v49 = vcombine.low %v6426_v57, %v6430_v29  ;;  %v15531_v46 = vcombine.high %v6306_v30, %v6310_v32  ;;  %v6458_v17 = vld [vmem:[%s17545_s12 + $0x550] sm:$0xff]  ;;  %v15554_v29 = vcombine.low %v6330_v1, %v6334_v12 }
 0x5eb   : > { %13073 = vmatprep.subr.bf16.mxu1 %v16513_v39  ;;  %v15659_v39 = vcombine.high %v6434_v34, %v6438_v6  ;;  %v6462_v27 = vld [vmem:[%s17545_s12 + $0x570] sm:$0xff] }
 0x5ec   : > { %v6338_v36 = vld [vmem:[%s17545_s12 + $0x190] sm:$0xff] }
 0x5ed   : > { %13033 = vmatpush1.bf16.msra.mxu0 %v16384_v56  ;;  %v15530_v56 = vcombine.low %v6306_v30, %v6310_v32  ;;  %v6342_v37 = vld [vmem:[%s17545_s12 + $0x1b0] sm:$0xff] }
 0x5ee   : > { %13074 = vmatpush1.bf16.msra.mxu1 %v16512_v62  ;;  %13034 = vmatprep.subr.bf16.mxu0 %v16393_v3  ;;  %v15658_v62 = vcombine.low %v6434_v34, %v6438_v6  ;;  %v15539_v3 = vcombine.high %v6314_v59, %v6318_v58  ;;  %v6470_v57 = vld [vmem:[%s17545_s12 + $0x5b0] sm:$0xff] }
 0x5ef   : > { %13075 = vmatprep.subr.bf16.mxu1 %v16521_v43  ;;  %v15667_v43 = vcombine.high %v6442_v42, %v6446_v23  ;;  %v6350_v34 = vld [vmem:[%s17545_s12 + $0x1f0] sm:$0xff] }
 0x5f1   : > { %13035 = vmatpush1.bf16.msra.mxu0 %v16392_v41  ;;  %v15538_v41 = vcombine.low %v6314_v59, %v6318_v58 }
 0x5f2   : > { %13076 = vmatpush1.bf16.msra.mxu1 %v16520_v55  ;;  %13036 = vmatprep.subr.bf16.mxu0 %v16401_v22  ;;  %v15666_v55 = vcombine.low %v6442_v42, %v6446_v23  ;;  %v15547_v22 = vcombine.high %v6322_v2, %v6326_v45  ;;  %v15562_v42 = vcombine.low %v6338_v36, %v6342_v37 }
 0x5f3   : > { %13077 = vmatprep.subr.bf16.mxu1 %v16529_v63  ;;  %v15675_v63 = vcombine.high %v6450_v48, %v6454_v51 }
 0x5f5   : > { %13037 = vmatpush1.bf16.msra.mxu0 %v16400_v15  ;;  %v15546_v15 = vcombine.low %v6322_v2, %v6326_v45 }
 0x5f6   : > { %13078 = vmatpush1.bf16.msra.mxu1 %v16528_v13  ;;  %13088 = vmatprep.subr.bf16.mxu0 %v15515_v19  ;;  %v15674_v13 = vcombine.low %v6450_v48, %v6454_v51  ;;  %v15555_v19 = vcombine.high %v6330_v1, %v6334_v12  ;;  %v6354_v48 = vld [vmem:[%s17545_s12 + $0x210] sm:$0xff] }
 0x5f7   : > { %13129 = vmatprep.subr.bf16.mxu1 %v15643_v20  ;;  %v15683_v20 = vcombine.high %v6458_v17, %v6462_v27  ;;  %v6358_v51 = vld [vmem:[%s17545_s12 + $0x230] sm:$0xff] }
 0x5f8   : > { %13039 = vmatmul.mubr.bf16.vlgmr.msra.gmra.mrb[44].mxu0 %v18857_v47  ;;  %v15579_v1 = vcombine.high %v6354_v48, %v6358_v51 }
 0x5f9   : > { %13080 = vmatmul.mubr.bf16.vlgmr.msra.gmra.mrb[44].mxu1 %v18859_v16  ;;  %13089 = vmatpush1.bf16.msra.mxu0 %v15514_v25  ;;  %v6466_v25 = vld [vmem:[%s17545_s12 + $0x590] sm:$0xff] }
 0x5fa   : > { %13120 = vmatprep.mubr.bf16.mxu0 %v18455_v0  ;;  %13130 = vmatpush1.bf16.msra.mxu1 %v15642_v40  ;;  %v15682_v40 = vcombine.low %v6458_v17, %v6462_v27  ;;  %v15691_v32 = vcombine.high %v6466_v25, %v6470_v57  ;;  %v6362_v17 = vld [vmem:[%s17545_s12 + $0x250] sm:$0xff] }
 0x5fb   : > { %13161 = vmatprep.mubr.bf16.mxu1 %v18460_v8  ;;  %13090 = vmatprep.subr.bf16.mxu0 %v15523_v7  ;;  %v15563_v7 = vcombine.high %v6338_v36, %v6342_v37  ;;  %v6366_v27 = vld [vmem:[%s17545_s12 + $0x270] sm:$0xff] }
 0x5fc   : > { %13131 = vmatprep.subr.bf16.mxu1 %v15651_v52  ;;  %v6346_v52 = vld [vmem:[%s17545_s12 + $0x1d0] sm:$0xff]  ;;  %v15587_v36 = vcombine.high %v6362_v17, %v6366_v27 }
 0x5fd   : > { %13091 = vmatpush1.bf16.msra.mxu0 %v15522_v38 }
 0x5fe   : > { %13132 = vmatpush1.bf16.msra.mxu1 %v15650_v49  ;;  %13092 = vmatprep.subr.bf16.mxu0 %v15531_v46  ;;  %v6474_v49 = vld [vmem:[%s17545_s12 + $0x5d0] sm:$0xff] }
 0x5ff   : > { %13133 = vmatprep.subr.bf16.mxu1 %v15659_v39  ;;  %v6478_v46 = vld [vmem:[%s17545_s12 + $0x5f0] sm:$0xff] }
 0x600   : > { %v15699_v45 = vcombine.high %v6474_v49, %v6478_v46 }
 0x601   : > { %13093 = vmatpush1.bf16.msra.mxu0 %v15530_v56 }
 0x602   : > { %13134 = vmatpush1.bf16.msra.mxu1 %v15658_v62  ;;  %13094 = vmatprep.subr.bf16.mxu0 %v15539_v3  ;;  %v15690_v3 = vcombine.low %v6466_v25, %v6470_v57  ;;  %v6370_v25 = vld [vmem:[%s17545_s12 + $0x290] sm:$0xff] }
 0x603   : > { %13135 = vmatprep.subr.bf16.mxu1 %v15667_v43  ;;  %v15571_v43 = vcombine.high %v6346_v52, %v6350_v34  ;;  %v6374_v57 = vld [vmem:[%s17545_s12 + $0x2b0] sm:$0xff] }
 0x605   : > { %13095 = vmatpush1.bf16.msra.mxu0 %v15538_v41  ;;  %v6482_v41 = vld [vmem:[%s17545_s12 + $0x610] sm:$0xff] }
 0x606   : > { %13136 = vmatpush1.bf16.msra.mxu1 %v15666_v55  ;;  %13096 = vmatprep.subr.bf16.mxu0 %v15547_v22  ;;  %v6486_v55 = vld [vmem:[%s17545_s12 + $0x630] sm:$0xff]  ;;  %v15570_v22 = vcombine.low %v6346_v52, %v6350_v34 }
 0x607   : > { %13137 = vmatprep.subr.bf16.mxu1 %v15675_v63  ;;  %v15698_v63 = vcombine.low %v6474_v49, %v6478_v46  ;;  %v15707_v12 = vcombine.high %v6482_v41, %v6486_v55  ;;  %v6378_v34 = vld [vmem:[%s17545_s12 + $0x2d0] sm:$0xff]  ;;  %v15594_v46 = vcombine.low %v6370_v25, %v6374_v57 }
 0x608   : > { %v6510_v49 = vld [vmem:[%s17545_s12 + $0x6f0] sm:$0xff] }
 0x609   : > { %13097 = vmatpush1.bf16.msra.mxu0 %v15546_v15  ;;  %v6490_v15 = vld [vmem:[%s17545_s12 + $0x650] sm:$0xff] }
 0x60a   : > { %13138 = vmatpush1.bf16.msra.mxu1 %v15674_v13  ;;  %13098 = vmatprep.subr.bf16.mxu0 %v15555_v19  ;;  %v6494_v13 = vld [vmem:[%s17545_s12 + $0x670] sm:$0xff]  ;;  %v15578_v19 = vcombine.low %v6354_v48, %v6358_v51 }
 0x60b   : > { %v12794_v30 = vpop.f32.mrb[32].mxu0  ;;  %13139 = vmatprep.subr.bf16.mxu1 %v15683_v20  ;;  %v15706_v20 = vcombine.low %v6482_v41, %v6486_v55  ;;  %v15715_v37 = vcombine.high %v6490_v15, %v6494_v13  ;;  %v6394_v41 = vld [vmem:[%s17545_s12 + $0x350] sm:$0xff] }
 0x60c   : > { %v12835_v6 = vpop.f32.mrb[32].mxu1  ;;  %v12796_v38 = vpop.f32.mrb[33].mxu0  ;;  %v6398_v55 = vld [vmem:[%s17545_s12 + $0x370] sm:$0xff] }
 0x60d   : > { %v19179_v39 = vadd.f32 %v12835_v6, %v12794_v30  ;;  %v12837_v59 = vpop.f32.mrb[33].mxu1  ;;  %v12798_v58 = vpop.f32.mrb[34].mxu0  ;;  %13099 = vmatpush1.bf16.msra.mxu0 %v15554_v29  ;;  %v6498_v29 = vld [vmem:[%s17545_s12 + $0x690] sm:$0xff]  ;;  %v15714_v30 = vcombine.low %v6490_v15, %v6494_v13 }
 0x60e   : > { %v19181_v23 = vadd.f32 %v12837_v59, %v12796_v38  ;;  %v12839_v56 = vpop.f32.mrb[34].mxu1  ;;  %13140 = vmatpush1.bf16.msra.mxu1 %v15682_v40  ;;  %v12799_v62 = vpop.f32.mrb[35].mxu0  ;;  %13100 = vmatprep.subr.bf16.mxu0 %v15563_v7  ;;  %v6502_v40 = vld [vmem:[%s17545_s12 + $0x6b0] sm:$0xff]  ;;  %v15586_v7 = vcombine.low %v6362_v17, %v6366_v27  ;;  %v15619_v17 = vcombine.high %v6394_v41, %v6398_v55 }
 0x60f   : > { %v12840_v2 = vpop.f32.mrb[35].mxu1  ;;  %13141 = vmatprep.subr.bf16.mxu1 %v15691_v32  ;;  %v15595_v32 = vcombine.high %v6370_v25, %v6374_v57  ;;  %v15723_v52 = vcombine.high %v6498_v29, %v6502_v40  ;;  %v6382_v6 = vld [vmem:[%s17545_s12 + $0x2f0] sm:$0xff]  ;;  %v15722_v59 = vcombine.low %v6498_v29, %v6502_v40 }
 0x610   : > { %v6506_v38 = vld [vmem:[%s17545_s12 + $0x6d0] sm:$0xff]  ;;  %v15603_v58 = vcombine.high %v6378_v34, %v6382_v6  ;;  %v15602_v2 = vcombine.low %v6378_v34, %v6382_v6 }
 0x611   : > { %13101 = vmatpush1.bf16.msra.mxu0 %v15562_v42  ;;  %v15731_v42 = vcombine.high %v6506_v38, %v6510_v49  ;;  %v6386_v56 = vld [vmem:[%s17545_s12 + $0x310] sm:$0xff] }
 0x612   : > { %13142 = vmatpush1.bf16.msra.mxu1 %v15690_v3  ;;  %13102 = vmatprep.subr.bf16.mxu0 %v15571_v43  ;;  %v6390_v62 = vld [vmem:[%s17545_s12 + $0x330] sm:$0xff] }
 0x613   : > { %13143 = vmatprep.subr.bf16.mxu1 %v15699_v45  ;;  %v6514_v3 = vld [vmem:[%s17545_s12 + $0x710] sm:$0xff]  ;;  %v15730_v45 = vcombine.low %v6506_v38, %v6510_v49  ;;  %v15611_v48 = vcombine.high %v6386_v56, %v6390_v62 }
 0x614   : > { %v6518_v43 = vld [vmem:[%s17545_s12 + $0x730] sm:$0xff] }
 0x615   : > { %13103 = vmatpush1.bf16.msra.mxu0 %v15570_v22  ;;  %v15739_v51 = vcombine.high %v6514_v3, %v6518_v43  ;;  %v6522_v22 = vld [vmem:[%s17545_s12 + $0x750] sm:$0xff] }
 0x616   : > { %13144 = vmatpush1.bf16.msra.mxu1 %v15698_v63  ;;  %13104 = vmatprep.subr.bf16.mxu0 %v15579_v1  ;;  %v6526_v63 = vld [vmem:[%s17545_s12 + $0x770] sm:$0xff]  ;;  %v15610_v1 = vcombine.low %v6386_v56, %v6390_v62 }
 0x617   : > { %13145 = vmatprep.subr.bf16.mxu1 %v15707_v12  ;;  %v15738_v12 = vcombine.low %v6514_v3, %v6518_v43  ;;  %v15747_v27 = vcombine.high %v6522_v22, %v6526_v63  ;;  %v6402_v15 = vld [vmem:[%s17545_s12 + $0x390] sm:$0xff] }
 0x618   : > { %v6406_v13 = vld [vmem:[%s17545_s12 + $0x3b0] sm:$0xff] }
 0x619   : > { %13105 = vmatpush1.bf16.msra.mxu0 %v15578_v19  ;;  %v6530_v19 = vld [vmem:[%s17545_s12 + $0x790] sm:$0xff]  ;;  %v15627_v25 = vcombine.high %v6402_v15, %v6406_v13 }
 0x61a   : > { %13146 = vmatpush1.bf16.msra.mxu1 %v15706_v20  ;;  %13106 = vmatprep.subr.bf16.mxu0 %v15587_v36  ;;  %v6534_v20 = vld [vmem:[%s17545_s12 + $0x7b0] sm:$0xff]  ;;  %v15618_v36 = vcombine.low %v6394_v41, %v6398_v55 }
 0x61b   : > { %13147 = vmatprep.subr.bf16.mxu1 %v15715_v37  ;;  %v15746_v37 = vcombine.low %v6522_v22, %v6526_v63  ;;  %v15755_v57 = vcombine.high %v6530_v19, %v6534_v20  ;;  %v6410_v29 = vld [vmem:[%s17545_s12 + $0x3d0] sm:$0xff] }
 0x61c   : > { %v6414_v40 = vld [vmem:[%s17545_s12 + $0x3f0] sm:$0xff] }
 0x61d   : > { %13107 = vmatpush1.bf16.msra.mxu0 %v15586_v7  ;;  %v6538_v7 = vld [vmem:[%s17545_s12 + $0x7d0] sm:$0xff]  ;;  %v15635_v34 = vcombine.high %v6410_v29, %v6414_v40 }
 0x61e   : > { %13148 = vmatpush1.bf16.msra.mxu1 %v15714_v30  ;;  %13108 = vmatprep.subr.bf16.mxu0 %v15595_v32  ;;  %v6542_v30 = vld [vmem:[%s17545_s12 + $0x7f0] sm:$0xff]  ;;  %v15626_v32 = vcombine.low %v6402_v15, %v6406_v13 }
 0x61f   : > { %13149 = vmatprep.subr.bf16.mxu1 %v15723_v52  ;;  %v15754_v52 = vcombine.low %v6530_v19, %v6534_v20  ;;  %v15763_v6 = vcombine.high %v6538_v7, %v6542_v30  ;;  %v6546_v38 = vld [vmem:[%s17545_s12 + $0x810] sm:$0xff] }
 0x620   : > { %v6550_v49 = vld [vmem:[%s17545_s12 + $0x830] sm:$0xff] }
 0x621   : > { %13109 = vmatpush1.bf16.msra.mxu0 %v15594_v46  ;;  %v6674_v46 = vld [vmem:[%s17545_s12 + $0xc10] sm:$0xff]  ;;  %v15771_v56 = vcombine.high %v6546_v38, %v6550_v49 }
 0x622   : > { %13150 = vmatpush1.bf16.msra.mxu1 %v15722_v59  ;;  %13110 = vmatprep.subr.bf16.mxu0 %v15603_v58  ;;  %v6678_v59 = vld [vmem:[%s17545_s12 + $0xc30] sm:$0xff]  ;;  %v15634_v58 = vcombine.low %v6410_v29, %v6414_v40 }
 0x623   : > { %13151 = vmatprep.subr.bf16.mxu1 %v15731_v42  ;;  %v15762_v42 = vcombine.low %v6538_v7, %v6542_v30  ;;  %v15899_v62 = vcombine.high %v6674_v46, %v6678_v59  ;;  %v6554_v3 = vld [vmem:[%s17545_s12 + $0x850] sm:$0xff] }
 0x624   : > { %v6558_v43 = vld [vmem:[%s17545_s12 + $0x870] sm:$0xff] }
 0x625   : > { %13111 = vmatpush1.bf16.msra.mxu0 %v15602_v2  ;;  %v15770_v2 = vcombine.low %v6546_v38, %v6550_v49  ;;  %v15779_v41 = vcombine.high %v6554_v3, %v6558_v43  ;;  %v6562_v55 = vld [vmem:[%s17545_s12 + $0x890] sm:$0xff] }
 0x626   : > { %13152 = vmatpush1.bf16.msra.mxu1 %v15730_v45  ;;  %13112 = vmatprep.subr.bf16.mxu0 %v15611_v48  ;;  %v6682_v45 = vld [vmem:[%s17545_s12 + $0xc50] sm:$0xff] }
 0x627   : > { %13153 = vmatprep.subr.bf16.mxu1 %v15739_v51  ;;  %v6686_v48 = vld [vmem:[%s17545_s12 + $0xc70] sm:$0xff]  ;;  %v15898_v51 = vcombine.low %v6674_v46, %v6678_v59 }
 0x628   : > { %v6566_v22 = vld [vmem:[%s17545_s12 + $0x8b0] sm:$0xff]  ;;  %v15907_v63 = vcombine.high %v6682_v45, %v6686_v48 }
 0x629   : > { %13113 = vmatpush1.bf16.msra.mxu0 %v15610_v1  ;;  %v6690_v1 = vld [vmem:[%s17545_s12 + $0xc90] sm:$0xff]  ;;  %v15787_v15 = vcombine.high %v6562_v55, %v6566_v22 }
 0x62a   : > { %13154 = vmatpush1.bf16.msra.mxu1 %v15738_v12  ;;  %13114 = vmatprep.subr.bf16.mxu0 %v15619_v17  ;;  %v6694_v12 = vld [vmem:[%s17545_s12 + $0xcb0] sm:$0xff]  ;;  %v15778_v17 = vcombine.low %v6554_v3, %v6558_v43 }
 0x62b   : > { %13155 = vmatprep.subr.bf16.mxu1 %v15747_v27  ;;  %v15906_v27 = vcombine.low %v6682_v45, %v6686_v48  ;;  %v15915_v13 = vcombine.high %v6690_v1, %v6694_v12  ;;  %v6570_v19 = vld [vmem:[%s17545_s12 + $0x8d0] sm:$0xff] }
 0x62c   : > { %v6574_v20 = vld [vmem:[%s17545_s12 + $0x8f0] sm:$0xff] }
 0x62d   : > { %13115 = vmatpush1.bf16.msra.mxu0 %v15618_v36  ;;  %v6698_v36 = vld [vmem:[%s17545_s12 + $0xcd0] sm:$0xff]  ;;  %v15795_v29 = vcombine.high %v6570_v19, %v6574_v20 }
 0x62e   : > { %13156 = vmatpush1.bf16.msra.mxu1 %v15746_v37  ;;  %13116 = vmatprep.subr.bf16.mxu0 %v15627_v25  ;;  %v6702_v37 = vld [vmem:[%s17545_s12 + $0xcf0] sm:$0xff]  ;;  %v15786_v25 = vcombine.low %v6562_v55, %v6566_v22 }
 0x62f   : > { %13157 = vmatprep.subr.bf16.mxu1 %v15755_v57  ;;  %v15914_v57 = vcombine.low %v6690_v1, %v6694_v12  ;;  %v15923_v40 = vcombine.high %v6698_v36, %v6702_v37  ;;  %v6578_v7 = vld [vmem:[%s17545_s12 + $0x910] sm:$0xff] }
 0x630   : > { %v6582_v30 = vld [vmem:[%s17545_s12 + $0x930] sm:$0xff] }
 0x631   : > { %13117 = vmatpush1.bf16.msra.mxu0 %v15626_v32  ;;  %v6706_v32 = vld [vmem:[%s17545_s12 + $0xd10] sm:$0xff]  ;;  %v15803_v38 = vcombine.high %v6578_v7, %v6582_v30 }
 0x632   : > { %13158 = vmatpush1.bf16.msra.mxu1 %v15754_v52  ;;  %13118 = vmatprep.subr.bf16.mxu0 %v15635_v34  ;;  %v6710_v52 = vld [vmem:[%s17545_s12 + $0xd30] sm:$0xff]  ;;  %v15794_v34 = vcombine.low %v6570_v19, %v6574_v20 }
 0x633   : > { %13159 = vmatprep.subr.bf16.mxu1 %v15763_v6  ;;  %v15922_v6 = vcombine.low %v6698_v36, %v6702_v37  ;;  %v15931_v49 = vcombine.high %v6706_v32, %v6710_v52  ;;  %v6586_v46 = vld [vmem:[%s17545_s12 + $0x950] sm:$0xff] }
 0x634   : > { %v6590_v59 = vld [vmem:[%s17545_s12 + $0x970] sm:$0xff] }
 0x635   : > { %13119 = vmatpush1.bf16.msra.mxu0 %v15634_v58  ;;  %v6714_v58 = vld [vmem:[%s17545_s12 + $0xd50] sm:$0xff]  ;;  %v15811_v3 = vcombine.high %v6586_v46, %v6590_v59 }
 0x636   : > { %13160 = vmatpush1.bf16.msra.mxu1 %v15762_v42  ;;  %13170 = vmatprep.subr.bf16.mxu0 %v15771_v56  ;;  %v6718_v42 = vld [vmem:[%s17545_s12 + $0xd70] sm:$0xff]  ;;  %v15802_v56 = vcombine.low %v6578_v7, %v6582_v30 }
 0x637   : > { %13211 = vmatprep.subr.bf16.mxu1 %v15899_v62  ;;  %v15930_v62 = vcombine.low %v6706_v32, %v6710_v52  ;;  %v15939_v43 = vcombine.high %v6714_v58, %v6718_v42  ;;  %v6598_v45 = vld [vmem:[%s17545_s12 + $0x9b0] sm:$0xff]  ;;  %v15938_v55 = vcombine.low %v6714_v58, %v6718_v42 }
 0x638   : > { %13121 = vmatmul.mubr.bf16.vlgmr.msra.gmra.mrb[48].mxu0 %v18565_v24  ;;  %v6722_v48 = vld [vmem:[%s17545_s12 + $0xd90] sm:$0xff] }
 0x639   : > { %13162 = vmatmul.mubr.bf16.vlgmr.msra.gmra.mrb[48].mxu1 %v18567_v28  ;;  %13171 = vmatpush1.bf16.msra.mxu0 %v15770_v2  ;;  %v6594_v2 = vld [vmem:[%s17545_s12 + $0x990] sm:$0xff] }
 0x63a   : > { %13202 = vmatprep.mubr.bf16.mxu0 %v18571_v31  ;;  %13212 = vmatpush1.bf16.msra.mxu1 %v15898_v51  ;;  %v6726_v51 = vld [vmem:[%s17545_s12 + $0xdb0] sm:$0xff]  ;;  %v15819_v22 = vcombine.high %v6594_v2, %v6598_v45 }
 0x63b   : > { %13243 = vmatprep.mubr.bf16.mxu1 %v18576_v35  ;;  %13172 = vmatprep.subr.bf16.mxu0 %v15779_v41  ;;  %v15810_v41 = vcombine.low %v6586_v46, %v6590_v59  ;;  %v15947_v1 = vcombine.high %v6722_v48, %v6726_v51  ;;  %v6602_v12 = vld [vmem:[%s17545_s12 + $0x9d0] sm:$0xff] }
 0x63c   : > { %13213 = vmatprep.subr.bf16.mxu1 %v15907_v63  ;;  %v6730_v19 = vld [vmem:[%s17545_s12 + $0xdd0] sm:$0xff] }
 0x63d   : > { %13173 = vmatpush1.bf16.msra.mxu0 %v15778_v17  ;;  %v6606_v17 = vld [vmem:[%s17545_s12 + $0x9f0] sm:$0xff] }
 0x63e   : > { %13214 = vmatpush1.bf16.msra.mxu1 %v15906_v27  ;;  %13174 = vmatprep.subr.bf16.mxu0 %v15787_v15  ;;  %v6734_v20 = vld [vmem:[%s17545_s12 + $0xdf0] sm:$0xff]  ;;  %v15827_v30 = vcombine.high %v6602_v12, %v6606_v17  ;;  %v15826_v46 = vcombine.low %v6602_v12, %v6606_v17 }
 0x63f   : > { %13215 = vmatprep.subr.bf16.mxu1 %v15915_v13  ;;  %v15955_v52 = vcombine.high %v6730_v19, %v6734_v20  ;;  %v15954_v59 = vcombine.low %v6730_v19, %v6734_v20  ;;  %v6762_v19 = vld [vmem:[%s17545_s12 + $0xed0] sm:$0xff] }
 0x640   : > { %v6766_v20 = vld [vmem:[%s17545_s12 + $0xef0] sm:$0xff] }
 0x641   : > { %13175 = vmatpush1.bf16.msra.mxu0 %v15786_v25 }
 0x642   : > { %13216 = vmatpush1.bf16.msra.mxu1 %v15914_v57  ;;  %13176 = vmatprep.subr.bf16.mxu0 %v15795_v29  ;;  %v15818_v57 = vcombine.low %v6594_v2, %v6598_v45 }
 0x643   : > { %13217 = vmatprep.subr.bf16.mxu1 %v15923_v40 }
 0x645   : > { %13177 = vmatpush1.bf16.msra.mxu0 %v15794_v34  ;;  %v6610_v34 = vld [vmem:[%s17545_s12 + $0xa10] sm:$0xff] }
 0x646   : > { %13218 = vmatpush1.bf16.msra.mxu1 %v15922_v6  ;;  %13178 = vmatprep.subr.bf16.mxu0 %v15803_v38  ;;  %v6614_v6 = vld [vmem:[%s17545_s12 + $0xa30] sm:$0xff] }
 0x647   : > { %13219 = vmatprep.subr.bf16.mxu1 %v15931_v49  ;;  %v6738_v38 = vld [vmem:[%s17545_s12 + $0xe10] sm:$0xff]  ;;  %v15835_v58 = vcombine.high %v6610_v34, %v6614_v6  ;;  %v15834_v2 = vcombine.low %v6610_v34, %v6614_v6 }
 0x648   : > { %v6742_v49 = vld [vmem:[%s17545_s12 + $0xe30] sm:$0xff] }
 0x649   : > { %13179 = vmatpush1.bf16.msra.mxu0 %v15802_v56  ;;  %v15963_v42 = vcombine.high %v6738_v38, %v6742_v49  ;;  %v6618_v56 = vld [vmem:[%s17545_s12 + $0xa50] sm:$0xff]  ;;  %v15962_v45 = vcombine.low %v6738_v38, %v6742_v49 }
 0x64a   : > { %13220 = vmatpush1.bf16.msra.mxu1 %v15930_v62  ;;  %13180 = vmatprep.subr.bf16.mxu0 %v15811_v3  ;;  %v6622_v62 = vld [vmem:[%s17545_s12 + $0xa70] sm:$0xff] }
 0x64b   : > { %v12876_v63 = vpop.f32.mrb[36].mxu0  ;;  %13221 = vmatprep.subr.bf16.mxu1 %v15939_v43  ;;  %v6746_v3 = vld [vmem:[%s17545_s12 + $0xe50] sm:$0xff] }
 0x64c   : > { %v12877_v27 = vadd.f32 %v12876_v63, %v19179_v39  ;;  %v12917_v15 = vpop.f32.mrb[36].mxu1  ;;  %v12878_v13 = vpop.f32.mrb[37].mxu0  ;;  %v15946_v39 = vcombine.low %v6722_v48, %v6726_v51  ;;  %v6750_v43 = vld [vmem:[%s17545_s12 + $0xe70] sm:$0xff]  ;;  %v15843_v48 = vcombine.high %v6618_v56, %v6622_v62 }
 0x64d   : > { %v12879_v36 = vadd.f32 %v12878_v13, %v19181_v23  ;;  %v12919_v37 = vpop.f32.mrb[37].mxu1  ;;  %v12880_v25 = vpop.f32.mrb[38].mxu0  ;;  %13181 = vmatpush1.bf16.msra.mxu0 %v15810_v41  ;;  %v15971_v51 = vcombine.high %v6746_v3, %v6750_v43  ;;  %v6626_v41 = vld [vmem:[%s17545_s12 + $0xa90] sm:$0xff]  ;;  %v15970_v12 = vcombine.low %v6746_v3, %v6750_v43 }
 0x64e   : > { %v19253_v29 = vadd.f32 %v12917_v15, %v12877_v27  ;;  %v12921_v40 = vpop.f32.mrb[38].mxu1  ;;  %13222 = vmatpush1.bf16.msra.mxu1 %v15938_v55  ;;  %v12881_v7 = vpop.f32.mrb[39].mxu0  ;;  %13182 = vmatprep.subr.bf16.mxu0 %v15819_v22  ;;  %v6630_v55 = vld [vmem:[%s17545_s12 + $0xab0] sm:$0xff] }
 0x64f   : > { %v19255_v32 = vadd.f32 %v12919_v37, %v12879_v36  ;;  %v12922_v23 = vpop.f32.mrb[39].mxu1  ;;  %13223 = vmatprep.subr.bf16.mxu1 %v15947_v1  ;;  %v6754_v22 = vld [vmem:[%s17545_s12 + $0xe90] sm:$0xff]  ;;  %v15842_v1 = vcombine.low %v6618_v56, %v6622_v62  ;;  %v15851_v17 = vcombine.high %v6626_v41, %v6630_v55  ;;  %v15850_v36 = vcombine.low %v6626_v41, %v6630_v55 }
 0x650   : > { %v6758_v63 = vld [vmem:[%s17545_s12 + $0xeb0] sm:$0xff] }
 0x651   : > { %13183 = vmatpush1.bf16.msra.mxu0 %v15818_v57  ;;  %v15979_v27 = vcombine.high %v6754_v22, %v6758_v63  ;;  %v6634_v15 = vld [vmem:[%s17545_s12 + $0xad0] sm:$0xff]  ;;  %v15978_v37 = vcombine.low %v6754_v22, %v6758_v63  ;;  %v15987_v57 = vcombine.high %v6762_v19, %v6766_v20 }
 0x652   : > { %13224 = vmatpush1.bf16.msra.mxu1 %v15946_v39  ;;  %13184 = vmatprep.subr.bf16.mxu0 %v15827_v30  ;;  %v6638_v13 = vld [vmem:[%s17545_s12 + $0xaf0] sm:$0xff] }
 0x653   : > { %13225 = vmatprep.subr.bf16.mxu1 %v15955_v52  ;;  %v15859_v25 = vcombine.high %v6634_v15, %v6638_v13  ;;  %v6642_v40 = vld [vmem:[%s17545_s12 + $0xb10] sm:$0xff]  ;;  %v15858_v23 = vcombine.low %v6634_v15, %v6638_v13  ;;  %v15986_v52 = vcombine.low %v6762_v19, %v6766_v20 }
 0x654   : > { %v6646_v7 = vld [vmem:[%s17545_s12 + $0xb30] sm:$0xff] }
 0x655   : > { %13185 = vmatpush1.bf16.msra.mxu0 %v15826_v46  ;;  %v6770_v39 = vld [vmem:[%s17545_s12 + $0xf10] sm:$0xff]  ;;  %v15867_v34 = vcombine.high %v6642_v40, %v6646_v7 }
 0x656   : > { %13226 = vmatpush1.bf16.msra.mxu1 %v15954_v59  ;;  %13186 = vmatprep.subr.bf16.mxu0 %v15835_v58  ;;  %v6774_v30 = vld [vmem:[%s17545_s12 + $0xf30] sm:$0xff]  ;;  %v15866_v58 = vcombine.low %v6642_v40, %v6646_v7 }
 0x657   : > { %13227 = vmatprep.subr.bf16.mxu1 %v15963_v42  ;;  %v15995_v6 = vcombine.high %v6770_v39, %v6774_v30  ;;  %v6650_v38 = vld [vmem:[%s17545_s12 + $0xb50] sm:$0xff]  ;;  %v15994_v42 = vcombine.low %v6770_v39, %v6774_v30 }
 0x658   : > { %v6654_v49 = vld [vmem:[%s17545_s12 + $0xb70] sm:$0xff] }
 0x659   : > { %13187 = vmatpush1.bf16.msra.mxu0 %v15834_v2  ;;  %v6778_v46 = vld [vmem:[%s17545_s12 + $0xf50] sm:$0xff]  ;;  %v15875_v56 = vcombine.high %v6650_v38, %v6654_v49 }
 0x65a   : > { %13228 = vmatpush1.bf16.msra.mxu1 %v15962_v45  ;;  %13188 = vmatprep.subr.bf16.mxu0 %v15843_v48  ;;  %v6782_v59 = vld [vmem:[%s17545_s12 + $0xf70] sm:$0xff]  ;;  %v15874_v48 = vcombine.low %v6650_v38, %v6654_v49 }
 0x65b   : > { %13229 = vmatprep.subr.bf16.mxu1 %v15971_v51  ;;  %v16003_v62 = vcombine.high %v6778_v46, %v6782_v59  ;;  %v6658_v3 = vld [vmem:[%s17545_s12 + $0xb90] sm:$0xff]  ;;  %v16002_v51 = vcombine.low %v6778_v46, %v6782_v59 }
 0x65c   : > { %v6662_v43 = vld [vmem:[%s17545_s12 + $0xbb0] sm:$0xff] }
 0x65d   : > { %13189 = vmatpush1.bf16.msra.mxu0 %v15842_v1  ;;  %v6786_v2 = vld [vmem:[%s17545_s12 + $0xf90] sm:$0xff]  ;;  %v15883_v41 = vcombine.high %v6658_v3, %v6662_v43 }
 0x65e   : > { %13230 = vmatpush1.bf16.msra.mxu1 %v15970_v12  ;;  %13190 = vmatprep.subr.bf16.mxu0 %v15851_v17  ;;  %v6790_v45 = vld [vmem:[%s17545_s12 + $0xfb0] sm:$0xff]  ;;  %v15882_v17 = vcombine.low %v6658_v3, %v6662_v43 }
 0x65f   : > { %13231 = vmatprep.subr.bf16.mxu1 %v15979_v27  ;;  %v16011_v55 = vcombine.high %v6786_v2, %v6790_v45  ;;  %v6666_v22 = vld [vmem:[%s17545_s12 + $0xbd0] sm:$0xff]  ;;  %v16010_v27 = vcombine.low %v6786_v2, %v6790_v45 }
 0x660   : > { %v6670_v63 = vld [vmem:[%s17545_s12 + $0xbf0] sm:$0xff] }
 0x661   : > { %13191 = vmatpush1.bf16.msra.mxu0 %v15850_v36  ;;  %v6794_v1 = vld [vmem:[%s17545_s12 + $0xfd0] sm:$0xff]  ;;  %v15891_v15 = vcombine.high %v6666_v22, %v6670_v63 }
 0x662   : > { %13232 = vmatpush1.bf16.msra.mxu1 %v15978_v37  ;;  %13192 = vmatprep.subr.bf16.mxu0 %v15859_v25  ;;  %v6798_v12 = vld [vmem:[%s17545_s12 + $0xff0] sm:$0xff]  ;;  %v15890_v25 = vcombine.low %v6666_v22, %v6670_v63 }
 0x663   : > { %13233 = vmatprep.subr.bf16.mxu1 %v15987_v57  ;;  %v16019_v13 = vcombine.high %v6794_v1, %v6798_v12  ;;  %v6802_v19 = vld [vmem:[%s17545_s12 + $0x1010] sm:$0xff]  ;;  %v16018_v57 = vcombine.low %v6794_v1, %v6798_v12 }
 0x664   : > { %v6806_v20 = vld [vmem:[%s17545_s12 + $0x1030] sm:$0xff] }
 0x665   : > { %13193 = vmatpush1.bf16.msra.mxu0 %v15858_v23  ;;  %v6930_v36 = vld [vmem:[%s17545_s12 + $0x1410] sm:$0xff]  ;;  %v16027_v40 = vcombine.high %v6802_v19, %v6806_v20  ;;  %v16026_v23 = vcombine.low %v6802_v19, %v6806_v20 }
 0x666   : > { %13234 = vmatpush1.bf16.msra.mxu1 %v15986_v52  ;;  %13194 = vmatprep.subr.bf16.mxu0 %v15867_v34  ;;  %v6934_v37 = vld [vmem:[%s17545_s12 + $0x1430] sm:$0xff] }
 0x667   : > { %13235 = vmatprep.subr.bf16.mxu1 %v15995_v6  ;;  %v16155_v7 = vcombine.high %v6930_v36, %v6934_v37  ;;  %v6810_v39 = vld [vmem:[%s17545_s12 + $0x1050] sm:$0xff]  ;;  %v16154_v6 = vcombine.low %v6930_v36, %v6934_v37 }
 0x668   : > { %v6814_v30 = vld [vmem:[%s17545_s12 + $0x1070] sm:$0xff] }
 0x669   : > { %13195 = vmatpush1.bf16.msra.mxu0 %v15866_v58  ;;  %v6938_v52 = vld [vmem:[%s17545_s12 + $0x1450] sm:$0xff]  ;;  %v16035_v38 = vcombine.high %v6810_v39, %v6814_v30 }
 0x66a   : > { %13236 = vmatpush1.bf16.msra.mxu1 %v15994_v42  ;;  %13196 = vmatprep.subr.bf16.mxu0 %v15875_v56  ;;  %v6942_v34 = vld [vmem:[%s17545_s12 + $0x1470] sm:$0xff]  ;;  %v16034_v56 = vcombine.low %v6810_v39, %v6814_v30 }
 0x66b   : > { %13237 = vmatprep.subr.bf16.mxu1 %v16003_v62  ;;  %v6818_v49 = vld [vmem:[%s17545_s12 + $0x1090] sm:$0xff]  ;;  %v16163_v59 = vcombine.high %v6938_v52, %v6942_v34  ;;  %v16162_v62 = vcombine.low %v6938_v52, %v6942_v34 }
 0x66c   : > { %v6822_v46 = vld [vmem:[%s17545_s12 + $0x10b0] sm:$0xff] }
 0x66d   : > { %13197 = vmatpush1.bf16.msra.mxu0 %v15874_v48  ;;  %v6946_v58 = vld [vmem:[%s17545_s12 + $0x1490] sm:$0xff]  ;;  %v16043_v3 = vcombine.high %v6818_v49, %v6822_v46 }
 0x66e   : > { %13238 = vmatpush1.bf16.msra.mxu1 %v16002_v51  ;;  %13198 = vmatprep.subr.bf16.mxu0 %v15883_v41  ;;  %v6950_v42 = vld [vmem:[%s17545_s12 + $0x14b0] sm:$0xff]  ;;  %v16042_v41 = vcombine.low %v6818_v49, %v6822_v46 }
 0x66f   : > { %13239 = vmatprep.subr.bf16.mxu1 %v16011_v55  ;;  %v16171_v43 = vcombine.high %v6946_v58, %v6950_v42  ;;  %v6826_v2 = vld [vmem:[%s17545_s12 + $0x10d0] sm:$0xff]  ;;  %v16170_v55 = vcombine.low %v6946_v58, %v6950_v42 }
 0x670   : > { %v6830_v45 = vld [vmem:[%s17545_s12 + $0x10f0] sm:$0xff] }
 0x671   : > { %13199 = vmatpush1.bf16.msra.mxu0 %v15882_v17  ;;  %v6954_v48 = vld [vmem:[%s17545_s12 + $0x14d0] sm:$0xff]  ;;  %v16051_v22 = vcombine.high %v6826_v2, %v6830_v45 }
 0x672   : > { %13240 = vmatpush1.bf16.msra.mxu1 %v16010_v27  ;;  %13200 = vmatprep.subr.bf16.mxu0 %v15891_v15  ;;  %v6958_v51 = vld [vmem:[%s17545_s12 + $0x14f0] sm:$0xff]  ;;  %v16050_v15 = vcombine.low %v6826_v2, %v6830_v45 }
 0x673   : > { %13241 = vmatprep.subr.bf16.mxu1 %v16019_v13  ;;  %v16179_v63 = vcombine.high %v6954_v48, %v6958_v51  ;;  %v6834_v1 = vld [vmem:[%s17545_s12 + $0x1110] sm:$0xff]  ;;  %v16178_v13 = vcombine.low %v6954_v48, %v6958_v51 }
 0x674   : > { %v6838_v12 = vld [vmem:[%s17545_s12 + $0x1130] sm:$0xff] }
 0x675   : > { %13201 = vmatpush1.bf16.msra.mxu0 %v15890_v25  ;;  %v6962_v17 = vld [vmem:[%s17545_s12 + $0x1510] sm:$0xff]  ;;  %v16059_v19 = vcombine.high %v6834_v1, %v6838_v12 }
 0x676   : > { %13242 = vmatpush1.bf16.msra.mxu1 %v16018_v57  ;;  %13252 = vmatprep.subr.bf16.mxu0 %v16027_v40  ;;  %v6966_v27 = vld [vmem:[%s17545_s12 + $0x1530] sm:$0xff]  ;;  %v16058_v40 = vcombine.low %v6834_v1, %v6838_v12 }
 0x677   : > { %13293 = vmatprep.subr.bf16.mxu1 %v16155_v7  ;;  %v16187_v20 = vcombine.high %v6962_v17, %v6966_v27  ;;  %v6842_v36 = vld [vmem:[%s17545_s12 + $0x1150] sm:$0xff]  ;;  %v16186_v7 = vcombine.low %v6962_v17, %v6966_v27 }
 0x678   : > { %13203 = vmatmul.mubr.bf16.vlgmr.msra.gmra.mrb[52].mxu0 %v18673_v44  ;;  %v6846_v37 = vld [vmem:[%s17545_s12 + $0x1170] sm:$0xff] }
 0x679   : > { %13244 = vmatmul.mubr.bf16.vlgmr.msra.gmra.mrb[52].mxu1 %v18675_v18  ;;  %13253 = vmatpush1.bf16.msra.mxu0 %v16026_v23  ;;  %v6970_v25 = vld [vmem:[%s17545_s12 + $0x1550] sm:$0xff]  ;;  %v16067_v39 = vcombine.high %v6842_v36, %v6846_v37 }
 0x67a   : > { %13284 = vmatprep.mubr.bf16.mxu0 %v18679_v9  ;;  %13294 = vmatpush1.bf16.msra.mxu1 %v16154_v6  ;;  %v6974_v57 = vld [vmem:[%s17545_s12 + $0x1570] sm:$0xff] }
 0x67b   : > { %13325 = vmatprep.mubr.bf16.mxu1 %v18684_v50  ;;  %13254 = vmatprep.subr.bf16.mxu0 %v16035_v38  ;;  %v16195_v30 = vcombine.high %v6970_v25, %v6974_v57  ;;  %v6850_v23 = vld [vmem:[%s17545_s12 + $0x1190] sm:$0xff]  ;;  %v16066_v38 = vcombine.low %v6842_v36, %v6846_v37  ;;  %v16194_v49 = vcombine.low %v6970_v25, %v6974_v57 }
 0x67c   : > { %13295 = vmatprep.subr.bf16.mxu1 %v16163_v59  ;;  %v6854_v52 = vld [vmem:[%s17545_s12 + $0x11b0] sm:$0xff] }
 0x67d   : > { %13255 = vmatpush1.bf16.msra.mxu0 %v16034_v56  ;;  %v6978_v34 = vld [vmem:[%s17545_s12 + $0x1590] sm:$0xff]  ;;  %v16075_v46 = vcombine.high %v6850_v23, %v6854_v52 }
 0x67e   : > { %13296 = vmatpush1.bf16.msra.mxu1 %v16162_v62  ;;  %13256 = vmatprep.subr.bf16.mxu0 %v16043_v3  ;;  %v6982_v6 = vld [vmem:[%s17545_s12 + $0x15b0] sm:$0xff] }
 0x67f   : > { %13297 = vmatprep.subr.bf16.mxu1 %v16171_v43  ;;  %v16203_v58 = vcombine.high %v6978_v34, %v6982_v6  ;;  %v6858_v42 = vld [vmem:[%s17545_s12 + $0x11d0] sm:$0xff] }
 0x680   : > { %v6862_v56 = vld [vmem:[%s17545_s12 + $0x11f0] sm:$0xff] }
 0x681   : > { %13257 = vmatpush1.bf16.msra.mxu0 %v16042_v41  ;;  %v6986_v2 = vld [vmem:[%s17545_s12 + $0x15d0] sm:$0xff]  ;;  %v16083_v12 = vcombine.high %v6858_v42, %v6862_v56  ;;  %v16082_v36 = vcombine.low %v6858_v42, %v6862_v56 }
 0x682   : > { %13298 = vmatpush1.bf16.msra.mxu1 %v16170_v55  ;;  %13258 = vmatprep.subr.bf16.mxu0 %v16051_v22  ;;  %v6990_v45 = vld [vmem:[%s17545_s12 + $0x15f0] sm:$0xff]  ;;  %v16074_v55 = vcombine.low %v6850_v23, %v6854_v52 }
 0x683   : > { %13299 = vmatprep.subr.bf16.mxu1 %v16179_v63  ;;  %v16211_v27 = vcombine.high %v6986_v2, %v6990_v45  ;;  %v16210_v37 = vcombine.low %v6986_v2, %v6990_v45  ;;  %v7018_v2 = vld [vmem:[%s17545_s12 + $0x16d0] sm:$0xff] }
 0x684   : > { %v7022_v45 = vld [vmem:[%s17545_s12 + $0x16f0] sm:$0xff] }
 0x685   : > { %13259 = vmatpush1.bf16.msra.mxu0 %v16050_v15  ;;  %v6866_v15 = vld [vmem:[%s17545_s12 + $0x1210] sm:$0xff] }
 0x686   : > { %13300 = vmatpush1.bf16.msra.mxu1 %v16178_v13  ;;  %13260 = vmatprep.subr.bf16.mxu0 %v16059_v19  ;;  %v6870_v13 = vld [vmem:[%s17545_s12 + $0x1230] sm:$0xff] }
 0x687   : > { %13301 = vmatprep.subr.bf16.mxu1 %v16187_v20  ;;  %v6994_v19 = vld [vmem:[%s17545_s12 + $0x1610] sm:$0xff]  ;;  %v16091_v25 = vcombine.high %v6866_v15, %v6870_v13  ;;  %v16090_v23 = vcombine.low %v6866_v15, %v6870_v13 }
 0x688   : > { %v6998_v20 = vld [vmem:[%s17545_s12 + $0x1630] sm:$0xff] }
 0x689   : > { %13261 = vmatpush1.bf16.msra.mxu0 %v16058_v40  ;;  %v16219_v57 = vcombine.high %v6994_v19, %v6998_v20  ;;  %v6874_v40 = vld [vmem:[%s17545_s12 + $0x1250] sm:$0xff]  ;;  %v16218_v52 = vcombine.low %v6994_v19, %v6998_v20 }
 0x68a   : > { %13302 = vmatpush1.bf16.msra.mxu1 %v16186_v7  ;;  %13262 = vmatprep.subr.bf16.mxu0 %v16067_v39  ;;  %v6878_v7 = vld [vmem:[%s17545_s12 + $0x1270] sm:$0xff] }
 0x68b   : > { %v12958_v59 = vpop.f32.mrb[40].mxu0  ;;  %13303 = vmatprep.subr.bf16.mxu1 %v16195_v30  ;;  %v7002_v39 = vld [vmem:[%s17545_s12 + $0x1650] sm:$0xff] }
 0x68c   : > { %v12959_v62 = vadd.f32 %v12958_v59, %v19253_v29  ;;  %v12999_v3 = vpop.f32.mrb[40].mxu1  ;;  %v12960_v43 = vpop.f32.mrb[41].mxu0  ;;  %v16202_v29 = vcombine.low %v6978_v34, %v6982_v6  ;;  %v7006_v30 = vld [vmem:[%s17545_s12 + $0x1670] sm:$0xff]  ;;  %v16099_v34 = vcombine.high %v6874_v40, %v6878_v7 }
 0x68d   : > { %v12961_v48 = vadd.f32 %v12960_v43, %v19255_v32  ;;  %v13001_v51 = vpop.f32.mrb[41].mxu1  ;;  %v12962_v41 = vpop.f32.mrb[42].mxu0  ;;  %13263 = vmatpush1.bf16.msra.mxu0 %v16066_v38  ;;  %v16227_v6 = vcombine.high %v7002_v39, %v7006_v30  ;;  %v6882_v38 = vld [vmem:[%s17545_s12 + $0x1290] sm:$0xff]  ;;  %v16226_v42 = vcombine.low %v7002_v39, %v7006_v30 }
 0x68e   : > { %v19327_v22 = vadd.f32 %v12999_v3, %v12959_v62  ;;  %v13003_v63 = vpop.f32.mrb[42].mxu1  ;;  %13304 = vmatpush1.bf16.msra.mxu1 %v16194_v49  ;;  %v12963_v1 = vpop.f32.mrb[43].mxu0  ;;  %13264 = vmatprep.subr.bf16.mxu0 %v16075_v46  ;;  %v6886_v49 = vld [vmem:[%s17545_s12 + $0x12b0] sm:$0xff] }
 0x68f   : > { %v19329_v17 = vadd.f32 %v13001_v51, %v12961_v48  ;;  %v13004_v32 = vpop.f32.mrb[43].mxu1  ;;  %13305 = vmatprep.subr.bf16.mxu1 %v16203_v58  ;;  %v7010_v46 = vld [vmem:[%s17545_s12 + $0x1690] sm:$0xff]  ;;  %v16098_v58 = vcombine.low %v6874_v40, %v6878_v7  ;;  %v16107_v56 = vcombine.high %v6882_v38, %v6886_v49  ;;  %v16106_v48 = vcombine.low %v6882_v38, %v6886_v49 }
 0x690   : > { %v7014_v59 = vld [vmem:[%s17545_s12 + $0x16b0] sm:$0xff] }
 0x691   : > { %13265 = vmatpush1.bf16.msra.mxu0 %v16074_v55  ;;  %v16235_v62 = vcombine.high %v7010_v46, %v7014_v59  ;;  %v6890_v3 = vld [vmem:[%s17545_s12 + $0x12d0] sm:$0xff]  ;;  %v16234_v51 = vcombine.low %v7010_v46, %v7014_v59  ;;  %v16243_v55 = vcombine.high %v7018_v2, %v7022_v45 }
 0x692   : > { %13306 = vmatpush1.bf16.msra.mxu1 %v16202_v29  ;;  %13266 = vmatprep.subr.bf16.mxu0 %v16083_v12  ;;  %v6894_v43 = vld [vmem:[%s17545_s12 + $0x12f0] sm:$0xff] }
 0x693   : > { %13307 = vmatprep.subr.bf16.mxu1 %v16211_v27  ;;  %v16115_v41 = vcombine.high %v6890_v3, %v6894_v43  ;;  %v6898_v63 = vld [vmem:[%s17545_s12 + $0x1310] sm:$0xff]  ;;  %v16114_v32 = vcombine.low %v6890_v3, %v6894_v43  ;;  %v16242_v27 = vcombine.low %v7018_v2, %v7022_v45 }
 0x694   : > { %v6902_v1 = vld [vmem:[%s17545_s12 + $0x1330] sm:$0xff] }
 0x695   : > { %13267 = vmatpush1.bf16.msra.mxu0 %v16082_v36  ;;  %v7026_v29 = vld [vmem:[%s17545_s12 + $0x1710] sm:$0xff]  ;;  %v16123_v15 = vcombine.high %v6898_v63, %v6902_v1 }
 0x696   : > { %13308 = vmatpush1.bf16.msra.mxu1 %v16210_v37  ;;  %13268 = vmatprep.subr.bf16.mxu0 %v16091_v25  ;;  %v7030_v12 = vld [vmem:[%s17545_s12 + $0x1730] sm:$0xff]  ;;  %v16122_v25 = vcombine.low %v6898_v63, %v6902_v1 }
 0x697   : > { %13309 = vmatprep.subr.bf16.mxu1 %v16219_v57  ;;  %v16251_v13 = vcombine.high %v7026_v29, %v7030_v12  ;;  %v6906_v19 = vld [vmem:[%s17545_s12 + $0x1350] sm:$0xff]  ;;  %v16250_v57 = vcombine.low %v7026_v29, %v7030_v12 }
 0x698   : > { %v6910_v20 = vld [vmem:[%s17545_s12 + $0x1370] sm:$0xff] }
 0x699   : > { %13269 = vmatpush1.bf16.msra.mxu0 %v16090_v23  ;;  %v7034_v36 = vld [vmem:[%s17545_s12 + $0x1750] sm:$0xff]  ;;  %v16131_v40 = vcombine.high %v6906_v19, %v6910_v20 }
 0x69a   : > { %13310 = vmatpush1.bf16.msra.mxu1 %v16218_v52  ;;  %13270 = vmatprep.subr.bf16.mxu0 %v16099_v34  ;;  %v7038_v37 = vld [vmem:[%s17545_s12 + $0x1770] sm:$0xff]  ;;  %v16130_v34 = vcombine.low %v6906_v19, %v6910_v20 }
 0x69b   : > { %13311 = vmatprep.subr.bf16.mxu1 %v16227_v6  ;;  %v16259_v7 = vcombine.high %v7034_v36, %v7038_v37  ;;  %v6914_v39 = vld [vmem:[%s17545_s12 + $0x1390] sm:$0xff]  ;;  %v16258_v6 = vcombine.low %v7034_v36, %v7038_v37 }
 0x69c   : > { %v6918_v30 = vld [vmem:[%s17545_s12 + $0x13b0] sm:$0xff] }
 0x69d   : > { %13271 = vmatpush1.bf16.msra.mxu0 %v16098_v58  ;;  %v7042_v23 = vld [vmem:[%s17545_s12 + $0x1790] sm:$0xff]  ;;  %v16139_v38 = vcombine.high %v6914_v39, %v6918_v30 }
 0x69e   : > { %13312 = vmatpush1.bf16.msra.mxu1 %v16226_v42  ;;  %13272 = vmatprep.subr.bf16.mxu0 %v16107_v56  ;;  %v7046_v52 = vld [vmem:[%s17545_s12 + $0x17b0] sm:$0xff]  ;;  %v16138_v56 = vcombine.low %v6914_v39, %v6918_v30 }
 0x69f   : > { %13313 = vmatprep.subr.bf16.mxu1 %v16235_v62  ;;  %v16267_v49 = vcombine.high %v7042_v23, %v7046_v52  ;;  %v6922_v46 = vld [vmem:[%s17545_s12 + $0x13d0] sm:$0xff]  ;;  %v16266_v62 = vcombine.low %v7042_v23, %v7046_v52 }
 0x6a0   : > { %v6926_v59 = vld [vmem:[%s17545_s12 + $0x13f0] sm:$0xff] }
 0x6a1   : > { %13273 = vmatpush1.bf16.msra.mxu0 %v16106_v48  ;;  %v7050_v58 = vld [vmem:[%s17545_s12 + $0x17d0] sm:$0xff]  ;;  %v16147_v3 = vcombine.high %v6922_v46, %v6926_v59 }
 0x6a2   : > { %13314 = vmatpush1.bf16.msra.mxu1 %v16234_v51  ;;  %13274 = vmatprep.subr.bf16.mxu0 %v16115_v41  ;;  %v7054_v42 = vld [vmem:[%s17545_s12 + $0x17f0] sm:$0xff]  ;;  %v16146_v41 = vcombine.low %v6922_v46, %v6926_v59 }
 0x6a3   : > { %13315 = vmatprep.subr.bf16.mxu1 %v16243_v55  ;;  %v16275_v43 = vcombine.high %v7050_v58, %v7054_v42  ;;  %v7058_v2 = vld [vmem:[%s17545_s12 + $0x1810] sm:$0xff]  ;;  %v16274_v55 = vcombine.low %v7050_v58, %v7054_v42 }
 0x6a4   : > { %v7062_v45 = vld [vmem:[%s17545_s12 + $0x1830] sm:$0xff] }
 0x6a5   : > { %13275 = vmatpush1.bf16.msra.mxu0 %v16114_v32  ;;  %v7186_v48 = vld [vmem:[%s17545_s12 + $0x1c10] sm:$0xff]  ;;  %v16283_v63 = vcombine.high %v7058_v2, %v7062_v45  ;;  %v16282_v32 = vcombine.low %v7058_v2, %v7062_v45 }
 0x6a6   : > { %13316 = vmatpush1.bf16.msra.mxu1 %v16242_v27  ;;  %13276 = vmatprep.subr.bf16.mxu0 %v16123_v15  ;;  %v7190_v51 = vld [vmem:[%s17545_s12 + $0x1c30] sm:$0xff] }
 0x6a7   : > { %13317 = vmatprep.subr.bf16.mxu1 %v16251_v13  ;;  %v16411_v1 = vcombine.high %v7186_v48, %v7190_v51  ;;  %v7066_v29 = vld [vmem:[%s17545_s12 + $0x1850] sm:$0xff]  ;;  %v16410_v13 = vcombine.low %v7186_v48, %v7190_v51 }
 0x6a8   : > { %v7070_v12 = vld [vmem:[%s17545_s12 + $0x1870] sm:$0xff] }
 0x6a9   : > { %13277 = vmatpush1.bf16.msra.mxu0 %v16122_v25  ;;  %v7194_v27 = vld [vmem:[%s17545_s12 + $0x1c50] sm:$0xff]  ;;  %v16291_v19 = vcombine.high %v7066_v29, %v7070_v12 }
 0x6aa   : > { %13318 = vmatpush1.bf16.msra.mxu1 %v16250_v57  ;;  %13278 = vmatprep.subr.bf16.mxu0 %v16131_v40  ;;  %v7198_v15 = vld [vmem:[%s17545_s12 + $0x1c70] sm:$0xff]  ;;  %v16290_v40 = vcombine.low %v7066_v29, %v7070_v12 }
 0x6ab   : > { %13319 = vmatprep.subr.bf16.mxu1 %v16259_v7  ;;  %v7074_v20 = vld [vmem:[%s17545_s12 + $0x1890] sm:$0xff]  ;;  %v16419_v37 = vcombine.high %v7194_v27, %v7198_v15  ;;  %v16418_v7 = vcombine.low %v7194_v27, %v7198_v15 }
 0x6ac   : > { %v7078_v36 = vld [vmem:[%s17545_s12 + $0x18b0] sm:$0xff] }
 0x6ad   : > { %13279 = vmatpush1.bf16.msra.mxu0 %v16130_v34  ;;  %v7202_v25 = vld [vmem:[%s17545_s12 + $0x1c90] sm:$0xff]  ;;  %v16299_v39 = vcombine.high %v7074_v20, %v7078_v36 }
 0x6ae   : > { %13320 = vmatpush1.bf16.msra.mxu1 %v16258_v6  ;;  %13280 = vmatprep.subr.bf16.mxu0 %v16139_v38  ;;  %v7206_v57 = vld [vmem:[%s17545_s12 + $0x1cb0] sm:$0xff]  ;;  %v16298_v38 = vcombine.low %v7074_v20, %v7078_v36 }
 0x6af   : > { %13321 = vmatprep.subr.bf16.mxu1 %v16267_v49  ;;  %v16427_v30 = vcombine.high %v7202_v25, %v7206_v57  ;;  %v7082_v23 = vld [vmem:[%s17545_s12 + $0x18d0] sm:$0xff]  ;;  %v16426_v49 = vcombine.low %v7202_v25, %v7206_v57 }
 0x6b0   : > { %v7086_v52 = vld [vmem:[%s17545_s12 + $0x18f0] sm:$0xff] }
 0x6b1   : > { %13281 = vmatpush1.bf16.msra.mxu0 %v16138_v56  ;;  %v7210_v34 = vld [vmem:[%s17545_s12 + $0x1cd0] sm:$0xff]  ;;  %v16307_v46 = vcombine.high %v7082_v23, %v7086_v52 }
 0x6b2   : > { %13322 = vmatpush1.bf16.msra.mxu1 %v16266_v62  ;;  %13282 = vmatprep.subr.bf16.mxu0 %v16147_v3  ;;  %v7214_v6 = vld [vmem:[%s17545_s12 + $0x1cf0] sm:$0xff]  ;;  %v16306_v3 = vcombine.low %v7082_v23, %v7086_v52 }
 0x6b3   : > { %13323 = vmatprep.subr.bf16.mxu1 %v16275_v43  ;;  %v16435_v59 = vcombine.high %v7210_v34, %v7214_v6  ;;  %v7090_v58 = vld [vmem:[%s17545_s12 + $0x1910] sm:$0xff]  ;;  %v16434_v43 = vcombine.low %v7210_v34, %v7214_v6  ;;  %v6266_v34 = vld [vmem:[#allocation2 + $0x10] sm:$0xff] }
 0x6b4   : > { %v7094_v42 = vld [vmem:[%s17545_s12 + $0x1930] sm:$0xff] }
 0x6b5   : > { %13283 = vmatpush1.bf16.msra.mxu0 %v16146_v41  ;;  %v7218_v56 = vld [vmem:[%s17545_s12 + $0x1d10] sm:$0xff]  ;;  %v16315_v2 = vcombine.high %v7090_v58, %v7094_v42 }
 0x6b6   : > { %13324 = vmatpush1.bf16.msra.mxu1 %v16274_v55  ;;  %13334 = vmatprep.subr.bf16.mxu0 %v16283_v63  ;;  %v7222_v62 = vld [vmem:[%s17545_s12 + $0x1d30] sm:$0xff]  ;;  %v16314_v63 = vcombine.low %v7090_v58, %v7094_v42  ;;  %v6267_v58 = vld [vmem:[#allocation2 + $0x18] sm:$0xff] }
 0x6b7   : > { %13375 = vmatprep.subr.bf16.mxu1 %v16411_v1  ;;  %v16443_v45 = vcombine.high %v7218_v56, %v7222_v62  ;;  %v7098_v48 = vld [vmem:[%s17545_s12 + $0x1950] sm:$0xff]  ;;  %v16442_v1 = vcombine.low %v7218_v56, %v7222_v62 }
 0x6b8   : > { %13285 = vmatmul.mubr.bf16.vlgmr.msra.gmra.mrb[56].mxu0 %v18759_v61  ;;  %v7102_v51 = vld [vmem:[%s17545_s12 + $0x1970] sm:$0xff] }
 0x6b9   : > { %13326 = vmatmul.mubr.bf16.vlgmr.msra.gmra.mrb[56].mxu1 %v18761_v11  ;;  %13335 = vmatpush1.bf16.msra.mxu0 %v16282_v32  ;;  %v7226_v41 = vld [vmem:[%s17545_s12 + $0x1d50] sm:$0xff]  ;;  %v16323_v29 = vcombine.high %v7098_v48, %v7102_v51 }
 0x6ba   : > { %13366 = vmatprep.mubr.bf16.mxu0 %v18805_v26  ;;  %13376 = vmatpush1.bf16.msra.mxu1 %v16410_v13  ;;  %v7230_v55 = vld [vmem:[%s17545_s12 + $0x1d70] sm:$0xff] }
 0x6bb   : > { %13407 = vmatprep.mubr.bf16.mxu1 %v18809_v21  ;;  %13336 = vmatprep.subr.bf16.mxu0 %v16291_v19  ;;  %v16451_v12 = vcombine.high %v7226_v41, %v7230_v55  ;;  %v7106_v32 = vld [vmem:[%s17545_s12 + $0x1990] sm:$0xff]  ;;  %v16322_v19 = vcombine.low %v7098_v48, %v7102_v51  ;;  %v16450_v20 = vcombine.low %v7226_v41, %v7230_v55 }
 0x6bc   : > { %13377 = vmatprep.subr.bf16.mxu1 %v16419_v37  ;;  %v7110_v27 = vld [vmem:[%s17545_s12 + $0x19b0] sm:$0xff] }
 0x6bd   : > { %13337 = vmatpush1.bf16.msra.mxu0 %v16290_v40  ;;  %v7234_v15 = vld [vmem:[%s17545_s12 + $0x1d90] sm:$0xff]  ;;  %v16331_v36 = vcombine.high %v7106_v32, %v7110_v27 }
 0x6be   : > { %13378 = vmatpush1.bf16.msra.mxu1 %v16418_v7  ;;  %13338 = vmatprep.subr.bf16.mxu0 %v16299_v39  ;;  %v7238_v13 = vld [vmem:[%s17545_s12 + $0x1db0] sm:$0xff] }
 0x6bf   : > { %13379 = vmatprep.subr.bf16.mxu1 %v16427_v30  ;;  %v16459_v25 = vcombine.high %v7234_v15, %v7238_v13  ;;  %v7114_v57 = vld [vmem:[%s17545_s12 + $0x19d0] sm:$0xff]  ;;  %v16458_v56 = vcombine.low %v7234_v15, %v7238_v13 }
 0x6c0   : > { %v7118_v40 = vld [vmem:[%s17545_s12 + $0x19f0] sm:$0xff] }
 0x6c1   : > { %13339 = vmatpush1.bf16.msra.mxu0 %v16298_v38  ;;  %v7242_v23 = vld [vmem:[%s17545_s12 + $0x1dd0] sm:$0xff]  ;;  %v16339_v62 = vcombine.high %v7114_v57, %v7118_v40 }
 0x6c2   : > { %13380 = vmatpush1.bf16.msra.mxu1 %v16426_v49  ;;  %13340 = vmatprep.subr.bf16.mxu0 %v16307_v46  ;;  %v7246_v52 = vld [vmem:[%s17545_s12 + $0x1df0] sm:$0xff]  ;;  %v16330_v46 = vcombine.low %v7106_v32, %v7110_v27 }
 0x6c3   : > { %13381 = vmatprep.subr.bf16.mxu1 %v16435_v59  ;;  %v7250_v51 = vld [vmem:[%s17545_s12 + $0x1e10] sm:$0xff] }
 0x6c4   : > { %v7254_v41 = vld [vmem:[%s17545_s12 + $0x1e30] sm:$0xff] }
 0x6c5   : > { %13341 = vmatpush1.bf16.msra.mxu0 %v16306_v3  ;;  %v7130_v32 = vld [vmem:[%s17545_s12 + $0x1a50] sm:$0xff] }
 0x6c6   : > { %13382 = vmatpush1.bf16.msra.mxu1 %v16434_v43  ;;  %13342 = vmatprep.subr.bf16.mxu0 %v16315_v2  ;;  %v7122_v2 = vld [vmem:[%s17545_s12 + $0x1a10] sm:$0xff] }
 0x6c7   : > { %13383 = vmatprep.subr.bf16.mxu1 %v16443_v45  ;;  %v7126_v45 = vld [vmem:[%s17545_s12 + $0x1a30] sm:$0xff] }
 0x6c8   : > { %v7134_v27 = vld [vmem:[%s17545_s12 + $0x1a70] sm:$0xff] }
 0x6c9   : > { %13343 = vmatpush1.bf16.msra.mxu0 %v16314_v63  ;;  %v16338_v63 = vcombine.low %v7114_v57, %v7118_v40  ;;  %v7258_v15 = vld [vmem:[%s17545_s12 + $0x1e50] sm:$0xff] }
 0x6ca   : > { %13384 = vmatpush1.bf16.msra.mxu1 %v16442_v1  ;;  %13344 = vmatprep.subr.bf16.mxu0 %v16323_v29  ;;  %v16466_v1 = vcombine.low %v7242_v23, %v7246_v52  ;;  %v16347_v29 = vcombine.high %v7122_v2, %v7126_v45  ;;  %v7262_v13 = vld [vmem:[%s17545_s12 + $0x1e70] sm:$0xff] }
 0x6cb   : > { %v13040_v37 = vpop.f32.mrb[44].mxu0  ;;  %13385 = vmatprep.subr.bf16.mxu1 %v16451_v12  ;;  %v16475_v12 = vcombine.high %v7250_v51, %v7254_v41  ;;  %v7142_v57 = vld [vmem:[%s17545_s12 + $0x1ab0] sm:$0xff] }
 0x6cc   : > { %v13041_v7 = vadd.f32 %v13040_v37, %v19327_v22  ;;  %v13081_v39 = vpop.f32.mrb[44].mxu1  ;;  %v13042_v30 = vpop.f32.mrb[45].mxu0  ;;  %v16483_v37 = vcombine.high %v7258_v15, %v7262_v13  ;;  %v7266_v40 = vld [vmem:[%s17545_s12 + $0x1e90] sm:$0xff] }
 0x6cd   : > { %v13043_v6 = vadd.f32 %v13042_v30, %v19329_v17  ;;  %v13083_v38 = vpop.f32.mrb[45].mxu1  ;;  %v13044_v49 = vpop.f32.mrb[46].mxu0  ;;  %13345 = vmatpush1.bf16.msra.mxu0 %v16322_v19  ;;  %v16467_v17 = vcombine.high %v7242_v23, %v7246_v52  ;;  %v16346_v19 = vcombine.low %v7122_v2, %v7126_v45  ;;  %v16482_v30 = vcombine.low %v7258_v15, %v7262_v13  ;;  %v7298_v15 = vld [vmem:[%s17545_s12 + $0x1f90] sm:$0xff] }
 0x6ce   : > { %v13082_v59 = vadd.f32 %v13081_v39, %v13041_v7  ;;  %v13085_v42 = vpop.f32.mrb[46].mxu1  ;;  %13386 = vmatpush1.bf16.msra.mxu1 %v16450_v20  ;;  %v13045_v22 = vpop.f32.mrb[47].mxu0  ;;  %13346 = vmatprep.subr.bf16.mxu0 %v16331_v36  ;;  %v16474_v20 = vcombine.low %v7250_v51, %v7254_v41  ;;  %v16355_v36 = vcombine.high %v7130_v32, %v7134_v27  ;;  %v7270_v7 = vld [vmem:[%s17545_s12 + $0x1eb0] sm:$0xff] }
 0x6cf   : > { %v13084_v3 = vadd.f32 %v13083_v38, %v13043_v6  ;;  %v13086_v43 = vpop.f32.mrb[47].mxu1  ;;  %13387 = vmatprep.subr.bf16.mxu1 %v16459_v25  ;;  %v7138_v25 = vld [vmem:[%s17545_s12 + $0x1a90] sm:$0xff]  ;;  %v16354_v39 = vcombine.low %v7130_v32, %v7134_v27  ;;  %v16491_v52 = vcombine.high %v7266_v40, %v7270_v7 }
 0x6d0   : > { %v13746_v48 = vadd.f32 %v13082_v59, %v6266_v34  ;;  %v16363_v23 = vcombine.high %v7138_v25, %v7142_v57  ;;  %v7146_v34 = vld [vmem:[%s17545_s12 + $0x1ad0] sm:$0xff]  ;;  %v16490_v59 = vcombine.low %v7266_v40, %v7270_v7 }
 0x6d1   : > { %v13747_v55 = vadd.f32 %v13084_v3, %v6267_v58  ;;  %13347 = vmatpush1.bf16.msra.mxu0 %v16330_v46  ;;  %v7150_v6 = vld [vmem:[%s17545_s12 + $0x1af0] sm:$0xff]  ;;  %v16362_v46 = vcombine.low %v7138_v25, %v7142_v57 }
 0x6d2   : > { %13754 = vst [vmem:[#allocation2 + $0x10] sm:$0xff] %v13746_v48  ;;  %13388 = vmatpush1.bf16.msra.mxu1 %v16458_v56  ;;  %13348 = vmatprep.subr.bf16.mxu0 %v16339_v62  ;;  %v7274_v38 = vld [vmem:[%s17545_s12 + $0x1ed0] sm:$0xff]  ;;  %v16371_v58 = vcombine.high %v7146_v34, %v7150_v6  ;;  %v16370_v43 = vcombine.low %v7146_v34, %v7150_v6  ;;  %v6291_v34 = vld [vmem:[%s17545_s12 + $0x18] sm:$0xff] }
 0x6d3   : > { %13755 = vst [vmem:[#allocation2 + $0x18] sm:$0xff] %v13747_v55  ;;  %13389 = vmatprep.subr.bf16.mxu1 %v16467_v17  ;;  %v7278_v49 = vld [vmem:[%s17545_s12 + $0x1ef0] sm:$0xff]  ;;  %v6295_v6 = vld [vmem:[%s17545_s12 + $0x38] sm:$0xff] }
 0x6d4   : > { %v16499_v42 = vcombine.high %v7274_v38, %v7278_v49  ;;  %v7154_v22 = vld [vmem:[%s17545_s12 + $0x1b10] sm:$0xff]  ;;  %v16498_v17 = vcombine.low %v7274_v38, %v7278_v49  ;;  %v6419_v38 = vld [vmem:[%s17545_s12 + $0x418] sm:$0xff] }
 0x6d5   : > { %13349 = vmatpush1.bf16.msra.mxu0 %v16338_v63  ;;  %v7158_v56 = vld [vmem:[%s17545_s12 + $0x1b30] sm:$0xff]  ;;  %v6423_v49 = vld [vmem:[%s17545_s12 + $0x438] sm:$0xff] }
 0x6d6   : > { %13390 = vmatpush1.bf16.msra.mxu1 %v16466_v1  ;;  %13350 = vmatprep.subr.bf16.mxu0 %v16347_v29  ;;  %v7282_v62 = vld [vmem:[%s17545_s12 + $0x1f10] sm:$0xff]  ;;  %v16379_v2 = vcombine.high %v7154_v22, %v7158_v56  ;;  %v16378_v63 = vcombine.low %v7154_v22, %v7158_v56  ;;  %v6299_v22 = vld [vmem:[%s17545_s12 + $0x58] sm:$0xff] }
 0x6d7   : > { %13391 = vmatprep.subr.bf16.mxu1 %v16475_v12  ;;  %v7286_v3 = vld [vmem:[%s17545_s12 + $0x1f30] sm:$0xff]  ;;  %v6303_v56 = vld [vmem:[%s17545_s12 + $0x78] sm:$0xff] }
 0x6d8   : > { %v16507_v45 = vcombine.high %v7282_v62, %v7286_v3  ;;  %v7162_v48 = vld [vmem:[%s17545_s12 + $0x1b50] sm:$0xff]  ;;  %v16506_v1 = vcombine.low %v7282_v62, %v7286_v3  ;;  %v15516_v62 = vcombine.low %v6291_v34, %v6295_v6  ;;  %v6427_v3 = vld [vmem:[%s17545_s12 + $0x458] sm:$0xff] }
 0x6d9   : > { %13351 = vmatpush1.bf16.msra.mxu0 %v16346_v19  ;;  %v7166_v51 = vld [vmem:[%s17545_s12 + $0x1b70] sm:$0xff] }
 0x6da   : > { %13392 = vmatpush1.bf16.msra.mxu1 %v16474_v20  ;;  %13352 = vmatprep.subr.bf16.mxu0 %v16355_v36  ;;  %v7290_v41 = vld [vmem:[%s17545_s12 + $0x1f50] sm:$0xff]  ;;  %v16387_v29 = vcombine.high %v7162_v48, %v7166_v51  ;;  %v16386_v19 = vcombine.low %v7162_v48, %v7166_v51  ;;  %v6311_v48 = vld [vmem:[%s17545_s12 + $0xb8] sm:$0xff] }
 0x6db   : > { %13393 = vmatprep.subr.bf16.mxu1 %v16483_v37  ;;  %v7294_v55 = vld [vmem:[%s17545_s12 + $0x1f70] sm:$0xff] }
 0x6dc   : > { %v16515_v12 = vcombine.high %v7290_v41, %v7294_v55  ;;  %v7170_v32 = vld [vmem:[%s17545_s12 + $0x1b90] sm:$0xff]  ;;  %v16514_v20 = vcombine.low %v7290_v41, %v7294_v55  ;;  %v6435_v41 = vld [vmem:[%s17545_s12 + $0x498] sm:$0xff] }
 0x6dd   : > { %13353 = vmatpush1.bf16.msra.mxu0 %v16354_v39  ;;  %v7174_v27 = vld [vmem:[%s17545_s12 + $0x1bb0] sm:$0xff]  ;;  %v6439_v55 = vld [vmem:[%s17545_s12 + $0x4b8] sm:$0xff] }
 0x6de   : > { %13394 = vmatpush1.bf16.msra.mxu1 %v16482_v30  ;;  %13354 = vmatprep.subr.bf16.mxu0 %v16363_v23  ;;  %v7302_v13 = vld [vmem:[%s17545_s12 + $0x1fb0] sm:$0xff]  ;;  %v16395_v36 = vcombine.high %v7170_v32, %v7174_v27  ;;  %v16394_v39 = vcombine.low %v7170_v32, %v7174_v27  ;;  %v6315_v32 = vld [vmem:[%s17545_s12 + $0xd8] sm:$0xff] }
 0x6df   : > { %13395 = vmatprep.subr.bf16.mxu1 %v16491_v52  ;;  %v16523_v37 = vcombine.high %v7298_v15, %v7302_v13  ;;  %v7178_v25 = vld [vmem:[%s17545_s12 + $0x1bd0] sm:$0xff]  ;;  %v16522_v30 = vcombine.low %v7298_v15, %v7302_v13  ;;  %v6319_v27 = vld [vmem:[%s17545_s12 + $0xf8] sm:$0xff] }
 0x6e0   : > { %v7182_v57 = vld [vmem:[%s17545_s12 + $0x1bf0] sm:$0xff]  ;;  %v6443_v15 = vld [vmem:[%s17545_s12 + $0x4d8] sm:$0xff] }
 0x6e1   : > { %13355 = vmatpush1.bf16.msra.mxu0 %v16362_v46  ;;  %v7306_v40 = vld [vmem:[%s17545_s12 + $0x1fd0] sm:$0xff]  ;;  %v16403_v23 = vcombine.high %v7178_v25, %v7182_v57  ;;  %v16402_v46 = vcombine.low %v7178_v25, %v7182_v57  ;;  %v6447_v13 = vld [vmem:[%s17545_s12 + $0x4f8] sm:$0xff] }
 0x6e2   : > { %13396 = vmatpush1.bf16.msra.mxu1 %v16490_v59  ;;  %13356 = vmatprep.subr.bf16.mxu0 %v16371_v58  ;;  %v7310_v7 = vld [vmem:[%s17545_s12 + $0x1ff0] sm:$0xff]  ;;  %v15517_v58 = vcombine.high %v6291_v34, %v6295_v6  ;;  %v6451_v25 = vld [vmem:[%s17545_s12 + $0x518] sm:$0xff] }
 0x6e3   : > { %13397 = vmatprep.subr.bf16.mxu1 %v16499_v42  ;;  %v16531_v52 = vcombine.high %v7306_v40, %v7310_v7  ;;  %v16530_v59 = vcombine.low %v7306_v40, %v7310_v7  ;;  %v15645_v42 = vcombine.high %v6419_v38, %v6423_v49  ;;  %v6455_v57 = vld [vmem:[%s17545_s12 + $0x538] sm:$0xff]  ;;  %v15540_v40 = vcombine.low %v6315_v32, %v6319_v27 }
 0x6e4   : > { %v15668_v7 = vcombine.low %v6443_v15, %v6447_v13  ;;  %v6459_v34 = vld [vmem:[%s17545_s12 + $0x558] sm:$0xff] }
 0x6e5   : > { %13357 = vmatpush1.bf16.msra.mxu0 %v16370_v43  ;;  %v6431_v43 = vld [vmem:[%s17545_s12 + $0x478] sm:$0xff] }
 0x6e6   : > { %13398 = vmatpush1.bf16.msra.mxu1 %v16498_v17  ;;  %13358 = vmatprep.subr.bf16.mxu0 %v16379_v2  ;;  %v15644_v17 = vcombine.low %v6419_v38, %v6423_v49  ;;  %v15525_v2 = vcombine.high %v6299_v22, %v6303_v56  ;;  %v15653_v51 = vcombine.high %v6427_v3, %v6431_v43  ;;  %v6463_v6 = vld [vmem:[%s17545_s12 + $0x578] sm:$0xff] }
 0x6e7   : > { %13399 = vmatprep.subr.bf16.mxu1 %v16507_v45  ;;  %v6307_v45 = vld [vmem:[%s17545_s12 + $0x98] sm:$0xff]  ;;  %v15676_v49 = vcombine.low %v6451_v25, %v6455_v57 }
 0x6e9   : > { %13359 = vmatpush1.bf16.msra.mxu0 %v16378_v63  ;;  %v15524_v63 = vcombine.low %v6299_v22, %v6303_v56  ;;  %v6467_v22 = vld [vmem:[%s17545_s12 + $0x598] sm:$0xff] }
 0x6ea   : > { %13400 = vmatpush1.bf16.msra.mxu1 %v16506_v1  ;;  %13360 = vmatprep.subr.bf16.mxu0 %v16387_v29  ;;  %v15652_v1 = vcombine.low %v6427_v3, %v6431_v43  ;;  %v15533_v29 = vcombine.high %v6307_v45, %v6311_v48  ;;  %v6471_v56 = vld [vmem:[%s17545_s12 + $0x5b8] sm:$0xff]  ;;  %v15684_v3 = vcombine.low %v6459_v34, %v6463_v6 }
 0x6eb   : > { %13401 = vmatprep.subr.bf16.mxu1 %v16515_v12  ;;  %v15661_v12 = vcombine.high %v6435_v41, %v6439_v55 }
 0x6ed   : > { %13361 = vmatpush1.bf16.msra.mxu0 %v16386_v19  ;;  %v15532_v19 = vcombine.low %v6307_v45, %v6311_v48  ;;  %v6347_v45 = vld [vmem:[%s17545_s12 + $0x1d8] sm:$0xff] }
 0x6ee   : > { %13402 = vmatpush1.bf16.msra.mxu1 %v16514_v20  ;;  %13362 = vmatprep.subr.bf16.mxu0 %v16395_v36  ;;  %v15541_v20 = vcombine.high %v6315_v32, %v6319_v27  ;;  %v6323_v36 = vld [vmem:[%s17545_s12 + $0x118] sm:$0xff] }
 0x6ef   : > { %13403 = vmatprep.subr.bf16.mxu1 %v16523_v37  ;;  %v6327_v37 = vld [vmem:[%s17545_s12 + $0x138] sm:$0xff] }
 0x6f0   : > { %v15548_v38 = vcombine.low %v6323_v36, %v6327_v37  ;;  %v6351_v48 = vld [vmem:[%s17545_s12 + $0x1f8] sm:$0xff] }
 0x6f1   : > { %13363 = vmatpush1.bf16.msra.mxu0 %v16394_v39  ;;  %v15549_v39 = vcombine.high %v6323_v36, %v6327_v37  ;;  %v6355_v36 = vld [vmem:[%s17545_s12 + $0x218] sm:$0xff] }
 0x6f2   : > { %13404 = vmatpush1.bf16.msra.mxu1 %v16522_v30  ;;  %13364 = vmatprep.subr.bf16.mxu0 %v16403_v23  ;;  %v15677_v30 = vcombine.high %v6451_v25, %v6455_v57  ;;  %v6331_v23 = vld [vmem:[%s17545_s12 + $0x158] sm:$0xff] }
 0x6f3   : > { %13405 = vmatprep.subr.bf16.mxu1 %v16531_v52  ;;  %v6335_v52 = vld [vmem:[%s17545_s12 + $0x178] sm:$0xff] }
 0x6f4   : > { %v6359_v37 = vld [vmem:[%s17545_s12 + $0x238] sm:$0xff] }
 0x6f5   : > { %13365 = vmatpush1.bf16.msra.mxu0 %v16402_v46  ;;  %v15557_v46 = vcombine.high %v6331_v23, %v6335_v52  ;;  %v6483_v25 = vld [vmem:[%s17545_s12 + $0x618] sm:$0xff] }
 0x6f6   : > { %13406 = vmatpush1.bf16.msra.mxu1 %v16530_v59  ;;  %13416 = vmatprep.subr.bf16.mxu0 %v15517_v58  ;;  %v15685_v59 = vcombine.high %v6459_v34, %v6463_v6  ;;  %v6339_v58 = vld [vmem:[%s17545_s12 + $0x198] sm:$0xff] }
 0x6f7   : > { %13457 = vmatprep.subr.bf16.mxu1 %v15645_v42  ;;  %v6343_v42 = vld [vmem:[%s17545_s12 + $0x1b8] sm:$0xff] }
 0x6f8   : > { %13367 = vmatmul.mubr.bf16.vlgmr.msra.gmra.mrb[60].mxu0 %v18857_v47  ;;  %v15565_v43 = vcombine.high %v6339_v58, %v6343_v42  ;;  %v15564_v32 = vcombine.low %v6339_v58, %v6343_v42  ;;  %v6487_v57 = vld [vmem:[%s17545_s12 + $0x638] sm:$0xff] }
 0x6f9   : > { %13408 = vmatmul.mubr.bf16.vlgmr.msra.gmra.mrb[60].mxu1 %v18859_v16  ;;  %13417 = vmatpush1.bf16.msra.mxu0 %v15516_v62  ;;  %v15556_v62 = vcombine.low %v6331_v23, %v6335_v52  ;;  %v6363_v23 = vld [vmem:[%s17545_s12 + $0x258] sm:$0xff] }
 0x6fa   : > { %13448 = vmatprep.mubr.bf16.mxu0 %v18455_v0  ;;  %13458 = vmatpush1.bf16.msra.mxu1 %v15644_v17  ;;  %v15660_v0 = vcombine.low %v6435_v41, %v6439_v55  ;;  %v6475_v55 = vld [vmem:[%s17545_s12 + $0x5d8] sm:$0xff] }
 0x6fb   : > { %13489 = vmatprep.mubr.bf16.mxu1 %v18460_v8  ;;  %13418 = vmatprep.subr.bf16.mxu0 %v15525_v2  ;;  %v15669_v8 = vcombine.high %v6443_v15, %v6447_v13  ;;  %v15693_v2 = vcombine.high %v6467_v22, %v6471_v56  ;;  %v6367_v52 = vld [vmem:[%s17545_s12 + $0x278] sm:$0xff] }
 0x6fc   : > { %13459 = vmatprep.subr.bf16.mxu1 %v15653_v51  ;;  %v6491_v34 = vld [vmem:[%s17545_s12 + $0x658] sm:$0xff] }
 0x6fd   : > { %13419 = vmatpush1.bf16.msra.mxu0 %v15524_v63  ;;  %v6479_v63 = vld [vmem:[%s17545_s12 + $0x5f8] sm:$0xff] }
 0x6fe   : > { %13460 = vmatpush1.bf16.msra.mxu1 %v15652_v1  ;;  %13420 = vmatprep.subr.bf16.mxu0 %v15533_v29  ;;  %v6495_v6 = vld [vmem:[%s17545_s12 + $0x678] sm:$0xff] }
 0x6ff   : > { %13461 = vmatprep.subr.bf16.mxu1 %v15661_v12  ;;  %v6371_v58 = vld [vmem:[%s17545_s12 + $0x298] sm:$0xff] }
 0x700   : > { %v6375_v42 = vld [vmem:[%s17545_s12 + $0x2b8] sm:$0xff] }
 0x701   : > { %13421 = vmatpush1.bf16.msra.mxu0 %v15532_v19  ;;  %v15692_v19 = vcombine.low %v6467_v22, %v6471_v56  ;;  %v6499_v22 = vld [vmem:[%s17545_s12 + $0x698] sm:$0xff] }
 0x702   : > { %13462 = vmatpush1.bf16.msra.mxu1 %v15660_v0  ;;  %13422 = vmatprep.subr.bf16.mxu0 %v15541_v20  ;;  %v15573_v0 = vcombine.high %v6347_v45, %v6351_v48  ;;  %v6503_v56 = vld [vmem:[%s17545_s12 + $0x6b8] sm:$0xff] }
 0x703   : > { %13463 = vmatprep.subr.bf16.mxu1 %v15669_v8  ;;  %v15701_v8 = vcombine.high %v6475_v55, %v6479_v63 }
 0x705   : > { %13423 = vmatpush1.bf16.msra.mxu0 %v15540_v40  ;;  %v15572_v40 = vcombine.low %v6347_v45, %v6351_v48  ;;  %v6383_v45 = vld [vmem:[%s17545_s12 + $0x2f8] sm:$0xff] }
 0x706   : > { %13464 = vmatpush1.bf16.msra.mxu1 %v15668_v7  ;;  %13424 = vmatprep.subr.bf16.mxu0 %v15549_v39  ;;  %v15700_v7 = vcombine.low %v6475_v55, %v6479_v63  ;;  %v15581_v39 = vcombine.high %v6355_v36, %v6359_v37  ;;  %v6507_v48 = vld [vmem:[%s17545_s12 + $0x6d8] sm:$0xff]  ;;  %v15724_v55 = vcombine.low %v6499_v22, %v6503_v56 }
 0x707   : > { %13465 = vmatprep.subr.bf16.mxu1 %v15677_v30  ;;  %v15709_v30 = vcombine.high %v6483_v25, %v6487_v57 }
 0x709   : > { %13425 = vmatpush1.bf16.msra.mxu0 %v15548_v38  ;;  %v15580_v38 = vcombine.low %v6355_v36, %v6359_v37  ;;  %v6395_v36 = vld [vmem:[%s17545_s12 + $0x358] sm:$0xff] }
 0x70a   : > { %13466 = vmatpush1.bf16.msra.mxu1 %v15676_v49  ;;  %13426 = vmatprep.subr.bf16.mxu0 %v15557_v46  ;;  %v15708_v49 = vcombine.low %v6483_v25, %v6487_v57  ;;  %v15589_v46 = vcombine.high %v6363_v23, %v6367_v52  ;;  %v6399_v37 = vld [vmem:[%s17545_s12 + $0x378] sm:$0xff] }
 0x70b   : > { %v13122_v17 = vpop.f32.mrb[48].mxu0  ;;  %13467 = vmatprep.subr.bf16.mxu1 %v15685_v59  ;;  %v15717_v59 = vcombine.high %v6491_v34, %v6495_v6  ;;  %v6523_v25 = vld [vmem:[%s17545_s12 + $0x758] sm:$0xff] }
 0x70c   : > { %v13163_v51 = vpop.f32.mrb[48].mxu1  ;;  %v13124_v41 = vpop.f32.mrb[49].mxu0  ;;  %v6527_v57 = vld [vmem:[%s17545_s12 + $0x778] sm:$0xff] }
 0x70d   : > { %v19469_v1 = vadd.f32 %v13163_v51, %v13122_v17  ;;  %v13165_v29 = vpop.f32.mrb[49].mxu1  ;;  %v13126_v12 = vpop.f32.mrb[50].mxu0  ;;  %13427 = vmatpush1.bf16.msra.mxu0 %v15556_v62  ;;  %v15588_v62 = vcombine.low %v6363_v23, %v6367_v52  ;;  %v15725_v17 = vcombine.high %v6499_v22, %v6503_v56  ;;  %v6511_v51 = vld [vmem:[%s17545_s12 + $0x6f8] sm:$0xff] }
 0x70e   : > { %v19471_v27 = vadd.f32 %v13165_v29, %v13124_v41  ;;  %v13167_v15 = vpop.f32.mrb[50].mxu1  ;;  %13468 = vmatpush1.bf16.msra.mxu1 %v15684_v3  ;;  %v13127_v13 = vpop.f32.mrb[51].mxu0  ;;  %13428 = vmatprep.subr.bf16.mxu0 %v15565_v43  ;;  %v15716_v3 = vcombine.low %v6491_v34, %v6495_v6  ;;  %v15597_v43 = vcombine.high %v6371_v58, %v6375_v42  ;;  %v6387_v12 = vld [vmem:[%s17545_s12 + $0x318] sm:$0xff] }
 0x70f   : > { %v13168_v20 = vpop.f32.mrb[51].mxu1  ;;  %13469 = vmatprep.subr.bf16.mxu1 %v15693_v2  ;;  %v6379_v2 = vld [vmem:[%s17545_s12 + $0x2d8] sm:$0xff]  ;;  %v15596_v41 = vcombine.low %v6371_v58, %v6375_v42  ;;  %v15733_v29 = vcombine.high %v6507_v48, %v6511_v51 }
 0x710   : > { %v15605_v63 = vcombine.high %v6379_v2, %v6383_v45  ;;  %v6515_v15 = vld [vmem:[%s17545_s12 + $0x718] sm:$0xff] }
 0x711   : > { %13429 = vmatpush1.bf16.msra.mxu0 %v15564_v32  ;;  %v6391_v32 = vld [vmem:[%s17545_s12 + $0x338] sm:$0xff] }
 0x712   : > { %13470 = vmatpush1.bf16.msra.mxu1 %v15692_v19  ;;  %13430 = vmatprep.subr.bf16.mxu0 %v15573_v0  ;;  %v6519_v13 = vld [vmem:[%s17545_s12 + $0x738] sm:$0xff]  ;;  %v15604_v19 = vcombine.low %v6379_v2, %v6383_v45  ;;  %v15732_v0 = vcombine.low %v6507_v48, %v6511_v51  ;;  %v15613_v20 = vcombine.high %v6387_v12, %v6391_v32 }
 0x713   : > { %13471 = vmatprep.subr.bf16.mxu1 %v15701_v8  ;;  %v15741_v8 = vcombine.high %v6515_v15, %v6519_v13  ;;  %v6403_v23 = vld [vmem:[%s17545_s12 + $0x398] sm:$0xff] }
 0x714   : > { %v6407_v52 = vld [vmem:[%s17545_s12 + $0x3b8] sm:$0xff] }
 0x715   : > { %13431 = vmatpush1.bf16.msra.mxu0 %v15572_v40  ;;  %v15612_v40 = vcombine.low %v6387_v12, %v6391_v32  ;;  %v6531_v34 = vld [vmem:[%s17545_s12 + $0x798] sm:$0xff] }
 0x716   : > { %13472 = vmatpush1.bf16.msra.mxu1 %v15700_v7  ;;  %13432 = vmatprep.subr.bf16.mxu0 %v15581_v39  ;;  %v15740_v7 = vcombine.low %v6515_v15, %v6519_v13  ;;  %v15621_v39 = vcombine.high %v6395_v36, %v6399_v37  ;;  %v6535_v6 = vld [vmem:[%s17545_s12 + $0x7b8] sm:$0xff] }
 0x717   : > { %13473 = vmatprep.subr.bf16.mxu1 %v15709_v30  ;;  %v15749_v30 = vcombine.high %v6523_v25, %v6527_v57  ;;  %v6411_v58 = vld [vmem:[%s17545_s12 + $0x3d8] sm:$0xff] }
 0x718   : > { %v6415_v42 = vld [vmem:[%s17545_s12 + $0x3f8] sm:$0xff] }
 0x719   : > { %13433 = vmatpush1.bf16.msra.mxu0 %v15580_v38  ;;  %v15620_v38 = vcombine.low %v6395_v36, %v6399_v37  ;;  %v6539_v22 = vld [vmem:[%s17545_s12 + $0x7d8] sm:$0xff] }
 0x71a   : > { %13474 = vmatpush1.bf16.msra.mxu1 %v15708_v49  ;;  %13434 = vmatprep.subr.bf16.mxu0 %v15589_v46  ;;  %v15748_v49 = vcombine.low %v6523_v25, %v6527_v57  ;;  %v15629_v46 = vcombine.high %v6403_v23, %v6407_v52  ;;  %v6543_v56 = vld [vmem:[%s17545_s12 + $0x7f8] sm:$0xff] }
 0x71b   : > { %13475 = vmatprep.subr.bf16.mxu1 %v15717_v59  ;;  %v15757_v59 = vcombine.high %v6531_v34, %v6535_v6  ;;  %v6547_v2 = vld [vmem:[%s17545_s12 + $0x818] sm:$0xff] }
 0x71c   : > { %v6551_v45 = vld [vmem:[%s17545_s12 + $0x838] sm:$0xff] }
 0x71d   : > { %13435 = vmatpush1.bf16.msra.mxu0 %v15588_v62  ;;  %v15628_v62 = vcombine.low %v6403_v23, %v6407_v52  ;;  %v6675_v48 = vld [vmem:[%s17545_s12 + $0xc18] sm:$0xff]  ;;  %v15772_v15 = vcombine.low %v6547_v2, %v6551_v45 }
 0x71e   : > { %13476 = vmatpush1.bf16.msra.mxu1 %v15716_v3  ;;  %13436 = vmatprep.subr.bf16.mxu0 %v15597_v43  ;;  %v15756_v3 = vcombine.low %v6531_v34, %v6535_v6  ;;  %v15637_v43 = vcombine.high %v6411_v58, %v6415_v42  ;;  %v6679_v51 = vld [vmem:[%s17545_s12 + $0xc38] sm:$0xff] }
 0x71f   : > { %13477 = vmatprep.subr.bf16.mxu1 %v15725_v17  ;;  %v15765_v17 = vcombine.high %v6539_v22, %v6543_v56  ;;  %v6555_v12 = vld [vmem:[%s17545_s12 + $0x858] sm:$0xff] }
 0x720   : > { %v6559_v32 = vld [vmem:[%s17545_s12 + $0x878] sm:$0xff] }
 0x721   : > { %13437 = vmatpush1.bf16.msra.mxu0 %v15596_v41  ;;  %v15636_v41 = vcombine.low %v6411_v58, %v6415_v42  ;;  %v6683_v13 = vld [vmem:[%s17545_s12 + $0xc58] sm:$0xff] }
 0x722   : > { %13478 = vmatpush1.bf16.msra.mxu1 %v15724_v55  ;;  %13438 = vmatprep.subr.bf16.mxu0 %v15605_v63  ;;  %v15764_v55 = vcombine.low %v6539_v22, %v6543_v56  ;;  %v15773_v63 = vcombine.high %v6547_v2, %v6551_v45  ;;  %v6567_v36 = vld [vmem:[%s17545_s12 + $0x8b8] sm:$0xff] }
 0x723   : > { %13479 = vmatprep.subr.bf16.mxu1 %v15733_v29  ;;  %v15901_v29 = vcombine.high %v6675_v48, %v6679_v51  ;;  %v6691_v25 = vld [vmem:[%s17545_s12 + $0xc98] sm:$0xff] }
 0x724   : > { %v6695_v57 = vld [vmem:[%s17545_s12 + $0xcb8] sm:$0xff] }
 0x725   : > { %13439 = vmatpush1.bf16.msra.mxu0 %v15604_v19  ;;  %v6687_v19 = vld [vmem:[%s17545_s12 + $0xc78] sm:$0xff] }
 0x726   : > { %13480 = vmatpush1.bf16.msra.mxu1 %v15732_v0  ;;  %13440 = vmatprep.subr.bf16.mxu0 %v15613_v20  ;;  %v15900_v0 = vcombine.low %v6675_v48, %v6679_v51  ;;  %v15781_v20 = vcombine.high %v6555_v12, %v6559_v32  ;;  %v15909_v37 = vcombine.high %v6683_v13, %v6687_v19  ;;  %v6575_v23 = vld [vmem:[%s17545_s12 + $0x8f8] sm:$0xff] }
 0x727   : > { %13481 = vmatprep.subr.bf16.mxu1 %v15741_v8  ;;  %v6563_v8 = vld [vmem:[%s17545_s12 + $0x898] sm:$0xff] }
 0x728   : > { %v6699_v52 = vld [vmem:[%s17545_s12 + $0xcd8] sm:$0xff]  ;;  %v15788_v34 = vcombine.low %v6563_v8, %v6567_v36 }
 0x729   : > { %13441 = vmatpush1.bf16.msra.mxu0 %v15612_v40  ;;  %v15780_v40 = vcombine.low %v6555_v12, %v6559_v32 }
 0x72a   : > { %13482 = vmatpush1.bf16.msra.mxu1 %v15740_v7  ;;  %13442 = vmatprep.subr.bf16.mxu0 %v15621_v39  ;;  %v15908_v7 = vcombine.low %v6683_v13, %v6687_v19  ;;  %v15789_v39 = vcombine.high %v6563_v8, %v6567_v36 }
 0x72b   : > { %13483 = vmatprep.subr.bf16.mxu1 %v15749_v30  ;;  %v6571_v30 = vld [vmem:[%s17545_s12 + $0x8d8] sm:$0xff] }
 0x72c   : > { %v15797_v6 = vcombine.high %v6571_v30, %v6575_v23  ;;  %v15796_v58 = vcombine.low %v6571_v30, %v6575_v23 }
 0x72d   : > { %13443 = vmatpush1.bf16.msra.mxu0 %v15620_v38  ;;  %v6579_v38 = vld [vmem:[%s17545_s12 + $0x918] sm:$0xff] }
 0x72e   : > { %13484 = vmatpush1.bf16.msra.mxu1 %v15748_v49  ;;  %13444 = vmatprep.subr.bf16.mxu0 %v15629_v46  ;;  %v6583_v49 = vld [vmem:[%s17545_s12 + $0x938] sm:$0xff] }
 0x72f   : > { %13485 = vmatprep.subr.bf16.mxu1 %v15757_v59  ;;  %v6707_v46 = vld [vmem:[%s17545_s12 + $0xd18] sm:$0xff]  ;;  %v15805_v22 = vcombine.high %v6579_v38, %v6583_v49  ;;  %v15804_v2 = vcombine.low %v6579_v38, %v6583_v49 }
 0x730   : > { %v6711_v59 = vld [vmem:[%s17545_s12 + $0xd38] sm:$0xff] }
 0x731   : > { %13445 = vmatpush1.bf16.msra.mxu0 %v15628_v62  ;;  %v15933_v56 = vcombine.high %v6707_v46, %v6711_v59  ;;  %v6587_v62 = vld [vmem:[%s17545_s12 + $0x958] sm:$0xff]  ;;  %v15932_v45 = vcombine.low %v6707_v46, %v6711_v59 }
 0x732   : > { %13486 = vmatpush1.bf16.msra.mxu1 %v15756_v3  ;;  %13446 = vmatprep.subr.bf16.mxu0 %v15637_v43  ;;  %v6591_v3 = vld [vmem:[%s17545_s12 + $0x978] sm:$0xff] }
 0x733   : > { %13487 = vmatprep.subr.bf16.mxu1 %v15765_v17  ;;  %v6715_v43 = vld [vmem:[%s17545_s12 + $0xd58] sm:$0xff]  ;;  %v15813_v48 = vcombine.high %v6587_v62, %v6591_v3  ;;  %v15812_v12 = vcombine.low %v6587_v62, %v6591_v3 }
 0x734   : > { %v6719_v17 = vld [vmem:[%s17545_s12 + $0xd78] sm:$0xff] }
 0x735   : > { %13447 = vmatpush1.bf16.msra.mxu0 %v15636_v41  ;;  %v15941_v51 = vcombine.high %v6715_v43, %v6719_v17  ;;  %v6595_v41 = vld [vmem:[%s17545_s12 + $0x998] sm:$0xff]  ;;  %v15940_v32 = vcombine.low %v6715_v43, %v6719_v17 }
 0x736   : > { %13488 = vmatpush1.bf16.msra.mxu1 %v15764_v55  ;;  %13498 = vmatprep.subr.bf16.mxu0 %v15773_v63  ;;  %v6599_v55 = vld [vmem:[%s17545_s12 + $0x9b8] sm:$0xff] }
 0x737   : > { %13539 = vmatprep.subr.bf16.mxu1 %v15901_v29  ;;  %v6723_v63 = vld [vmem:[%s17545_s12 + $0xd98] sm:$0xff] }
 0x738   : > { %13449 = vmatmul.mubr.bf16.vlgmr.msra.gmra.mrb[64].mxu0 %v18565_v24  ;;  %v15917_v24 = vcombine.high %v6691_v25, %v6695_v57  ;;  %v6727_v29 = vld [vmem:[%s17545_s12 + $0xdb8] sm:$0xff] }
 0x739   : > { %13490 = vmatmul.mubr.bf16.vlgmr.msra.gmra.mrb[64].mxu1 %v18567_v28  ;;  %13499 = vmatpush1.bf16.msra.mxu0 %v15772_v15  ;;  %v6703_v28 = vld [vmem:[%s17545_s12 + $0xcf8] sm:$0xff]  ;;  %v15821_v15 = vcombine.high %v6595_v41, %v6599_v55  ;;  %v15949_v19 = vcombine.high %v6723_v63, %v6727_v29 }
 0x73a   : > { %13530 = vmatprep.mubr.bf16.mxu0 %v18571_v31  ;;  %13540 = vmatpush1.bf16.msra.mxu1 %v15900_v0  ;;  %v15916_v31 = vcombine.low %v6691_v25, %v6695_v57  ;;  %v15924_v42 = vcombine.low %v6699_v52, %v6703_v28  ;;  %v6603_v0 = vld [vmem:[%s17545_s12 + $0x9d8] sm:$0xff] }
 0x73b   : > { %13571 = vmatprep.mubr.bf16.mxu1 %v18576_v35  ;;  %13500 = vmatprep.subr.bf16.mxu0 %v15781_v20  ;;  %v15925_v35 = vcombine.high %v6699_v52, %v6703_v28  ;;  %v6607_v20 = vld [vmem:[%s17545_s12 + $0x9f8] sm:$0xff] }
 0x73c   : > { %13541 = vmatprep.subr.bf16.mxu1 %v15909_v37  ;;  %v6731_v25 = vld [vmem:[%s17545_s12 + $0xdd8] sm:$0xff]  ;;  %v15829_v28 = vcombine.high %v6603_v0, %v6607_v20  ;;  %v15828_v46 = vcombine.low %v6603_v0, %v6607_v20 }
 0x73d   : > { %13501 = vmatpush1.bf16.msra.mxu0 %v15780_v40  ;;  %v6735_v57 = vld [vmem:[%s17545_s12 + $0xdf8] sm:$0xff] }
 0x73e   : > { %13542 = vmatpush1.bf16.msra.mxu1 %v15908_v7  ;;  %13502 = vmatprep.subr.bf16.mxu0 %v15789_v39  ;;  %v6739_v38 = vld [vmem:[%s17545_s12 + $0xe18] sm:$0xff]  ;;  %v15956_v59 = vcombine.low %v6731_v25, %v6735_v57 }
 0x73f   : > { %13543 = vmatprep.subr.bf16.mxu1 %v15917_v24  ;;  %v15820_v24 = vcombine.low %v6595_v41, %v6599_v55  ;;  %v6743_v49 = vld [vmem:[%s17545_s12 + $0xe38] sm:$0xff] }
 0x740   : > { %v6747_v62 = vld [vmem:[%s17545_s12 + $0xe58] sm:$0xff]  ;;  %v15964_v17 = vcombine.low %v6739_v38, %v6743_v49 }
 0x741   : > { %13503 = vmatpush1.bf16.msra.mxu0 %v15788_v34  ;;  %v6751_v3 = vld [vmem:[%s17545_s12 + $0xe78] sm:$0xff] }
 0x742   : > { %13544 = vmatpush1.bf16.msra.mxu1 %v15916_v31  ;;  %13504 = vmatprep.subr.bf16.mxu0 %v15797_v6  ;;  %v15957_v31 = vcombine.high %v6731_v25, %v6735_v57  ;;  %v6611_v6 = vld [vmem:[%s17545_s12 + $0xa18] sm:$0xff] }
 0x743   : > { %13545 = vmatprep.subr.bf16.mxu1 %v15925_v35  ;;  %v6615_v35 = vld [vmem:[%s17545_s12 + $0xa38] sm:$0xff] }
 0x744   : > { %v15836_v43 = vcombine.low %v6611_v6, %v6615_v35  ;;  %v6755_v41 = vld [vmem:[%s17545_s12 + $0xe98] sm:$0xff] }
 0x745   : > { %13505 = vmatpush1.bf16.msra.mxu0 %v15796_v58  ;;  %v15837_v58 = vcombine.high %v6611_v6, %v6615_v35  ;;  %v6759_v55 = vld [vmem:[%s17545_s12 + $0xeb8] sm:$0xff] }
 0x746   : > { %13546 = vmatpush1.bf16.msra.mxu1 %v15924_v42  ;;  %13506 = vmatprep.subr.bf16.mxu0 %v15805_v22  ;;  %v15965_v42 = vcombine.high %v6739_v38, %v6743_v49  ;;  %v6619_v22 = vld [vmem:[%s17545_s12 + $0xa58] sm:$0xff] }
 0x747   : > { %13547 = vmatprep.subr.bf16.mxu1 %v15933_v56  ;;  %v6623_v56 = vld [vmem:[%s17545_s12 + $0xa78] sm:$0xff] }
 0x748   : > { %v6767_v0 = vld [vmem:[%s17545_s12 + $0xef8] sm:$0xff] }
 0x749   : > { %13507 = vmatpush1.bf16.msra.mxu0 %v15804_v2  ;;  %v15845_v2 = vcombine.high %v6619_v22, %v6623_v56  ;;  %v6643_v25 = vld [vmem:[%s17545_s12 + $0xb18] sm:$0xff] }
 0x74a   : > { %13548 = vmatpush1.bf16.msra.mxu1 %v15932_v45  ;;  %13508 = vmatprep.subr.bf16.mxu0 %v15813_v48  ;;  %v15973_v45 = vcombine.high %v6747_v62, %v6751_v3  ;;  %v6627_v48 = vld [vmem:[%s17545_s12 + $0xa98] sm:$0xff] }
 0x74b   : > { %v13204_v13 = vpop.f32.mrb[52].mxu0  ;;  %13549 = vmatprep.subr.bf16.mxu1 %v15941_v51  ;;  %v6631_v51 = vld [vmem:[%s17545_s12 + $0xab8] sm:$0xff] }
 0x74c   : > { %v13205_v8 = vadd.f32 %v13204_v13, %v19469_v1  ;;  %v13245_v36 = vpop.f32.mrb[52].mxu1  ;;  %v13206_v37 = vpop.f32.mrb[53].mxu0  ;;  %v15948_v1 = vcombine.low %v6723_v63, %v6727_v29  ;;  %v15844_v63 = vcombine.low %v6619_v22, %v6623_v56  ;;  %v15972_v29 = vcombine.low %v6747_v62, %v6751_v3  ;;  %v6639_v13 = vld [vmem:[%s17545_s12 + $0xaf8] sm:$0xff] }
 0x74d   : > { %v13207_v40 = vadd.f32 %v13206_v37, %v19471_v27  ;;  %v13247_v7 = vpop.f32.mrb[53].mxu1  ;;  %v13208_v39 = vpop.f32.mrb[54].mxu0  ;;  %13509 = vmatpush1.bf16.msra.mxu0 %v15812_v12  ;;  %v15853_v12 = vcombine.high %v6627_v48, %v6631_v51  ;;  %v15852_v20 = vcombine.low %v6627_v48, %v6631_v51  ;;  %v6647_v57 = vld [vmem:[%s17545_s12 + $0xb38] sm:$0xff] }
 0x74e   : > { %v19543_v30 = vadd.f32 %v13245_v36, %v13205_v8  ;;  %v13249_v23 = vpop.f32.mrb[54].mxu1  ;;  %13550 = vmatpush1.bf16.msra.mxu1 %v15940_v32  ;;  %v13209_v52 = vpop.f32.mrb[55].mxu0  ;;  %13510 = vmatprep.subr.bf16.mxu0 %v15821_v15  ;;  %v15981_v32 = vcombine.high %v6755_v41, %v6759_v55  ;;  %v6635_v15 = vld [vmem:[%s17545_s12 + $0xad8] sm:$0xff]  ;;  %v15980_v8 = vcombine.low %v6755_v41, %v6759_v55 }
 0x74f   : > { %v19545_v34 = vadd.f32 %v13247_v7, %v13207_v40  ;;  %v13250_v27 = vpop.f32.mrb[55].mxu1  ;;  %13551 = vmatprep.subr.bf16.mxu1 %v15949_v19  ;;  %v6763_v19 = vld [vmem:[%s17545_s12 + $0xed8] sm:$0xff]  ;;  %v15861_v36 = vcombine.high %v6635_v15, %v6639_v13  ;;  %v15860_v39 = vcombine.low %v6635_v15, %v6639_v13  ;;  %v15869_v23 = vcombine.high %v6643_v25, %v6647_v57 }
 0x750   : > { %v15989_v37 = vcombine.high %v6763_v19, %v6767_v0  ;;  %v6771_v40 = vld [vmem:[%s17545_s12 + $0xf18] sm:$0xff]  ;;  %v15868_v6 = vcombine.low %v6643_v25, %v6647_v57 }
 0x751   : > { %13511 = vmatpush1.bf16.msra.mxu0 %v15820_v24  ;;  %v6775_v7 = vld [vmem:[%s17545_s12 + $0xf38] sm:$0xff]  ;;  %v15988_v24 = vcombine.low %v6763_v19, %v6767_v0 }
 0x752   : > { %13552 = vmatpush1.bf16.msra.mxu1 %v15948_v1  ;;  %13512 = vmatprep.subr.bf16.mxu0 %v15829_v28  ;;  %v15997_v52 = vcombine.high %v6771_v40, %v6775_v7  ;;  %v6651_v1 = vld [vmem:[%s17545_s12 + $0xb58] sm:$0xff]  ;;  %v15996_v35 = vcombine.low %v6771_v40, %v6775_v7 }
 0x753   : > { %13553 = vmatprep.subr.bf16.mxu1 %v15957_v31  ;;  %v6655_v28 = vld [vmem:[%s17545_s12 + $0xb78] sm:$0xff] }
 0x754   : > { %v6779_v27 = vld [vmem:[%s17545_s12 + $0xf58] sm:$0xff]  ;;  %v15877_v38 = vcombine.high %v6651_v1, %v6655_v28  ;;  %v15876_v22 = vcombine.low %v6651_v1, %v6655_v28 }
 0x755   : > { %13513 = vmatpush1.bf16.msra.mxu0 %v15828_v46  ;;  %v6783_v31 = vld [vmem:[%s17545_s12 + $0xf78] sm:$0xff] }
 0x756   : > { %13554 = vmatpush1.bf16.msra.mxu1 %v15956_v59  ;;  %13514 = vmatprep.subr.bf16.mxu0 %v15837_v58  ;;  %v16005_v49 = vcombine.high %v6779_v27, %v6783_v31  ;;  %v6659_v46 = vld [vmem:[%s17545_s12 + $0xb98] sm:$0xff]  ;;  %v16004_v56 = vcombine.low %v6779_v27, %v6783_v31 }
 0x757   : > { %13555 = vmatprep.subr.bf16.mxu1 %v15965_v42  ;;  %v6663_v59 = vld [vmem:[%s17545_s12 + $0xbb8] sm:$0xff] }
 0x758   : > { %v6787_v58 = vld [vmem:[%s17545_s12 + $0xf98] sm:$0xff]  ;;  %v15885_v62 = vcombine.high %v6659_v46, %v6663_v59  ;;  %v15884_v48 = vcombine.low %v6659_v46, %v6663_v59 }
 0x759   : > { %13515 = vmatpush1.bf16.msra.mxu0 %v15836_v43  ;;  %v6791_v42 = vld [vmem:[%s17545_s12 + $0xfb8] sm:$0xff] }
 0x75a   : > { %13556 = vmatpush1.bf16.msra.mxu1 %v15964_v17  ;;  %13516 = vmatprep.subr.bf16.mxu0 %v15845_v2  ;;  %v16013_v3 = vcombine.high %v6787_v58, %v6791_v42  ;;  %v6667_v43 = vld [vmem:[%s17545_s12 + $0xbd8] sm:$0xff]  ;;  %v16012_v51 = vcombine.low %v6787_v58, %v6791_v42 }
 0x75b   : > { %13557 = vmatprep.subr.bf16.mxu1 %v15973_v45  ;;  %v6671_v17 = vld [vmem:[%s17545_s12 + $0xbf8] sm:$0xff] }
 0x75c   : > { %v6795_v2 = vld [vmem:[%s17545_s12 + $0xfd8] sm:$0xff]  ;;  %v15893_v41 = vcombine.high %v6667_v43, %v6671_v17  ;;  %v15892_v15 = vcombine.low %v6667_v43, %v6671_v17 }
 0x75d   : > { %13517 = vmatpush1.bf16.msra.mxu0 %v15844_v63  ;;  %v6799_v45 = vld [vmem:[%s17545_s12 + $0xff8] sm:$0xff] }
 0x75e   : > { %13558 = vmatpush1.bf16.msra.mxu1 %v15972_v29  ;;  %13518 = vmatprep.subr.bf16.mxu0 %v15853_v12  ;;  %v16021_v55 = vcombine.high %v6795_v2, %v6799_v45  ;;  %v6803_v63 = vld [vmem:[%s17545_s12 + $0x1018] sm:$0xff]  ;;  %v16020_v13 = vcombine.low %v6795_v2, %v6799_v45 }
 0x75f   : > { %13559 = vmatprep.subr.bf16.mxu1 %v15981_v32  ;;  %v6807_v29 = vld [vmem:[%s17545_s12 + $0x1038] sm:$0xff] }
 0x760   : > { %v6931_v12 = vld [vmem:[%s17545_s12 + $0x1418] sm:$0xff]  ;;  %v16029_v19 = vcombine.high %v6803_v63, %v6807_v29 }
 0x761   : > { %13519 = vmatpush1.bf16.msra.mxu0 %v15852_v20  ;;  %v6935_v32 = vld [vmem:[%s17545_s12 + $0x1438] sm:$0xff] }
 0x762   : > { %13560 = vmatpush1.bf16.msra.mxu1 %v15980_v8  ;;  %13520 = vmatprep.subr.bf16.mxu0 %v15861_v36  ;;  %v16157_v0 = vcombine.high %v6931_v12, %v6935_v32  ;;  %v6811_v20 = vld [vmem:[%s17545_s12 + $0x1058] sm:$0xff]  ;;  %v16028_v36 = vcombine.low %v6803_v63, %v6807_v29  ;;  %v16156_v57 = vcombine.low %v6931_v12, %v6935_v32 }
 0x763   : > { %13561 = vmatprep.subr.bf16.mxu1 %v15989_v37  ;;  %v6815_v8 = vld [vmem:[%s17545_s12 + $0x1078] sm:$0xff] }
 0x764   : > { %v6939_v37 = vld [vmem:[%s17545_s12 + $0x1458] sm:$0xff]  ;;  %v16037_v40 = vcombine.high %v6811_v20, %v6815_v8  ;;  %v16036_v1 = vcombine.low %v6811_v20, %v6815_v8 }
 0x765   : > { %13521 = vmatpush1.bf16.msra.mxu0 %v15860_v39  ;;  %v6943_v25 = vld [vmem:[%s17545_s12 + $0x1478] sm:$0xff] }
 0x766   : > { %13562 = vmatpush1.bf16.msra.mxu1 %v15988_v24  ;;  %13522 = vmatprep.subr.bf16.mxu0 %v15869_v23  ;;  %v6819_v7 = vld [vmem:[%s17545_s12 + $0x1098] sm:$0xff]  ;;  %v16165_v24 = vcombine.high %v6939_v37, %v6943_v25  ;;  %v16164_v28 = vcombine.low %v6939_v37, %v6943_v25 }
 0x767   : > { %13563 = vmatprep.subr.bf16.mxu1 %v15997_v52  ;;  %v6823_v39 = vld [vmem:[%s17545_s12 + $0x10b8] sm:$0xff] }
 0x768   : > { %v6947_v23 = vld [vmem:[%s17545_s12 + $0x1498] sm:$0xff]  ;;  %v16045_v27 = vcombine.high %v6819_v7, %v6823_v39 }
 0x769   : > { %13523 = vmatpush1.bf16.msra.mxu0 %v15868_v6  ;;  %v6951_v52 = vld [vmem:[%s17545_s12 + $0x14b8] sm:$0xff] }
 0x76a   : > { %13564 = vmatpush1.bf16.msra.mxu1 %v15996_v35  ;;  %13524 = vmatprep.subr.bf16.mxu0 %v15877_v38  ;;  %v6827_v31 = vld [vmem:[%s17545_s12 + $0x10d8] sm:$0xff]  ;;  %v16044_v38 = vcombine.low %v6819_v7, %v6823_v39 }
 0x76b   : > { %13565 = vmatprep.subr.bf16.mxu1 %v16005_v49  ;;  %v6831_v6 = vld [vmem:[%s17545_s12 + $0x10f8] sm:$0xff] }
 0x76c   : > { %v6955_v35 = vld [vmem:[%s17545_s12 + $0x14d8] sm:$0xff]  ;;  %v16053_v49 = vcombine.high %v6827_v31, %v6831_v6 }
 0x76d   : > { %13525 = vmatpush1.bf16.msra.mxu0 %v15876_v22  ;;  %v6835_v46 = vld [vmem:[%s17545_s12 + $0x1118] sm:$0xff]  ;;  %v16052_v22 = vcombine.low %v6827_v31, %v6831_v6 }
 0x76e   : > { %13566 = vmatpush1.bf16.msra.mxu1 %v16004_v56  ;;  %13526 = vmatprep.subr.bf16.mxu0 %v15885_v62  ;;  %v6839_v59 = vld [vmem:[%s17545_s12 + $0x1138] sm:$0xff] }
 0x76f   : > { %13567 = vmatprep.subr.bf16.mxu1 %v16013_v3  ;;  %v6963_v58 = vld [vmem:[%s17545_s12 + $0x1518] sm:$0xff]  ;;  %v16061_v62 = vcombine.high %v6835_v46, %v6839_v59 }
 0x770   : > { %v6967_v42 = vld [vmem:[%s17545_s12 + $0x1538] sm:$0xff] }
 0x771   : > { %13527 = vmatpush1.bf16.msra.mxu0 %v15884_v48  ;;  %v16189_v3 = vcombine.high %v6963_v58, %v6967_v42  ;;  %v6843_v43 = vld [vmem:[%s17545_s12 + $0x1158] sm:$0xff]  ;;  %v16060_v48 = vcombine.low %v6835_v46, %v6839_v59 }
 0x772   : > { %13568 = vmatpush1.bf16.msra.mxu1 %v16012_v51  ;;  %13528 = vmatprep.subr.bf16.mxu0 %v15893_v41  ;;  %v6847_v17 = vld [vmem:[%s17545_s12 + $0x1178] sm:$0xff]  ;;  %v16188_v51 = vcombine.low %v6963_v58, %v6967_v42 }
 0x773   : > { %13569 = vmatprep.subr.bf16.mxu1 %v16021_v55  ;;  %v6971_v2 = vld [vmem:[%s17545_s12 + $0x1558] sm:$0xff]  ;;  %v16069_v41 = vcombine.high %v6843_v43, %v6847_v17 }
 0x774   : > { %v6975_v45 = vld [vmem:[%s17545_s12 + $0x1578] sm:$0xff] }
 0x775   : > { %13529 = vmatpush1.bf16.msra.mxu0 %v15892_v15  ;;  %v16197_v55 = vcombine.high %v6971_v2, %v6975_v45  ;;  %v6851_v63 = vld [vmem:[%s17545_s12 + $0x1198] sm:$0xff]  ;;  %v16068_v15 = vcombine.low %v6843_v43, %v6847_v17 }
 0x776   : > { %13570 = vmatpush1.bf16.msra.mxu1 %v16020_v13  ;;  %13580 = vmatprep.subr.bf16.mxu0 %v16029_v19  ;;  %v6855_v29 = vld [vmem:[%s17545_s12 + $0x11b8] sm:$0xff]  ;;  %v16196_v13 = vcombine.low %v6971_v2, %v6975_v45 }
 0x777   : > { %13621 = vmatprep.subr.bf16.mxu1 %v16157_v0  ;;  %v6979_v12 = vld [vmem:[%s17545_s12 + $0x1598] sm:$0xff]  ;;  %v16077_v19 = vcombine.high %v6851_v63, %v6855_v29 }
 0x778   : > { %13531 = vmatmul.mubr.bf16.vlgmr.msra.gmra.mrb[68].mxu0 %v18673_v44  ;;  %v16173_v44 = vcombine.high %v6947_v23, %v6951_v52  ;;  %v6983_v32 = vld [vmem:[%s17545_s12 + $0x15b8] sm:$0xff] }
 0x779   : > { %13572 = vmatmul.mubr.bf16.vlgmr.msra.gmra.mrb[68].mxu1 %v18675_v18  ;;  %13581 = vmatpush1.bf16.msra.mxu0 %v16028_v36  ;;  %v6959_v18 = vld [vmem:[%s17545_s12 + $0x14f8] sm:$0xff]  ;;  %v16205_v20 = vcombine.high %v6979_v12, %v6983_v32 }
 0x77a   : > { %13612 = vmatprep.mubr.bf16.mxu0 %v18679_v9  ;;  %13622 = vmatpush1.bf16.msra.mxu1 %v16156_v57  ;;  %v16172_v9 = vcombine.low %v6947_v23, %v6951_v52  ;;  %v16180_v56 = vcombine.low %v6955_v35, %v6959_v18  ;;  %v6859_v8 = vld [vmem:[%s17545_s12 + $0x11d8] sm:$0xff]  ;;  %v16076_v52 = vcombine.low %v6851_v63, %v6855_v29 }
 0x77b   : > { %13653 = vmatprep.mubr.bf16.mxu1 %v18684_v50  ;;  %13582 = vmatprep.subr.bf16.mxu0 %v16037_v40  ;;  %v16181_v50 = vcombine.high %v6955_v35, %v6959_v18  ;;  %v6863_v36 = vld [vmem:[%s17545_s12 + $0x11f8] sm:$0xff] }
 0x77c   : > { %13623 = vmatprep.subr.bf16.mxu1 %v16165_v24  ;;  %v6987_v40 = vld [vmem:[%s17545_s12 + $0x15d8] sm:$0xff] }
 0x77d   : > { %13583 = vmatpush1.bf16.msra.mxu0 %v16036_v1  ;;  %v6991_v7 = vld [vmem:[%s17545_s12 + $0x15f8] sm:$0xff] }
 0x77e   : > { %13624 = vmatpush1.bf16.msra.mxu1 %v16164_v28  ;;  %13584 = vmatprep.subr.bf16.mxu0 %v16045_v27  ;;  %v16213_v6 = vcombine.high %v6987_v40, %v6991_v7  ;;  %v6867_v35 = vld [vmem:[%s17545_s12 + $0x1218] sm:$0xff] }
 0x77f   : > { %13625 = vmatprep.subr.bf16.mxu1 %v16173_v44  ;;  %v16085_v44 = vcombine.high %v6859_v8, %v6863_v36  ;;  %v6871_v18 = vld [vmem:[%s17545_s12 + $0x1238] sm:$0xff] }
 0x780   : > { %v16093_v46 = vcombine.high %v6867_v35, %v6871_v18  ;;  %v6875_v58 = vld [vmem:[%s17545_s12 + $0x1258] sm:$0xff] }
 0x781   : > { %13585 = vmatpush1.bf16.msra.mxu0 %v16044_v38  ;;  %v6995_v38 = vld [vmem:[%s17545_s12 + $0x1618] sm:$0xff] }
 0x782   : > { %13626 = vmatpush1.bf16.msra.mxu1 %v16172_v9  ;;  %13586 = vmatprep.subr.bf16.mxu0 %v16053_v49  ;;  %v6999_v9 = vld [vmem:[%s17545_s12 + $0x1638] sm:$0xff]  ;;  %v16084_v49 = vcombine.low %v6859_v8, %v6863_v36 }
 0x783   : > { %13627 = vmatprep.subr.bf16.mxu1 %v16181_v50  ;;  %v16212_v50 = vcombine.low %v6987_v40, %v6991_v7  ;;  %v16221_v59 = vcombine.high %v6995_v38, %v6999_v9  ;;  %v6879_v42 = vld [vmem:[%s17545_s12 + $0x1278] sm:$0xff] }
 0x784   : > { %v16101_v43 = vcombine.high %v6875_v58, %v6879_v42  ;;  %v6883_v2 = vld [vmem:[%s17545_s12 + $0x1298] sm:$0xff] }
 0x785   : > { %13587 = vmatpush1.bf16.msra.mxu0 %v16052_v22  ;;  %v7003_v22 = vld [vmem:[%s17545_s12 + $0x1658] sm:$0xff] }
 0x786   : > { %13628 = vmatpush1.bf16.msra.mxu1 %v16180_v56  ;;  %13588 = vmatprep.subr.bf16.mxu0 %v16061_v62  ;;  %v7007_v56 = vld [vmem:[%s17545_s12 + $0x1678] sm:$0xff]  ;;  %v16092_v62 = vcombine.low %v6867_v35, %v6871_v18 }
 0x787   : > { %13629 = vmatprep.subr.bf16.mxu1 %v16189_v3  ;;  %v16220_v3 = vcombine.low %v6995_v38, %v6999_v9  ;;  %v16229_v17 = vcombine.high %v7003_v22, %v7007_v56  ;;  %v6887_v45 = vld [vmem:[%s17545_s12 + $0x12b8] sm:$0xff] }
 0x788   : > { %v16109_v63 = vcombine.high %v6883_v2, %v6887_v45  ;;  %v6899_v36 = vld [vmem:[%s17545_s12 + $0x1318] sm:$0xff] }
 0x789   : > { %13589 = vmatpush1.bf16.msra.mxu0 %v16060_v48  ;;  %v7011_v48 = vld [vmem:[%s17545_s12 + $0x1698] sm:$0xff] }
 0x78a   : > { %13630 = vmatpush1.bf16.msra.mxu1 %v16188_v51  ;;  %13590 = vmatprep.subr.bf16.mxu0 %v16069_v41  ;;  %v7015_v51 = vld [vmem:[%s17545_s12 + $0x16b8] sm:$0xff]  ;;  %v16100_v41 = vcombine.low %v6875_v58, %v6879_v42 }
 0x78b   : > { %v13286_v0 = vpop.f32.mrb[56].mxu0  ;;  %13631 = vmatprep.subr.bf16.mxu1 %v16197_v55  ;;  %v16228_v55 = vcombine.low %v7003_v22, %v7007_v56  ;;  %v16237_v29 = vcombine.high %v7011_v48, %v7015_v51  ;;  %v6915_v35 = vld [vmem:[%s17545_s12 + $0x1398] sm:$0xff] }
 0x78c   : > { %v13287_v37 = vadd.f32 %v13286_v0, %v19543_v30  ;;  %v13327_v25 = vpop.f32.mrb[56].mxu1  ;;  %v13288_v57 = vpop.f32.mrb[57].mxu0  ;;  %v16204_v30 = vcombine.low %v6979_v12, %v6983_v32  ;;  %v6891_v12 = vld [vmem:[%s17545_s12 + $0x12d8] sm:$0xff]  ;;  %v16236_v0 = vcombine.low %v7011_v48, %v7015_v51 }
 0x78d   : > { %v13289_v39 = vadd.f32 %v13288_v57, %v19545_v34  ;;  %v13329_v24 = vpop.f32.mrb[57].mxu1  ;;  %v13290_v23 = vpop.f32.mrb[58].mxu0  ;;  %13591 = vmatpush1.bf16.msra.mxu0 %v16068_v15  ;;  %v6895_v32 = vld [vmem:[%s17545_s12 + $0x12f8] sm:$0xff] }
 0x78e   : > { %v19617_v1 = vadd.f32 %v13327_v25, %v13287_v37  ;;  %v13331_v28 = vpop.f32.mrb[58].mxu1  ;;  %13632 = vmatpush1.bf16.msra.mxu1 %v16196_v13  ;;  %v13291_v27 = vpop.f32.mrb[59].mxu0  ;;  %13592 = vmatprep.subr.bf16.mxu0 %v16077_v19  ;;  %v7019_v15 = vld [vmem:[%s17545_s12 + $0x16d8] sm:$0xff]  ;;  %v16108_v19 = vcombine.low %v6883_v2, %v6887_v45  ;;  %v16116_v40 = vcombine.low %v6891_v12, %v6895_v32 }
 0x78f   : > { %v19619_v31 = vadd.f32 %v13329_v24, %v13289_v39  ;;  %v13332_v34 = vpop.f32.mrb[59].mxu1  ;;  %13633 = vmatprep.subr.bf16.mxu1 %v16205_v20  ;;  %v7023_v13 = vld [vmem:[%s17545_s12 + $0x16f8] sm:$0xff]  ;;  %v16117_v20 = vcombine.high %v6891_v12, %v6895_v32 }
 0x790   : > { %v16245_v8 = vcombine.high %v7019_v15, %v7023_v13  ;;  %v6903_v37 = vld [vmem:[%s17545_s12 + $0x1338] sm:$0xff]  ;;  %v16244_v7 = vcombine.low %v7019_v15, %v7023_v13 }
 0x791   : > { %13593 = vmatpush1.bf16.msra.mxu0 %v16076_v52  ;;  %v7027_v25 = vld [vmem:[%s17545_s12 + $0x1718] sm:$0xff]  ;;  %v16125_v39 = vcombine.high %v6899_v36, %v6903_v37 }
 0x792   : > { %13634 = vmatpush1.bf16.msra.mxu1 %v16204_v30  ;;  %13594 = vmatprep.subr.bf16.mxu0 %v16085_v44  ;;  %v7031_v57 = vld [vmem:[%s17545_s12 + $0x1738] sm:$0xff]  ;;  %v16124_v30 = vcombine.low %v6899_v36, %v6903_v37 }
 0x793   : > { %13635 = vmatprep.subr.bf16.mxu1 %v16213_v6  ;;  %v16253_v24 = vcombine.high %v7027_v25, %v7031_v57  ;;  %v6907_v23 = vld [vmem:[%s17545_s12 + $0x1358] sm:$0xff]  ;;  %v16252_v44 = vcombine.low %v7027_v25, %v7031_v57 }
 0x794   : > { %v6911_v52 = vld [vmem:[%s17545_s12 + $0x1378] sm:$0xff] }
 0x795   : > { %13595 = vmatpush1.bf16.msra.mxu0 %v16084_v49  ;;  %v7035_v28 = vld [vmem:[%s17545_s12 + $0x1758] sm:$0xff]  ;;  %v16133_v34 = vcombine.high %v6907_v23, %v6911_v52  ;;  %v16132_v49 = vcombine.low %v6907_v23, %v6911_v52 }
 0x796   : > { %13636 = vmatpush1.bf16.msra.mxu1 %v16212_v50  ;;  %13596 = vmatprep.subr.bf16.mxu0 %v16093_v46  ;;  %v7039_v27 = vld [vmem:[%s17545_s12 + $0x1778] sm:$0xff] }
 0x797   : > { %13637 = vmatprep.subr.bf16.mxu1 %v16221_v59  ;;  %v16261_v6 = vcombine.high %v7035_v28, %v7039_v27  ;;  %v6919_v18 = vld [vmem:[%s17545_s12 + $0x13b8] sm:$0xff]  ;;  %v16260_v50 = vcombine.low %v7035_v28, %v7039_v27 }
 0x798   : > { %v7043_v38 = vld [vmem:[%s17545_s12 + $0x1798] sm:$0xff]  ;;  %v16141_v46 = vcombine.high %v6915_v35, %v6919_v18 }
 0x799   : > { %13597 = vmatpush1.bf16.msra.mxu0 %v16092_v62  ;;  %v7047_v9 = vld [vmem:[%s17545_s12 + $0x17b8] sm:$0xff]  ;;  %v16140_v62 = vcombine.low %v6915_v35, %v6919_v18 }
 0x79a   : > { %13638 = vmatpush1.bf16.msra.mxu1 %v16220_v3  ;;  %13598 = vmatprep.subr.bf16.mxu0 %v16101_v43  ;;  %v16269_v59 = vcombine.high %v7043_v38, %v7047_v9  ;;  %v6923_v58 = vld [vmem:[%s17545_s12 + $0x13d8] sm:$0xff]  ;;  %v16268_v3 = vcombine.low %v7043_v38, %v7047_v9 }
 0x79b   : > { %13639 = vmatprep.subr.bf16.mxu1 %v16229_v17  ;;  %v6927_v42 = vld [vmem:[%s17545_s12 + $0x13f8] sm:$0xff] }
 0x79c   : > { %v7051_v22 = vld [vmem:[%s17545_s12 + $0x17d8] sm:$0xff]  ;;  %v16149_v43 = vcombine.high %v6923_v58, %v6927_v42 }
 0x79d   : > { %13599 = vmatpush1.bf16.msra.mxu0 %v16100_v41  ;;  %v7055_v56 = vld [vmem:[%s17545_s12 + $0x17f8] sm:$0xff]  ;;  %v16148_v41 = vcombine.low %v6923_v58, %v6927_v42 }
 0x79e   : > { %13640 = vmatpush1.bf16.msra.mxu1 %v16228_v55  ;;  %13600 = vmatprep.subr.bf16.mxu0 %v16109_v63  ;;  %v16277_v17 = vcombine.high %v7051_v22, %v7055_v56  ;;  %v7059_v2 = vld [vmem:[%s17545_s12 + $0x1818] sm:$0xff]  ;;  %v16276_v55 = vcombine.low %v7051_v22, %v7055_v56 }
 0x79f   : > { %13641 = vmatprep.subr.bf16.mxu1 %v16237_v29  ;;  %v7063_v45 = vld [vmem:[%s17545_s12 + $0x1838] sm:$0xff] }
 0x7a0   : > { %v7187_v48 = vld [vmem:[%s17545_s12 + $0x1c18] sm:$0xff]  ;;  %v16285_v63 = vcombine.high %v7059_v2, %v7063_v45  ;;  %v16284_v15 = vcombine.low %v7059_v2, %v7063_v45 }
 0x7a1   : > { %13601 = vmatpush1.bf16.msra.mxu0 %v16108_v19  ;;  %v7191_v51 = vld [vmem:[%s17545_s12 + $0x1c38] sm:$0xff] }
 0x7a2   : > { %13642 = vmatpush1.bf16.msra.mxu1 %v16236_v0  ;;  %13602 = vmatprep.subr.bf16.mxu0 %v16117_v20  ;;  %v16413_v29 = vcombine.high %v7187_v48, %v7191_v51  ;;  %v7067_v12 = vld [vmem:[%s17545_s12 + $0x1858] sm:$0xff]  ;;  %v16412_v0 = vcombine.low %v7187_v48, %v7191_v51 }
 0x7a3   : > { %13643 = vmatprep.subr.bf16.mxu1 %v16245_v8  ;;  %v7071_v32 = vld [vmem:[%s17545_s12 + $0x1878] sm:$0xff] }
 0x7a4   : > { %v7195_v13 = vld [vmem:[%s17545_s12 + $0x1c58] sm:$0xff]  ;;  %v16293_v20 = vcombine.high %v7067_v12, %v7071_v32 }
 0x7a5   : > { %13603 = vmatpush1.bf16.msra.mxu0 %v16116_v40  ;;  %v7199_v19 = vld [vmem:[%s17545_s12 + $0x1c78] sm:$0xff]  ;;  %v16292_v40 = vcombine.low %v7067_v12, %v7071_v32 }
 0x7a6   : > { %13644 = vmatpush1.bf16.msra.mxu1 %v16244_v7  ;;  %13604 = vmatprep.subr.bf16.mxu0 %v16125_v39  ;;  %v7075_v8 = vld [vmem:[%s17545_s12 + $0x1898] sm:$0xff]  ;;  %v16421_v37 = vcombine.high %v7195_v13, %v7199_v19  ;;  %v16420_v7 = vcombine.low %v7195_v13, %v7199_v19  ;;  %v6268_v19 = vld [vmem:[#allocation2 + $0x20] sm:$0xff] }
 0x7a7   : > { %13645 = vmatprep.subr.bf16.mxu1 %v16253_v24  ;;  %v7079_v36 = vld [vmem:[%s17545_s12 + $0x18b8] sm:$0xff] }
 0x7a8   : > { %v7203_v25 = vld [vmem:[%s17545_s12 + $0x1c98] sm:$0xff]  ;;  %v16301_v39 = vcombine.high %v7075_v8, %v7079_v36  ;;  %v16300_v28 = vcombine.low %v7075_v8, %v7079_v36 }
 0x7a9   : > { %13605 = vmatpush1.bf16.msra.mxu0 %v16124_v30  ;;  %v7207_v57 = vld [vmem:[%s17545_s12 + $0x1cb8] sm:$0xff] }
 0x7aa   : > { %13646 = vmatpush1.bf16.msra.mxu1 %v16252_v44  ;;  %13606 = vmatprep.subr.bf16.mxu0 %v16133_v34  ;;  %v7083_v24 = vld [vmem:[%s17545_s12 + $0x18d8] sm:$0xff] }
 0x7ab   : > { %13647 = vmatprep.subr.bf16.mxu1 %v16261_v6  ;;  %v7087_v23 = vld [vmem:[%s17545_s12 + $0x18f8] sm:$0xff] }
 0x7ac   : > { %v7211_v52 = vld [vmem:[%s17545_s12 + $0x1cd8] sm:$0xff]  ;;  %v16309_v27 = vcombine.high %v7083_v24, %v7087_v23  ;;  %v16308_v35 = vcombine.low %v7083_v24, %v7087_v23 }
 0x7ad   : > { %13607 = vmatpush1.bf16.msra.mxu0 %v16132_v49  ;;  %v7091_v30 = vld [vmem:[%s17545_s12 + $0x1918] sm:$0xff] }
 0x7ae   : > { %13648 = vmatpush1.bf16.msra.mxu1 %v16260_v50  ;;  %13608 = vmatprep.subr.bf16.mxu0 %v16141_v46  ;;  %v7095_v44 = vld [vmem:[%s17545_s12 + $0x1938] sm:$0xff] }
 0x7af   : > { %13649 = vmatprep.subr.bf16.mxu1 %v16269_v59  ;;  %v7219_v34 = vld [vmem:[%s17545_s12 + $0x1d18] sm:$0xff]  ;;  %v16317_v38 = vcombine.high %v7091_v30, %v7095_v44  ;;  %v16316_v58 = vcombine.low %v7091_v30, %v7095_v44 }
 0x7b0   : > { %v7223_v6 = vld [vmem:[%s17545_s12 + $0x1d38] sm:$0xff] }
 0x7b1   : > { %13609 = vmatpush1.bf16.msra.mxu0 %v16140_v62  ;;  %v16445_v9 = vcombine.high %v7219_v34, %v7223_v6  ;;  %v7099_v49 = vld [vmem:[%s17545_s12 + $0x1958] sm:$0xff]  ;;  %v16444_v42 = vcombine.low %v7219_v34, %v7223_v6 }
 0x7b2   : > { %13650 = vmatpush1.bf16.msra.mxu1 %v16268_v3  ;;  %13610 = vmatprep.subr.bf16.mxu0 %v16149_v43  ;;  %v7103_v50 = vld [vmem:[%s17545_s12 + $0x1978] sm:$0xff] }
 0x7b3   : > { %13651 = vmatprep.subr.bf16.mxu1 %v16277_v17  ;;  %v7227_v46 = vld [vmem:[%s17545_s12 + $0x1d58] sm:$0xff]  ;;  %v16325_v22 = vcombine.high %v7099_v49, %v7103_v50  ;;  %v16324_v2 = vcombine.low %v7099_v49, %v7103_v50 }
 0x7b4   : > { %v7231_v59 = vld [vmem:[%s17545_s12 + $0x1d78] sm:$0xff] }
 0x7b5   : > { %13611 = vmatpush1.bf16.msra.mxu0 %v16148_v41  ;;  %v16453_v56 = vcombine.high %v7227_v46, %v7231_v59  ;;  %v7107_v62 = vld [vmem:[%s17545_s12 + $0x1998] sm:$0xff]  ;;  %v16452_v45 = vcombine.low %v7227_v46, %v7231_v59 }
 0x7b6   : > { %13652 = vmatpush1.bf16.msra.mxu1 %v16276_v55  ;;  %13662 = vmatprep.subr.bf16.mxu0 %v16285_v63  ;;  %v7111_v3 = vld [vmem:[%s17545_s12 + $0x19b8] sm:$0xff] }
 0x7b7   : > { %13703 = vmatprep.subr.bf16.mxu1 %v16413_v29  ;;  %v7235_v43 = vld [vmem:[%s17545_s12 + $0x1d98] sm:$0xff]  ;;  %v16333_v48 = vcombine.high %v7107_v62, %v7111_v3  ;;  %v16332_v36 = vcombine.low %v7107_v62, %v7111_v3 }
 0x7b8   : > { %13613 = vmatmul.mubr.bf16.vlgmr.msra.gmra.mrb[72].mxu0 %v18759_v61  ;;  %v16429_v61 = vcombine.high %v7203_v25, %v7207_v57  ;;  %v7239_v17 = vld [vmem:[%s17545_s12 + $0x1db8] sm:$0xff] }
 0x7b9   : > { %13654 = vmatmul.mubr.bf16.vlgmr.msra.gmra.mrb[72].mxu1 %v18761_v11  ;;  %13663 = vmatpush1.bf16.msra.mxu0 %v16284_v15  ;;  %v7215_v11 = vld [vmem:[%s17545_s12 + $0x1cf8] sm:$0xff]  ;;  %v16461_v41 = vcombine.high %v7235_v43, %v7239_v17 }
 0x7ba   : > { %13694 = vmatprep.mubr.bf16.mxu0 %v18805_v26  ;;  %13704 = vmatpush1.bf16.msra.mxu1 %v16412_v0  ;;  %v16428_v26 = vcombine.low %v7203_v25, %v7207_v57  ;;  %v16436_v18 = vcombine.low %v7211_v52, %v7215_v11  ;;  %v7115_v55 = vld [vmem:[%s17545_s12 + $0x19d8] sm:$0xff]  ;;  %v6269_v25 = vld [vmem:[#allocation2 + $0x28] sm:$0xff] }
 0x7bb   : > { %13735 = vmatprep.mubr.bf16.mxu1 %v18809_v21  ;;  %13664 = vmatprep.subr.bf16.mxu0 %v16293_v20  ;;  %v16437_v21 = vcombine.high %v7211_v52, %v7215_v11  ;;  %v7119_v63 = vld [vmem:[%s17545_s12 + $0x19f8] sm:$0xff] }
 0x7bc   : > { %13705 = vmatprep.subr.bf16.mxu1 %v16421_v37  ;;  %v7243_v15 = vld [vmem:[%s17545_s12 + $0x1dd8] sm:$0xff] }
 0x7bd   : > { %13665 = vmatpush1.bf16.msra.mxu0 %v16292_v40  ;;  %v7247_v13 = vld [vmem:[%s17545_s12 + $0x1df8] sm:$0xff]  ;;  %v16460_v40 = vcombine.low %v7235_v43, %v7239_v17 }
 0x7be   : > { %13706 = vmatpush1.bf16.msra.mxu1 %v16420_v7  ;;  %13666 = vmatprep.subr.bf16.mxu0 %v16301_v39  ;;  %v16341_v7 = vcombine.high %v7115_v55, %v7119_v63  ;;  %v7123_v24 = vld [vmem:[%s17545_s12 + $0x1a18] sm:$0xff] }
 0x7bf   : > { %13707 = vmatprep.subr.bf16.mxu1 %v16429_v61  ;;  %v7127_v23 = vld [vmem:[%s17545_s12 + $0x1a38] sm:$0xff] }
 0x7c0   : > { %v7251_v11 = vld [vmem:[%s17545_s12 + $0x1e18] sm:$0xff]  ;;  %v16349_v30 = vcombine.high %v7123_v24, %v7127_v23 }
 0x7c1   : > { %13667 = vmatpush1.bf16.msra.mxu0 %v16300_v28  ;;  %v7255_v28 = vld [vmem:[%s17545_s12 + $0x1e38] sm:$0xff] }
 0x7c2   : > { %13708 = vmatpush1.bf16.msra.mxu1 %v16428_v26  ;;  %13668 = vmatprep.subr.bf16.mxu0 %v16309_v27  ;;  %v16340_v27 = vcombine.low %v7115_v55, %v7119_v63  ;;  %v16477_v44 = vcombine.high %v7251_v11, %v7255_v28  ;;  %v7131_v34 = vld [vmem:[%s17545_s12 + $0x1a58] sm:$0xff] }
 0x7c3   : > { %13709 = vmatprep.subr.bf16.mxu1 %v16437_v21  ;;  %v16468_v21 = vcombine.low %v7243_v15, %v7247_v13  ;;  %v7135_v6 = vld [vmem:[%s17545_s12 + $0x1a78] sm:$0xff] }
 0x7c4   : > { %v16357_v49 = vcombine.high %v7131_v34, %v7135_v6  ;;  %v7139_v46 = vld [vmem:[%s17545_s12 + $0x1a98] sm:$0xff] }
 0x7c5   : > { %13669 = vmatpush1.bf16.msra.mxu0 %v16308_v35  ;;  %v7259_v35 = vld [vmem:[%s17545_s12 + $0x1e58] sm:$0xff] }
 0x7c6   : > { %13710 = vmatpush1.bf16.msra.mxu1 %v16436_v18  ;;  %13670 = vmatprep.subr.bf16.mxu0 %v16317_v38  ;;  %v7263_v18 = vld [vmem:[%s17545_s12 + $0x1e78] sm:$0xff]  ;;  %v16348_v38 = vcombine.low %v7123_v24, %v7127_v23 }
 0x7c7   : > { %13711 = vmatprep.subr.bf16.mxu1 %v16445_v9  ;;  %v16476_v9 = vcombine.low %v7251_v11, %v7255_v28  ;;  %v16485_v50 = vcombine.high %v7259_v35, %v7263_v18  ;;  %v7143_v59 = vld [vmem:[%s17545_s12 + $0x1ab8] sm:$0xff] }
 0x7c8   : > { %v16365_v62 = vcombine.high %v7139_v46, %v7143_v59  ;;  %v7147_v43 = vld [vmem:[%s17545_s12 + $0x1ad8] sm:$0xff] }
 0x7c9   : > { %13671 = vmatpush1.bf16.msra.mxu0 %v16316_v58  ;;  %v7267_v58 = vld [vmem:[%s17545_s12 + $0x1e98] sm:$0xff] }
 0x7ca   : > { %13712 = vmatpush1.bf16.msra.mxu1 %v16444_v42  ;;  %13672 = vmatprep.subr.bf16.mxu0 %v16325_v22  ;;  %v7271_v42 = vld [vmem:[%s17545_s12 + $0x1eb8] sm:$0xff]  ;;  %v16356_v22 = vcombine.low %v7131_v34, %v7135_v6 }
 0x7cb   : > { %v13368_v51 = vpop.f32.mrb[60].mxu0  ;;  %13713 = vmatprep.subr.bf16.mxu1 %v16453_v56  ;;  %v16484_v56 = vcombine.low %v7259_v35, %v7263_v18  ;;  %v16493_v3 = vcombine.high %v7267_v58, %v7271_v42  ;;  %v7151_v17 = vld [vmem:[%s17545_s12 + $0x1af8] sm:$0xff] }
 0x7cc   : > { %v13369_v29 = vadd.f32 %v13368_v51, %v19617_v1  ;;  %v13409_v12 = vpop.f32.mrb[60].mxu1  ;;  %v13370_v32 = vpop.f32.mrb[61].mxu0  ;;  %v16492_v51 = vcombine.low %v7267_v58, %v7271_v42  ;;  %v7155_v63 = vld [vmem:[%s17545_s12 + $0x1b18] sm:$0xff] }
 0x7cd   : > { %v13371_v0 = vadd.f32 %v13370_v32, %v19619_v31  ;;  %v13411_v20 = vpop.f32.mrb[61].mxu1  ;;  %v13372_v8 = vpop.f32.mrb[62].mxu0  ;;  %13673 = vmatpush1.bf16.msra.mxu0 %v16324_v2  ;;  %v16469_v31 = vcombine.high %v7243_v15, %v7247_v13  ;;  %v7275_v2 = vld [vmem:[%s17545_s12 + $0x1ed8] sm:$0xff]  ;;  %v16372_v15 = vcombine.low %v7147_v43, %v7151_v17 }
 0x7ce   : > { %v13410_v37 = vadd.f32 %v13409_v12, %v13369_v29  ;;  %v13413_v57 = vpop.f32.mrb[62].mxu1  ;;  %13714 = vmatpush1.bf16.msra.mxu1 %v16452_v45  ;;  %v13373_v1 = vpop.f32.mrb[63].mxu0  ;;  %13674 = vmatprep.subr.bf16.mxu0 %v16333_v48  ;;  %v7279_v45 = vld [vmem:[%s17545_s12 + $0x1ef8] sm:$0xff]  ;;  %v16364_v48 = vcombine.low %v7139_v46, %v7143_v59 }
 0x7cf   : > { %v13412_v39 = vadd.f32 %v13411_v20, %v13371_v0  ;;  %v13414_v61 = vpop.f32.mrb[63].mxu1  ;;  %13715 = vmatprep.subr.bf16.mxu1 %v16461_v41  ;;  %v16373_v41 = vcombine.high %v7147_v43, %v7151_v17  ;;  %v16501_v55 = vcombine.high %v7275_v2, %v7279_v45  ;;  %v7159_v29 = vld [vmem:[%s17545_s12 + $0x1b38] sm:$0xff]  ;;  %v16500_v13 = vcombine.low %v7275_v2, %v7279_v45 }
 0x7d0   : > { %v13748_v52 = vadd.f32 %v13410_v37, %v6268_v19  ;;  %v7283_v12 = vld [vmem:[%s17545_s12 + $0x1f18] sm:$0xff]  ;;  %v16381_v19 = vcombine.high %v7155_v63, %v7159_v29 }
 0x7d1   : > { %v13749_v26 = vadd.f32 %v13412_v39, %v6269_v25  ;;  %13675 = vmatpush1.bf16.msra.mxu0 %v16332_v36  ;;  %v7287_v32 = vld [vmem:[%s17545_s12 + $0x1f38] sm:$0xff]  ;;  %v16380_v25 = vcombine.low %v7155_v63, %v7159_v29 }
 0x7d2   : > { %13756 = vst [vmem:[#allocation2 + $0x20] sm:$0xff] %v13748_v52  ;;  %13716 = vmatpush1.bf16.msra.mxu1 %v16460_v40  ;;  %13676 = vmatprep.subr.bf16.mxu0 %v16341_v7  ;;  %v16509_v0 = vcombine.high %v7283_v12, %v7287_v32  ;;  %v7163_v20 = vld [vmem:[%s17545_s12 + $0x1b58] sm:$0xff]  ;;  %v16508_v57 = vcombine.low %v7283_v12, %v7287_v32 }
 0x7d3   : > { %13757 = vst [vmem:[#allocation2 + $0x28] sm:$0xff] %v13749_v26  ;;  %13717 = vmatprep.subr.bf16.mxu1 %v16469_v31  ;;  %v7167_v8 = vld [vmem:[%s17545_s12 + $0x1b78] sm:$0xff] }
 0x7d4   : > { %v7291_v36 = vld [vmem:[%s17545_s12 + $0x1f58] sm:$0xff]  ;;  %v16389_v1 = vcombine.high %v7163_v20, %v7167_v8  ;;  %v16388_v24 = vcombine.low %v7163_v20, %v7167_v8 }
 0x7d5   : > { %13677 = vmatpush1.bf16.msra.mxu0 %v16340_v27  ;;  %v7295_v37 = vld [vmem:[%s17545_s12 + $0x1f78] sm:$0xff] }
 0x7d6   : > { %13718 = vmatpush1.bf16.msra.mxu1 %v16468_v21  ;;  %13678 = vmatprep.subr.bf16.mxu0 %v16349_v30  ;;  %v16517_v40 = vcombine.high %v7291_v36, %v7295_v37  ;;  %v7171_v7 = vld [vmem:[%s17545_s12 + $0x1b98] sm:$0xff]  ;;  %v16516_v23 = vcombine.low %v7291_v36, %v7295_v37 }
 0x7d7   : > { %13719 = vmatprep.subr.bf16.mxu1 %v16477_v44  ;;  %v7175_v39 = vld [vmem:[%s17545_s12 + $0x1bb8] sm:$0xff] }
 0x7d8   : > { %v7299_v61 = vld [vmem:[%s17545_s12 + $0x1f98] sm:$0xff]  ;;  %v16397_v52 = vcombine.high %v7171_v7, %v7175_v39  ;;  %v16396_v30 = vcombine.low %v7171_v7, %v7175_v39 }
 0x7d9   : > { %13679 = vmatpush1.bf16.msra.mxu0 %v16348_v38  ;;  %v7303_v31 = vld [vmem:[%s17545_s12 + $0x1fb8] sm:$0xff] }
 0x7da   : > { %13720 = vmatpush1.bf16.msra.mxu1 %v16476_v9  ;;  %13680 = vmatprep.subr.bf16.mxu0 %v16357_v49  ;;  %v16525_v11 = vcombine.high %v7299_v61, %v7303_v31  ;;  %v7179_v28 = vld [vmem:[%s17545_s12 + $0x1bd8] sm:$0xff]  ;;  %v16524_v44 = vcombine.low %v7299_v61, %v7303_v31 }
 0x7db   : > { %13721 = vmatprep.subr.bf16.mxu1 %v16485_v50  ;;  %v7183_v26 = vld [vmem:[%s17545_s12 + $0x1bf8] sm:$0xff] }
 0x7dc   : > { %v7307_v27 = vld [vmem:[%s17545_s12 + $0x1fd8] sm:$0xff]  ;;  %v16405_v34 = vcombine.high %v7179_v28, %v7183_v26  ;;  %v16404_v35 = vcombine.low %v7179_v28, %v7183_v26 }
 0x7dd   : > { %13681 = vmatpush1.bf16.msra.mxu0 %v16356_v22  ;;  %v7311_v21 = vld [vmem:[%s17545_s12 + $0x1ff8] sm:$0xff] }
 0x7de   : > { %13722 = vmatpush1.bf16.msra.mxu1 %v16484_v56  ;;  %13682 = vmatprep.subr.bf16.mxu0 %v16365_v62  ;;  %v16533_v6 = vcombine.high %v7307_v27, %v7311_v21  ;;  %v16532_v18 = vcombine.low %v7307_v27, %v7311_v21  ;;  %v6270_v7 = vld [vmem:[#allocation2 + $0x30] sm:$0xff] }
 0x7df   : > { %13723 = vmatprep.subr.bf16.mxu1 %v16493_v3 }
 0x7e1   : > { %13683 = vmatpush1.bf16.msra.mxu0 %v16364_v48 }
 0x7e2   : > { %13724 = vmatpush1.bf16.msra.mxu1 %v16492_v51  ;;  %13684 = vmatprep.subr.bf16.mxu0 %v16373_v41 }
 0x7e3   : > { %13725 = vmatprep.subr.bf16.mxu1 %v16501_v55 }
 0x7e5   : > { %13685 = vmatpush1.bf16.msra.mxu0 %v16372_v15 }
 0x7e6   : > { %13726 = vmatpush1.bf16.msra.mxu1 %v16500_v13  ;;  %13686 = vmatprep.subr.bf16.mxu0 %v16381_v19 }
 0x7e7   : > { %13727 = vmatprep.subr.bf16.mxu1 %v16509_v0 }
 0x7e9   : > { %13687 = vmatpush1.bf16.msra.mxu0 %v16380_v25 }
 0x7ea   : > { %13728 = vmatpush1.bf16.msra.mxu1 %v16508_v57  ;;  %13688 = vmatprep.subr.bf16.mxu0 %v16389_v1 }
 0x7eb   : > { %13729 = vmatprep.subr.bf16.mxu1 %v16517_v40 }
 0x7ed   : > { %13689 = vmatpush1.bf16.msra.mxu0 %v16388_v24 }
 0x7ee   : > { %13730 = vmatpush1.bf16.msra.mxu1 %v16516_v23  ;;  %13690 = vmatprep.subr.bf16.mxu0 %v16397_v52  ;;  %v6271_v23 = vld [vmem:[#allocation2 + $0x38] sm:$0xff] }
 0x7ef   : > { %13731 = vmatprep.subr.bf16.mxu1 %v16525_v11 }
 0x7f1   : > { %13691 = vmatpush1.bf16.msra.mxu0 %v16396_v30  ;;  %v16872_v30 = vld [vmem:[#allocation12 + $0x40] sm:$0xff] (!%p16534_p8)  }
 0x7f2   : > { %13732 = vmatpush1.bf16.msra.mxu1 %v16524_v44  ;;  %13692 = vmatprep.subr.bf16.mxu0 %v16405_v34  ;;  %v16873_v44 = vld [vmem:[#allocation12 + $0xc0] sm:$0xff] (!%p16534_p8)  }
 0x7f3   : > { %13733 = vmatprep.subr.bf16.mxu1 %v16533_v6  ;;  %v16874_v34 = vld [vmem:[#allocation12] sm:$0xff] (!%p16534_p8)  }
 0x7f4   : > { %v16875_v6 = vld [vmem:[#allocation12 + $0x80] sm:$0xff] (!%p16534_p8)  }
 0x7f5   : > { %13693 = vmatpush1.bf16.msra.mxu0 %v16404_v35  ;;  %v16876_v35 = vld [vmem:[#allocation12 + $0x48] sm:$0xff] (!%p16534_p8)  }
 0x7f6   : > { %13734 = vmatpush1.bf16.msra.mxu1 %v16532_v18  ;;  %16608 = vmatprep.subr.bf16.mxu0 (!%p16534_p8), %v16872_v30  ;;  %v16877_v18 = vld [vmem:[#allocation12 + $0xc8] sm:$0xff] (!%p16534_p8)  }
 0x7f7   : > { %16630 = vmatprep.subr.bf16.mxu1 (!%p16534_p8), %v16873_v44 }
 0x7f8   : > { %13695 = vmatmul.mubr.bf16.vlgmr.msra.gmra.mrb[76].mxu0 %v18857_v47 }
 0x7f9   : > { %13736 = vmatmul.mubr.bf16.vlgmr.msra.gmra.mrb[76].mxu1 %v18859_v16  ;;  %16609 = vmatpush3.bf16.msra.mxu0 (!%p16534_p8), %v16874_v34  ;;  %v16907_v34 = vld [vmem:[#allocation12 + $0x180] sm:$0xff] (!%p16534_p8)  }
 0x7fa   : > { %16631 = vmatpush3.bf16.msra.mxu1 (!%p16534_p8), %v16875_v6  ;;  %16610 = vmatprep.subr.bf16.mxu0 (!%p16534_p8), %v16876_v35  ;;  %v16908_v6 = vld [vmem:[#allocation12 + $0x148] sm:$0xff] (!%p16534_p8)  }
 0x7fb   : > { %16632 = vmatprep.subr.bf16.mxu1 (!%p16534_p8), %v16877_v18 }
 0x80b   : > { %v13450_v38 = vpop.f32.mrb[64].mxu0 }
 0x80c   : > { %v13491_v9 = vpop.f32.mrb[64].mxu1  ;;  %v13452_v49 = vpop.f32.mrb[65].mxu0 }
 0x80d   : > { %v13492_v50 = vadd.f32 %v13491_v9, %v13450_v38  ;;  %v13493_v46 = vpop.f32.mrb[65].mxu1  ;;  %v13454_v59 = vpop.f32.mrb[66].mxu0  ;;  %v16878_v38 = vld [vmem:[#allocation12 + $0x8] sm:$0xff] (!%p16534_p8)  }
 0x80e   : > { %v13494_v58 = vadd.f32 %v13493_v46, %v13452_v49  ;;  %v13495_v42 = vpop.f32.mrb[66].mxu1  ;;  %v13455_v22 = vpop.f32.mrb[67].mxu0  ;;  %v16879_v9 = vld [vmem:[#allocation12 + $0x88] sm:$0xff] (!%p16534_p8)   ;;  %16611 = vmatpush3.bf16.msra.mxu0 (!%p16534_p8), %v16878_v38  ;;  %v16880_v49 = vld [vmem:[#allocation12 + $0x50] sm:$0xff] (!%p16534_p8)  }
 0x80f   : > { %v13496_v56 = vpop.f32.mrb[67].mxu1  ;;  %16633 = vmatpush3.bf16.msra.mxu1 (!%p16534_p8), %v16879_v9  ;;  %16612 = vmatprep.subr.bf16.mxu0 (!%p16534_p8), %v16880_v49  ;;  %v16882_v46 = vld [vmem:[#allocation12 + $0x10] sm:$0xff] (!%p16534_p8)   ;;  %v16885_v42 = vld [vmem:[#allocation12 + $0xd8] sm:$0xff] (!%p16534_p8)   ;;  %v16909_v9 = vld [vmem:[#allocation12 + $0x1c8] sm:$0xff] (!%p16534_p8)  }
 0x810   : > { %v16883_v59 = vld [vmem:[#allocation12 + $0x90] sm:$0xff] (!%p16534_p8)   ;;  %v16886_v22 = vld [vmem:[#allocation12 + $0x18] sm:$0xff] (!%p16534_p8)   ;;  %v16910_v49 = vld [vmem:[#allocation12 + $0x108] sm:$0xff] (!%p16534_p8)  }
 0x811   : > { %v16887_v56 = vld [vmem:[#allocation12 + $0x98] sm:$0xff] (!%p16534_p8)  }
 0x812   : > { %16613 = vmatpush3.bf16.msra.mxu0 (!%p16534_p8), %v16882_v46  ;;  %v16912_v46 = vld [vmem:[#allocation12 + $0x150] sm:$0xff] (!%p16534_p8)  }
 0x84b   : > { %v13532_v62 = vpop.f32.mrb[68].mxu0 }
 0x84c   : > { %v13533_v3 = vadd.f32 %v13532_v62, %v13492_v50  ;;  %v13573_v43 = vpop.f32.mrb[68].mxu1  ;;  %v13534_v17 = vpop.f32.mrb[69].mxu0  ;;  %v16881_v50 = vld [vmem:[#allocation12 + $0xd0] sm:$0xff] (!%p16534_p8)   ;;  %v16888_v62 = vld [vmem:[#allocation12 + $0x60] sm:$0xff] (!%p16534_p8)  }
 0x84d   : > { %v13535_v2 = vadd.f32 %v13534_v17, %v13494_v58  ;;  %v13575_v45 = vpop.f32.mrb[69].mxu1  ;;  %v13536_v48 = vpop.f32.mrb[70].mxu0  ;;  %16634 = vmatprep.subr.bf16.mxu1 (!%p16534_p8), %v16881_v50  ;;  %v16884_v58 = vld [vmem:[#allocation12 + $0x58] sm:$0xff] (!%p16534_p8)   ;;  %v16891_v17 = vld [vmem:[#allocation12 + $0xa0] sm:$0xff] (!%p16534_p8)   ;;  %v16911_v50 = vld [vmem:[#allocation12 + $0x188] sm:$0xff] (!%p16534_p8)  }
 0x84e   : > { %v13574_v47 = vadd.f32 %v13573_v43, %v13533_v3  ;;  %v13577_v51 = vpop.f32.mrb[70].mxu1  ;;  %v13537_v16 = vpop.f32.mrb[71].mxu0  ;;  %16635 = vmatpush3.bf16.msra.mxu1 (!%p16534_p8), %v16883_v59  ;;  %16614 = vmatprep.subr.bf16.mxu0 (!%p16534_p8), %v16884_v58  ;;  %v16889_v3 = vld [vmem:[#allocation12 + $0xe0] sm:$0xff] (!%p16534_p8)   ;;  %v16894_v48 = vld [vmem:[#allocation12 + $0x28] sm:$0xff] (!%p16534_p8)   ;;  %v16913_v59 = vld [vmem:[#allocation12 + $0x1d0] sm:$0xff] (!%p16534_p8)  }
 0x84f   : > { %v13576_v41 = vadd.f32 %v13575_v45, %v13535_v2  ;;  %v13578_v55 = vpop.f32.mrb[71].mxu1  ;;  %16636 = vmatprep.subr.bf16.mxu1 (!%p16534_p8), %v16885_v42  ;;  %16615 = vmatpush3.bf16.msra.mxu0 (!%p16534_p8), %v16886_v22  ;;  %v16890_v43 = vld [vmem:[#allocation12 + $0x20] sm:$0xff] (!%p16534_p8)   ;;  %v16892_v2 = vld [vmem:[#allocation12 + $0x68] sm:$0xff] (!%p16534_p8)   ;;  %v16896_v51 = vld [vmem:[#allocation12 + $0x70] sm:$0xff] (!%p16534_p8)  }
 0x850   : > { %16616 = vmatprep.subr.bf16.mxu0 (!%p16534_p8), %v16888_v62  ;;  %v16893_v45 = vld [vmem:[#allocation12 + $0xe8] sm:$0xff] (!%p16534_p8)   ;;  %v16897_v16 = vld [vmem:[#allocation12 + $0xf0] sm:$0xff] (!%p16534_p8)   ;;  %v16916_v22 = vld [vmem:[#allocation12 + $0x158] sm:$0xff] (!%p16534_p8)  }
 0x851   : > { %v16899_v55 = vld [vmem:[#allocation12 + $0xb0] sm:$0xff] (!%p16534_p8)   ;;  %v16918_v62 = vld [vmem:[#allocation12 + $0x118] sm:$0xff] (!%p16534_p8)  }
 0x852   : > { %16637 = vmatpush3.bf16.msra.mxu1 (!%p16534_p8), %v16887_v56  ;;  %v16914_v58 = vld [vmem:[#allocation12 + $0x110] sm:$0xff] (!%p16534_p8)   ;;  %v16917_v56 = vld [vmem:[#allocation12 + $0x1d8] sm:$0xff] (!%p16534_p8)  }
 0x853   : > { %16638 = vmatprep.subr.bf16.mxu1 (!%p16534_p8), %v16889_v3  ;;  %16617 = vmatpush3.bf16.msra.mxu0 (!%p16534_p8), %v16890_v43  ;;  %v16915_v42 = vld [vmem:[#allocation12 + $0x190] sm:$0xff] (!%p16534_p8)   ;;  %v16919_v3 = vld [vmem:[#allocation12 + $0x198] sm:$0xff] (!%p16534_p8)   ;;  %v16920_v43 = vld [vmem:[#allocation12 + $0x160] sm:$0xff] (!%p16534_p8)  }
 0x854   : > { %16618 = vmatprep.subr.bf16.mxu0 (!%p16534_p8), %v16892_v2  ;;  %v16922_v2 = vld [vmem:[#allocation12 + $0x120] sm:$0xff] (!%p16534_p8)  }
 0x856   : > { %16639 = vmatpush3.bf16.msra.mxu1 (!%p16534_p8), %v16891_v17  ;;  %v16921_v17 = vld [vmem:[#allocation12 + $0x1e0] sm:$0xff] (!%p16534_p8)  }
 0x857   : > { %16640 = vmatprep.subr.bf16.mxu1 (!%p16534_p8), %v16893_v45  ;;  %16619 = vmatpush3.bf16.msra.mxu0 (!%p16534_p8), %v16894_v48  ;;  %v16923_v45 = vld [vmem:[#allocation12 + $0x1a0] sm:$0xff] (!%p16534_p8)   ;;  %v16924_v48 = vld [vmem:[#allocation12 + $0x168] sm:$0xff] (!%p16534_p8)  }
 0x858   : > { %16620 = vmatprep.subr.bf16.mxu0 (!%p16534_p8), %v16896_v51  ;;  %v16926_v51 = vld [vmem:[#allocation12 + $0x128] sm:$0xff] (!%p16534_p8)  }
 0x88b   : > { %v13614_v63 = vpop.f32.mrb[72].mxu0 }
 0x88c   : > { %v13615_v29 = vadd.f32 %v13614_v63, %v13574_v47  ;;  %v13655_v12 = vpop.f32.mrb[72].mxu1  ;;  %v13616_v32 = vpop.f32.mrb[73].mxu0  ;;  %v16895_v47 = vld [vmem:[#allocation12 + $0xa8] sm:$0xff] (!%p16534_p8)   ;;  %v16900_v63 = vld [vmem:[#allocation12 + $0x78] sm:$0xff] (!%p16534_p8)  }
 0x88d   : > { %v13617_v15 = vadd.f32 %v13616_v32, %v13576_v41  ;;  %v13657_v13 = vpop.f32.mrb[73].mxu1  ;;  %v13618_v19 = vpop.f32.mrb[74].mxu0  ;;  %16641 = vmatpush3.bf16.msra.mxu1 (!%p16534_p8), %v16895_v47  ;;  %v16898_v41 = vld [vmem:[#allocation12 + $0x30] sm:$0xff] (!%p16534_p8)   ;;  %v16903_v32 = vld [vmem:[#allocation12 + $0xb8] sm:$0xff] (!%p16534_p8)   ;;  %v16925_v47 = vld [vmem:[#allocation12 + $0x1e8] sm:$0xff] (!%p16534_p8)  }
 0x88e   : > { %v13656_v0 = vadd.f32 %v13655_v12, %v13615_v29  ;;  %v13659_v20 = vpop.f32.mrb[74].mxu1  ;;  %v13619_v8 = vpop.f32.mrb[75].mxu0  ;;  %16642 = vmatprep.subr.bf16.mxu1 (!%p16534_p8), %v16897_v16  ;;  %16621 = vmatpush3.bf16.msra.mxu0 (!%p16534_p8), %v16898_v41  ;;  %v16901_v29 = vld [vmem:[#allocation12 + $0xf8] sm:$0xff] (!%p16534_p8)   ;;  %v16927_v16 = vld [vmem:[#allocation12 + $0x1a8] sm:$0xff] (!%p16534_p8)   ;;  %v16928_v41 = vld [vmem:[#allocation12 + $0x170] sm:$0xff] (!%p16534_p8)  }
 0x88f   : > { %v13658_v36 = vadd.f32 %v13657_v13, %v13617_v15  ;;  %v13660_v37 = vpop.f32.mrb[75].mxu1  ;;  %16622 = vmatprep.subr.bf16.mxu0 (!%p16534_p8), %v16900_v63  ;;  %v16902_v12 = vld [vmem:[#allocation12 + $0x38] sm:$0xff] (!%p16534_p8)   ;;  %v13765_v15 = vld [vmem:[#allocation2 + $0x8] sm:$0xff] (!%p16534_p8)  ;;  %v13767_v8 = vld [vmem:[#allocation2 + $0x18] sm:$0xff] (!%p16534_p8) }
 0x890   : > { %v19726_v13 = vld [vmem:[#allocation11] ss:$2 sm:$0xff] (!%p16534_p8)  ;;  %v19728_v19 = vld [vmem:[#allocation11 + $0x1] ss:$2 sm:$0xff] (!%p16534_p8) }
 0x891   : > { %16643 = vmatpush3.bf16.msra.mxu1 (!%p16534_p8), %v16899_v55  ;;  %v13832_v20 = vrot.slane (!%p16534_p8), %v19728_v19, %v18414_v5  ;;  %v13840_v37 = vrot.slane (!%p16534_p8), %v19728_v19, %v18422_v10  ;;  %v16929_v55 = vld [vmem:[#allocation12 + $0x1f0] sm:$0xff] (!%p16534_p8)  }
 0x892   : > { %16644 = vmatprep.subr.bf16.mxu1 (!%p16534_p8), %v16901_v29  ;;  %16623 = vmatpush3.bf16.msra.mxu0 (!%p16534_p8), %v16902_v12  ;;  %v16930_v63 = vld [vmem:[#allocation12 + $0x130] sm:$0xff] (!%p16534_p8)   ;;  %v13797_v29 = vrot.slane (!%p16534_p8), %v19726_v13, %v18522_v4  ;;  %v13805_v12 = vrot.slane (!%p16534_p8), %v19726_v13, %v18527_v14 }
 0x895   : > { %16645 = vmatpush3.bf16.msra.mxu1 (!%p16534_p8), %v16903_v32  ;;  %v16931_v32 = vld [vmem:[#allocation12 + $0x1b0] sm:$0xff] (!%p16534_p8)  }
 0x8cb   : > { %v13696_v25 = vpop.f32.mrb[76].mxu0 }
 0x8cc   : > { %v13697_v57 = vadd.f32 %v13696_v25, %v13656_v0  ;;  %v13737_v1 = vpop.f32.mrb[76].mxu1  ;;  %v13698_v40 = vpop.f32.mrb[77].mxu0  ;;  %v13781_v0 = vrot.slane (!%p16534_p8), %v19726_v13, %v18414_v5  ;;  %v13764_v25 = vld [vmem:[#allocation2] sm:$0xff] (!%p16534_p8)  ;;  %v13836_v5 = vrot.slane (!%p16534_p8), %v19728_v19, %v18517_v60 }
 0x8cd   : > { %v13699_v39 = vadd.f32 %v13698_v40, %v13658_v36  ;;  %v13739_v61 = vpop.f32.mrb[77].mxu1  ;;  %v13700_v31 = vpop.f32.mrb[78].mxu0  ;;  %13763 = sbr.rel (%p16534_p8) target bundleno = 2517 (0x9d5), region = 84  ;;  %v13789_v36 = vrot.slane (!%p16534_p8), %v19726_v13, %v18422_v10  ;;  %v13828_v40 = vrot.slane (!%p16534_p8), %v19728_v19, %v18514_v53 }
 0x8ce   : > { %v13738_v24 = vadd.f32 %v13737_v1, %v13697_v57  ;;  %v13741_v52 = vpop.f32.mrb[78].mxu1  ;;  %v13701_v11 = vpop.f32.mrb[79].mxu0  ;;  %v13766_v57 = vld [vmem:[#allocation2 + $0x10] sm:$0xff] (!%p16534_p8)  ;;  %v13777_v1 = vrot.slane (!%p16534_p8), %v19726_v13, %v18514_v53 }
 0x8cf   : > { %v13740_v28 = vadd.f32 %v13739_v61, %v13699_v39  ;;  %v13742_v26 = vpop.f32.mrb[79].mxu1  ;;  %v16904_v39 = vld [vmem:[#allocation12 + $0x140] sm:$0xff] (!%p16534_p8)   ;;  %v13815_v61 = vmul.f32 (!%p16534_p8), %v13781_v0, %v13765_v15  ;;  %v13817_v31 = vmul.f32 (!%p16534_p8), %v13789_v36, %v13767_v8  ;;  %v13793_v15 = vrot.slane (!%p16534_p8), %v19726_v13, %v18622_v54 }
 0x8d0   : > { %v13750_v27 = vadd.f32 %v13738_v24, %v6270_v7  ;;  %v13785_v7 = vrot.slane (!%p16534_p8), %v19726_v13, %v18517_v60  ;;  %v16905_v24 = vld [vmem:[#allocation12 + $0x1c0] sm:$0xff] (!%p16534_p8)   ;;  %16652 = vmatprep.subr.bf16.mxu0 (!%p16534_p8), %v16904_v39  ;;  %v13801_v0 = vrot.slane (!%p16534_p8), %v19726_v13, %v18625_v33  ;;  %v13848_v8 = vrot.slane (!%p16534_p8), %v19728_v19, %v18522_v4 }
 0x8d1   : > { %v13751_v21 = vadd.f32 %v13740_v28, %v6271_v23  ;;  %v13814_v23 = vmul.f32 (!%p16534_p8), %v13777_v1, %v13764_v25  ;;  %v13866_v52 = vadd.f32 (!%p16534_p8), %v13832_v20, %v13815_v61  ;;  %v13868_v11 = vadd.f32 (!%p16534_p8), %v13840_v37, %v13817_v31  ;;  %16674 = vmatprep.subr.bf16.mxu1 (!%p16534_p8), %v16905_v24  ;;  %v16932_v20 = vld [vmem:[#allocation12 + $0x178] sm:$0xff] (!%p16534_p8)   ;;  %v13769_v25 = vld [vmem:[#allocation2 + $0x28] sm:$0xff] (!%p16534_p8) }
 0x8d2   : > { %13758 = vst [vmem:[#allocation2 + $0x30] sm:$0xff] %v13750_v27  ;;  %v13816_v10 = vmul.f32 (!%p16534_p8), %v13785_v7, %v13766_v57  ;;  %v13856_v36 = vrot.slane (!%p16534_p8), %v19728_v19, %v18527_v14  ;;  %v16933_v37 = vld [vmem:[#allocation12 + $0x1f8] sm:$0xff] (!%p16534_p8)   ;;  %v13844_v1 = vrot.slane (!%p16534_p8), %v19728_v19, %v18622_v54  ;;  %v13852_v13 = vrot.slane (!%p16534_p8), %v19728_v19, %v18625_v33 }
 0x8d3   : > { %13759 = vst [vmem:[#allocation2 + $0x38] sm:$0xff] %v13751_v21  ;;  %v13865_v28 = vadd.f32 (!%p16534_p8), %v13828_v40, %v13814_v23  ;;  %v13874_v27 = vmax.f32 (!%p16534_p8), %v13866_v52, 0.0  ;;  %v13876_v53 = vmax.f32 (!%p16534_p8), %v13868_v11, 0.0  ;;  %v16906_v21 = vld [vmem:[#allocation12 + $0x100] sm:$0xff] (!%p16534_p8)   ;;  %v13819_v40 = vmul.f32 (!%p16534_p8), %v13797_v29, %v13769_v25  ;;  %v16934_v14 = vld [vmem:[#allocation12 + $0x138] sm:$0xff] (!%p16534_p8)  }
 0x8d4   : > { %v13867_v26 = vadd.f32 %v13836_v5, %v13816_v10  ;;  %v13768_v5 = vld [vmem:[#allocation2 + $0x20] sm:$0xff] }
 0x8d5   : > { %v13873_v30 = vmax.f32 %v13865_v28, 0.0  ;;  %v13882_v60 = vpack.c.bf16 %v13874_v27, %v13874_v27  ;;  %v13884_v35 = vpack.c.bf16 %v13876_v53, %v13876_v53  ;;  %v13818_v61 = vmul.f32 %v13793_v15, %v13768_v5  ;;  %v16935_v31 = vld [vmem:[#allocation12 + $0x1b8] sm:$0xff]  }
 0x8d6   : > { %v13875_v44 = vmax.f32 %v13867_v26, 0.0  ;;  %v13870_v24 = vadd.f32 %v13848_v8, %v13819_v40 }
 0x8d7   : > { %v13881_v18 = vpack.c.bf16 %v13873_v30, %v13873_v30  ;;  %14440 = vmatprep.mubr.bf16.mxu0 %v13882_v60  ;;  %14480 = vmatprep.mubr.bf16.mxu1 %v13884_v35  ;;  %v13869_v10 = vadd.f32 %v13844_v1, %v13818_v61 }
 0x8d8   : > { %v13883_v38 = vpack.c.bf16 %v13875_v44, %v13875_v44  ;;  %v13878_v54 = vmax.f32 %v13870_v24, 0.0  ;;  %v16535_v44 = vld [vmem:[#allocation14] ss:$0 sm:$0xff] }
 0x8d9   : > { %14441 = vmatmul.mubr.bf16.vlgmr.msra.gmra.mrb[0].mxu0 %v13881_v18  ;;  %v13770_v39 = vld [vmem:[#allocation2 + $0x30] sm:$0xff]  ;;  %v13877_v28 = vmax.f32 %v13869_v10, 0.0 }
 0x8da   : > { %14481 = vmatmul.mubr.bf16.vlgmr.msra.gmra.mrb[0].mxu1 %v13883_v38  ;;  %16653 = vmatpush3.bf16.msra.mxu0 %v16906_v21  ;;  %v13771_v57 = vld [vmem:[#allocation2 + $0x38] sm:$0xff]  ;;  %v13820_v4 = vmul.f32 %v13801_v0, %v13770_v39  ;;  %v13886_v19 = vpack.c.bf16 %v13878_v54, %v13878_v54 }
 0x8db   : > { %16675 = vmatpush3.bf16.msra.mxu1 %v16907_v34  ;;  %16654 = vmatprep.subr.bf16.mxu0 %v16908_v6  ;;  %v13821_v7 = vmul.f32 %v13805_v12, %v13771_v57  ;;  %v13885_v27 = vpack.c.bf16 %v13877_v28, %v13877_v28 }
 0x8dc   : > { %16676 = vmatprep.subr.bf16.mxu1 %v16909_v9  ;;  %v13871_v52 = vadd.f32 %v13852_v13, %v13820_v4  ;;  %14520 = vmatprep.mubr.bf16.mxu0 %v13886_v19 }
 0x8dd   : > { %v13872_v23 = vadd.f32 %v13856_v36, %v13821_v7 }
 0x8de   : > { %16655 = vmatpush3.bf16.msra.mxu0 %v16910_v49  ;;  %v13879_v33 = vmax.f32 %v13871_v52, 0.0 }
 0x8df   : > { %16677 = vmatpush3.bf16.msra.mxu1 %v16911_v50  ;;  %16656 = vmatprep.subr.bf16.mxu0 %v16912_v46  ;;  %v13880_v11 = vmax.f32 %v13872_v23, 0.0 }
 0x8e0   : > { %16678 = vmatprep.subr.bf16.mxu1 %v16913_v59  ;;  %v13887_v53 = vpack.c.bf16 %v13879_v33, %v13879_v33 }
 0x8e1   : > { %v13888_v26 = vpack.c.bf16 %v13880_v11, %v13880_v11 }
 0x8e2   : > { %16657 = vmatpush3.bf16.msra.mxu0 %v16914_v58 }
 0x8e3   : > { %16679 = vmatpush3.bf16.msra.mxu1 %v16915_v42  ;;  %16658 = vmatprep.subr.bf16.mxu0 %v16916_v22 }
 0x8e4   : > { %16680 = vmatprep.subr.bf16.mxu1 %v16917_v56  ;;  %14560 = vmatprep.mubr.bf16.mxu1 %v13888_v26 }
 0x8e6   : > { %16659 = vmatpush3.bf16.msra.mxu0 %v16918_v62 }
 0x8e7   : > { %16681 = vmatpush3.bf16.msra.mxu1 %v16919_v3  ;;  %16660 = vmatprep.subr.bf16.mxu0 %v16920_v43 }
 0x8e8   : > { %16682 = vmatprep.subr.bf16.mxu1 %v16921_v17 }
 0x8ea   : > { %16661 = vmatpush3.bf16.msra.mxu0 %v16922_v2 }
 0x8eb   : > { %16683 = vmatpush3.bf16.msra.mxu1 %v16923_v45  ;;  %16662 = vmatprep.subr.bf16.mxu0 %v16924_v48 }
 0x8ec   : > { %16684 = vmatprep.subr.bf16.mxu1 %v16925_v47 }
 0x8ee   : > { %16663 = vmatpush3.bf16.msra.mxu0 %v16926_v51 }
 0x8ef   : > { %16685 = vmatpush3.bf16.msra.mxu1 %v16927_v16  ;;  %16664 = vmatprep.subr.bf16.mxu0 %v16928_v41 }
 0x8f0   : > { %16686 = vmatprep.subr.bf16.mxu1 %v16929_v55 }
 0x8f2   : > { %16665 = vmatpush3.bf16.msra.mxu0 %v16930_v63 }
 0x8f3   : > { %16687 = vmatpush3.bf16.msra.mxu1 %v16931_v32  ;;  %16666 = vmatprep.subr.bf16.mxu0 %v16932_v20 }
 0x8f4   : > { %16688 = vmatprep.subr.bf16.mxu1 %v16933_v37 }
 0x8f6   : > { %16667 = vmatpush3.bf16.msra.mxu0 %v16934_v14 }
 0x8f7   : > { %16689 = vmatpush3.bf16.msra.mxu1 %v16935_v31 }
 0x8f9   : > { %14521 = vmatmul.mubr.bf16.vlgmr.msra.gmra.mrb[4].mxu0 %v13885_v27 }
 0x8fa   : > { %14561 = vmatmul.mubr.bf16.vlgmr.msra.gmra.mrb[4].mxu1 %v13887_v53 }
 0x9ac   : > { %v16624_v21 = vpop.f32.mrb[0].mxu0 }
 0x9ad   : > { %v16646_v30 = vpop.f32.mrb[0].mxu1  ;;  %v16625_v34 = vpop.f32.mrb[1].mxu0 }
 0x9ae   : > { %v16647_v6 = vpop.f32.mrb[1].mxu1  ;;  %v16626_v60 = vadd.f32 %v16625_v34, %v16624_v21  ;;  %v16627_v18 = vpop.f32.mrb[2].mxu0 }
 0x9af   : > { %v16648_v35 = vadd.f32 %v16647_v6, %v16646_v30  ;;  %v16649_v38 = vpop.f32.mrb[2].mxu1  ;;  %v16628_v9 = vpop.f32.mrb[3].mxu0 }
 0x9b0   : > { %v16650_v49 = vpop.f32.mrb[3].mxu1  ;;  %v14443_v50 = vadd.f32 %v16626_v60, %v16535_v44 }
 0x9b2   : > { %v14483_v46 = vadd.f32 %v16648_v35, %v14443_v50 }
 0x9cc   : > { %v16668_v59 = vpop.f32.mrb[4].mxu0 }
 0x9cd   : > { %v16690_v58 = vpop.f32.mrb[4].mxu1  ;;  %v16669_v42 = vpop.f32.mrb[5].mxu0 }
 0x9ce   : > { %v16691_v22 = vpop.f32.mrb[5].mxu1  ;;  %v16670_v56 = vadd.f32 %v16669_v42, %v16668_v59  ;;  %v16671_v3 = vpop.f32.mrb[6].mxu0 }
 0x9cf   : > { %v16692_v62 = vadd.f32 %v16691_v22, %v16690_v58  ;;  %v16693_v43 = vpop.f32.mrb[6].mxu1  ;;  %v16672_v17 = vpop.f32.mrb[7].mxu0 }
 0x9d0   : > { %v16694_v2 = vpop.f32.mrb[7].mxu1  ;;  %v14523_v45 = vadd.f32 %v16670_v56, %v14483_v46 }
 0x9d2   : > { %v14563_v48 = vadd.f32 %v16692_v62, %v14523_v45 }
 0x9d4   : > { %14568 = vst [vmem:[#allocation15] sm:$0xff] %v14563_v48 }
 0x9d5 PF: > { %p16820_p6 = scmp.eq.s32.totalorder %s17294_s28, 1  ;;  %s17234_s29 = smov [#allocation15]  }
 0x9d6   : > { %s14576_s21 = sshll.u32 %s17234_s29, 4  ;;  %s14577_s21 = int_to_ptr.vmem [resolvable:$true] %s14576_s21 }
 0x9d7   : > { %s17138_s5 = scalar_lea.vmem %s14577_s21, 128  ;;  %p17145_p10 = scmp.lt.s32.totalorder %s14577_s21, %s14577_s21 }
 0x9d8   : > { %p17139_p11 = scmp.ne.s32.totalorder %s14577_s21, %s17138_s5  ;;  %p17146_p1 = scmp.lt.s32.totalorder %s17138_s5, %s17138_s5 }
 0x9da   : > { %p17140_p4 = pnand %p17139_p11, %p16820_p6  ;;  %p17147_p12 = por %p17146_p1, %p17145_p10 }
 0x9dc   : > { %p17141_p5 = pneg %p17140_p4 }
 0x9de   : > { %p17148_p0 = pnand %p17147_p12, %p17141_p5 }
 0x9e0   : > { %17151 = shalt.err (!%p17148_p0)
}
 0x9e1   : > { %s19854_s23 = sld [smem:[#allocation28_spill]] }
 0x9e7   : > { %s17152_s18 = scalar_lea.hbm %s19854_s23, 128 }
 0x9e8   : > { %p17153_p9 = scmp.ne.s32.totalorder %s19854_s23, %s17152_s18  ;;  %p17158_p13 = scmp.lt.u32.totalorder %s17152_s18, %s19854_s23 }
 0x9ea   : > { %p17154_p3 = pnand %p17153_p9, %p16820_p6 }
 0x9ec   : > { %p17155_p7 = pneg %p17154_p3 }
 0x9ee   : > { %p17160_p2 = pnand %p17158_p13, %p17155_p7 }
 0x9f0   : > { %17163 = shalt.err (!%p17160_p2)
}
 0x9f1   : > { %16785 = dma.vmem_to_hbm [thread:$0]  (%p16820_p6), %s14577_s21, 128, %s19854_s23, [#allocation5]  }
 0x9f2   : > { %17201 = dma.done.wait (%p16820_p6), [#allocation5], 128  }
 0x9f3   : > { %17203 = vsyncadd (%p16820_p6), [#allocation5], 4294967168 }
 0x9f4 PF: > { %s19855_s27 = sld [smem:[#allocation23_spill]]  ;;  %s19856_s4 = sld [smem:[#allocation22_spill]] }
 0x9f5   : > { %s19857_s26 = sld [smem:[#allocation24_spill]]  ;;  %s19858_s24 = smov %s17210_s25 }
 0x9fa   : > { %p23_p8 = scmp.ge.s32.totalorder %s19855_s27, 4   ;;  %s19859_s25 = smov %s19856_s4 }
 0x9fc   :  { %25 = sbr.rel (!%p23_p8) target bundleno = 13 (0xd), region = 138 }
 0xa03   :  { %14589 = vsyncpa [#allocation4], 1 }
 0xa04   :  { %14591 = vsyncpa [#allocation4 + $0x1], 1 }
 0xa05   :  { %14592 = vsyncpa [#allocation7], 1 }
 0xa06   :  { %14594 = vsyncpa [#allocation7 + $0x1], 1 }
 0xa07   :  { %14595 = vsyncpa [#allocation10], 1 }
 0xa08   :  { %14597 = vsyncpa [#allocation10 + $0x1], 1 }
 0xa09   :  { %14598 = vsyncpa [#allocation13], 1 }
 0xa0a   :  { %14599 = vsyncpa [#allocation5], 1 }
 0xa0b   :  { %14601 = vsyncpa [#allocation5 + $0x1], 1 }

</bundles_post_ra>
